<compile_context>
chip_gen: v7x
topology: tpu7x:2x2x1
jax: 0.10.0
libtpu: 0.0.40
codegen_flags: <defaults>
</compile_context>

<pallas_src>
import math

import jax
import jax.numpy as jnp
from jax.experimental import pallas as pl
from jax.experimental.pallas import tpu as pltpu

HIDDEN = 128          # hidden_size (PyTorch default; lane-dense)
FNO_HIDDEN = 64
DIM = 2
WINDOW = 5
PTYPE_DIM = 16
NUM_TYPES = 9
N_MP_LAYERS = 2       # first message-passing stack (small for the demo)
N_MP_LAYERS2 = 4      # fixed to 4 in the module
N_SCH_LAYERS = N_MP_LAYERS + N_MP_LAYERS2
LN_EPS = 1e-5


# ----------------------------- in-kernel helpers -----------------------------

def _act(x, act):
    if act == "relu":
        return jnp.maximum(x, 0.0)
    return jax.nn.gelu(x, approximate=True)


def _layernorm(y, g, b):
    mu = jnp.mean(y, axis=-1, keepdims=True)
    var = jnp.mean((y - mu) ** 2, axis=-1, keepdims=True)
    return (y - mu) * jax.lax.rsqrt(var + LN_EPS) * g + b


def _mlp3(x, w1, b1, w2, b2, w3, b3, act="relu"):
    """3-layer MLP. Weights arrive in bf16; activations cast to bf16, f32 accumulation."""
    h = _act(jnp.dot(x.astype(jnp.bfloat16), w1,
                     preferred_element_type=jnp.float32) + b1, act)
    h = _act(jnp.dot(h.astype(jnp.bfloat16), w2,
                     preferred_element_type=jnp.float32) + b2, act)
    return jnp.dot(h.astype(jnp.bfloat16), w3,
                   preferred_element_type=jnp.float32) + b3


# ----------------------------- fused forward kernel -----------------------------

def _fused_forward_kernel(
    # graph data
    nf0_ref, ea_ref, nd_ref, src_ref, dstc_ref, dstr_ref,
    # node_in MLP (LayerNorm)
    ni_w1, ni_b1, ni_w2, ni_b2, ni_w3, ni_b3, ni_g, ni_bt,
    # edge_in MLP (LayerNorm)
    ei_w1, ei_b1, ei_w2, ei_b2, ei_w3, ei_b3, ei_g, ei_bt,
    # node_out MLP (no LayerNorm) -- used twice in forward()
    no_w1, no_b1, no_w2, no_b2, no_w3, no_b3,
    # fno_mapper stand-in MLP (no LayerNorm, GELU)
    fm_w1, fm_b1, fm_w2, fm_b2, fm_w3, fm_b3,
    # stacked SchInteractionNetwork edge MLPs, leading dim = layer
    se_w1, se_b1, se_w2, se_b2, se_w3, se_b3, se_g, se_bt,
    # stacked SchInteractionNetwork node MLPs, leading dim = layer
    sn_w1, sn_b1, sn_w2, sn_b2, sn_w3, sn_b3, sn_g, sn_bt,
    # output
    out_ref,
):
    nf0 = nf0_ref[...]                    # (N, 30) f32
    ea = ea_ref[...]                      # (E, 3)  f32
    nd = nd_ref[...]                      # (E, 1)  f32
    N = nf0.shape[0]
    E = ea.shape[0]

    # ---- encoders ----
    nf = _layernorm(_mlp3(nf0, ni_w1[...], ni_b1[...], ni_w2[...], ni_b2[...],
                          ni_w3[...], ni_b3[...]), ni_g[...], ni_bt[...])     # (N, H)
    ef = _layernorm(_mlp3(ea, ei_w1[...], ei_b1[...], ei_w2[...], ei_b2[...],
                          ei_w3[...], ei_b3[...]), ei_g[...], ei_bt[...])     # (E, H)

    # ---- incidence matrices built once in-kernel from int32 edge indices ----
    # gat_j[e, n] = 1 iff n == src[e]   (gather x_j = x[edge_index[0]])
    # gat_i[e, n] = 1 iff n == dst[e]   (gather x_i = x[edge_index[1]])
    # sca [n, e]  = 1 iff n == dst[e]   (scatter-sum onto target nodes; already (N, E)
    #                                    so the reduction is a plain matmul)
    e_iota = jax.lax.broadcasted_iota(jnp.int32, (E, N), 1)
    gat_j = jnp.where(e_iota == src_ref[...], 1.0, 0.0).astype(jnp.bfloat16)
    gat_i = jnp.where(e_iota == dstc_ref[...], 1.0, 0.0).astype(jnp.bfloat16)
    n_iota = jax.lax.broadcasted_iota(jnp.int32, (N, E), 0)
    sca = jnp.where(n_iota == dstr_ref[...], 1.0, 0.0).astype(jnp.bfloat16)

    def sch_layer(l, nf, ef):
        nf_b = nf.astype(jnp.bfloat16)
        x_j = jnp.dot(gat_j, nf_b, preferred_element_type=jnp.float32)        # (E, H)
        x_i = jnp.dot(gat_i, nf_b, preferred_element_type=jnp.float32)        # (E, H)
        # lin_edge on cat(x_i, x_j, edge_feature): single K=3H matmul.
        msg = _mlp3(jnp.concatenate([x_i, x_j, ef], axis=-1),
                    se_w1[l], se_b1[l], se_w2[l], se_b2[l], se_w3[l], se_b3[l])
        msg = _layernorm(msg, se_g[l], se_bt[l])                              # (E, H)
        # dist-weighted scatter-sum onto target nodes (plain matmul, bf16/f32-acc).
        weighted = (msg * nd).astype(jnp.bfloat16)
        aggr = jnp.dot(sca, weighted, preferred_element_type=jnp.float32)     # (N, H)
        # lin_node on cat(x, aggr): single K=2H matmul.
        node_out = _mlp3(jnp.concatenate([nf, aggr], axis=-1),
                         sn_w1[l], sn_b1[l], sn_w2[l], sn_b2[l], sn_w3[l], sn_b3[l])
        node_out = _layernorm(node_out, sn_g[l], sn_bt[l])
        return nf + node_out, ef + msg        # residuals on nodes and edges

    for l in range(N_MP_LAYERS):
        nf, ef = sch_layer(l, nf, ef)

    out = _mlp3(nf, no_w1[...], no_b1[...], no_w2[...], no_b2[...],
                no_w3[...], no_b3[...])                                       # (N, 2)

    # TODO(synk): FNO spectral-conv mapper -> pointwise GELU MLP lift (2 -> H) stand-in.
    nf = _mlp3(out, fm_w1[...], fm_b1[...], fm_w2[...], fm_b2[...],
               fm_w3[...], fm_b3[...], act="gelu")                            # (N, H)

    for l in range(N_MP_LAYERS, N_SCH_LAYERS):
        nf, ef = sch_layer(l, nf, ef)

    out_ref[...] = _mlp3(nf, no_w1[...], no_b1[...], no_w2[...], no_b2[...],
                         no_w3[...], no_b3[...])                              # (N, 2)


# ----------------------------- host-side wrapper -----------------------------

def _mlp_args(p, *, with_ln):
    args = [p["w1"].astype(jnp.bfloat16), p["b1"],
            p["w2"].astype(jnp.bfloat16), p["b2"],
            p["w3"].astype(jnp.bfloat16), p["b3"]]
    if with_ln:
        args += [p["g"], p["b"]]
    return args


def _stacked_sch_args(layers, which):
    def stk(name, to_bf16):
        s = jnp.stack([lyr[which][name] for lyr in layers], axis=0)
        return s.astype(jnp.bfloat16) if to_bf16 else s
    return [stk("w1", True), stk("b1", False), stk("w2", True), stk("b2", False),
            stk("w3", True), stk("b3", False), stk("g", False), stk("b", False)]


@jax.jit
def learned_simulator_forward(params, x_idx, pos, edge_attr, src_idx, dst_idx, node_dist):
    # embedding lookup + concat is host-side glue; everything else is ONE fused kernel.
    emb = jnp.take(params["embed"], x_idx, axis=0)               # (N, 16)
    nf0 = jnp.concatenate([emb, pos], axis=-1)                   # (N, 30)
    N = nf0.shape[0]
    E = edge_attr.shape[0]

    src_col = src_idx.astype(jnp.int32).reshape(E, 1)            # edge_index[0] (x_j)
    dst_col = dst_idx.astype(jnp.int32).reshape(E, 1)            # edge_index[1] (x_i)
    dst_row = dst_idx.astype(jnp.int32).reshape(1, E)            # scatter target

    all_layers = list(params["layers"]) + list(params["layers2"])
    args = ([nf0, edge_attr, node_dist, src_col, dst_col, dst_row]
            + _mlp_args(params["node_in"], with_ln=True)
            + _mlp_args(params["edge_in"], with_ln=True)
            + _mlp_args(params["node_out"], with_ln=False)
            + _mlp_args(params["fno_mapper"], with_ln=False)
            + _stacked_sch_args(all_layers, "edge")
            + _stacked_sch_args(all_layers, "node"))

    vmem = pl.BlockSpec(memory_space=pltpu.MemorySpace.VMEM)
    return pl.pallas_call(
        _fused_forward_kernel,
        out_shape=jax.ShapeDtypeStruct((N, DIM), jnp.float32),
        in_specs=[vmem] * len(args),
        out_specs=vmem,
    )(*args)


# ----------------------------- parameters -----------------------------

def init_mlp(key, in_size, hidden, out_size):
    k1, k2, k3 = jax.random.split(key, 3)

    def lin(k, fi, fo):
        # torch: weight.normal_(0, 1/sqrt(in_features)), bias = 0  (stored transposed)
        return jax.random.normal(k, (fi, fo), jnp.float32) / math.sqrt(fi)

    return {
        "w1": lin(k1, in_size, hidden), "b1": jnp.zeros((1, hidden), jnp.float32),
        "w2": lin(k2, hidden, hidden), "b2": jnp.zeros((1, hidden), jnp.float32),
        "w3": lin(k3, hidden, out_size), "b3": jnp.zeros((1, out_size), jnp.float32),
        "g": jnp.ones((1, out_size), jnp.float32), "b": jnp.zeros((1, out_size), jnp.float32),
    }


def init_params(key, hidden=HIDDEN):
    n_keys = 5 + N_MP_LAYERS * 2 + N_MP_LAYERS2 * 2
    keys = list(jax.random.split(key, n_keys))
    pop = lambda: keys.pop()

    limit = math.sqrt(6.0 / (NUM_TYPES + PTYPE_DIM))   # xavier_uniform
    params = {
        "embed": jax.random.uniform(pop(), (NUM_TYPES, PTYPE_DIM), jnp.float32,
                                    -limit, limit),
        "node_in": init_mlp(pop(), PTYPE_DIM + DIM * (WINDOW + 2), hidden, hidden),
        "edge_in": init_mlp(pop(), DIM + 1, hidden, hidden),
        "node_out": init_mlp(pop(), hidden, hidden, DIM),
        # pointwise stand-in for the FNO mapper (2 -> hidden), see TODO at top.
        "fno_mapper": init_mlp(pop(), DIM, FNO_HIDDEN, hidden),
        "layers": [{"edge": init_mlp(pop(), 3 * hidden, hidden, hidden),
                    "node": init_mlp(pop(), 2 * hidden, hidden, hidden)}
                   for _ in range(N_MP_LAYERS)],
        "layers2": [{"edge": init_mlp(pop(), 3 * hidden, hidden, hidden),
                     "node": init_mlp(pop(), 2 * hidden, hidden, hidden)}
                    for _ in range(N_MP_LAYERS2)],
    }
    return params


# ----------------------------- demo -----------------------------

if __name__ == "__main__":
    key = jax.random.PRNGKey(0)
    kp, k1, k2, k3, k4 = jax.random.split(key, 5)

    params = init_params(kp)

    N = 16                         # particles
    E = 2 * N                      # bidirectional ring graph -> 32 edges

    x_idx = jax.random.randint(k1, (N,), 0, NUM_TYPES)                      # particle types
    pos = jax.random.normal(k2, (N, DIM * (WINDOW + 2)), jnp.float32)       # (16, 14)
    edge_attr = jax.random.normal(k3, (E, DIM + 1), jnp.float32)            # (32, 3)
    node_dist = jax.random.uniform(k4, (E, 1), jnp.float32)                 # (32, 1)

    idx = jnp.arange(N)
    src = jnp.concatenate([idx, (idx + 1) % N])        # edge_index[0] (source, x_j)
    dst = jnp.concatenate([(idx + 1) % N, idx])        # edge_index[1] (target, x_i)

    out = learned_simulator_forward(params, x_idx, pos, edge_attr, src, dst, node_dist)
    out = jax.block_until_ready(out)
    assert out.shape == (N, DIM) and out.dtype == jnp.float32
    assert bool(jnp.all(jnp.isfinite(out)))
    print("KERNEL_OK")
</pallas_src>

<mosaic_0001>
module attributes {stable_mosaic.version = 11 : i64} {
  func.func @_fused_forward_kernel(%arg0: memref<16x30xf32, #tpu.memory_space<vmem>>, %arg1: memref<32x3xf32, #tpu.memory_space<vmem>>, %arg2: memref<32x1xf32, #tpu.memory_space<vmem>>, %arg3: memref<32x1xi32, #tpu.memory_space<vmem>>, %arg4: memref<32x1xi32, #tpu.memory_space<vmem>>, %arg5: memref<1x32xi32, #tpu.memory_space<vmem>>, %arg6: memref<30x128xbf16, #tpu.memory_space<vmem>>, %arg7: memref<1x128xf32, #tpu.memory_space<vmem>>, %arg8: memref<128x128xbf16, #tpu.memory_space<vmem>>, %arg9: memref<1x128xf32, #tpu.memory_space<vmem>>, %arg10: memref<128x128xbf16, #tpu.memory_space<vmem>>, %arg11: memref<1x128xf32, #tpu.memory_space<vmem>>, %arg12: memref<1x128xf32, #tpu.memory_space<vmem>>, %arg13: memref<1x128xf32, #tpu.memory_space<vmem>>, %arg14: memref<3x128xbf16, #tpu.memory_space<vmem>>, %arg15: memref<1x128xf32, #tpu.memory_space<vmem>>, %arg16: memref<128x128xbf16, #tpu.memory_space<vmem>>, %arg17: memref<1x128xf32, #tpu.memory_space<vmem>>, %arg18: memref<128x128xbf16, #tpu.memory_space<vmem>>, %arg19: memref<1x128xf32, #tpu.memory_space<vmem>>, %arg20: memref<1x128xf32, #tpu.memory_space<vmem>>, %arg21: memref<1x128xf32, #tpu.memory_space<vmem>>, %arg22: memref<128x128xbf16, #tpu.memory_space<vmem>>, %arg23: memref<1x128xf32, #tpu.memory_space<vmem>>, %arg24: memref<128x128xbf16, #tpu.memory_space<vmem>>, %arg25: memref<1x128xf32, #tpu.memory_space<vmem>>, %arg26: memref<128x2xbf16, #tpu.memory_space<vmem>>, %arg27: memref<1x2xf32, #tpu.memory_space<vmem>>, %arg28: memref<2x64xbf16, #tpu.memory_space<vmem>>, %arg29: memref<1x64xf32, #tpu.memory_space<vmem>>, %arg30: memref<64x64xbf16, #tpu.memory_space<vmem>>, %arg31: memref<1x64xf32, #tpu.memory_space<vmem>>, %arg32: memref<64x128xbf16, #tpu.memory_space<vmem>>, %arg33: memref<1x128xf32, #tpu.memory_space<vmem>>, %arg34: memref<6x384x128xbf16, #tpu.memory_space<vmem>>, %arg35: memref<6x1x128xf32, #tpu.memory_space<vmem>>, %arg36: memref<6x128x128xbf16, #tpu.memory_space<vmem>>, %arg37: memref<6x1x128xf32, #tpu.memory_space<vmem>>, %arg38: memref<6x128x128xbf16, #tpu.memory_space<vmem>>, %arg39: memref<6x1x128xf32, #tpu.memory_space<vmem>>, %arg40: memref<6x1x128xf32, #tpu.memory_space<vmem>>, %arg41: memref<6x1x128xf32, #tpu.memory_space<vmem>>, %arg42: memref<6x256x128xbf16, #tpu.memory_space<vmem>>, %arg43: memref<6x1x128xf32, #tpu.memory_space<vmem>>, %arg44: memref<6x128x128xbf16, #tpu.memory_space<vmem>>, %arg45: memref<6x1x128xf32, #tpu.memory_space<vmem>>, %arg46: memref<6x128x128xbf16, #tpu.memory_space<vmem>>, %arg47: memref<6x1x128xf32, #tpu.memory_space<vmem>>, %arg48: memref<6x1x128xf32, #tpu.memory_space<vmem>>, %arg49: memref<6x1x128xf32, #tpu.memory_space<vmem>>, %arg50: memref<16x2xf32, #tpu.memory_space<vmem>>) attributes {dimension_semantics = [], scalar_prefetch = 0 : i64, scratch_operands = 0 : i64, tpu.core_type = #tpu.core_type<tc>} {
    %c0 = arith.constant 0 : index
    %c0_0 = arith.constant 0 : index
    %0 = vector.load %arg0[%c0, %c0_0] : memref<16x30xf32, #tpu.memory_space<vmem>>, vector<16x30xf32>
    %c0_1 = arith.constant 0 : index
    %c0_2 = arith.constant 0 : index
    %1 = vector.load %arg1[%c0_1, %c0_2] : memref<32x3xf32, #tpu.memory_space<vmem>>, vector<32x3xf32>
    %c0_3 = arith.constant 0 : index
    %c0_4 = arith.constant 0 : index
    %2 = vector.load %arg2[%c0_3, %c0_4] : memref<32x1xf32, #tpu.memory_space<vmem>>, vector<32x1xf32>
    %c0_5 = arith.constant 0 : index
    %c0_6 = arith.constant 0 : index
    %3 = vector.load %arg6[%c0_5, %c0_6] : memref<30x128xbf16, #tpu.memory_space<vmem>>, vector<30x128xbf16>
    %c0_7 = arith.constant 0 : index
    %c0_8 = arith.constant 0 : index
    %4 = vector.load %arg7[%c0_7, %c0_8] : memref<1x128xf32, #tpu.memory_space<vmem>>, vector<1x128xf32>
    %c0_9 = arith.constant 0 : index
    %c0_10 = arith.constant 0 : index
    %5 = vector.load %arg8[%c0_9, %c0_10] : memref<128x128xbf16, #tpu.memory_space<vmem>>, vector<128x128xbf16>
    %c0_11 = arith.constant 0 : index
    %c0_12 = arith.constant 0 : index
    %6 = vector.load %arg9[%c0_11, %c0_12] : memref<1x128xf32, #tpu.memory_space<vmem>>, vector<1x128xf32>
    %c0_13 = arith.constant 0 : index
    %c0_14 = arith.constant 0 : index
    %7 = vector.load %arg10[%c0_13, %c0_14] : memref<128x128xbf16, #tpu.memory_space<vmem>>, vector<128x128xbf16>
    %c0_15 = arith.constant 0 : index
    %c0_16 = arith.constant 0 : index
    %8 = vector.load %arg11[%c0_15, %c0_16] : memref<1x128xf32, #tpu.memory_space<vmem>>, vector<1x128xf32>
    %9 = arith.truncf %0 : vector<16x30xf32> to vector<16x30xbf16>
    %cst = arith.constant dense<0.000000e+00> : vector<16x128xf32>
    %10 = tpu.matmul %9, %3, %cst {dimension_numbers = #tpu.dot_dimension_numbers<[1], [0], [0], [1], [0, 0, 1, 1], [], []>} : vector<16x30xbf16>, vector<30x128xbf16>, vector<16x128xf32> -> vector<16x128xf32>
    %11 = vector.broadcast %4 : vector<1x128xf32> to vector<16x128xf32>
    %12 = arith.addf %10, %11 : vector<16x128xf32>
    %cst_17 = arith.constant 0.000000e+00 : f32
    %13 = vector.broadcast %cst_17 : f32 to vector<16x128xf32>
    %14 = arith.maximumf %12, %13 : vector<16x128xf32>
    %15 = arith.truncf %14 : vector<16x128xf32> to vector<16x128xbf16>
    %cst_18 = arith.constant dense<0.000000e+00> : vector<16x128xf32>
    %16 = tpu.matmul %15, %5, %cst_18 {dimension_numbers = #tpu.dot_dimension_numbers<[1], [0], [0], [1], [0, 0, 1, 1], [], []>} : vector<16x128xbf16>, vector<128x128xbf16>, vector<16x128xf32> -> vector<16x128xf32>
    %17 = vector.broadcast %6 : vector<1x128xf32> to vector<16x128xf32>
    %18 = arith.addf %16, %17 : vector<16x128xf32>
    %cst_19 = arith.constant 0.000000e+00 : f32
    %19 = vector.broadcast %cst_19 : f32 to vector<16x128xf32>
    %20 = arith.maximumf %18, %19 : vector<16x128xf32>
    %21 = arith.truncf %20 : vector<16x128xf32> to vector<16x128xbf16>
    %cst_20 = arith.constant dense<0.000000e+00> : vector<16x128xf32>
    %22 = tpu.matmul %21, %7, %cst_20 {dimension_numbers = #tpu.dot_dimension_numbers<[1], [0], [0], [1], [0, 0, 1, 1], [], []>} : vector<16x128xbf16>, vector<128x128xbf16>, vector<16x128xf32> -> vector<16x128xf32>
    %23 = vector.broadcast %8 : vector<1x128xf32> to vector<16x128xf32>
    %24 = arith.addf %22, %23 : vector<16x128xf32>
    %c0_21 = arith.constant 0 : index
    %c0_22 = arith.constant 0 : index
    %25 = vector.load %arg12[%c0_21, %c0_22] : memref<1x128xf32, #tpu.memory_space<vmem>>, vector<1x128xf32>
    %c0_23 = arith.constant 0 : index
    %c0_24 = arith.constant 0 : index
    %26 = vector.load %arg13[%c0_23, %c0_24] : memref<1x128xf32, #tpu.memory_space<vmem>>, vector<1x128xf32>
    %cst_25 = arith.constant dense<0.000000e+00> : vector<16xf32>
    %27 = vector.multi_reduction <add>, %24, %cst_25 [1] : vector<16x128xf32> to vector<16xf32>
    %28 = vector.shape_cast %27 : vector<16xf32> to vector<16x1xf32>
    %cst_26 = arith.constant 1.280000e+02 : f32
    %29 = vector.broadcast %cst_26 : f32 to vector<16x1xf32>
    %30 = arith.divf %28, %29 : vector<16x1xf32>
    %31 = vector.broadcast %30 : vector<16x1xf32> to vector<16x128xf32>
    %32 = arith.subf %24, %31 : vector<16x128xf32>
    %33 = arith.mulf %32, %32 : vector<16x128xf32>
    %cst_27 = arith.constant dense<0.000000e+00> : vector<16xf32>
    %34 = vector.multi_reduction <add>, %33, %cst_27 [1] : vector<16x128xf32> to vector<16xf32>
    %35 = vector.shape_cast %34 : vector<16xf32> to vector<16x1xf32>
    %cst_28 = arith.constant 1.280000e+02 : f32
    %36 = vector.broadcast %cst_28 : f32 to vector<16x1xf32>
    %37 = arith.divf %35, %36 : vector<16x1xf32>
    %38 = vector.broadcast %30 : vector<16x1xf32> to vector<16x128xf32>
    %39 = arith.subf %24, %38 : vector<16x128xf32>
    %cst_29 = arith.constant 9.99999974E-6 : f32
    %40 = vector.broadcast %cst_29 : f32 to vector<16x1xf32>
    %41 = arith.addf %37, %40 : vector<16x1xf32>
    %42 = math.rsqrt %41 : vector<16x1xf32>
    %43 = vector.broadcast %42 : vector<16x1xf32> to vector<16x128xf32>
    %44 = arith.mulf %39, %43 : vector<16x128xf32>
    %45 = vector.broadcast %25 : vector<1x128xf32> to vector<16x128xf32>
    %46 = arith.mulf %44, %45 : vector<16x128xf32>
    %47 = vector.broadcast %26 : vector<1x128xf32> to vector<16x128xf32>
    %48 = arith.addf %46, %47 : vector<16x128xf32>
    %c0_30 = arith.constant 0 : index
    %c0_31 = arith.constant 0 : index
    %49 = vector.load %arg14[%c0_30, %c0_31] : memref<3x128xbf16, #tpu.memory_space<vmem>>, vector<3x128xbf16>
    %c0_32 = arith.constant 0 : index
    %c0_33 = arith.constant 0 : index
    %50 = vector.load %arg15[%c0_32, %c0_33] : memref<1x128xf32, #tpu.memory_space<vmem>>, vector<1x128xf32>
    %c0_34 = arith.constant 0 : index
    %c0_35 = arith.constant 0 : index
    %51 = vector.load %arg16[%c0_34, %c0_35] : memref<128x128xbf16, #tpu.memory_space<vmem>>, vector<128x128xbf16>
    %c0_36 = arith.constant 0 : index
    %c0_37 = arith.constant 0 : index
    %52 = vector.load %arg17[%c0_36, %c0_37] : memref<1x128xf32, #tpu.memory_space<vmem>>, vector<1x128xf32>
    %c0_38 = arith.constant 0 : index
    %c0_39 = arith.constant 0 : index
    %53 = vector.load %arg18[%c0_38, %c0_39] : memref<128x128xbf16, #tpu.memory_space<vmem>>, vector<128x128xbf16>
    %c0_40 = arith.constant 0 : index
    %c0_41 = arith.constant 0 : index
    %54 = vector.load %arg19[%c0_40, %c0_41] : memref<1x128xf32, #tpu.memory_space<vmem>>, vector<1x128xf32>
    %55 = arith.truncf %1 : vector<32x3xf32> to vector<32x3xbf16>
    %cst_42 = arith.constant dense<0.000000e+00> : vector<32x128xf32>
    %56 = tpu.matmul %55, %49, %cst_42 {dimension_numbers = #tpu.dot_dimension_numbers<[1], [0], [0], [1], [0, 0, 1, 1], [], []>} : vector<32x3xbf16>, vector<3x128xbf16>, vector<32x128xf32> -> vector<32x128xf32>
    %57 = vector.broadcast %50 : vector<1x128xf32> to vector<32x128xf32>
    %58 = arith.addf %56, %57 : vector<32x128xf32>
    %cst_43 = arith.constant 0.000000e+00 : f32
    %59 = vector.broadcast %cst_43 : f32 to vector<32x128xf32>
    %60 = arith.maximumf %58, %59 : vector<32x128xf32>
    %61 = arith.truncf %60 : vector<32x128xf32> to vector<32x128xbf16>
    %cst_44 = arith.constant dense<0.000000e+00> : vector<32x128xf32>
    %62 = tpu.matmul %61, %51, %cst_44 {dimension_numbers = #tpu.dot_dimension_numbers<[1], [0], [0], [1], [0, 0, 1, 1], [], []>} : vector<32x128xbf16>, vector<128x128xbf16>, vector<32x128xf32> -> vector<32x128xf32>
    %63 = vector.broadcast %52 : vector<1x128xf32> to vector<32x128xf32>
    %64 = arith.addf %62, %63 : vector<32x128xf32>
    %cst_45 = arith.constant 0.000000e+00 : f32
    %65 = vector.broadcast %cst_45 : f32 to vector<32x128xf32>
    %66 = arith.maximumf %64, %65 : vector<32x128xf32>
    %67 = arith.truncf %66 : vector<32x128xf32> to vector<32x128xbf16>
    %cst_46 = arith.constant dense<0.000000e+00> : vector<32x128xf32>
    %68 = tpu.matmul %67, %53, %cst_46 {dimension_numbers = #tpu.dot_dimension_numbers<[1], [0], [0], [1], [0, 0, 1, 1], [], []>} : vector<32x128xbf16>, vector<128x128xbf16>, vector<32x128xf32> -> vector<32x128xf32>
    %69 = vector.broadcast %54 : vector<1x128xf32> to vector<32x128xf32>
    %70 = arith.addf %68, %69 : vector<32x128xf32>
    %c0_47 = arith.constant 0 : index
    %c0_48 = arith.constant 0 : index
    %71 = vector.load %arg20[%c0_47, %c0_48] : memref<1x128xf32, #tpu.memory_space<vmem>>, vector<1x128xf32>
    %c0_49 = arith.constant 0 : index
    %c0_50 = arith.constant 0 : index
    %72 = vector.load %arg21[%c0_49, %c0_50] : memref<1x128xf32, #tpu.memory_space<vmem>>, vector<1x128xf32>
    %cst_51 = arith.constant dense<0.000000e+00> : vector<32xf32>
    %73 = vector.multi_reduction <add>, %70, %cst_51 [1] : vector<32x128xf32> to vector<32xf32>
    %74 = vector.shape_cast %73 : vector<32xf32> to vector<32x1xf32>
    %cst_52 = arith.constant 1.280000e+02 : f32
    %75 = vector.broadcast %cst_52 : f32 to vector<32x1xf32>
    %76 = arith.divf %74, %75 : vector<32x1xf32>
    %77 = vector.broadcast %76 : vector<32x1xf32> to vector<32x128xf32>
    %78 = arith.subf %70, %77 : vector<32x128xf32>
    %79 = arith.mulf %78, %78 : vector<32x128xf32>
    %cst_53 = arith.constant dense<0.000000e+00> : vector<32xf32>
    %80 = vector.multi_reduction <add>, %79, %cst_53 [1] : vector<32x128xf32> to vector<32xf32>
    %81 = vector.shape_cast %80 : vector<32xf32> to vector<32x1xf32>
    %cst_54 = arith.constant 1.280000e+02 : f32
    %82 = vector.broadcast %cst_54 : f32 to vector<32x1xf32>
    %83 = arith.divf %81, %82 : vector<32x1xf32>
    %84 = vector.broadcast %76 : vector<32x1xf32> to vector<32x128xf32>
    %85 = arith.subf %70, %84 : vector<32x128xf32>
    %cst_55 = arith.constant 9.99999974E-6 : f32
    %86 = vector.broadcast %cst_55 : f32 to vector<32x1xf32>
    %87 = arith.addf %83, %86 : vector<32x1xf32>
    %88 = math.rsqrt %87 : vector<32x1xf32>
    %89 = vector.broadcast %88 : vector<32x1xf32> to vector<32x128xf32>
    %90 = arith.mulf %85, %89 : vector<32x128xf32>
    %91 = vector.broadcast %71 : vector<1x128xf32> to vector<32x128xf32>
    %92 = arith.mulf %90, %91 : vector<32x128xf32>
    %93 = vector.broadcast %72 : vector<1x128xf32> to vector<32x128xf32>
    %94 = arith.addf %92, %93 : vector<32x128xf32>
    %95 = tpu.iota {dimensions = array<i32: 1>} : vector<32x16xi32>
    %c0_56 = arith.constant 0 : index
    %c0_57 = arith.constant 0 : index
    %96 = vector.load %arg3[%c0_56, %c0_57] : memref<32x1xi32, #tpu.memory_space<vmem>>, vector<32x1xi32>
    %97 = vector.broadcast %96 : vector<32x1xi32> to vector<32x16xi32>
    %98 = arith.cmpi eq, %95, %97 : vector<32x16xi32>
    %cst_58 = arith.constant 1.000000e+00 : f32
    %cst_59 = arith.constant 0.000000e+00 : f32
    %99 = vector.broadcast %cst_58 : f32 to vector<32x16xf32>
    %100 = vector.broadcast %cst_59 : f32 to vector<32x16xf32>
    %101 = arith.select %98, %99, %100 : vector<32x16xi1>, vector<32x16xf32>
    %102 = arith.truncf %101 : vector<32x16xf32> to vector<32x16xbf16>
    %c0_60 = arith.constant 0 : index
    %c0_61 = arith.constant 0 : index
    %103 = vector.load %arg4[%c0_60, %c0_61] : memref<32x1xi32, #tpu.memory_space<vmem>>, vector<32x1xi32>
    %104 = vector.broadcast %103 : vector<32x1xi32> to vector<32x16xi32>
    %105 = arith.cmpi eq, %95, %104 : vector<32x16xi32>
    %cst_62 = arith.constant 1.000000e+00 : f32
    %cst_63 = arith.constant 0.000000e+00 : f32
    %106 = vector.broadcast %cst_62 : f32 to vector<32x16xf32>
    %107 = vector.broadcast %cst_63 : f32 to vector<32x16xf32>
    %108 = arith.select %105, %106, %107 : vector<32x16xi1>, vector<32x16xf32>
    %109 = arith.truncf %108 : vector<32x16xf32> to vector<32x16xbf16>
    %110 = tpu.iota {dimensions = array<i32: 0>} : vector<16x32xi32>
    %c0_64 = arith.constant 0 : index
    %c0_65 = arith.constant 0 : index
    %111 = vector.load %arg5[%c0_64, %c0_65] : memref<1x32xi32, #tpu.memory_space<vmem>>, vector<1x32xi32>
    %112 = vector.broadcast %111 : vector<1x32xi32> to vector<16x32xi32>
    %113 = arith.cmpi eq, %110, %112 : vector<16x32xi32>
    %cst_66 = arith.constant 1.000000e+00 : f32
    %cst_67 = arith.constant 0.000000e+00 : f32
    %114 = vector.broadcast %cst_66 : f32 to vector<16x32xf32>
    %115 = vector.broadcast %cst_67 : f32 to vector<16x32xf32>
    %116 = arith.select %113, %114, %115 : vector<16x32xi1>, vector<16x32xf32>
    %117 = arith.truncf %116 : vector<16x32xf32> to vector<16x32xbf16>
    %118 = arith.truncf %48 : vector<16x128xf32> to vector<16x128xbf16>
    %cst_68 = arith.constant dense<0.000000e+00> : vector<32x128xf32>
    %119 = tpu.matmul %102, %118, %cst_68 {dimension_numbers = #tpu.dot_dimension_numbers<[1], [0], [0], [1], [0, 0, 1, 1], [], []>} : vector<32x16xbf16>, vector<16x128xbf16>, vector<32x128xf32> -> vector<32x128xf32>
    %cst_69 = arith.constant dense<0.000000e+00> : vector<32x128xf32>
    %120 = tpu.matmul %109, %118, %cst_69 {dimension_numbers = #tpu.dot_dimension_numbers<[1], [0], [0], [1], [0, 0, 1, 1], [], []>} : vector<32x16xbf16>, vector<16x128xbf16>, vector<32x128xf32> -> vector<32x128xf32>
    %121 = tpu.concatenate %120, %119, %94 in 1 : vector<32x128xf32>, vector<32x128xf32>, vector<32x128xf32> -> vector<32x384xf32>
    %c0_70 = arith.constant 0 : index
    %c0_71 = arith.constant 0 : index
    %c0_72 = arith.constant 0 : index
    %122 = vector.load %arg34[%c0_70, %c0_71, %c0_72] : memref<6x384x128xbf16, #tpu.memory_space<vmem>>, vector<1x384x128xbf16>
    %123 = vector.shape_cast %122 : vector<1x384x128xbf16> to vector<384x128xbf16>
    %c0_73 = arith.constant 0 : index
    %c0_74 = arith.constant 0 : index
    %c0_75 = arith.constant 0 : index
    %124 = vector.load %arg35[%c0_73, %c0_74, %c0_75] : memref<6x1x128xf32, #tpu.memory_space<vmem>>, vector<1x1x128xf32>
    %125 = vector.shape_cast %124 : vector<1x1x128xf32> to vector<1x128xf32>
    %c0_76 = arith.constant 0 : index
    %c0_77 = arith.constant 0 : index
    %c0_78 = arith.constant 0 : index
    %126 = vector.load %arg36[%c0_76, %c0_77, %c0_78] : memref<6x128x128xbf16, #tpu.memory_space<vmem>>, vector<1x128x128xbf16>
    %127 = vector.shape_cast %126 : vector<1x128x128xbf16> to vector<128x128xbf16>
    %c0_79 = arith.constant 0 : index
    %c0_80 = arith.constant 0 : index
    %c0_81 = arith.constant 0 : index
    %128 = vector.load %arg37[%c0_79, %c0_80, %c0_81] : memref<6x1x128xf32, #tpu.memory_space<vmem>>, vector<1x1x128xf32>
    %129 = vector.shape_cast %128 : vector<1x1x128xf32> to vector<1x128xf32>
    %c0_82 = arith.constant 0 : index
    %c0_83 = arith.constant 0 : index
    %c0_84 = arith.constant 0 : index
    %130 = vector.load %arg38[%c0_82, %c0_83, %c0_84] : memref<6x128x128xbf16, #tpu.memory_space<vmem>>, vector<1x128x128xbf16>
    %131 = vector.shape_cast %130 : vector<1x128x128xbf16> to vector<128x128xbf16>
    %c0_85 = arith.constant 0 : index
    %c0_86 = arith.constant 0 : index
    %c0_87 = arith.constant 0 : index
    %132 = vector.load %arg39[%c0_85, %c0_86, %c0_87] : memref<6x1x128xf32, #tpu.memory_space<vmem>>, vector<1x1x128xf32>
    %133 = vector.shape_cast %132 : vector<1x1x128xf32> to vector<1x128xf32>
    %134 = arith.truncf %121 : vector<32x384xf32> to vector<32x384xbf16>
    %cst_88 = arith.constant dense<0.000000e+00> : vector<32x128xf32>
    %135 = tpu.matmul %134, %123, %cst_88 {dimension_numbers = #tpu.dot_dimension_numbers<[1], [0], [0], [1], [0, 0, 1, 1], [], []>} : vector<32x384xbf16>, vector<384x128xbf16>, vector<32x128xf32> -> vector<32x128xf32>
    %136 = vector.broadcast %125 : vector<1x128xf32> to vector<32x128xf32>
    %137 = arith.addf %135, %136 : vector<32x128xf32>
    %cst_89 = arith.constant 0.000000e+00 : f32
    %138 = vector.broadcast %cst_89 : f32 to vector<32x128xf32>
    %139 = arith.maximumf %137, %138 : vector<32x128xf32>
    %140 = arith.truncf %139 : vector<32x128xf32> to vector<32x128xbf16>
    %cst_90 = arith.constant dense<0.000000e+00> : vector<32x128xf32>
    %141 = tpu.matmul %140, %127, %cst_90 {dimension_numbers = #tpu.dot_dimension_numbers<[1], [0], [0], [1], [0, 0, 1, 1], [], []>} : vector<32x128xbf16>, vector<128x128xbf16>, vector<32x128xf32> -> vector<32x128xf32>
    %142 = vector.broadcast %129 : vector<1x128xf32> to vector<32x128xf32>
    %143 = arith.addf %141, %142 : vector<32x128xf32>
    %cst_91 = arith.constant 0.000000e+00 : f32
    %144 = vector.broadcast %cst_91 : f32 to vector<32x128xf32>
    %145 = arith.maximumf %143, %144 : vector<32x128xf32>
    %146 = arith.truncf %145 : vector<32x128xf32> to vector<32x128xbf16>
    %cst_92 = arith.constant dense<0.000000e+00> : vector<32x128xf32>
    %147 = tpu.matmul %146, %131, %cst_92 {dimension_numbers = #tpu.dot_dimension_numbers<[1], [0], [0], [1], [0, 0, 1, 1], [], []>} : vector<32x128xbf16>, vector<128x128xbf16>, vector<32x128xf32> -> vector<32x128xf32>
    %148 = vector.broadcast %133 : vector<1x128xf32> to vector<32x128xf32>
    %149 = arith.addf %147, %148 : vector<32x128xf32>
    %c0_93 = arith.constant 0 : index
    %c0_94 = arith.constant 0 : index
    %c0_95 = arith.constant 0 : index
    %150 = vector.load %arg40[%c0_93, %c0_94, %c0_95] : memref<6x1x128xf32, #tpu.memory_space<vmem>>, vector<1x1x128xf32>
    %151 = vector.shape_cast %150 : vector<1x1x128xf32> to vector<1x128xf32>
    %c0_96 = arith.constant 0 : index
    %c0_97 = arith.constant 0 : index
    %c0_98 = arith.constant 0 : index
    %152 = vector.load %arg41[%c0_96, %c0_97, %c0_98] : memref<6x1x128xf32, #tpu.memory_space<vmem>>, vector<1x1x128xf32>
    %153 = vector.shape_cast %152 : vector<1x1x128xf32> to vector<1x128xf32>
    %cst_99 = arith.constant dense<0.000000e+00> : vector<32xf32>
    %154 = vector.multi_reduction <add>, %149, %cst_99 [1] : vector<32x128xf32> to vector<32xf32>
    %155 = vector.shape_cast %154 : vector<32xf32> to vector<32x1xf32>
    %cst_100 = arith.constant 1.280000e+02 : f32
    %156 = vector.broadcast %cst_100 : f32 to vector<32x1xf32>
    %157 = arith.divf %155, %156 : vector<32x1xf32>
    %158 = vector.broadcast %157 : vector<32x1xf32> to vector<32x128xf32>
    %159 = arith.subf %149, %158 : vector<32x128xf32>
    %160 = arith.mulf %159, %159 : vector<32x128xf32>
    %cst_101 = arith.constant dense<0.000000e+00> : vector<32xf32>
    %161 = vector.multi_reduction <add>, %160, %cst_101 [1] : vector<32x128xf32> to vector<32xf32>
    %162 = vector.shape_cast %161 : vector<32xf32> to vector<32x1xf32>
    %cst_102 = arith.constant 1.280000e+02 : f32
    %163 = vector.broadcast %cst_102 : f32 to vector<32x1xf32>
    %164 = arith.divf %162, %163 : vector<32x1xf32>
    %165 = vector.broadcast %157 : vector<32x1xf32> to vector<32x128xf32>
    %166 = arith.subf %149, %165 : vector<32x128xf32>
    %cst_103 = arith.constant 9.99999974E-6 : f32
    %167 = vector.broadcast %cst_103 : f32 to vector<32x1xf32>
    %168 = arith.addf %164, %167 : vector<32x1xf32>
    %169 = math.rsqrt %168 : vector<32x1xf32>
    %170 = vector.broadcast %169 : vector<32x1xf32> to vector<32x128xf32>
    %171 = arith.mulf %166, %170 : vector<32x128xf32>
    %172 = vector.broadcast %151 : vector<1x128xf32> to vector<32x128xf32>
    %173 = arith.mulf %171, %172 : vector<32x128xf32>
    %174 = vector.broadcast %153 : vector<1x128xf32> to vector<32x128xf32>
    %175 = arith.addf %173, %174 : vector<32x128xf32>
    %176 = vector.broadcast %2 : vector<32x1xf32> to vector<32x128xf32>
    %177 = arith.mulf %175, %176 : vector<32x128xf32>
    %178 = arith.truncf %177 : vector<32x128xf32> to vector<32x128xbf16>
    %cst_104 = arith.constant dense<0.000000e+00> : vector<16x128xf32>
    %179 = tpu.matmul %117, %178, %cst_104 {dimension_numbers = #tpu.dot_dimension_numbers<[1], [0], [0], [1], [0, 0, 1, 1], [], []>} : vector<16x32xbf16>, vector<32x128xbf16>, vector<16x128xf32> -> vector<16x128xf32>
    %180 = tpu.concatenate %48, %179 in 1 : vector<16x128xf32>, vector<16x128xf32> -> vector<16x256xf32>
    %c0_105 = arith.constant 0 : index
    %c0_106 = arith.constant 0 : index
    %c0_107 = arith.constant 0 : index
    %181 = vector.load %arg42[%c0_105, %c0_106, %c0_107] : memref<6x256x128xbf16, #tpu.memory_space<vmem>>, vector<1x256x128xbf16>
    %182 = vector.shape_cast %181 : vector<1x256x128xbf16> to vector<256x128xbf16>
    %c0_108 = arith.constant 0 : index
    %c0_109 = arith.constant 0 : index
    %c0_110 = arith.constant 0 : index
    %183 = vector.load %arg43[%c0_108, %c0_109, %c0_110] : memref<6x1x128xf32, #tpu.memory_space<vmem>>, vector<1x1x128xf32>
    %184 = vector.shape_cast %183 : vector<1x1x128xf32> to vector<1x128xf32>
    %c0_111 = arith.constant 0 : index
    %c0_112 = arith.constant 0 : index
    %c0_113 = arith.constant 0 : index
    %185 = vector.load %arg44[%c0_111, %c0_112, %c0_113] : memref<6x128x128xbf16, #tpu.memory_space<vmem>>, vector<1x128x128xbf16>
    %186 = vector.shape_cast %185 : vector<1x128x128xbf16> to vector<128x128xbf16>
    %c0_114 = arith.constant 0 : index
    %c0_115 = arith.constant 0 : index
    %c0_116 = arith.constant 0 : index
    %187 = vector.load %arg45[%c0_114, %c0_115, %c0_116] : memref<6x1x128xf32, #tpu.memory_space<vmem>>, vector<1x1x128xf32>
    %188 = vector.shape_cast %187 : vector<1x1x128xf32> to vector<1x128xf32>
    %c0_117 = arith.constant 0 : index
    %c0_118 = arith.constant 0 : index
    %c0_119 = arith.constant 0 : index
    %189 = vector.load %arg46[%c0_117, %c0_118, %c0_119] : memref<6x128x128xbf16, #tpu.memory_space<vmem>>, vector<1x128x128xbf16>
    %190 = vector.shape_cast %189 : vector<1x128x128xbf16> to vector<128x128xbf16>
    %c0_120 = arith.constant 0 : index
    %c0_121 = arith.constant 0 : index
    %c0_122 = arith.constant 0 : index
    %191 = vector.load %arg47[%c0_120, %c0_121, %c0_122] : memref<6x1x128xf32, #tpu.memory_space<vmem>>, vector<1x1x128xf32>
    %192 = vector.shape_cast %191 : vector<1x1x128xf32> to vector<1x128xf32>
    %193 = arith.truncf %180 : vector<16x256xf32> to vector<16x256xbf16>
    %cst_123 = arith.constant dense<0.000000e+00> : vector<16x128xf32>
    %194 = tpu.matmul %193, %182, %cst_123 {dimension_numbers = #tpu.dot_dimension_numbers<[1], [0], [0], [1], [0, 0, 1, 1], [], []>} : vector<16x256xbf16>, vector<256x128xbf16>, vector<16x128xf32> -> vector<16x128xf32>
    %195 = vector.broadcast %184 : vector<1x128xf32> to vector<16x128xf32>
    %196 = arith.addf %194, %195 : vector<16x128xf32>
    %cst_124 = arith.constant 0.000000e+00 : f32
    %197 = vector.broadcast %cst_124 : f32 to vector<16x128xf32>
    %198 = arith.maximumf %196, %197 : vector<16x128xf32>
    %199 = arith.truncf %198 : vector<16x128xf32> to vector<16x128xbf16>
    %cst_125 = arith.constant dense<0.000000e+00> : vector<16x128xf32>
    %200 = tpu.matmul %199, %186, %cst_125 {dimension_numbers = #tpu.dot_dimension_numbers<[1], [0], [0], [1], [0, 0, 1, 1], [], []>} : vector<16x128xbf16>, vector<128x128xbf16>, vector<16x128xf32> -> vector<16x128xf32>
    %201 = vector.broadcast %188 : vector<1x128xf32> to vector<16x128xf32>
    %202 = arith.addf %200, %201 : vector<16x128xf32>
    %cst_126 = arith.constant 0.000000e+00 : f32
    %203 = vector.broadcast %cst_126 : f32 to vector<16x128xf32>
    %204 = arith.maximumf %202, %203 : vector<16x128xf32>
    %205 = arith.truncf %204 : vector<16x128xf32> to vector<16x128xbf16>
    %cst_127 = arith.constant dense<0.000000e+00> : vector<16x128xf32>
    %206 = tpu.matmul %205, %190, %cst_127 {dimension_numbers = #tpu.dot_dimension_numbers<[1], [0], [0], [1], [0, 0, 1, 1], [], []>} : vector<16x128xbf16>, vector<128x128xbf16>, vector<16x128xf32> -> vector<16x128xf32>
    %207 = vector.broadcast %192 : vector<1x128xf32> to vector<16x128xf32>
    %208 = arith.addf %206, %207 : vector<16x128xf32>
    %c0_128 = arith.constant 0 : index
    %c0_129 = arith.constant 0 : index
    %c0_130 = arith.constant 0 : index
    %209 = vector.load %arg48[%c0_128, %c0_129, %c0_130] : memref<6x1x128xf32, #tpu.memory_space<vmem>>, vector<1x1x128xf32>
    %210 = vector.shape_cast %209 : vector<1x1x128xf32> to vector<1x128xf32>
    %c0_131 = arith.constant 0 : index
    %c0_132 = arith.constant 0 : index
    %c0_133 = arith.constant 0 : index
    %211 = vector.load %arg49[%c0_131, %c0_132, %c0_133] : memref<6x1x128xf32, #tpu.memory_space<vmem>>, vector<1x1x128xf32>
    %212 = vector.shape_cast %211 : vector<1x1x128xf32> to vector<1x128xf32>
    %cst_134 = arith.constant dense<0.000000e+00> : vector<16xf32>
    %213 = vector.multi_reduction <add>, %208, %cst_134 [1] : vector<16x128xf32> to vector<16xf32>
    %214 = vector.shape_cast %213 : vector<16xf32> to vector<16x1xf32>
    %cst_135 = arith.constant 1.280000e+02 : f32
    %215 = vector.broadcast %cst_135 : f32 to vector<16x1xf32>
    %216 = arith.divf %214, %215 : vector<16x1xf32>
    %217 = vector.broadcast %216 : vector<16x1xf32> to vector<16x128xf32>
    %218 = arith.subf %208, %217 : vector<16x128xf32>
    %219 = arith.mulf %218, %218 : vector<16x128xf32>
    %cst_136 = arith.constant dense<0.000000e+00> : vector<16xf32>
    %220 = vector.multi_reduction <add>, %219, %cst_136 [1] : vector<16x128xf32> to vector<16xf32>
    %221 = vector.shape_cast %220 : vector<16xf32> to vector<16x1xf32>
    %cst_137 = arith.constant 1.280000e+02 : f32
    %222 = vector.broadcast %cst_137 : f32 to vector<16x1xf32>
    %223 = arith.divf %221, %222 : vector<16x1xf32>
    %224 = vector.broadcast %216 : vector<16x1xf32> to vector<16x128xf32>
    %225 = arith.subf %208, %224 : vector<16x128xf32>
    %cst_138 = arith.constant 9.99999974E-6 : f32
    %226 = vector.broadcast %cst_138 : f32 to vector<16x1xf32>
    %227 = arith.addf %223, %226 : vector<16x1xf32>
    %228 = math.rsqrt %227 : vector<16x1xf32>
    %229 = vector.broadcast %228 : vector<16x1xf32> to vector<16x128xf32>
    %230 = arith.mulf %225, %229 : vector<16x128xf32>
    %231 = vector.broadcast %210 : vector<1x128xf32> to vector<16x128xf32>
    %232 = arith.mulf %230, %231 : vector<16x128xf32>
    %233 = vector.broadcast %212 : vector<1x128xf32> to vector<16x128xf32>
    %234 = arith.addf %232, %233 : vector<16x128xf32>
    %235 = arith.addf %48, %234 : vector<16x128xf32>
    %236 = arith.addf %94, %175 : vector<32x128xf32>
    %237 = arith.truncf %235 : vector<16x128xf32> to vector<16x128xbf16>
    %cst_139 = arith.constant dense<0.000000e+00> : vector<32x128xf32>
    %238 = tpu.matmul %102, %237, %cst_139 {dimension_numbers = #tpu.dot_dimension_numbers<[1], [0], [0], [1], [0, 0, 1, 1], [], []>} : vector<32x16xbf16>, vector<16x128xbf16>, vector<32x128xf32> -> vector<32x128xf32>
    %cst_140 = arith.constant dense<0.000000e+00> : vector<32x128xf32>
    %239 = tpu.matmul %109, %237, %cst_140 {dimension_numbers = #tpu.dot_dimension_numbers<[1], [0], [0], [1], [0, 0, 1, 1], [], []>} : vector<32x16xbf16>, vector<16x128xbf16>, vector<32x128xf32> -> vector<32x128xf32>
    %240 = tpu.concatenate %239, %238, %236 in 1 : vector<32x128xf32>, vector<32x128xf32>, vector<32x128xf32> -> vector<32x384xf32>
    %c1 = arith.constant 1 : index
    %c0_141 = arith.constant 0 : index
    %c0_142 = arith.constant 0 : index
    %241 = vector.load %arg34[%c1, %c0_141, %c0_142] : memref<6x384x128xbf16, #tpu.memory_space<vmem>>, vector<1x384x128xbf16>
    %242 = vector.shape_cast %241 : vector<1x384x128xbf16> to vector<384x128xbf16>
    %c1_143 = arith.constant 1 : index
    %c0_144 = arith.constant 0 : index
    %c0_145 = arith.constant 0 : index
    %243 = vector.load %arg35[%c1_143, %c0_144, %c0_145] : memref<6x1x128xf32, #tpu.memory_space<vmem>>, vector<1x1x128xf32>
    %244 = vector.shape_cast %243 : vector<1x1x128xf32> to vector<1x128xf32>
    %c1_146 = arith.constant 1 : index
    %c0_147 = arith.constant 0 : index
    %c0_148 = arith.constant 0 : index
    %245 = vector.load %arg36[%c1_146, %c0_147, %c0_148] : memref<6x128x128xbf16, #tpu.memory_space<vmem>>, vector<1x128x128xbf16>
    %246 = vector.shape_cast %245 : vector<1x128x128xbf16> to vector<128x128xbf16>
    %c1_149 = arith.constant 1 : index
    %c0_150 = arith.constant 0 : index
    %c0_151 = arith.constant 0 : index
    %247 = vector.load %arg37[%c1_149, %c0_150, %c0_151] : memref<6x1x128xf32, #tpu.memory_space<vmem>>, vector<1x1x128xf32>
    %248 = vector.shape_cast %247 : vector<1x1x128xf32> to vector<1x128xf32>
    %c1_152 = arith.constant 1 : index
    %c0_153 = arith.constant 0 : index
    %c0_154 = arith.constant 0 : index
    %249 = vector.load %arg38[%c1_152, %c0_153, %c0_154] : memref<6x128x128xbf16, #tpu.memory_space<vmem>>, vector<1x128x128xbf16>
    %250 = vector.shape_cast %249 : vector<1x128x128xbf16> to vector<128x128xbf16>
    %c1_155 = arith.constant 1 : index
    %c0_156 = arith.constant 0 : index
    %c0_157 = arith.constant 0 : index
    %251 = vector.load %arg39[%c1_155, %c0_156, %c0_157] : memref<6x1x128xf32, #tpu.memory_space<vmem>>, vector<1x1x128xf32>
    %252 = vector.shape_cast %251 : vector<1x1x128xf32> to vector<1x128xf32>
    %253 = arith.truncf %240 : vector<32x384xf32> to vector<32x384xbf16>
    %cst_158 = arith.constant dense<0.000000e+00> : vector<32x128xf32>
    %254 = tpu.matmul %253, %242, %cst_158 {dimension_numbers = #tpu.dot_dimension_numbers<[1], [0], [0], [1], [0, 0, 1, 1], [], []>} : vector<32x384xbf16>, vector<384x128xbf16>, vector<32x128xf32> -> vector<32x128xf32>
    %255 = vector.broadcast %244 : vector<1x128xf32> to vector<32x128xf32>
    %256 = arith.addf %254, %255 : vector<32x128xf32>
    %cst_159 = arith.constant 0.000000e+00 : f32
    %257 = vector.broadcast %cst_159 : f32 to vector<32x128xf32>
    %258 = arith.maximumf %256, %257 : vector<32x128xf32>
    %259 = arith.truncf %258 : vector<32x128xf32> to vector<32x128xbf16>
    %cst_160 = arith.constant dense<0.000000e+00> : vector<32x128xf32>
    %260 = tpu.matmul %259, %246, %cst_160 {dimension_numbers = #tpu.dot_dimension_numbers<[1], [0], [0], [1], [0, 0, 1, 1], [], []>} : vector<32x128xbf16>, vector<128x128xbf16>, vector<32x128xf32> -> vector<32x128xf32>
    %261 = vector.broadcast %248 : vector<1x128xf32> to vector<32x128xf32>
    %262 = arith.addf %260, %261 : vector<32x128xf32>
    %cst_161 = arith.constant 0.000000e+00 : f32
    %263 = vector.broadcast %cst_161 : f32 to vector<32x128xf32>
    %264 = arith.maximumf %262, %263 : vector<32x128xf32>
    %265 = arith.truncf %264 : vector<32x128xf32> to vector<32x128xbf16>
    %cst_162 = arith.constant dense<0.000000e+00> : vector<32x128xf32>
    %266 = tpu.matmul %265, %250, %cst_162 {dimension_numbers = #tpu.dot_dimension_numbers<[1], [0], [0], [1], [0, 0, 1, 1], [], []>} : vector<32x128xbf16>, vector<128x128xbf16>, vector<32x128xf32> -> vector<32x128xf32>
    %267 = vector.broadcast %252 : vector<1x128xf32> to vector<32x128xf32>
    %268 = arith.addf %266, %267 : vector<32x128xf32>
    %c1_163 = arith.constant 1 : index
    %c0_164 = arith.constant 0 : index
    %c0_165 = arith.constant 0 : index
    %269 = vector.load %arg40[%c1_163, %c0_164, %c0_165] : memref<6x1x128xf32, #tpu.memory_space<vmem>>, vector<1x1x128xf32>
    %270 = vector.shape_cast %269 : vector<1x1x128xf32> to vector<1x128xf32>
    %c1_166 = arith.constant 1 : index
    %c0_167 = arith.constant 0 : index
    %c0_168 = arith.constant 0 : index
    %271 = vector.load %arg41[%c1_166, %c0_167, %c0_168] : memref<6x1x128xf32, #tpu.memory_space<vmem>>, vector<1x1x128xf32>
    %272 = vector.shape_cast %271 : vector<1x1x128xf32> to vector<1x128xf32>
    %cst_169 = arith.constant dense<0.000000e+00> : vector<32xf32>
    %273 = vector.multi_reduction <add>, %268, %cst_169 [1] : vector<32x128xf32> to vector<32xf32>
    %274 = vector.shape_cast %273 : vector<32xf32> to vector<32x1xf32>
    %cst_170 = arith.constant 1.280000e+02 : f32
    %275 = vector.broadcast %cst_170 : f32 to vector<32x1xf32>
    %276 = arith.divf %274, %275 : vector<32x1xf32>
    %277 = vector.broadcast %276 : vector<32x1xf32> to vector<32x128xf32>
    %278 = arith.subf %268, %277 : vector<32x128xf32>
    %279 = arith.mulf %278, %278 : vector<32x128xf32>
    %cst_171 = arith.constant dense<0.000000e+00> : vector<32xf32>
    %280 = vector.multi_reduction <add>, %279, %cst_171 [1] : vector<32x128xf32> to vector<32xf32>
    %281 = vector.shape_cast %280 : vector<32xf32> to vector<32x1xf32>
    %cst_172 = arith.constant 1.280000e+02 : f32
    %282 = vector.broadcast %cst_172 : f32 to vector<32x1xf32>
    %283 = arith.divf %281, %282 : vector<32x1xf32>
    %284 = vector.broadcast %276 : vector<32x1xf32> to vector<32x128xf32>
    %285 = arith.subf %268, %284 : vector<32x128xf32>
    %cst_173 = arith.constant 9.99999974E-6 : f32
    %286 = vector.broadcast %cst_173 : f32 to vector<32x1xf32>
    %287 = arith.addf %283, %286 : vector<32x1xf32>
    %288 = math.rsqrt %287 : vector<32x1xf32>
    %289 = vector.broadcast %288 : vector<32x1xf32> to vector<32x128xf32>
    %290 = arith.mulf %285, %289 : vector<32x128xf32>
    %291 = vector.broadcast %270 : vector<1x128xf32> to vector<32x128xf32>
    %292 = arith.mulf %290, %291 : vector<32x128xf32>
    %293 = vector.broadcast %272 : vector<1x128xf32> to vector<32x128xf32>
    %294 = arith.addf %292, %293 : vector<32x128xf32>
    %295 = vector.broadcast %2 : vector<32x1xf32> to vector<32x128xf32>
    %296 = arith.mulf %294, %295 : vector<32x128xf32>
    %297 = arith.truncf %296 : vector<32x128xf32> to vector<32x128xbf16>
    %cst_174 = arith.constant dense<0.000000e+00> : vector<16x128xf32>
    %298 = tpu.matmul %117, %297, %cst_174 {dimension_numbers = #tpu.dot_dimension_numbers<[1], [0], [0], [1], [0, 0, 1, 1], [], []>} : vector<16x32xbf16>, vector<32x128xbf16>, vector<16x128xf32> -> vector<16x128xf32>
    %299 = tpu.concatenate %235, %298 in 1 : vector<16x128xf32>, vector<16x128xf32> -> vector<16x256xf32>
    %c1_175 = arith.constant 1 : index
    %c0_176 = arith.constant 0 : index
    %c0_177 = arith.constant 0 : index
    %300 = vector.load %arg42[%c1_175, %c0_176, %c0_177] : memref<6x256x128xbf16, #tpu.memory_space<vmem>>, vector<1x256x128xbf16>
    %301 = vector.shape_cast %300 : vector<1x256x128xbf16> to vector<256x128xbf16>
    %c1_178 = arith.constant 1 : index
    %c0_179 = arith.constant 0 : index
    %c0_180 = arith.constant 0 : index
    %302 = vector.load %arg43[%c1_178, %c0_179, %c0_180] : memref<6x1x128xf32, #tpu.memory_space<vmem>>, vector<1x1x128xf32>
    %303 = vector.shape_cast %302 : vector<1x1x128xf32> to vector<1x128xf32>
    %c1_181 = arith.constant 1 : index
    %c0_182 = arith.constant 0 : index
    %c0_183 = arith.constant 0 : index
    %304 = vector.load %arg44[%c1_181, %c0_182, %c0_183] : memref<6x128x128xbf16, #tpu.memory_space<vmem>>, vector<1x128x128xbf16>
    %305 = vector.shape_cast %304 : vector<1x128x128xbf16> to vector<128x128xbf16>
    %c1_184 = arith.constant 1 : index
    %c0_185 = arith.constant 0 : index
    %c0_186 = arith.constant 0 : index
    %306 = vector.load %arg45[%c1_184, %c0_185, %c0_186] : memref<6x1x128xf32, #tpu.memory_space<vmem>>, vector<1x1x128xf32>
    %307 = vector.shape_cast %306 : vector<1x1x128xf32> to vector<1x128xf32>
    %c1_187 = arith.constant 1 : index
    %c0_188 = arith.constant 0 : index
    %c0_189 = arith.constant 0 : index
    %308 = vector.load %arg46[%c1_187, %c0_188, %c0_189] : memref<6x128x128xbf16, #tpu.memory_space<vmem>>, vector<1x128x128xbf16>
    %309 = vector.shape_cast %308 : vector<1x128x128xbf16> to vector<128x128xbf16>
    %c1_190 = arith.constant 1 : index
    %c0_191 = arith.constant 0 : index
    %c0_192 = arith.constant 0 : index
    %310 = vector.load %arg47[%c1_190, %c0_191, %c0_192] : memref<6x1x128xf32, #tpu.memory_space<vmem>>, vector<1x1x128xf32>
    %311 = vector.shape_cast %310 : vector<1x1x128xf32> to vector<1x128xf32>
    %312 = arith.truncf %299 : vector<16x256xf32> to vector<16x256xbf16>
    %cst_193 = arith.constant dense<0.000000e+00> : vector<16x128xf32>
    %313 = tpu.matmul %312, %301, %cst_193 {dimension_numbers = #tpu.dot_dimension_numbers<[1], [0], [0], [1], [0, 0, 1, 1], [], []>} : vector<16x256xbf16>, vector<256x128xbf16>, vector<16x128xf32> -> vector<16x128xf32>
    %314 = vector.broadcast %303 : vector<1x128xf32> to vector<16x128xf32>
    %315 = arith.addf %313, %314 : vector<16x128xf32>
    %cst_194 = arith.constant 0.000000e+00 : f32
    %316 = vector.broadcast %cst_194 : f32 to vector<16x128xf32>
    %317 = arith.maximumf %315, %316 : vector<16x128xf32>
    %318 = arith.truncf %317 : vector<16x128xf32> to vector<16x128xbf16>
    %cst_195 = arith.constant dense<0.000000e+00> : vector<16x128xf32>
    %319 = tpu.matmul %318, %305, %cst_195 {dimension_numbers = #tpu.dot_dimension_numbers<[1], [0], [0], [1], [0, 0, 1, 1], [], []>} : vector<16x128xbf16>, vector<128x128xbf16>, vector<16x128xf32> -> vector<16x128xf32>
    %320 = vector.broadcast %307 : vector<1x128xf32> to vector<16x128xf32>
    %321 = arith.addf %319, %320 : vector<16x128xf32>
    %cst_196 = arith.constant 0.000000e+00 : f32
    %322 = vector.broadcast %cst_196 : f32 to vector<16x128xf32>
    %323 = arith.maximumf %321, %322 : vector<16x128xf32>
    %324 = arith.truncf %323 : vector<16x128xf32> to vector<16x128xbf16>
    %cst_197 = arith.constant dense<0.000000e+00> : vector<16x128xf32>
    %325 = tpu.matmul %324, %309, %cst_197 {dimension_numbers = #tpu.dot_dimension_numbers<[1], [0], [0], [1], [0, 0, 1, 1], [], []>} : vector<16x128xbf16>, vector<128x128xbf16>, vector<16x128xf32> -> vector<16x128xf32>
    %326 = vector.broadcast %311 : vector<1x128xf32> to vector<16x128xf32>
    %327 = arith.addf %325, %326 : vector<16x128xf32>
    %c1_198 = arith.constant 1 : index
    %c0_199 = arith.constant 0 : index
    %c0_200 = arith.constant 0 : index
    %328 = vector.load %arg48[%c1_198, %c0_199, %c0_200] : memref<6x1x128xf32, #tpu.memory_space<vmem>>, vector<1x1x128xf32>
    %329 = vector.shape_cast %328 : vector<1x1x128xf32> to vector<1x128xf32>
    %c1_201 = arith.constant 1 : index
    %c0_202 = arith.constant 0 : index
    %c0_203 = arith.constant 0 : index
    %330 = vector.load %arg49[%c1_201, %c0_202, %c0_203] : memref<6x1x128xf32, #tpu.memory_space<vmem>>, vector<1x1x128xf32>
    %331 = vector.shape_cast %330 : vector<1x1x128xf32> to vector<1x128xf32>
    %cst_204 = arith.constant dense<0.000000e+00> : vector<16xf32>
    %332 = vector.multi_reduction <add>, %327, %cst_204 [1] : vector<16x128xf32> to vector<16xf32>
    %333 = vector.shape_cast %332 : vector<16xf32> to vector<16x1xf32>
    %cst_205 = arith.constant 1.280000e+02 : f32
    %334 = vector.broadcast %cst_205 : f32 to vector<16x1xf32>
    %335 = arith.divf %333, %334 : vector<16x1xf32>
    %336 = vector.broadcast %335 : vector<16x1xf32> to vector<16x128xf32>
    %337 = arith.subf %327, %336 : vector<16x128xf32>
    %338 = arith.mulf %337, %337 : vector<16x128xf32>
    %cst_206 = arith.constant dense<0.000000e+00> : vector<16xf32>
    %339 = vector.multi_reduction <add>, %338, %cst_206 [1] : vector<16x128xf32> to vector<16xf32>
    %340 = vector.shape_cast %339 : vector<16xf32> to vector<16x1xf32>
    %cst_207 = arith.constant 1.280000e+02 : f32
    %341 = vector.broadcast %cst_207 : f32 to vector<16x1xf32>
    %342 = arith.divf %340, %341 : vector<16x1xf32>
    %343 = vector.broadcast %335 : vector<16x1xf32> to vector<16x128xf32>
    %344 = arith.subf %327, %343 : vector<16x128xf32>
    %cst_208 = arith.constant 9.99999974E-6 : f32
    %345 = vector.broadcast %cst_208 : f32 to vector<16x1xf32>
    %346 = arith.addf %342, %345 : vector<16x1xf32>
    %347 = math.rsqrt %346 : vector<16x1xf32>
    %348 = vector.broadcast %347 : vector<16x1xf32> to vector<16x128xf32>
    %349 = arith.mulf %344, %348 : vector<16x128xf32>
    %350 = vector.broadcast %329 : vector<1x128xf32> to vector<16x128xf32>
    %351 = arith.mulf %349, %350 : vector<16x128xf32>
    %352 = vector.broadcast %331 : vector<1x128xf32> to vector<16x128xf32>
    %353 = arith.addf %351, %352 : vector<16x128xf32>
    %354 = arith.addf %235, %353 : vector<16x128xf32>
    %355 = arith.addf %236, %294 : vector<32x128xf32>
    %c0_209 = arith.constant 0 : index
    %c0_210 = arith.constant 0 : index
    %356 = vector.load %arg22[%c0_209, %c0_210] : memref<128x128xbf16, #tpu.memory_space<vmem>>, vector<128x128xbf16>
    %c0_211 = arith.constant 0 : index
    %c0_212 = arith.constant 0 : index
    %357 = vector.load %arg23[%c0_211, %c0_212] : memref<1x128xf32, #tpu.memory_space<vmem>>, vector<1x128xf32>
    %c0_213 = arith.constant 0 : index
    %c0_214 = arith.constant 0 : index
    %358 = vector.load %arg24[%c0_213, %c0_214] : memref<128x128xbf16, #tpu.memory_space<vmem>>, vector<128x128xbf16>
    %c0_215 = arith.constant 0 : index
    %c0_216 = arith.constant 0 : index
    %359 = vector.load %arg25[%c0_215, %c0_216] : memref<1x128xf32, #tpu.memory_space<vmem>>, vector<1x128xf32>
    %c0_217 = arith.constant 0 : index
    %c0_218 = arith.constant 0 : index
    %360 = vector.load %arg26[%c0_217, %c0_218] : memref<128x2xbf16, #tpu.memory_space<vmem>>, vector<128x2xbf16>
    %c0_219 = arith.constant 0 : index
    %c0_220 = arith.constant 0 : index
    %361 = vector.load %arg27[%c0_219, %c0_220] : memref<1x2xf32, #tpu.memory_space<vmem>>, vector<1x2xf32>
    %362 = arith.truncf %354 : vector<16x128xf32> to vector<16x128xbf16>
    %cst_221 = arith.constant dense<0.000000e+00> : vector<16x128xf32>
    %363 = tpu.matmul %362, %356, %cst_221 {dimension_numbers = #tpu.dot_dimension_numbers<[1], [0], [0], [1], [0, 0, 1, 1], [], []>} : vector<16x128xbf16>, vector<128x128xbf16>, vector<16x128xf32> -> vector<16x128xf32>
    %364 = vector.broadcast %357 : vector<1x128xf32> to vector<16x128xf32>
    %365 = arith.addf %363, %364 : vector<16x128xf32>
    %cst_222 = arith.constant 0.000000e+00 : f32
    %366 = vector.broadcast %cst_222 : f32 to vector<16x128xf32>
    %367 = arith.maximumf %365, %366 : vector<16x128xf32>
    %368 = arith.truncf %367 : vector<16x128xf32> to vector<16x128xbf16>
    %cst_223 = arith.constant dense<0.000000e+00> : vector<16x128xf32>
    %369 = tpu.matmul %368, %358, %cst_223 {dimension_numbers = #tpu.dot_dimension_numbers<[1], [0], [0], [1], [0, 0, 1, 1], [], []>} : vector<16x128xbf16>, vector<128x128xbf16>, vector<16x128xf32> -> vector<16x128xf32>
    %370 = vector.broadcast %359 : vector<1x128xf32> to vector<16x128xf32>
    %371 = arith.addf %369, %370 : vector<16x128xf32>
    %cst_224 = arith.constant 0.000000e+00 : f32
    %372 = vector.broadcast %cst_224 : f32 to vector<16x128xf32>
    %373 = arith.maximumf %371, %372 : vector<16x128xf32>
    %374 = arith.truncf %373 : vector<16x128xf32> to vector<16x128xbf16>
    %cst_225 = arith.constant dense<0.000000e+00> : vector<16x2xf32>
    %375 = tpu.matmul %374, %360, %cst_225 {dimension_numbers = #tpu.dot_dimension_numbers<[1], [0], [0], [1], [0, 0, 1, 1], [], []>} : vector<16x128xbf16>, vector<128x2xbf16>, vector<16x2xf32> -> vector<16x2xf32>
    %376 = vector.broadcast %361 : vector<1x2xf32> to vector<16x2xf32>
    %377 = arith.addf %375, %376 : vector<16x2xf32>
    %c0_226 = arith.constant 0 : index
    %c0_227 = arith.constant 0 : index
    %378 = vector.load %arg28[%c0_226, %c0_227] : memref<2x64xbf16, #tpu.memory_space<vmem>>, vector<2x64xbf16>
    %c0_228 = arith.constant 0 : index
    %c0_229 = arith.constant 0 : index
    %379 = vector.load %arg29[%c0_228, %c0_229] : memref<1x64xf32, #tpu.memory_space<vmem>>, vector<1x64xf32>
    %c0_230 = arith.constant 0 : index
    %c0_231 = arith.constant 0 : index
    %380 = vector.load %arg30[%c0_230, %c0_231] : memref<64x64xbf16, #tpu.memory_space<vmem>>, vector<64x64xbf16>
    %c0_232 = arith.constant 0 : index
    %c0_233 = arith.constant 0 : index
    %381 = vector.load %arg31[%c0_232, %c0_233] : memref<1x64xf32, #tpu.memory_space<vmem>>, vector<1x64xf32>
    %c0_234 = arith.constant 0 : index
    %c0_235 = arith.constant 0 : index
    %382 = vector.load %arg32[%c0_234, %c0_235] : memref<64x128xbf16, #tpu.memory_space<vmem>>, vector<64x128xbf16>
    %c0_236 = arith.constant 0 : index
    %c0_237 = arith.constant 0 : index
    %383 = vector.load %arg33[%c0_236, %c0_237] : memref<1x128xf32, #tpu.memory_space<vmem>>, vector<1x128xf32>
    %384 = arith.truncf %377 : vector<16x2xf32> to vector<16x2xbf16>
    %cst_238 = arith.constant dense<0.000000e+00> : vector<16x64xf32>
    %385 = tpu.matmul %384, %378, %cst_238 {dimension_numbers = #tpu.dot_dimension_numbers<[1], [0], [0], [1], [0, 0, 1, 1], [], []>} : vector<16x2xbf16>, vector<2x64xbf16>, vector<16x64xf32> -> vector<16x64xf32>
    %386 = vector.broadcast %379 : vector<1x64xf32> to vector<16x64xf32>
    %387 = arith.addf %385, %386 : vector<16x64xf32>
    %388 = arith.mulf %387, %387 : vector<16x64xf32>
    %389 = arith.mulf %387, %388 : vector<16x64xf32>
    %cst_239 = arith.constant 4.471500e-02 : f32
    %390 = vector.broadcast %cst_239 : f32 to vector<16x64xf32>
    %391 = arith.mulf %390, %389 : vector<16x64xf32>
    %392 = arith.addf %387, %391 : vector<16x64xf32>
    %cst_240 = arith.constant 0.797884583 : f32
    %393 = vector.broadcast %cst_240 : f32 to vector<16x64xf32>
    %394 = arith.mulf %393, %392 : vector<16x64xf32>
    %395 = math.tanh %394 : vector<16x64xf32>
    %cst_241 = arith.constant 1.000000e+00 : f32
    %396 = vector.broadcast %cst_241 : f32 to vector<16x64xf32>
    %397 = arith.addf %396, %395 : vector<16x64xf32>
    %cst_242 = arith.constant 5.000000e-01 : f32
    %398 = vector.broadcast %cst_242 : f32 to vector<16x64xf32>
    %399 = arith.mulf %398, %397 : vector<16x64xf32>
    %400 = arith.mulf %387, %399 : vector<16x64xf32>
    %401 = arith.truncf %400 : vector<16x64xf32> to vector<16x64xbf16>
    %cst_243 = arith.constant dense<0.000000e+00> : vector<16x64xf32>
    %402 = tpu.matmul %401, %380, %cst_243 {dimension_numbers = #tpu.dot_dimension_numbers<[1], [0], [0], [1], [0, 0, 1, 1], [], []>} : vector<16x64xbf16>, vector<64x64xbf16>, vector<16x64xf32> -> vector<16x64xf32>
    %403 = vector.broadcast %381 : vector<1x64xf32> to vector<16x64xf32>
    %404 = arith.addf %402, %403 : vector<16x64xf32>
    %405 = arith.mulf %404, %404 : vector<16x64xf32>
    %406 = arith.mulf %404, %405 : vector<16x64xf32>
    %cst_244 = arith.constant 4.471500e-02 : f32
    %407 = vector.broadcast %cst_244 : f32 to vector<16x64xf32>
    %408 = arith.mulf %407, %406 : vector<16x64xf32>
    %409 = arith.addf %404, %408 : vector<16x64xf32>
    %cst_245 = arith.constant 0.797884583 : f32
    %410 = vector.broadcast %cst_245 : f32 to vector<16x64xf32>
    %411 = arith.mulf %410, %409 : vector<16x64xf32>
    %412 = math.tanh %411 : vector<16x64xf32>
    %cst_246 = arith.constant 1.000000e+00 : f32
    %413 = vector.broadcast %cst_246 : f32 to vector<16x64xf32>
    %414 = arith.addf %413, %412 : vector<16x64xf32>
    %cst_247 = arith.constant 5.000000e-01 : f32
    %415 = vector.broadcast %cst_247 : f32 to vector<16x64xf32>
    %416 = arith.mulf %415, %414 : vector<16x64xf32>
    %417 = arith.mulf %404, %416 : vector<16x64xf32>
    %418 = arith.truncf %417 : vector<16x64xf32> to vector<16x64xbf16>
    %cst_248 = arith.constant dense<0.000000e+00> : vector<16x128xf32>
    %419 = tpu.matmul %418, %382, %cst_248 {dimension_numbers = #tpu.dot_dimension_numbers<[1], [0], [0], [1], [0, 0, 1, 1], [], []>} : vector<16x64xbf16>, vector<64x128xbf16>, vector<16x128xf32> -> vector<16x128xf32>
    %420 = vector.broadcast %383 : vector<1x128xf32> to vector<16x128xf32>
    %421 = arith.addf %419, %420 : vector<16x128xf32>
    %422 = arith.truncf %421 : vector<16x128xf32> to vector<16x128xbf16>
    %cst_249 = arith.constant dense<0.000000e+00> : vector<32x128xf32>
    %423 = tpu.matmul %102, %422, %cst_249 {dimension_numbers = #tpu.dot_dimension_numbers<[1], [0], [0], [1], [0, 0, 1, 1], [], []>} : vector<32x16xbf16>, vector<16x128xbf16>, vector<32x128xf32> -> vector<32x128xf32>
    %cst_250 = arith.constant dense<0.000000e+00> : vector<32x128xf32>
    %424 = tpu.matmul %109, %422, %cst_250 {dimension_numbers = #tpu.dot_dimension_numbers<[1], [0], [0], [1], [0, 0, 1, 1], [], []>} : vector<32x16xbf16>, vector<16x128xbf16>, vector<32x128xf32> -> vector<32x128xf32>
    %425 = tpu.concatenate %424, %423, %355 in 1 : vector<32x128xf32>, vector<32x128xf32>, vector<32x128xf32> -> vector<32x384xf32>
    %c2 = arith.constant 2 : index
    %c0_251 = arith.constant 0 : index
    %c0_252 = arith.constant 0 : index
    %426 = vector.load %arg34[%c2, %c0_251, %c0_252] : memref<6x384x128xbf16, #tpu.memory_space<vmem>>, vector<1x384x128xbf16>
    %427 = vector.shape_cast %426 : vector<1x384x128xbf16> to vector<384x128xbf16>
    %c2_253 = arith.constant 2 : index
    %c0_254 = arith.constant 0 : index
    %c0_255 = arith.constant 0 : index
    %428 = vector.load %arg35[%c2_253, %c0_254, %c0_255] : memref<6x1x128xf32, #tpu.memory_space<vmem>>, vector<1x1x128xf32>
    %429 = vector.shape_cast %428 : vector<1x1x128xf32> to vector<1x128xf32>
    %c2_256 = arith.constant 2 : index
    %c0_257 = arith.constant 0 : index
    %c0_258 = arith.constant 0 : index
    %430 = vector.load %arg36[%c2_256, %c0_257, %c0_258] : memref<6x128x128xbf16, #tpu.memory_space<vmem>>, vector<1x128x128xbf16>
    %431 = vector.shape_cast %430 : vector<1x128x128xbf16> to vector<128x128xbf16>
    %c2_259 = arith.constant 2 : index
    %c0_260 = arith.constant 0 : index
    %c0_261 = arith.constant 0 : index
    %432 = vector.load %arg37[%c2_259, %c0_260, %c0_261] : memref<6x1x128xf32, #tpu.memory_space<vmem>>, vector<1x1x128xf32>
    %433 = vector.shape_cast %432 : vector<1x1x128xf32> to vector<1x128xf32>
    %c2_262 = arith.constant 2 : index
    %c0_263 = arith.constant 0 : index
    %c0_264 = arith.constant 0 : index
    %434 = vector.load %arg38[%c2_262, %c0_263, %c0_264] : memref<6x128x128xbf16, #tpu.memory_space<vmem>>, vector<1x128x128xbf16>
    %435 = vector.shape_cast %434 : vector<1x128x128xbf16> to vector<128x128xbf16>
    %c2_265 = arith.constant 2 : index
    %c0_266 = arith.constant 0 : index
    %c0_267 = arith.constant 0 : index
    %436 = vector.load %arg39[%c2_265, %c0_266, %c0_267] : memref<6x1x128xf32, #tpu.memory_space<vmem>>, vector<1x1x128xf32>
    %437 = vector.shape_cast %436 : vector<1x1x128xf32> to vector<1x128xf32>
    %438 = arith.truncf %425 : vector<32x384xf32> to vector<32x384xbf16>
    %cst_268 = arith.constant dense<0.000000e+00> : vector<32x128xf32>
    %439 = tpu.matmul %438, %427, %cst_268 {dimension_numbers = #tpu.dot_dimension_numbers<[1], [0], [0], [1], [0, 0, 1, 1], [], []>} : vector<32x384xbf16>, vector<384x128xbf16>, vector<32x128xf32> -> vector<32x128xf32>
    %440 = vector.broadcast %429 : vector<1x128xf32> to vector<32x128xf32>
    %441 = arith.addf %439, %440 : vector<32x128xf32>
    %cst_269 = arith.constant 0.000000e+00 : f32
    %442 = vector.broadcast %cst_269 : f32 to vector<32x128xf32>
    %443 = arith.maximumf %441, %442 : vector<32x128xf32>
    %444 = arith.truncf %443 : vector<32x128xf32> to vector<32x128xbf16>
    %cst_270 = arith.constant dense<0.000000e+00> : vector<32x128xf32>
    %445 = tpu.matmul %444, %431, %cst_270 {dimension_numbers = #tpu.dot_dimension_numbers<[1], [0], [0], [1], [0, 0, 1, 1], [], []>} : vector<32x128xbf16>, vector<128x128xbf16>, vector<32x128xf32> -> vector<32x128xf32>
    %446 = vector.broadcast %433 : vector<1x128xf32> to vector<32x128xf32>
    %447 = arith.addf %445, %446 : vector<32x128xf32>
    %cst_271 = arith.constant 0.000000e+00 : f32
    %448 = vector.broadcast %cst_271 : f32 to vector<32x128xf32>
    %449 = arith.maximumf %447, %448 : vector<32x128xf32>
    %450 = arith.truncf %449 : vector<32x128xf32> to vector<32x128xbf16>
    %cst_272 = arith.constant dense<0.000000e+00> : vector<32x128xf32>
    %451 = tpu.matmul %450, %435, %cst_272 {dimension_numbers = #tpu.dot_dimension_numbers<[1], [0], [0], [1], [0, 0, 1, 1], [], []>} : vector<32x128xbf16>, vector<128x128xbf16>, vector<32x128xf32> -> vector<32x128xf32>
    %452 = vector.broadcast %437 : vector<1x128xf32> to vector<32x128xf32>
    %453 = arith.addf %451, %452 : vector<32x128xf32>
    %c2_273 = arith.constant 2 : index
    %c0_274 = arith.constant 0 : index
    %c0_275 = arith.constant 0 : index
    %454 = vector.load %arg40[%c2_273, %c0_274, %c0_275] : memref<6x1x128xf32, #tpu.memory_space<vmem>>, vector<1x1x128xf32>
    %455 = vector.shape_cast %454 : vector<1x1x128xf32> to vector<1x128xf32>
    %c2_276 = arith.constant 2 : index
    %c0_277 = arith.constant 0 : index
    %c0_278 = arith.constant 0 : index
    %456 = vector.load %arg41[%c2_276, %c0_277, %c0_278] : memref<6x1x128xf32, #tpu.memory_space<vmem>>, vector<1x1x128xf32>
    %457 = vector.shape_cast %456 : vector<1x1x128xf32> to vector<1x128xf32>
    %cst_279 = arith.constant dense<0.000000e+00> : vector<32xf32>
    %458 = vector.multi_reduction <add>, %453, %cst_279 [1] : vector<32x128xf32> to vector<32xf32>
    %459 = vector.shape_cast %458 : vector<32xf32> to vector<32x1xf32>
    %cst_280 = arith.constant 1.280000e+02 : f32
    %460 = vector.broadcast %cst_280 : f32 to vector<32x1xf32>
    %461 = arith.divf %459, %460 : vector<32x1xf32>
    %462 = vector.broadcast %461 : vector<32x1xf32> to vector<32x128xf32>
    %463 = arith.subf %453, %462 : vector<32x128xf32>
    %464 = arith.mulf %463, %463 : vector<32x128xf32>
    %cst_281 = arith.constant dense<0.000000e+00> : vector<32xf32>
    %465 = vector.multi_reduction <add>, %464, %cst_281 [1] : vector<32x128xf32> to vector<32xf32>
    %466 = vector.shape_cast %465 : vector<32xf32> to vector<32x1xf32>
    %cst_282 = arith.constant 1.280000e+02 : f32
    %467 = vector.broadcast %cst_282 : f32 to vector<32x1xf32>
    %468 = arith.divf %466, %467 : vector<32x1xf32>
    %469 = vector.broadcast %461 : vector<32x1xf32> to vector<32x128xf32>
    %470 = arith.subf %453, %469 : vector<32x128xf32>
    %cst_283 = arith.constant 9.99999974E-6 : f32
    %471 = vector.broadcast %cst_283 : f32 to vector<32x1xf32>
    %472 = arith.addf %468, %471 : vector<32x1xf32>
    %473 = math.rsqrt %472 : vector<32x1xf32>
    %474 = vector.broadcast %473 : vector<32x1xf32> to vector<32x128xf32>
    %475 = arith.mulf %470, %474 : vector<32x128xf32>
    %476 = vector.broadcast %455 : vector<1x128xf32> to vector<32x128xf32>
    %477 = arith.mulf %475, %476 : vector<32x128xf32>
    %478 = vector.broadcast %457 : vector<1x128xf32> to vector<32x128xf32>
    %479 = arith.addf %477, %478 : vector<32x128xf32>
    %480 = vector.broadcast %2 : vector<32x1xf32> to vector<32x128xf32>
    %481 = arith.mulf %479, %480 : vector<32x128xf32>
    %482 = arith.truncf %481 : vector<32x128xf32> to vector<32x128xbf16>
    %cst_284 = arith.constant dense<0.000000e+00> : vector<16x128xf32>
    %483 = tpu.matmul %117, %482, %cst_284 {dimension_numbers = #tpu.dot_dimension_numbers<[1], [0], [0], [1], [0, 0, 1, 1], [], []>} : vector<16x32xbf16>, vector<32x128xbf16>, vector<16x128xf32> -> vector<16x128xf32>
    %484 = tpu.concatenate %421, %483 in 1 : vector<16x128xf32>, vector<16x128xf32> -> vector<16x256xf32>
    %c2_285 = arith.constant 2 : index
    %c0_286 = arith.constant 0 : index
    %c0_287 = arith.constant 0 : index
    %485 = vector.load %arg42[%c2_285, %c0_286, %c0_287] : memref<6x256x128xbf16, #tpu.memory_space<vmem>>, vector<1x256x128xbf16>
    %486 = vector.shape_cast %485 : vector<1x256x128xbf16> to vector<256x128xbf16>
    %c2_288 = arith.constant 2 : index
    %c0_289 = arith.constant 0 : index
    %c0_290 = arith.constant 0 : index
    %487 = vector.load %arg43[%c2_288, %c0_289, %c0_290] : memref<6x1x128xf32, #tpu.memory_space<vmem>>, vector<1x1x128xf32>
    %488 = vector.shape_cast %487 : vector<1x1x128xf32> to vector<1x128xf32>
    %c2_291 = arith.constant 2 : index
    %c0_292 = arith.constant 0 : index
    %c0_293 = arith.constant 0 : index
    %489 = vector.load %arg44[%c2_291, %c0_292, %c0_293] : memref<6x128x128xbf16, #tpu.memory_space<vmem>>, vector<1x128x128xbf16>
    %490 = vector.shape_cast %489 : vector<1x128x128xbf16> to vector<128x128xbf16>
    %c2_294 = arith.constant 2 : index
    %c0_295 = arith.constant 0 : index
    %c0_296 = arith.constant 0 : index
    %491 = vector.load %arg45[%c2_294, %c0_295, %c0_296] : memref<6x1x128xf32, #tpu.memory_space<vmem>>, vector<1x1x128xf32>
    %492 = vector.shape_cast %491 : vector<1x1x128xf32> to vector<1x128xf32>
    %c2_297 = arith.constant 2 : index
    %c0_298 = arith.constant 0 : index
    %c0_299 = arith.constant 0 : index
    %493 = vector.load %arg46[%c2_297, %c0_298, %c0_299] : memref<6x128x128xbf16, #tpu.memory_space<vmem>>, vector<1x128x128xbf16>
    %494 = vector.shape_cast %493 : vector<1x128x128xbf16> to vector<128x128xbf16>
    %c2_300 = arith.constant 2 : index
    %c0_301 = arith.constant 0 : index
    %c0_302 = arith.constant 0 : index
    %495 = vector.load %arg47[%c2_300, %c0_301, %c0_302] : memref<6x1x128xf32, #tpu.memory_space<vmem>>, vector<1x1x128xf32>
    %496 = vector.shape_cast %495 : vector<1x1x128xf32> to vector<1x128xf32>
    %497 = arith.truncf %484 : vector<16x256xf32> to vector<16x256xbf16>
    %cst_303 = arith.constant dense<0.000000e+00> : vector<16x128xf32>
    %498 = tpu.matmul %497, %486, %cst_303 {dimension_numbers = #tpu.dot_dimension_numbers<[1], [0], [0], [1], [0, 0, 1, 1], [], []>} : vector<16x256xbf16>, vector<256x128xbf16>, vector<16x128xf32> -> vector<16x128xf32>
    %499 = vector.broadcast %488 : vector<1x128xf32> to vector<16x128xf32>
    %500 = arith.addf %498, %499 : vector<16x128xf32>
    %cst_304 = arith.constant 0.000000e+00 : f32
    %501 = vector.broadcast %cst_304 : f32 to vector<16x128xf32>
    %502 = arith.maximumf %500, %501 : vector<16x128xf32>
    %503 = arith.truncf %502 : vector<16x128xf32> to vector<16x128xbf16>
    %cst_305 = arith.constant dense<0.000000e+00> : vector<16x128xf32>
    %504 = tpu.matmul %503, %490, %cst_305 {dimension_numbers = #tpu.dot_dimension_numbers<[1], [0], [0], [1], [0, 0, 1, 1], [], []>} : vector<16x128xbf16>, vector<128x128xbf16>, vector<16x128xf32> -> vector<16x128xf32>
    %505 = vector.broadcast %492 : vector<1x128xf32> to vector<16x128xf32>
    %506 = arith.addf %504, %505 : vector<16x128xf32>
    %cst_306 = arith.constant 0.000000e+00 : f32
    %507 = vector.broadcast %cst_306 : f32 to vector<16x128xf32>
    %508 = arith.maximumf %506, %507 : vector<16x128xf32>
    %509 = arith.truncf %508 : vector<16x128xf32> to vector<16x128xbf16>
    %cst_307 = arith.constant dense<0.000000e+00> : vector<16x128xf32>
    %510 = tpu.matmul %509, %494, %cst_307 {dimension_numbers = #tpu.dot_dimension_numbers<[1], [0], [0], [1], [0, 0, 1, 1], [], []>} : vector<16x128xbf16>, vector<128x128xbf16>, vector<16x128xf32> -> vector<16x128xf32>
    %511 = vector.broadcast %496 : vector<1x128xf32> to vector<16x128xf32>
    %512 = arith.addf %510, %511 : vector<16x128xf32>
    %c2_308 = arith.constant 2 : index
    %c0_309 = arith.constant 0 : index
    %c0_310 = arith.constant 0 : index
    %513 = vector.load %arg48[%c2_308, %c0_309, %c0_310] : memref<6x1x128xf32, #tpu.memory_space<vmem>>, vector<1x1x128xf32>
    %514 = vector.shape_cast %513 : vector<1x1x128xf32> to vector<1x128xf32>
    %c2_311 = arith.constant 2 : index
    %c0_312 = arith.constant 0 : index
    %c0_313 = arith.constant 0 : index
    %515 = vector.load %arg49[%c2_311, %c0_312, %c0_313] : memref<6x1x128xf32, #tpu.memory_space<vmem>>, vector<1x1x128xf32>
    %516 = vector.shape_cast %515 : vector<1x1x128xf32> to vector<1x128xf32>
    %cst_314 = arith.constant dense<0.000000e+00> : vector<16xf32>
    %517 = vector.multi_reduction <add>, %512, %cst_314 [1] : vector<16x128xf32> to vector<16xf32>
    %518 = vector.shape_cast %517 : vector<16xf32> to vector<16x1xf32>
    %cst_315 = arith.constant 1.280000e+02 : f32
    %519 = vector.broadcast %cst_315 : f32 to vector<16x1xf32>
    %520 = arith.divf %518, %519 : vector<16x1xf32>
    %521 = vector.broadcast %520 : vector<16x1xf32> to vector<16x128xf32>
    %522 = arith.subf %512, %521 : vector<16x128xf32>
    %523 = arith.mulf %522, %522 : vector<16x128xf32>
    %cst_316 = arith.constant dense<0.000000e+00> : vector<16xf32>
    %524 = vector.multi_reduction <add>, %523, %cst_316 [1] : vector<16x128xf32> to vector<16xf32>
    %525 = vector.shape_cast %524 : vector<16xf32> to vector<16x1xf32>
    %cst_317 = arith.constant 1.280000e+02 : f32
    %526 = vector.broadcast %cst_317 : f32 to vector<16x1xf32>
    %527 = arith.divf %525, %526 : vector<16x1xf32>
    %528 = vector.broadcast %520 : vector<16x1xf32> to vector<16x128xf32>
    %529 = arith.subf %512, %528 : vector<16x128xf32>
    %cst_318 = arith.constant 9.99999974E-6 : f32
    %530 = vector.broadcast %cst_318 : f32 to vector<16x1xf32>
    %531 = arith.addf %527, %530 : vector<16x1xf32>
    %532 = math.rsqrt %531 : vector<16x1xf32>
    %533 = vector.broadcast %532 : vector<16x1xf32> to vector<16x128xf32>
    %534 = arith.mulf %529, %533 : vector<16x128xf32>
    %535 = vector.broadcast %514 : vector<1x128xf32> to vector<16x128xf32>
    %536 = arith.mulf %534, %535 : vector<16x128xf32>
    %537 = vector.broadcast %516 : vector<1x128xf32> to vector<16x128xf32>
    %538 = arith.addf %536, %537 : vector<16x128xf32>
    %539 = arith.addf %421, %538 : vector<16x128xf32>
    %540 = arith.addf %355, %479 : vector<32x128xf32>
    %541 = arith.truncf %539 : vector<16x128xf32> to vector<16x128xbf16>
    %cst_319 = arith.constant dense<0.000000e+00> : vector<32x128xf32>
    %542 = tpu.matmul %102, %541, %cst_319 {dimension_numbers = #tpu.dot_dimension_numbers<[1], [0], [0], [1], [0, 0, 1, 1], [], []>} : vector<32x16xbf16>, vector<16x128xbf16>, vector<32x128xf32> -> vector<32x128xf32>
    %cst_320 = arith.constant dense<0.000000e+00> : vector<32x128xf32>
    %543 = tpu.matmul %109, %541, %cst_320 {dimension_numbers = #tpu.dot_dimension_numbers<[1], [0], [0], [1], [0, 0, 1, 1], [], []>} : vector<32x16xbf16>, vector<16x128xbf16>, vector<32x128xf32> -> vector<32x128xf32>
    %544 = tpu.concatenate %543, %542, %540 in 1 : vector<32x128xf32>, vector<32x128xf32>, vector<32x128xf32> -> vector<32x384xf32>
    %c3 = arith.constant 3 : index
    %c0_321 = arith.constant 0 : index
    %c0_322 = arith.constant 0 : index
    %545 = vector.load %arg34[%c3, %c0_321, %c0_322] : memref<6x384x128xbf16, #tpu.memory_space<vmem>>, vector<1x384x128xbf16>
    %546 = vector.shape_cast %545 : vector<1x384x128xbf16> to vector<384x128xbf16>
    %c3_323 = arith.constant 3 : index
    %c0_324 = arith.constant 0 : index
    %c0_325 = arith.constant 0 : index
    %547 = vector.load %arg35[%c3_323, %c0_324, %c0_325] : memref<6x1x128xf32, #tpu.memory_space<vmem>>, vector<1x1x128xf32>
    %548 = vector.shape_cast %547 : vector<1x1x128xf32> to vector<1x128xf32>
    %c3_326 = arith.constant 3 : index
    %c0_327 = arith.constant 0 : index
    %c0_328 = arith.constant 0 : index
    %549 = vector.load %arg36[%c3_326, %c0_327, %c0_328] : memref<6x128x128xbf16, #tpu.memory_space<vmem>>, vector<1x128x128xbf16>
    %550 = vector.shape_cast %549 : vector<1x128x128xbf16> to vector<128x128xbf16>
    %c3_329 = arith.constant 3 : index
    %c0_330 = arith.constant 0 : index
    %c0_331 = arith.constant 0 : index
    %551 = vector.load %arg37[%c3_329, %c0_330, %c0_331] : memref<6x1x128xf32, #tpu.memory_space<vmem>>, vector<1x1x128xf32>
    %552 = vector.shape_cast %551 : vector<1x1x128xf32> to vector<1x128xf32>
    %c3_332 = arith.constant 3 : index
    %c0_333 = arith.constant 0 : index
    %c0_334 = arith.constant 0 : index
    %553 = vector.load %arg38[%c3_332, %c0_333, %c0_334] : memref<6x128x128xbf16, #tpu.memory_space<vmem>>, vector<1x128x128xbf16>
    %554 = vector.shape_cast %553 : vector<1x128x128xbf16> to vector<128x128xbf16>
    %c3_335 = arith.constant 3 : index
    %c0_336 = arith.constant 0 : index
    %c0_337 = arith.constant 0 : index
    %555 = vector.load %arg39[%c3_335, %c0_336, %c0_337] : memref<6x1x128xf32, #tpu.memory_space<vmem>>, vector<1x1x128xf32>
    %556 = vector.shape_cast %555 : vector<1x1x128xf32> to vector<1x128xf32>
    %557 = arith.truncf %544 : vector<32x384xf32> to vector<32x384xbf16>
    %cst_338 = arith.constant dense<0.000000e+00> : vector<32x128xf32>
    %558 = tpu.matmul %557, %546, %cst_338 {dimension_numbers = #tpu.dot_dimension_numbers<[1], [0], [0], [1], [0, 0, 1, 1], [], []>} : vector<32x384xbf16>, vector<384x128xbf16>, vector<32x128xf32> -> vector<32x128xf32>
    %559 = vector.broadcast %548 : vector<1x128xf32> to vector<32x128xf32>
    %560 = arith.addf %558, %559 : vector<32x128xf32>
    %cst_339 = arith.constant 0.000000e+00 : f32
    %561 = vector.broadcast %cst_339 : f32 to vector<32x128xf32>
    %562 = arith.maximumf %560, %561 : vector<32x128xf32>
    %563 = arith.truncf %562 : vector<32x128xf32> to vector<32x128xbf16>
    %cst_340 = arith.constant dense<0.000000e+00> : vector<32x128xf32>
    %564 = tpu.matmul %563, %550, %cst_340 {dimension_numbers = #tpu.dot_dimension_numbers<[1], [0], [0], [1], [0, 0, 1, 1], [], []>} : vector<32x128xbf16>, vector<128x128xbf16>, vector<32x128xf32> -> vector<32x128xf32>
    %565 = vector.broadcast %552 : vector<1x128xf32> to vector<32x128xf32>
    %566 = arith.addf %564, %565 : vector<32x128xf32>
    %cst_341 = arith.constant 0.000000e+00 : f32
    %567 = vector.broadcast %cst_341 : f32 to vector<32x128xf32>
    %568 = arith.maximumf %566, %567 : vector<32x128xf32>
    %569 = arith.truncf %568 : vector<32x128xf32> to vector<32x128xbf16>
    %cst_342 = arith.constant dense<0.000000e+00> : vector<32x128xf32>
    %570 = tpu.matmul %569, %554, %cst_342 {dimension_numbers = #tpu.dot_dimension_numbers<[1], [0], [0], [1], [0, 0, 1, 1], [], []>} : vector<32x128xbf16>, vector<128x128xbf16>, vector<32x128xf32> -> vector<32x128xf32>
    %571 = vector.broadcast %556 : vector<1x128xf32> to vector<32x128xf32>
    %572 = arith.addf %570, %571 : vector<32x128xf32>
    %c3_343 = arith.constant 3 : index
    %c0_344 = arith.constant 0 : index
    %c0_345 = arith.constant 0 : index
    %573 = vector.load %arg40[%c3_343, %c0_344, %c0_345] : memref<6x1x128xf32, #tpu.memory_space<vmem>>, vector<1x1x128xf32>
    %574 = vector.shape_cast %573 : vector<1x1x128xf32> to vector<1x128xf32>
    %c3_346 = arith.constant 3 : index
    %c0_347 = arith.constant 0 : index
    %c0_348 = arith.constant 0 : index
    %575 = vector.load %arg41[%c3_346, %c0_347, %c0_348] : memref<6x1x128xf32, #tpu.memory_space<vmem>>, vector<1x1x128xf32>
    %576 = vector.shape_cast %575 : vector<1x1x128xf32> to vector<1x128xf32>
    %cst_349 = arith.constant dense<0.000000e+00> : vector<32xf32>
    %577 = vector.multi_reduction <add>, %572, %cst_349 [1] : vector<32x128xf32> to vector<32xf32>
    %578 = vector.shape_cast %577 : vector<32xf32> to vector<32x1xf32>
    %cst_350 = arith.constant 1.280000e+02 : f32
    %579 = vector.broadcast %cst_350 : f32 to vector<32x1xf32>
    %580 = arith.divf %578, %579 : vector<32x1xf32>
    %581 = vector.broadcast %580 : vector<32x1xf32> to vector<32x128xf32>
    %582 = arith.subf %572, %581 : vector<32x128xf32>
    %583 = arith.mulf %582, %582 : vector<32x128xf32>
    %cst_351 = arith.constant dense<0.000000e+00> : vector<32xf32>
    %584 = vector.multi_reduction <add>, %583, %cst_351 [1] : vector<32x128xf32> to vector<32xf32>
    %585 = vector.shape_cast %584 : vector<32xf32> to vector<32x1xf32>
    %cst_352 = arith.constant 1.280000e+02 : f32
    %586 = vector.broadcast %cst_352 : f32 to vector<32x1xf32>
    %587 = arith.divf %585, %586 : vector<32x1xf32>
    %588 = vector.broadcast %580 : vector<32x1xf32> to vector<32x128xf32>
    %589 = arith.subf %572, %588 : vector<32x128xf32>
    %cst_353 = arith.constant 9.99999974E-6 : f32
    %590 = vector.broadcast %cst_353 : f32 to vector<32x1xf32>
    %591 = arith.addf %587, %590 : vector<32x1xf32>
    %592 = math.rsqrt %591 : vector<32x1xf32>
    %593 = vector.broadcast %592 : vector<32x1xf32> to vector<32x128xf32>
    %594 = arith.mulf %589, %593 : vector<32x128xf32>
    %595 = vector.broadcast %574 : vector<1x128xf32> to vector<32x128xf32>
    %596 = arith.mulf %594, %595 : vector<32x128xf32>
    %597 = vector.broadcast %576 : vector<1x128xf32> to vector<32x128xf32>
    %598 = arith.addf %596, %597 : vector<32x128xf32>
    %599 = vector.broadcast %2 : vector<32x1xf32> to vector<32x128xf32>
    %600 = arith.mulf %598, %599 : vector<32x128xf32>
    %601 = arith.truncf %600 : vector<32x128xf32> to vector<32x128xbf16>
    %cst_354 = arith.constant dense<0.000000e+00> : vector<16x128xf32>
    %602 = tpu.matmul %117, %601, %cst_354 {dimension_numbers = #tpu.dot_dimension_numbers<[1], [0], [0], [1], [0, 0, 1, 1], [], []>} : vector<16x32xbf16>, vector<32x128xbf16>, vector<16x128xf32> -> vector<16x128xf32>
    %603 = tpu.concatenate %539, %602 in 1 : vector<16x128xf32>, vector<16x128xf32> -> vector<16x256xf32>
    %c3_355 = arith.constant 3 : index
    %c0_356 = arith.constant 0 : index
    %c0_357 = arith.constant 0 : index
    %604 = vector.load %arg42[%c3_355, %c0_356, %c0_357] : memref<6x256x128xbf16, #tpu.memory_space<vmem>>, vector<1x256x128xbf16>
    %605 = vector.shape_cast %604 : vector<1x256x128xbf16> to vector<256x128xbf16>
    %c3_358 = arith.constant 3 : index
    %c0_359 = arith.constant 0 : index
    %c0_360 = arith.constant 0 : index
    %606 = vector.load %arg43[%c3_358, %c0_359, %c0_360] : memref<6x1x128xf32, #tpu.memory_space<vmem>>, vector<1x1x128xf32>
    %607 = vector.shape_cast %606 : vector<1x1x128xf32> to vector<1x128xf32>
    %c3_361 = arith.constant 3 : index
    %c0_362 = arith.constant 0 : index
    %c0_363 = arith.constant 0 : index
    %608 = vector.load %arg44[%c3_361, %c0_362, %c0_363] : memref<6x128x128xbf16, #tpu.memory_space<vmem>>, vector<1x128x128xbf16>
    %609 = vector.shape_cast %608 : vector<1x128x128xbf16> to vector<128x128xbf16>
    %c3_364 = arith.constant 3 : index
    %c0_365 = arith.constant 0 : index
    %c0_366 = arith.constant 0 : index
    %610 = vector.load %arg45[%c3_364, %c0_365, %c0_366] : memref<6x1x128xf32, #tpu.memory_space<vmem>>, vector<1x1x128xf32>
    %611 = vector.shape_cast %610 : vector<1x1x128xf32> to vector<1x128xf32>
    %c3_367 = arith.constant 3 : index
    %c0_368 = arith.constant 0 : index
    %c0_369 = arith.constant 0 : index
    %612 = vector.load %arg46[%c3_367, %c0_368, %c0_369] : memref<6x128x128xbf16, #tpu.memory_space<vmem>>, vector<1x128x128xbf16>
    %613 = vector.shape_cast %612 : vector<1x128x128xbf16> to vector<128x128xbf16>
    %c3_370 = arith.constant 3 : index
    %c0_371 = arith.constant 0 : index
    %c0_372 = arith.constant 0 : index
    %614 = vector.load %arg47[%c3_370, %c0_371, %c0_372] : memref<6x1x128xf32, #tpu.memory_space<vmem>>, vector<1x1x128xf32>
    %615 = vector.shape_cast %614 : vector<1x1x128xf32> to vector<1x128xf32>
    %616 = arith.truncf %603 : vector<16x256xf32> to vector<16x256xbf16>
    %cst_373 = arith.constant dense<0.000000e+00> : vector<16x128xf32>
    %617 = tpu.matmul %616, %605, %cst_373 {dimension_numbers = #tpu.dot_dimension_numbers<[1], [0], [0], [1], [0, 0, 1, 1], [], []>} : vector<16x256xbf16>, vector<256x128xbf16>, vector<16x128xf32> -> vector<16x128xf32>
    %618 = vector.broadcast %607 : vector<1x128xf32> to vector<16x128xf32>
    %619 = arith.addf %617, %618 : vector<16x128xf32>
    %cst_374 = arith.constant 0.000000e+00 : f32
    %620 = vector.broadcast %cst_374 : f32 to vector<16x128xf32>
    %621 = arith.maximumf %619, %620 : vector<16x128xf32>
    %622 = arith.truncf %621 : vector<16x128xf32> to vector<16x128xbf16>
    %cst_375 = arith.constant dense<0.000000e+00> : vector<16x128xf32>
    %623 = tpu.matmul %622, %609, %cst_375 {dimension_numbers = #tpu.dot_dimension_numbers<[1], [0], [0], [1], [0, 0, 1, 1], [], []>} : vector<16x128xbf16>, vector<128x128xbf16>, vector<16x128xf32> -> vector<16x128xf32>
    %624 = vector.broadcast %611 : vector<1x128xf32> to vector<16x128xf32>
    %625 = arith.addf %623, %624 : vector<16x128xf32>
    %cst_376 = arith.constant 0.000000e+00 : f32
    %626 = vector.broadcast %cst_376 : f32 to vector<16x128xf32>
    %627 = arith.maximumf %625, %626 : vector<16x128xf32>
    %628 = arith.truncf %627 : vector<16x128xf32> to vector<16x128xbf16>
    %cst_377 = arith.constant dense<0.000000e+00> : vector<16x128xf32>
    %629 = tpu.matmul %628, %613, %cst_377 {dimension_numbers = #tpu.dot_dimension_numbers<[1], [0], [0], [1], [0, 0, 1, 1], [], []>} : vector<16x128xbf16>, vector<128x128xbf16>, vector<16x128xf32> -> vector<16x128xf32>
    %630 = vector.broadcast %615 : vector<1x128xf32> to vector<16x128xf32>
    %631 = arith.addf %629, %630 : vector<16x128xf32>
    %c3_378 = arith.constant 3 : index
    %c0_379 = arith.constant 0 : index
    %c0_380 = arith.constant 0 : index
    %632 = vector.load %arg48[%c3_378, %c0_379, %c0_380] : memref<6x1x128xf32, #tpu.memory_space<vmem>>, vector<1x1x128xf32>
    %633 = vector.shape_cast %632 : vector<1x1x128xf32> to vector<1x128xf32>
    %c3_381 = arith.constant 3 : index
    %c0_382 = arith.constant 0 : index
    %c0_383 = arith.constant 0 : index
    %634 = vector.load %arg49[%c3_381, %c0_382, %c0_383] : memref<6x1x128xf32, #tpu.memory_space<vmem>>, vector<1x1x128xf32>
    %635 = vector.shape_cast %634 : vector<1x1x128xf32> to vector<1x128xf32>
    %cst_384 = arith.constant dense<0.000000e+00> : vector<16xf32>
    %636 = vector.multi_reduction <add>, %631, %cst_384 [1] : vector<16x128xf32> to vector<16xf32>
    %637 = vector.shape_cast %636 : vector<16xf32> to vector<16x1xf32>
    %cst_385 = arith.constant 1.280000e+02 : f32
    %638 = vector.broadcast %cst_385 : f32 to vector<16x1xf32>
    %639 = arith.divf %637, %638 : vector<16x1xf32>
    %640 = vector.broadcast %639 : vector<16x1xf32> to vector<16x128xf32>
    %641 = arith.subf %631, %640 : vector<16x128xf32>
    %642 = arith.mulf %641, %641 : vector<16x128xf32>
    %cst_386 = arith.constant dense<0.000000e+00> : vector<16xf32>
    %643 = vector.multi_reduction <add>, %642, %cst_386 [1] : vector<16x128xf32> to vector<16xf32>
    %644 = vector.shape_cast %643 : vector<16xf32> to vector<16x1xf32>
    %cst_387 = arith.constant 1.280000e+02 : f32
    %645 = vector.broadcast %cst_387 : f32 to vector<16x1xf32>
    %646 = arith.divf %644, %645 : vector<16x1xf32>
    %647 = vector.broadcast %639 : vector<16x1xf32> to vector<16x128xf32>
    %648 = arith.subf %631, %647 : vector<16x128xf32>
    %cst_388 = arith.constant 9.99999974E-6 : f32
    %649 = vector.broadcast %cst_388 : f32 to vector<16x1xf32>
    %650 = arith.addf %646, %649 : vector<16x1xf32>
    %651 = math.rsqrt %650 : vector<16x1xf32>
    %652 = vector.broadcast %651 : vector<16x1xf32> to vector<16x128xf32>
    %653 = arith.mulf %648, %652 : vector<16x128xf32>
    %654 = vector.broadcast %633 : vector<1x128xf32> to vector<16x128xf32>
    %655 = arith.mulf %653, %654 : vector<16x128xf32>
    %656 = vector.broadcast %635 : vector<1x128xf32> to vector<16x128xf32>
    %657 = arith.addf %655, %656 : vector<16x128xf32>
    %658 = arith.addf %539, %657 : vector<16x128xf32>
    %659 = arith.addf %540, %598 : vector<32x128xf32>
    %660 = arith.truncf %658 : vector<16x128xf32> to vector<16x128xbf16>
    %cst_389 = arith.constant dense<0.000000e+00> : vector<32x128xf32>
    %661 = tpu.matmul %102, %660, %cst_389 {dimension_numbers = #tpu.dot_dimension_numbers<[1], [0], [0], [1], [0, 0, 1, 1], [], []>} : vector<32x16xbf16>, vector<16x128xbf16>, vector<32x128xf32> -> vector<32x128xf32>
    %cst_390 = arith.constant dense<0.000000e+00> : vector<32x128xf32>
    %662 = tpu.matmul %109, %660, %cst_390 {dimension_numbers = #tpu.dot_dimension_numbers<[1], [0], [0], [1], [0, 0, 1, 1], [], []>} : vector<32x16xbf16>, vector<16x128xbf16>, vector<32x128xf32> -> vector<32x128xf32>
    %663 = tpu.concatenate %662, %661, %659 in 1 : vector<32x128xf32>, vector<32x128xf32>, vector<32x128xf32> -> vector<32x384xf32>
    %c4 = arith.constant 4 : index
    %c0_391 = arith.constant 0 : index
    %c0_392 = arith.constant 0 : index
    %664 = vector.load %arg34[%c4, %c0_391, %c0_392] : memref<6x384x128xbf16, #tpu.memory_space<vmem>>, vector<1x384x128xbf16>
    %665 = vector.shape_cast %664 : vector<1x384x128xbf16> to vector<384x128xbf16>
    %c4_393 = arith.constant 4 : index
    %c0_394 = arith.constant 0 : index
    %c0_395 = arith.constant 0 : index
    %666 = vector.load %arg35[%c4_393, %c0_394, %c0_395] : memref<6x1x128xf32, #tpu.memory_space<vmem>>, vector<1x1x128xf32>
    %667 = vector.shape_cast %666 : vector<1x1x128xf32> to vector<1x128xf32>
    %c4_396 = arith.constant 4 : index
    %c0_397 = arith.constant 0 : index
    %c0_398 = arith.constant 0 : index
    %668 = vector.load %arg36[%c4_396, %c0_397, %c0_398] : memref<6x128x128xbf16, #tpu.memory_space<vmem>>, vector<1x128x128xbf16>
    %669 = vector.shape_cast %668 : vector<1x128x128xbf16> to vector<128x128xbf16>
    %c4_399 = arith.constant 4 : index
    %c0_400 = arith.constant 0 : index
    %c0_401 = arith.constant 0 : index
    %670 = vector.load %arg37[%c4_399, %c0_400, %c0_401] : memref<6x1x128xf32, #tpu.memory_space<vmem>>, vector<1x1x128xf32>
    %671 = vector.shape_cast %670 : vector<1x1x128xf32> to vector<1x128xf32>
    %c4_402 = arith.constant 4 : index
    %c0_403 = arith.constant 0 : index
    %c0_404 = arith.constant 0 : index
    %672 = vector.load %arg38[%c4_402, %c0_403, %c0_404] : memref<6x128x128xbf16, #tpu.memory_space<vmem>>, vector<1x128x128xbf16>
    %673 = vector.shape_cast %672 : vector<1x128x128xbf16> to vector<128x128xbf16>
    %c4_405 = arith.constant 4 : index
    %c0_406 = arith.constant 0 : index
    %c0_407 = arith.constant 0 : index
    %674 = vector.load %arg39[%c4_405, %c0_406, %c0_407] : memref<6x1x128xf32, #tpu.memory_space<vmem>>, vector<1x1x128xf32>
    %675 = vector.shape_cast %674 : vector<1x1x128xf32> to vector<1x128xf32>
    %676 = arith.truncf %663 : vector<32x384xf32> to vector<32x384xbf16>
    %cst_408 = arith.constant dense<0.000000e+00> : vector<32x128xf32>
    %677 = tpu.matmul %676, %665, %cst_408 {dimension_numbers = #tpu.dot_dimension_numbers<[1], [0], [0], [1], [0, 0, 1, 1], [], []>} : vector<32x384xbf16>, vector<384x128xbf16>, vector<32x128xf32> -> vector<32x128xf32>
    %678 = vector.broadcast %667 : vector<1x128xf32> to vector<32x128xf32>
    %679 = arith.addf %677, %678 : vector<32x128xf32>
    %cst_409 = arith.constant 0.000000e+00 : f32
    %680 = vector.broadcast %cst_409 : f32 to vector<32x128xf32>
    %681 = arith.maximumf %679, %680 : vector<32x128xf32>
    %682 = arith.truncf %681 : vector<32x128xf32> to vector<32x128xbf16>
    %cst_410 = arith.constant dense<0.000000e+00> : vector<32x128xf32>
    %683 = tpu.matmul %682, %669, %cst_410 {dimension_numbers = #tpu.dot_dimension_numbers<[1], [0], [0], [1], [0, 0, 1, 1], [], []>} : vector<32x128xbf16>, vector<128x128xbf16>, vector<32x128xf32> -> vector<32x128xf32>
    %684 = vector.broadcast %671 : vector<1x128xf32> to vector<32x128xf32>
    %685 = arith.addf %683, %684 : vector<32x128xf32>
    %cst_411 = arith.constant 0.000000e+00 : f32
    %686 = vector.broadcast %cst_411 : f32 to vector<32x128xf32>
    %687 = arith.maximumf %685, %686 : vector<32x128xf32>
    %688 = arith.truncf %687 : vector<32x128xf32> to vector<32x128xbf16>
    %cst_412 = arith.constant dense<0.000000e+00> : vector<32x128xf32>
    %689 = tpu.matmul %688, %673, %cst_412 {dimension_numbers = #tpu.dot_dimension_numbers<[1], [0], [0], [1], [0, 0, 1, 1], [], []>} : vector<32x128xbf16>, vector<128x128xbf16>, vector<32x128xf32> -> vector<32x128xf32>
    %690 = vector.broadcast %675 : vector<1x128xf32> to vector<32x128xf32>
    %691 = arith.addf %689, %690 : vector<32x128xf32>
    %c4_413 = arith.constant 4 : index
    %c0_414 = arith.constant 0 : index
    %c0_415 = arith.constant 0 : index
    %692 = vector.load %arg40[%c4_413, %c0_414, %c0_415] : memref<6x1x128xf32, #tpu.memory_space<vmem>>, vector<1x1x128xf32>
    %693 = vector.shape_cast %692 : vector<1x1x128xf32> to vector<1x128xf32>
    %c4_416 = arith.constant 4 : index
    %c0_417 = arith.constant 0 : index
    %c0_418 = arith.constant 0 : index
    %694 = vector.load %arg41[%c4_416, %c0_417, %c0_418] : memref<6x1x128xf32, #tpu.memory_space<vmem>>, vector<1x1x128xf32>
    %695 = vector.shape_cast %694 : vector<1x1x128xf32> to vector<1x128xf32>
    %cst_419 = arith.constant dense<0.000000e+00> : vector<32xf32>
    %696 = vector.multi_reduction <add>, %691, %cst_419 [1] : vector<32x128xf32> to vector<32xf32>
    %697 = vector.shape_cast %696 : vector<32xf32> to vector<32x1xf32>
    %cst_420 = arith.constant 1.280000e+02 : f32
    %698 = vector.broadcast %cst_420 : f32 to vector<32x1xf32>
    %699 = arith.divf %697, %698 : vector<32x1xf32>
    %700 = vector.broadcast %699 : vector<32x1xf32> to vector<32x128xf32>
    %701 = arith.subf %691, %700 : vector<32x128xf32>
    %702 = arith.mulf %701, %701 : vector<32x128xf32>
    %cst_421 = arith.constant dense<0.000000e+00> : vector<32xf32>
    %703 = vector.multi_reduction <add>, %702, %cst_421 [1] : vector<32x128xf32> to vector<32xf32>
    %704 = vector.shape_cast %703 : vector<32xf32> to vector<32x1xf32>
    %cst_422 = arith.constant 1.280000e+02 : f32
    %705 = vector.broadcast %cst_422 : f32 to vector<32x1xf32>
    %706 = arith.divf %704, %705 : vector<32x1xf32>
    %707 = vector.broadcast %699 : vector<32x1xf32> to vector<32x128xf32>
    %708 = arith.subf %691, %707 : vector<32x128xf32>
    %cst_423 = arith.constant 9.99999974E-6 : f32
    %709 = vector.broadcast %cst_423 : f32 to vector<32x1xf32>
    %710 = arith.addf %706, %709 : vector<32x1xf32>
    %711 = math.rsqrt %710 : vector<32x1xf32>
    %712 = vector.broadcast %711 : vector<32x1xf32> to vector<32x128xf32>
    %713 = arith.mulf %708, %712 : vector<32x128xf32>
    %714 = vector.broadcast %693 : vector<1x128xf32> to vector<32x128xf32>
    %715 = arith.mulf %713, %714 : vector<32x128xf32>
    %716 = vector.broadcast %695 : vector<1x128xf32> to vector<32x128xf32>
    %717 = arith.addf %715, %716 : vector<32x128xf32>
    %718 = vector.broadcast %2 : vector<32x1xf32> to vector<32x128xf32>
    %719 = arith.mulf %717, %718 : vector<32x128xf32>
    %720 = arith.truncf %719 : vector<32x128xf32> to vector<32x128xbf16>
    %cst_424 = arith.constant dense<0.000000e+00> : vector<16x128xf32>
    %721 = tpu.matmul %117, %720, %cst_424 {dimension_numbers = #tpu.dot_dimension_numbers<[1], [0], [0], [1], [0, 0, 1, 1], [], []>} : vector<16x32xbf16>, vector<32x128xbf16>, vector<16x128xf32> -> vector<16x128xf32>
    %722 = tpu.concatenate %658, %721 in 1 : vector<16x128xf32>, vector<16x128xf32> -> vector<16x256xf32>
    %c4_425 = arith.constant 4 : index
    %c0_426 = arith.constant 0 : index
    %c0_427 = arith.constant 0 : index
    %723 = vector.load %arg42[%c4_425, %c0_426, %c0_427] : memref<6x256x128xbf16, #tpu.memory_space<vmem>>, vector<1x256x128xbf16>
    %724 = vector.shape_cast %723 : vector<1x256x128xbf16> to vector<256x128xbf16>
    %c4_428 = arith.constant 4 : index
    %c0_429 = arith.constant 0 : index
    %c0_430 = arith.constant 0 : index
    %725 = vector.load %arg43[%c4_428, %c0_429, %c0_430] : memref<6x1x128xf32, #tpu.memory_space<vmem>>, vector<1x1x128xf32>
    %726 = vector.shape_cast %725 : vector<1x1x128xf32> to vector<1x128xf32>
    %c4_431 = arith.constant 4 : index
    %c0_432 = arith.constant 0 : index
    %c0_433 = arith.constant 0 : index
    %727 = vector.load %arg44[%c4_431, %c0_432, %c0_433] : memref<6x128x128xbf16, #tpu.memory_space<vmem>>, vector<1x128x128xbf16>
    %728 = vector.shape_cast %727 : vector<1x128x128xbf16> to vector<128x128xbf16>
    %c4_434 = arith.constant 4 : index
    %c0_435 = arith.constant 0 : index
    %c0_436 = arith.constant 0 : index
    %729 = vector.load %arg45[%c4_434, %c0_435, %c0_436] : memref<6x1x128xf32, #tpu.memory_space<vmem>>, vector<1x1x128xf32>
    %730 = vector.shape_cast %729 : vector<1x1x128xf32> to vector<1x128xf32>
    %c4_437 = arith.constant 4 : index
    %c0_438 = arith.constant 0 : index
    %c0_439 = arith.constant 0 : index
    %731 = vector.load %arg46[%c4_437, %c0_438, %c0_439] : memref<6x128x128xbf16, #tpu.memory_space<vmem>>, vector<1x128x128xbf16>
    %732 = vector.shape_cast %731 : vector<1x128x128xbf16> to vector<128x128xbf16>
    %c4_440 = arith.constant 4 : index
    %c0_441 = arith.constant 0 : index
    %c0_442 = arith.constant 0 : index
    %733 = vector.load %arg47[%c4_440, %c0_441, %c0_442] : memref<6x1x128xf32, #tpu.memory_space<vmem>>, vector<1x1x128xf32>
    %734 = vector.shape_cast %733 : vector<1x1x128xf32> to vector<1x128xf32>
    %735 = arith.truncf %722 : vector<16x256xf32> to vector<16x256xbf16>
    %cst_443 = arith.constant dense<0.000000e+00> : vector<16x128xf32>
    %736 = tpu.matmul %735, %724, %cst_443 {dimension_numbers = #tpu.dot_dimension_numbers<[1], [0], [0], [1], [0, 0, 1, 1], [], []>} : vector<16x256xbf16>, vector<256x128xbf16>, vector<16x128xf32> -> vector<16x128xf32>
    %737 = vector.broadcast %726 : vector<1x128xf32> to vector<16x128xf32>
    %738 = arith.addf %736, %737 : vector<16x128xf32>
    %cst_444 = arith.constant 0.000000e+00 : f32
    %739 = vector.broadcast %cst_444 : f32 to vector<16x128xf32>
    %740 = arith.maximumf %738, %739 : vector<16x128xf32>
    %741 = arith.truncf %740 : vector<16x128xf32> to vector<16x128xbf16>
    %cst_445 = arith.constant dense<0.000000e+00> : vector<16x128xf32>
    %742 = tpu.matmul %741, %728, %cst_445 {dimension_numbers = #tpu.dot_dimension_numbers<[1], [0], [0], [1], [0, 0, 1, 1], [], []>} : vector<16x128xbf16>, vector<128x128xbf16>, vector<16x128xf32> -> vector<16x128xf32>
    %743 = vector.broadcast %730 : vector<1x128xf32> to vector<16x128xf32>
    %744 = arith.addf %742, %743 : vector<16x128xf32>
    %cst_446 = arith.constant 0.000000e+00 : f32
    %745 = vector.broadcast %cst_446 : f32 to vector<16x128xf32>
    %746 = arith.maximumf %744, %745 : vector<16x128xf32>
    %747 = arith.truncf %746 : vector<16x128xf32> to vector<16x128xbf16>
    %cst_447 = arith.constant dense<0.000000e+00> : vector<16x128xf32>
    %748 = tpu.matmul %747, %732, %cst_447 {dimension_numbers = #tpu.dot_dimension_numbers<[1], [0], [0], [1], [0, 0, 1, 1], [], []>} : vector<16x128xbf16>, vector<128x128xbf16>, vector<16x128xf32> -> vector<16x128xf32>
    %749 = vector.broadcast %734 : vector<1x128xf32> to vector<16x128xf32>
    %750 = arith.addf %748, %749 : vector<16x128xf32>
    %c4_448 = arith.constant 4 : index
    %c0_449 = arith.constant 0 : index
    %c0_450 = arith.constant 0 : index
    %751 = vector.load %arg48[%c4_448, %c0_449, %c0_450] : memref<6x1x128xf32, #tpu.memory_space<vmem>>, vector<1x1x128xf32>
    %752 = vector.shape_cast %751 : vector<1x1x128xf32> to vector<1x128xf32>
    %c4_451 = arith.constant 4 : index
    %c0_452 = arith.constant 0 : index
    %c0_453 = arith.constant 0 : index
    %753 = vector.load %arg49[%c4_451, %c0_452, %c0_453] : memref<6x1x128xf32, #tpu.memory_space<vmem>>, vector<1x1x128xf32>
    %754 = vector.shape_cast %753 : vector<1x1x128xf32> to vector<1x128xf32>
    %cst_454 = arith.constant dense<0.000000e+00> : vector<16xf32>
    %755 = vector.multi_reduction <add>, %750, %cst_454 [1] : vector<16x128xf32> to vector<16xf32>
    %756 = vector.shape_cast %755 : vector<16xf32> to vector<16x1xf32>
    %cst_455 = arith.constant 1.280000e+02 : f32
    %757 = vector.broadcast %cst_455 : f32 to vector<16x1xf32>
    %758 = arith.divf %756, %757 : vector<16x1xf32>
    %759 = vector.broadcast %758 : vector<16x1xf32> to vector<16x128xf32>
    %760 = arith.subf %750, %759 : vector<16x128xf32>
    %761 = arith.mulf %760, %760 : vector<16x128xf32>
    %cst_456 = arith.constant dense<0.000000e+00> : vector<16xf32>
    %762 = vector.multi_reduction <add>, %761, %cst_456 [1] : vector<16x128xf32> to vector<16xf32>
    %763 = vector.shape_cast %762 : vector<16xf32> to vector<16x1xf32>
    %cst_457 = arith.constant 1.280000e+02 : f32
    %764 = vector.broadcast %cst_457 : f32 to vector<16x1xf32>
    %765 = arith.divf %763, %764 : vector<16x1xf32>
    %766 = vector.broadcast %758 : vector<16x1xf32> to vector<16x128xf32>
    %767 = arith.subf %750, %766 : vector<16x128xf32>
    %cst_458 = arith.constant 9.99999974E-6 : f32
    %768 = vector.broadcast %cst_458 : f32 to vector<16x1xf32>
    %769 = arith.addf %765, %768 : vector<16x1xf32>
    %770 = math.rsqrt %769 : vector<16x1xf32>
    %771 = vector.broadcast %770 : vector<16x1xf32> to vector<16x128xf32>
    %772 = arith.mulf %767, %771 : vector<16x128xf32>
    %773 = vector.broadcast %752 : vector<1x128xf32> to vector<16x128xf32>
    %774 = arith.mulf %772, %773 : vector<16x128xf32>
    %775 = vector.broadcast %754 : vector<1x128xf32> to vector<16x128xf32>
    %776 = arith.addf %774, %775 : vector<16x128xf32>
    %777 = arith.addf %658, %776 : vector<16x128xf32>
    %778 = arith.addf %659, %717 : vector<32x128xf32>
    %779 = arith.truncf %777 : vector<16x128xf32> to vector<16x128xbf16>
    %cst_459 = arith.constant dense<0.000000e+00> : vector<32x128xf32>
    %780 = tpu.matmul %102, %779, %cst_459 {dimension_numbers = #tpu.dot_dimension_numbers<[1], [0], [0], [1], [0, 0, 1, 1], [], []>} : vector<32x16xbf16>, vector<16x128xbf16>, vector<32x128xf32> -> vector<32x128xf32>
    %cst_460 = arith.constant dense<0.000000e+00> : vector<32x128xf32>
    %781 = tpu.matmul %109, %779, %cst_460 {dimension_numbers = #tpu.dot_dimension_numbers<[1], [0], [0], [1], [0, 0, 1, 1], [], []>} : vector<32x16xbf16>, vector<16x128xbf16>, vector<32x128xf32> -> vector<32x128xf32>
    %782 = tpu.concatenate %781, %780, %778 in 1 : vector<32x128xf32>, vector<32x128xf32>, vector<32x128xf32> -> vector<32x384xf32>
    %c5 = arith.constant 5 : index
    %c0_461 = arith.constant 0 : index
    %c0_462 = arith.constant 0 : index
    %783 = vector.load %arg34[%c5, %c0_461, %c0_462] : memref<6x384x128xbf16, #tpu.memory_space<vmem>>, vector<1x384x128xbf16>
    %784 = vector.shape_cast %783 : vector<1x384x128xbf16> to vector<384x128xbf16>
    %c5_463 = arith.constant 5 : index
    %c0_464 = arith.constant 0 : index
    %c0_465 = arith.constant 0 : index
    %785 = vector.load %arg35[%c5_463, %c0_464, %c0_465] : memref<6x1x128xf32, #tpu.memory_space<vmem>>, vector<1x1x128xf32>
    %786 = vector.shape_cast %785 : vector<1x1x128xf32> to vector<1x128xf32>
    %c5_466 = arith.constant 5 : index
    %c0_467 = arith.constant 0 : index
    %c0_468 = arith.constant 0 : index
    %787 = vector.load %arg36[%c5_466, %c0_467, %c0_468] : memref<6x128x128xbf16, #tpu.memory_space<vmem>>, vector<1x128x128xbf16>
    %788 = vector.shape_cast %787 : vector<1x128x128xbf16> to vector<128x128xbf16>
    %c5_469 = arith.constant 5 : index
    %c0_470 = arith.constant 0 : index
    %c0_471 = arith.constant 0 : index
    %789 = vector.load %arg37[%c5_469, %c0_470, %c0_471] : memref<6x1x128xf32, #tpu.memory_space<vmem>>, vector<1x1x128xf32>
    %790 = vector.shape_cast %789 : vector<1x1x128xf32> to vector<1x128xf32>
    %c5_472 = arith.constant 5 : index
    %c0_473 = arith.constant 0 : index
    %c0_474 = arith.constant 0 : index
    %791 = vector.load %arg38[%c5_472, %c0_473, %c0_474] : memref<6x128x128xbf16, #tpu.memory_space<vmem>>, vector<1x128x128xbf16>
    %792 = vector.shape_cast %791 : vector<1x128x128xbf16> to vector<128x128xbf16>
    %c5_475 = arith.constant 5 : index
    %c0_476 = arith.constant 0 : index
    %c0_477 = arith.constant 0 : index
    %793 = vector.load %arg39[%c5_475, %c0_476, %c0_477] : memref<6x1x128xf32, #tpu.memory_space<vmem>>, vector<1x1x128xf32>
    %794 = vector.shape_cast %793 : vector<1x1x128xf32> to vector<1x128xf32>
    %795 = arith.truncf %782 : vector<32x384xf32> to vector<32x384xbf16>
    %cst_478 = arith.constant dense<0.000000e+00> : vector<32x128xf32>
    %796 = tpu.matmul %795, %784, %cst_478 {dimension_numbers = #tpu.dot_dimension_numbers<[1], [0], [0], [1], [0, 0, 1, 1], [], []>} : vector<32x384xbf16>, vector<384x128xbf16>, vector<32x128xf32> -> vector<32x128xf32>
    %797 = vector.broadcast %786 : vector<1x128xf32> to vector<32x128xf32>
    %798 = arith.addf %796, %797 : vector<32x128xf32>
    %cst_479 = arith.constant 0.000000e+00 : f32
    %799 = vector.broadcast %cst_479 : f32 to vector<32x128xf32>
    %800 = arith.maximumf %798, %799 : vector<32x128xf32>
    %801 = arith.truncf %800 : vector<32x128xf32> to vector<32x128xbf16>
    %cst_480 = arith.constant dense<0.000000e+00> : vector<32x128xf32>
    %802 = tpu.matmul %801, %788, %cst_480 {dimension_numbers = #tpu.dot_dimension_numbers<[1], [0], [0], [1], [0, 0, 1, 1], [], []>} : vector<32x128xbf16>, vector<128x128xbf16>, vector<32x128xf32> -> vector<32x128xf32>
    %803 = vector.broadcast %790 : vector<1x128xf32> to vector<32x128xf32>
    %804 = arith.addf %802, %803 : vector<32x128xf32>
    %cst_481 = arith.constant 0.000000e+00 : f32
    %805 = vector.broadcast %cst_481 : f32 to vector<32x128xf32>
    %806 = arith.maximumf %804, %805 : vector<32x128xf32>
    %807 = arith.truncf %806 : vector<32x128xf32> to vector<32x128xbf16>
    %cst_482 = arith.constant dense<0.000000e+00> : vector<32x128xf32>
    %808 = tpu.matmul %807, %792, %cst_482 {dimension_numbers = #tpu.dot_dimension_numbers<[1], [0], [0], [1], [0, 0, 1, 1], [], []>} : vector<32x128xbf16>, vector<128x128xbf16>, vector<32x128xf32> -> vector<32x128xf32>
    %809 = vector.broadcast %794 : vector<1x128xf32> to vector<32x128xf32>
    %810 = arith.addf %808, %809 : vector<32x128xf32>
    %c5_483 = arith.constant 5 : index
    %c0_484 = arith.constant 0 : index
    %c0_485 = arith.constant 0 : index
    %811 = vector.load %arg40[%c5_483, %c0_484, %c0_485] : memref<6x1x128xf32, #tpu.memory_space<vmem>>, vector<1x1x128xf32>
    %812 = vector.shape_cast %811 : vector<1x1x128xf32> to vector<1x128xf32>
    %c5_486 = arith.constant 5 : index
    %c0_487 = arith.constant 0 : index
    %c0_488 = arith.constant 0 : index
    %813 = vector.load %arg41[%c5_486, %c0_487, %c0_488] : memref<6x1x128xf32, #tpu.memory_space<vmem>>, vector<1x1x128xf32>
    %814 = vector.shape_cast %813 : vector<1x1x128xf32> to vector<1x128xf32>
    %cst_489 = arith.constant dense<0.000000e+00> : vector<32xf32>
    %815 = vector.multi_reduction <add>, %810, %cst_489 [1] : vector<32x128xf32> to vector<32xf32>
    %816 = vector.shape_cast %815 : vector<32xf32> to vector<32x1xf32>
    %cst_490 = arith.constant 1.280000e+02 : f32
    %817 = vector.broadcast %cst_490 : f32 to vector<32x1xf32>
    %818 = arith.divf %816, %817 : vector<32x1xf32>
    %819 = vector.broadcast %818 : vector<32x1xf32> to vector<32x128xf32>
    %820 = arith.subf %810, %819 : vector<32x128xf32>
    %821 = arith.mulf %820, %820 : vector<32x128xf32>
    %cst_491 = arith.constant dense<0.000000e+00> : vector<32xf32>
    %822 = vector.multi_reduction <add>, %821, %cst_491 [1] : vector<32x128xf32> to vector<32xf32>
    %823 = vector.shape_cast %822 : vector<32xf32> to vector<32x1xf32>
    %cst_492 = arith.constant 1.280000e+02 : f32
    %824 = vector.broadcast %cst_492 : f32 to vector<32x1xf32>
    %825 = arith.divf %823, %824 : vector<32x1xf32>
    %826 = vector.broadcast %818 : vector<32x1xf32> to vector<32x128xf32>
    %827 = arith.subf %810, %826 : vector<32x128xf32>
    %cst_493 = arith.constant 9.99999974E-6 : f32
    %828 = vector.broadcast %cst_493 : f32 to vector<32x1xf32>
    %829 = arith.addf %825, %828 : vector<32x1xf32>
    %830 = math.rsqrt %829 : vector<32x1xf32>
    %831 = vector.broadcast %830 : vector<32x1xf32> to vector<32x128xf32>
    %832 = arith.mulf %827, %831 : vector<32x128xf32>
    %833 = vector.broadcast %812 : vector<1x128xf32> to vector<32x128xf32>
    %834 = arith.mulf %832, %833 : vector<32x128xf32>
    %835 = vector.broadcast %814 : vector<1x128xf32> to vector<32x128xf32>
    %836 = arith.addf %834, %835 : vector<32x128xf32>
    %837 = vector.broadcast %2 : vector<32x1xf32> to vector<32x128xf32>
    %838 = arith.mulf %836, %837 : vector<32x128xf32>
    %839 = arith.truncf %838 : vector<32x128xf32> to vector<32x128xbf16>
    %cst_494 = arith.constant dense<0.000000e+00> : vector<16x128xf32>
    %840 = tpu.matmul %117, %839, %cst_494 {dimension_numbers = #tpu.dot_dimension_numbers<[1], [0], [0], [1], [0, 0, 1, 1], [], []>} : vector<16x32xbf16>, vector<32x128xbf16>, vector<16x128xf32> -> vector<16x128xf32>
    %841 = tpu.concatenate %777, %840 in 1 : vector<16x128xf32>, vector<16x128xf32> -> vector<16x256xf32>
    %c5_495 = arith.constant 5 : index
    %c0_496 = arith.constant 0 : index
    %c0_497 = arith.constant 0 : index
    %842 = vector.load %arg42[%c5_495, %c0_496, %c0_497] : memref<6x256x128xbf16, #tpu.memory_space<vmem>>, vector<1x256x128xbf16>
    %843 = vector.shape_cast %842 : vector<1x256x128xbf16> to vector<256x128xbf16>
    %c5_498 = arith.constant 5 : index
    %c0_499 = arith.constant 0 : index
    %c0_500 = arith.constant 0 : index
    %844 = vector.load %arg43[%c5_498, %c0_499, %c0_500] : memref<6x1x128xf32, #tpu.memory_space<vmem>>, vector<1x1x128xf32>
    %845 = vector.shape_cast %844 : vector<1x1x128xf32> to vector<1x128xf32>
    %c5_501 = arith.constant 5 : index
    %c0_502 = arith.constant 0 : index
    %c0_503 = arith.constant 0 : index
    %846 = vector.load %arg44[%c5_501, %c0_502, %c0_503] : memref<6x128x128xbf16, #tpu.memory_space<vmem>>, vector<1x128x128xbf16>
    %847 = vector.shape_cast %846 : vector<1x128x128xbf16> to vector<128x128xbf16>
    %c5_504 = arith.constant 5 : index
    %c0_505 = arith.constant 0 : index
    %c0_506 = arith.constant 0 : index
    %848 = vector.load %arg45[%c5_504, %c0_505, %c0_506] : memref<6x1x128xf32, #tpu.memory_space<vmem>>, vector<1x1x128xf32>
    %849 = vector.shape_cast %848 : vector<1x1x128xf32> to vector<1x128xf32>
    %c5_507 = arith.constant 5 : index
    %c0_508 = arith.constant 0 : index
    %c0_509 = arith.constant 0 : index
    %850 = vector.load %arg46[%c5_507, %c0_508, %c0_509] : memref<6x128x128xbf16, #tpu.memory_space<vmem>>, vector<1x128x128xbf16>
    %851 = vector.shape_cast %850 : vector<1x128x128xbf16> to vector<128x128xbf16>
    %c5_510 = arith.constant 5 : index
    %c0_511 = arith.constant 0 : index
    %c0_512 = arith.constant 0 : index
    %852 = vector.load %arg47[%c5_510, %c0_511, %c0_512] : memref<6x1x128xf32, #tpu.memory_space<vmem>>, vector<1x1x128xf32>
    %853 = vector.shape_cast %852 : vector<1x1x128xf32> to vector<1x128xf32>
    %854 = arith.truncf %841 : vector<16x256xf32> to vector<16x256xbf16>
    %cst_513 = arith.constant dense<0.000000e+00> : vector<16x128xf32>
    %855 = tpu.matmul %854, %843, %cst_513 {dimension_numbers = #tpu.dot_dimension_numbers<[1], [0], [0], [1], [0, 0, 1, 1], [], []>} : vector<16x256xbf16>, vector<256x128xbf16>, vector<16x128xf32> -> vector<16x128xf32>
    %856 = vector.broadcast %845 : vector<1x128xf32> to vector<16x128xf32>
    %857 = arith.addf %855, %856 : vector<16x128xf32>
    %cst_514 = arith.constant 0.000000e+00 : f32
    %858 = vector.broadcast %cst_514 : f32 to vector<16x128xf32>
    %859 = arith.maximumf %857, %858 : vector<16x128xf32>
    %860 = arith.truncf %859 : vector<16x128xf32> to vector<16x128xbf16>
    %cst_515 = arith.constant dense<0.000000e+00> : vector<16x128xf32>
    %861 = tpu.matmul %860, %847, %cst_515 {dimension_numbers = #tpu.dot_dimension_numbers<[1], [0], [0], [1], [0, 0, 1, 1], [], []>} : vector<16x128xbf16>, vector<128x128xbf16>, vector<16x128xf32> -> vector<16x128xf32>
    %862 = vector.broadcast %849 : vector<1x128xf32> to vector<16x128xf32>
    %863 = arith.addf %861, %862 : vector<16x128xf32>
    %cst_516 = arith.constant 0.000000e+00 : f32
    %864 = vector.broadcast %cst_516 : f32 to vector<16x128xf32>
    %865 = arith.maximumf %863, %864 : vector<16x128xf32>
    %866 = arith.truncf %865 : vector<16x128xf32> to vector<16x128xbf16>
    %cst_517 = arith.constant dense<0.000000e+00> : vector<16x128xf32>
    %867 = tpu.matmul %866, %851, %cst_517 {dimension_numbers = #tpu.dot_dimension_numbers<[1], [0], [0], [1], [0, 0, 1, 1], [], []>} : vector<16x128xbf16>, vector<128x128xbf16>, vector<16x128xf32> -> vector<16x128xf32>
    %868 = vector.broadcast %853 : vector<1x128xf32> to vector<16x128xf32>
    %869 = arith.addf %867, %868 : vector<16x128xf32>
    %c5_518 = arith.constant 5 : index
    %c0_519 = arith.constant 0 : index
    %c0_520 = arith.constant 0 : index
    %870 = vector.load %arg48[%c5_518, %c0_519, %c0_520] : memref<6x1x128xf32, #tpu.memory_space<vmem>>, vector<1x1x128xf32>
    %871 = vector.shape_cast %870 : vector<1x1x128xf32> to vector<1x128xf32>
    %c5_521 = arith.constant 5 : index
    %c0_522 = arith.constant 0 : index
    %c0_523 = arith.constant 0 : index
    %872 = vector.load %arg49[%c5_521, %c0_522, %c0_523] : memref<6x1x128xf32, #tpu.memory_space<vmem>>, vector<1x1x128xf32>
    %873 = vector.shape_cast %872 : vector<1x1x128xf32> to vector<1x128xf32>
    %cst_524 = arith.constant dense<0.000000e+00> : vector<16xf32>
    %874 = vector.multi_reduction <add>, %869, %cst_524 [1] : vector<16x128xf32> to vector<16xf32>
    %875 = vector.shape_cast %874 : vector<16xf32> to vector<16x1xf32>
    %cst_525 = arith.constant 1.280000e+02 : f32
    %876 = vector.broadcast %cst_525 : f32 to vector<16x1xf32>
    %877 = arith.divf %875, %876 : vector<16x1xf32>
    %878 = vector.broadcast %877 : vector<16x1xf32> to vector<16x128xf32>
    %879 = arith.subf %869, %878 : vector<16x128xf32>
    %880 = arith.mulf %879, %879 : vector<16x128xf32>
    %cst_526 = arith.constant dense<0.000000e+00> : vector<16xf32>
    %881 = vector.multi_reduction <add>, %880, %cst_526 [1] : vector<16x128xf32> to vector<16xf32>
    %882 = vector.shape_cast %881 : vector<16xf32> to vector<16x1xf32>
    %cst_527 = arith.constant 1.280000e+02 : f32
    %883 = vector.broadcast %cst_527 : f32 to vector<16x1xf32>
    %884 = arith.divf %882, %883 : vector<16x1xf32>
    %885 = vector.broadcast %877 : vector<16x1xf32> to vector<16x128xf32>
    %886 = arith.subf %869, %885 : vector<16x128xf32>
    %cst_528 = arith.constant 9.99999974E-6 : f32
    %887 = vector.broadcast %cst_528 : f32 to vector<16x1xf32>
    %888 = arith.addf %884, %887 : vector<16x1xf32>
    %889 = math.rsqrt %888 : vector<16x1xf32>
    %890 = vector.broadcast %889 : vector<16x1xf32> to vector<16x128xf32>
    %891 = arith.mulf %886, %890 : vector<16x128xf32>
    %892 = vector.broadcast %871 : vector<1x128xf32> to vector<16x128xf32>
    %893 = arith.mulf %891, %892 : vector<16x128xf32>
    %894 = vector.broadcast %873 : vector<1x128xf32> to vector<16x128xf32>
    %895 = arith.addf %893, %894 : vector<16x128xf32>
    %896 = arith.addf %777, %895 : vector<16x128xf32>
    %c0_529 = arith.constant 0 : index
    %c0_530 = arith.constant 0 : index
    %897 = vector.load %arg22[%c0_529, %c0_530] : memref<128x128xbf16, #tpu.memory_space<vmem>>, vector<128x128xbf16>
    %c0_531 = arith.constant 0 : index
    %c0_532 = arith.constant 0 : index
    %898 = vector.load %arg23[%c0_531, %c0_532] : memref<1x128xf32, #tpu.memory_space<vmem>>, vector<1x128xf32>
    %c0_533 = arith.constant 0 : index
    %c0_534 = arith.constant 0 : index
    %899 = vector.load %arg24[%c0_533, %c0_534] : memref<128x128xbf16, #tpu.memory_space<vmem>>, vector<128x128xbf16>
    %c0_535 = arith.constant 0 : index
    %c0_536 = arith.constant 0 : index
    %900 = vector.load %arg25[%c0_535, %c0_536] : memref<1x128xf32, #tpu.memory_space<vmem>>, vector<1x128xf32>
    %c0_537 = arith.constant 0 : index
    %c0_538 = arith.constant 0 : index
    %901 = vector.load %arg26[%c0_537, %c0_538] : memref<128x2xbf16, #tpu.memory_space<vmem>>, vector<128x2xbf16>
    %c0_539 = arith.constant 0 : index
    %c0_540 = arith.constant 0 : index
    %902 = vector.load %arg27[%c0_539, %c0_540] : memref<1x2xf32, #tpu.memory_space<vmem>>, vector<1x2xf32>
    %903 = arith.truncf %896 : vector<16x128xf32> to vector<16x128xbf16>
    %cst_541 = arith.constant dense<0.000000e+00> : vector<16x128xf32>
    %904 = tpu.matmul %903, %897, %cst_541 {dimension_numbers = #tpu.dot_dimension_numbers<[1], [0], [0], [1], [0, 0, 1, 1], [], []>} : vector<16x128xbf16>, vector<128x128xbf16>, vector<16x128xf32> -> vector<16x128xf32>
    %905 = vector.broadcast %898 : vector<1x128xf32> to vector<16x128xf32>
    %906 = arith.addf %904, %905 : vector<16x128xf32>
    %cst_542 = arith.constant 0.000000e+00 : f32
    %907 = vector.broadcast %cst_542 : f32 to vector<16x128xf32>
    %908 = arith.maximumf %906, %907 : vector<16x128xf32>
    %909 = arith.truncf %908 : vector<16x128xf32> to vector<16x128xbf16>
    %cst_543 = arith.constant dense<0.000000e+00> : vector<16x128xf32>
    %910 = tpu.matmul %909, %899, %cst_543 {dimension_numbers = #tpu.dot_dimension_numbers<[1], [0], [0], [1], [0, 0, 1, 1], [], []>} : vector<16x128xbf16>, vector<128x128xbf16>, vector<16x128xf32> -> vector<16x128xf32>
    %911 = vector.broadcast %900 : vector<1x128xf32> to vector<16x128xf32>
    %912 = arith.addf %910, %911 : vector<16x128xf32>
    %cst_544 = arith.constant 0.000000e+00 : f32
    %913 = vector.broadcast %cst_544 : f32 to vector<16x128xf32>
    %914 = arith.maximumf %912, %913 : vector<16x128xf32>
    %915 = arith.truncf %914 : vector<16x128xf32> to vector<16x128xbf16>
    %cst_545 = arith.constant dense<0.000000e+00> : vector<16x2xf32>
    %916 = tpu.matmul %915, %901, %cst_545 {dimension_numbers = #tpu.dot_dimension_numbers<[1], [0], [0], [1], [0, 0, 1, 1], [], []>} : vector<16x128xbf16>, vector<128x2xbf16>, vector<16x2xf32> -> vector<16x2xf32>
    %917 = vector.broadcast %902 : vector<1x2xf32> to vector<16x2xf32>
    %918 = arith.addf %916, %917 : vector<16x2xf32>
    %c0_546 = arith.constant 0 : index
    %c0_547 = arith.constant 0 : index
    %919 = vector.load %arg50[%c0_546, %c0_547] : memref<16x2xf32, #tpu.memory_space<vmem>>, vector<16x2xf32>
    tpu.vector_store %arg50[%c0_546, %c0_547], %918 {strides = array<i32>} : memref<16x2xf32, #tpu.memory_space<vmem>>, vector<16x2xf32>,
    return
  }
}

</mosaic_0001>

<bundles_post_ra>
// kernel: learned_simulator_forward.1
= control target key start
LH: loop header
LB: loop body
LE: loop exit
PB: predicated region body
PF: predicated region fallthrough
CT: control target
= control target key end

     0   :  { %v13012_v0 = vmov 0.0   ;;  %s13013_s3 = smov 6   ;;  %vm13014_vm0 = vmmov 0   ;;  %s13015_s10 = smov 8   ;;  %vm278_vm1 = vcmask 1046528   ;;  %vm274_vm2 = vcmask 244736   ;;  %s14602_s0 = inlined_call_operand.smem [shape: u32[51], index: -1, kind: input, shape index: {}] }
   0x1   :  { %11375 = vmatprep.subr.bf16.mxu0 %v13012_v0  ;;  %s9197_s6 = sld [smem:[%s14602_s0 + %s13013_s3]]   ;;  %11379 = vmatprep.mubr.msk.bf16.mxu0 %vm13014_vm0, %v13012_v0  ;;  %vm611_vm3 = vcmask 1040384   ;;  %s13016_s14 = smov 14   ;;  %vm612_vm4 = vcmask 1041408   ;;  %v13017_v15 = vmov 65535   ;;  %vm604_vm5 = vcmask 23552  }
   0x2   :  { %s1_s9 = sld [smem:[%s14602_s0]]   ;;  %11383 = vmatprep.subr.bf16.mxu1 %v13012_v0  ;;  %11399 = vmatprep.mubr.msk.bf16.mxu1 %vm13014_vm0, %v13012_v0  ;;  %v613_v16 = vsel %vm611_vm3, 4294967295, %v13017_v15  ;;  %s13018_s18 = smov 10   ;;  %vm1019_vm8 = vcmask 130048  }
   0x3   :  { %s13084_s13 = sld [smem:[%s14602_s0 + %s13015_s10]]   ;;  %v614_v17 = vsel %vm612_vm4, %v613_v16, 0  ;;  %s13019_s22 = smov 7   ;;  %vm3881_vm4 = vcmask 15360  }
   0x4   :  { %s9205_s17 = sld [smem:[%s14602_s0 + %s13016_s14]]   ;;  %s13020_s26 = smov 1  }
   0x5   :  { %s13114_s21 = sld [smem:[%s14602_s0 + %s13018_s18]]   ;;  %s13021_s30 = smov 16  }
   0x6   :  { %s9198_s25 = sld [smem:[%s14602_s0 + %s13019_s22]]   ;;  %s13022_s4 = smov 9  }
   0x7   :  { %v12395_v1 = vld [vmem:[%s9197_s6] sm:$0xff]   ;;  %v12396_v2 = vld [vmem:[%s9197_s6 + $0x8] sm:$0x7f]   ;;  %s9192_s29 = sld [smem:[%s14602_s0 + %s13020_s26]]   ;;  %s13023_s8 = smov 15  }
   0x8   :  { %11376 = vmatpush3.bf16.msra.mxu0 %v12395_v1  ;;  %v207_v3 = vld [vmem:[%s1_s9] sm:$0xff]  ;;  %v208_v4 = vld [vmem:[%s1_s9 + $0x8] sm:$0xff]  ;;  %v280_v5 = vsel %vm278_vm1, %v12396_v2, 0  ;;  %s13138_s3 = sld [smem:[%s14602_s0 + %s13021_s30]]   ;;  %s13024_s12 = smov 18  }
   0x9   :  { %11377 = vmatprep.subr.bf16.mxu0 %v13012_v0  ;;  %v12397_v6 = vld [vmem:[%s13084_s13] sm:$0xff]   ;;  %v256_v7 = vpack.c.bf16 %v208_v4, %v207_v3  ;;  %v12398_v8 = vld [vmem:[%s13084_s13 + $0x8] sm:$0xff]   ;;  %v12399_v9 = vld [vmem:[%s13084_s13 + $0x10] sm:$0xff]   ;;  %s9200_s7 = sld [smem:[%s14602_s0 + %s13022_s4]]   ;;  %s13026_s16 = smov 3  }
   0xa   :  { %11384 = vmatpush3.bf16.msra.mxu1 %v12397_v6  ;;  %v12400_v10 = vld [vmem:[%s13084_s13 + $0x18] sm:$0xff]   ;;  %v12401_v11 = vld [vmem:[%s13084_s13 + $0x20] sm:$0xff]   ;;  %v12402_v12 = vld [vmem:[%s13084_s13 + $0x28] sm:$0xff]   ;;  %s9206_s11 = sld [smem:[%s14602_s0 + %s13023_s8]]   ;;  %s13027_s20 = smov 4  }
   0xb   :  { %11385 = vmatprep.subr.bf16.mxu1 %v13012_v0  ;;  %v12403_v13 = vld [vmem:[%s13084_s13 + $0x30] sm:$0xff]   ;;  %v12404_v14 = vld [vmem:[%s13084_s13 + $0x38] sm:$0xff]   ;;  %v560_v18 = vld [vmem:[%s9205_s17] sm:$0x3]  ;;  %s9209_s15 = sld [smem:[%s14602_s0 + %s13024_s12]]   ;;  %s13028_s24 = smov 11  }
   0xc   :  { %11378 = vmatpush3.bf16.msra.mxu0 %v280_v5  ;;  %v616_v19 = vand.u32 %v614_v17, %v560_v18  ;;  %v12405_v20 = vld [vmem:[%s13114_s21] sm:$0xff]   ;;  %v12406_v21 = vld [vmem:[%s13114_s21 + $0x8] sm:$0xff]   ;;  %v12407_v22 = vld [vmem:[%s13114_s21 + $0x10] sm:$0xff]   ;;  %s13162_s19 = sld [smem:[%s14602_s0 + %s13026_s16]]   ;;  %s13029_s28 = smov 17  }
   0xd   :  { %11403 = vmatprep.subr.bf16.mxu0 %v13012_v0  ;;  %v12408_v23 = vld [vmem:[%s13114_s21 + $0x18] sm:$0xff]   ;;  %v12409_v24 = vld [vmem:[%s13114_s21 + $0x20] sm:$0xff]   ;;  %v12410_v25 = vld [vmem:[%s13114_s21 + $0x28] sm:$0xff]   ;;  %s13169_s23 = sld [smem:[%s14602_s0 + %s13027_s20]]   ;;  %s13030_s2 = smov 19  }
   0xe   :  { %11386 = vmatpush3.bf16.msra.mxu1 %v12398_v8  ;;  %v9242_v26 = vld [vmem:[%s9198_s25] ss:$0 sm:$0xff]  ;;  %v210_v34 = vld [vmem:[%s9192_s29 + $0x8] sm:$0xff]  ;;  %v211_v39 = vld [vmem:[%s9192_s29 + $0x10] sm:$0xff]  ;;  %s9202_s27 = sld [smem:[%s14602_s0 + %s13028_s24]]   ;;  %s13031_s6 = smov 34  }
   0xf   :  { %11380 = vmatmul.mubr.msk.bf16.vlgmr.msra.gmra.mrb[0].mxu0 %vm274_vm2, %v256_v7  ;;  %11387 = vmatprep.subr.bf16.mxu1 %v13012_v0  ;;  %v209_v33 = vld [vmem:[%s9192_s29] sm:$0xff]  ;;  %v212_v40 = vld [vmem:[%s9192_s29 + $0x18] sm:$0xff]  ;;  %v12411_v42 = vld [vmem:[%s13114_s21 + $0x30] sm:$0xff]   ;;  %s9208_s1 = sld [smem:[%s14602_s0 + %s13029_s28]]   ;;  %s13032_s10 = smov 12   ;;  %vm1777_vm2 = vcmask 261120  }
  0x10   :  { %11419 = vmatprep.mubr.msk.bf16.mxu0 %vm13014_vm0, %v13012_v0  ;;  %11404 = vmatpush3.bf16.msra.mxu0 %v12405_v20  ;;  %v596_v37 = vpack.c.bf16 %v210_v34, %v209_v33  ;;  %v597_v41 = vpack.c.bf16 %v212_v40, %v211_v39  ;;  %v12412_v43 = vld [vmem:[%s13114_s21 + $0x38] sm:$0xff]   ;;  %v12413_v44 = vld [vmem:[%s13138_s3] sm:$0xff]   ;;  %v12414_v56 = vld [vmem:[%s13138_s3 + $0x8] sm:$0xff]   ;;  %s9210_s5 = sld [smem:[%s14602_s0 + %s13030_s2]]   ;;  %s13033_s14 = smov 13  }
  0x11   :  { %11405 = vmatprep.subr.bf16.mxu0 %v13012_v0  ;;  %v9246_v45 = vld [vmem:[%s9200_s7] ss:$0 sm:$0xff]  ;;  %v12415_v62 = vld [vmem:[%s13138_s3 + $0x10] sm:$0xff]   ;;  %v12416_v7 = vld [vmem:[%s13138_s3 + $0x18] sm:$0xff]   ;;  %s13224_s9 = sld [smem:[%s14602_s0 + %s13031_s6]]   ;;  %s13034_s18 = smov 20  }
  0x12   :  { %11388 = vmatpush3.bf16.msra.mxu1 %v12399_v9  ;;  %v9266_v54 = vld [vmem:[%s9206_s11] ss:$0 sm:$0xff]  ;;  %v12422_v15 = vld [vmem:[%s9209_s15 + $0x8] sm:$0xff]   ;;  %v12423_v16 = vld [vmem:[%s9209_s15 + $0x10] sm:$0xff]   ;;  %s9203_s13 = sld [smem:[%s14602_s0 + %s13032_s10]]   ;;  %s13035_s22 = smov 21  }
  0x13   :  { %11389 = vmatprep.subr.bf16.mxu1 %v13012_v0  ;;  %v12424_v17 = vld [vmem:[%s9209_s15 + $0x18] sm:$0xff]   ;;  %v12425_v18 = vld [vmem:[%s9209_s15 + $0x20] sm:$0xff]   ;;  %v12427_v20 = vld [vmem:[%s9209_s15 + $0x30] sm:$0xff]   ;;  %s9204_s17 = sld [smem:[%s14602_s0 + %s13033_s14]]   ;;  %s13036_s26 = smov 36  }
  0x14   :  { %11406 = vmatpush3.bf16.msra.mxu0 %v12406_v21  ;;  %v12428_v21 = vld [vmem:[%s9209_s15 + $0x38] sm:$0xff]   ;;  %s9211_s21 = sld [smem:[%s14602_s0 + %s13034_s18]]   ;;  %s13037_s30 = smov 38  }
  0x15   :  { %11407 = vmatprep.subr.bf16.mxu0 %v13012_v0  ;;  %s9212_s25 = sld [smem:[%s14602_s0 + %s13035_s22]]   ;;  %s13038_s4 = smov 35  }
  0x16   :  { %11390 = vmatpush3.bf16.msra.mxu1 %v12400_v10  ;;  %v12417_v10 = vld [vmem:[%s13138_s3 + $0x20] sm:$0xff]   ;;  %s13331_s29 = sld [smem:[%s14602_s0 + %s13036_s26]]   ;;  %s13039_s8 = smov 37  }
  0x17   :  { %11391 = vmatprep.subr.bf16.mxu1 %v13012_v0  ;;  %s13356_s7 = sld [smem:[%s14602_s0 + %s13038_s4]]   ;;  %s13046_s11 = smov 44  }
  0x18   :  { %11408 = vmatpush3.bf16.msra.mxu0 %v12407_v22  ;;  %v13025_v22 = vmov 0   ;;  %s13366_s12 = sld [smem:[%s14602_s0 + %s13039_s8]]   ;;  %s13049_s26 = smov 45  }
  0x19   :  { %11409 = vmatprep.subr.bf16.mxu0 %v13012_v0  ;;  %12394 = vset.pattern.permute.xlu1 %v13025_v22  ;;  %s13050_s2 = smov 47   ;;  %s13053_s22 = smov 22  }
  0x1a   :  { %11392 = vmatpush3.bf16.msra.mxu1 %v12401_v11  ;;  %v12418_v11 = vld [vmem:[%s13138_s3 + $0x28] sm:$0xff]   ;;  %12393 = vset.pattern.permute.xlu0 %v13025_v22  ;;  %s13558_s8 = sld [smem:[%s14602_s0 + %s13050_s2]]   ;;  %s13056_s18 = smov 23  }
  0x1b   :  { %11393 = vmatprep.subr.bf16.mxu1 %v13012_v0  ;;  %s13060_s2 = smov 30  }
  0x1c   :  { %11410 = vmatpush3.bf16.msra.mxu0 %v12408_v23  ;;  %v954_v23 = vld [vmem:[%s13162_s19 + $0x8] sm:$0xff] }
  0x1d   :  { %11411 = vmatprep.subr.bf16.mxu0 %v13012_v0  ;;  %961 = vperm.xlu1 %12394, %v954_v23  }
  0x1e   :  { %11394 = vmatpush3.bf16.msra.mxu1 %v12402_v12  ;;  %v12419_v12 = vld [vmem:[%s13138_s3 + $0x30] sm:$0xff]  }
  0x1f   :  { %11395 = vmatprep.subr.bf16.mxu1 %v13012_v0 }
  0x20   :  { %11412 = vmatpush3.bf16.msra.mxu0 %v12409_v24  ;;  %v955_v24 = vld [vmem:[%s13162_s19 + $0x10] sm:$0xff] }
  0x21   :  { %11413 = vmatprep.subr.bf16.mxu0 %v13012_v0  ;;  %964 = vperm.xlu1 %12394, %v955_v24  }
  0x22   :  { %11396 = vmatpush3.bf16.msra.mxu1 %v12403_v13  ;;  %v12420_v13 = vld [vmem:[%s13138_s3 + $0x38] sm:$0xff]   ;;  %s13345_s3 = sld [smem:[%s14602_s0 + %s13037_s30]]   ;;  %s13044_s30 = smov 41  }
  0x23   :  { %11397 = vmatprep.subr.bf16.mxu1 %v13012_v0  ;;  %s13423_s4 = sld [smem:[%s14602_s0 + %s13044_s30]]   ;;  %s13054_s30 = smov 24  }
  0x24   :  { %11414 = vmatpush3.bf16.msra.mxu0 %v12410_v25  ;;  %v956_v25 = vld [vmem:[%s13162_s19 + $0x18] sm:$0xff]  ;;  %s13750_s6 = sld [smem:[%s14602_s0 + %s13054_s30]]  }
  0x25   :  { %11415 = vmatprep.subr.bf16.mxu0 %v13012_v0  ;;  %967 = vperm.xlu1 %12394, %v956_v25  }
  0x26   :  { %11398 = vmatpush3.bf16.msra.mxu1 %v12404_v14  ;;  %v12421_v14 = vld [vmem:[%s9209_s15] sm:$0xff]  }
  0x27   :  { %11423 = vmatprep.subr.bf16.mxu1 %v616_v19 }
  0x28   :  { %11416 = vmatpush3.bf16.msra.mxu0 %v12411_v42 }
  0x29   :  { %11417 = vmatprep.subr.bf16.mxu0 %v13012_v0 }
  0x2c   :  { %11418 = vmatpush3.bf16.msra.mxu0 %v12412_v43 }
  0x2d   :  { %11429 = vmatprep.subr.bf16.mxu0 %v12413_v44 }
  0xe2   :  { %v316_v27 = vpop.f32.mrb[0].mxu0 }
  0xe3   :  { %v317_v28 = vadd.f32 %v9242_v26, %v316_v27  ;;  %v11381_v29 = vpop.f32.mrb[1].mxu0  ;;  %v980_v27 = vld [vmem:[%s13169_s23 + $0x8] sm:$0xff] }
  0xe4   :  { %v319_v30 = vpop.f32.mrb[2].mxu0  ;;  %v9255_v29 = vld [vmem:[%s9202_s27] ss:$0 sm:$0xff]  ;;  %s13729_s27 = sld [smem:[%s14602_s0 + %s13053_s22]]  }
  0xe5   :  { %v320_v31 = vadd.f32 %v9242_v26, %v319_v30  ;;  %v11382_v32 = vpop.f32.mrb[3].mxu0  ;;  %v323_v35 = vmax.f32 %v317_v28, 0.0  ;;  %v979_v26 = vld [vmem:[%s13169_s23] sm:$0xff]  ;;  %v981_v28 = vld [vmem:[%s13169_s23 + $0x10] sm:$0xff] }
  0xe6   :  { %984 = vperm.xlu1 %12394, %v979_v26  }
  0xe7   :  { %v324_v36 = vmax.f32 %v320_v31, 0.0 }
  0xe9   :  { %v325_v38 = vpack.c.bf16 %v324_v36, %v323_v35  ;;  %v953_v36 = vld [vmem:[%s13162_s19] sm:$0xff]  ;;  %s13059_s19 = smov 27  }
  0xea   :  { %987 = vperm.xlu1 %12394, %v980_v27   ;;  %s13819_s30 = sld [smem:[%s14602_s0 + %s13059_s19]]  }
  0xeb   :  { %11400 = vmatmul.mubr.bf16.vlgmr.msra.gmra.mrb[0].mxu1 %v325_v38 }
  0xec   :  { %11424 = vmatpush3.bf16.msra.mxu1 %v616_v19  ;;  %11425 = vmatprep.mubr.msk.bf16.mxu1 %vm604_vm5, %v596_v37  ;;  %v12426_v19 = vld [vmem:[%s9209_s15 + $0x28] sm:$0xff]   ;;  %v9269_v37 = vld [vmem:[%s9208_s1] ss:$0 sm:$0xff]  ;;  %s13473_s15 = sld [smem:[%s14602_s0 + %s13046_s11]]  }
  0xed   :  { %11449 = vmatprep.subr.bf16.mxu1 %v12421_v14  ;;  %s13525_s1 = sld [smem:[%s14602_s0 + %s13049_s26]]   ;;  %s13057_s26 = smov 25  }
  0xee   :  { %990 = vperm.xlu1 %12394, %v981_v28  }
  0xf3   :  { %11426 = vmatmul.mubr.msk.bf16.vlgmr.msra.gmra.mrb[4].mxu1 %vm604_vm5, %v597_v41 }
  0xf4   :  { %11450 = vmatpush3.bf16.msra.mxu1 %v12421_v14 }
  0xf5   :  { %11451 = vmatprep.subr.bf16.mxu1 %v12422_v15 }
  0xf8   :  { %11452 = vmatpush3.bf16.msra.mxu1 %v12422_v15 }
  0xf9   :  { %11453 = vmatprep.subr.bf16.mxu1 %v12423_v16 }
  0xfc   :  { %11454 = vmatpush3.bf16.msra.mxu1 %v12423_v16 }
  0xfd   :  { %11455 = vmatprep.subr.bf16.mxu1 %v12424_v17 }
 0x100   :  { %11456 = vmatpush3.bf16.msra.mxu1 %v12424_v17 }
 0x101   :  { %11457 = vmatprep.subr.bf16.mxu1 %v12425_v18 }
 0x104   :  { %11458 = vmatpush3.bf16.msra.mxu1 %v12425_v18 }
 0x105   :  { %11459 = vmatprep.subr.bf16.mxu1 %v12426_v19 }
 0x108   :  { %11460 = vmatpush3.bf16.msra.mxu1 %v12426_v19 }
 0x109   :  { %11461 = vmatprep.subr.bf16.mxu1 %v12427_v20 }
 0x10c   :  { %11462 = vmatpush3.bf16.msra.mxu1 %v12427_v20 }
 0x10d   :  { %11463 = vmatprep.subr.bf16.mxu1 %v12428_v21 }
 0x110   :  { %11464 = vmatpush3.bf16.msra.mxu1 %v12428_v21 }
 0x1be   :  { %v414_v46 = vpop.f32.mrb[0].mxu1 }
 0x1bf   :  { %v415_v47 = vadd.f32 %v9246_v45, %v414_v46  ;;  %v11401_v48 = vpop.f32.mrb[1].mxu1 }
 0x1c0   :  { %v417_v49 = vpop.f32.mrb[2].mxu1 }
 0x1c1   :  { %v418_v50 = vadd.f32 %v9246_v45, %v417_v49  ;;  %v11402_v51 = vpop.f32.mrb[3].mxu1  ;;  %v421_v52 = vmax.f32 %v415_v47, 0.0 }
 0x1c3   :  { %v422_v53 = vmax.f32 %v418_v50, 0.0 }
 0x1c5   :  { %v423_v55 = vpack.c.bf16 %v422_v53, %v421_v52  ;;  %v962_v52 = vpop.permute.xlu1 %961 }
 0x1c6   :  { %v11427_v57 = vpop.f32.mrb[4].mxu1 }
 0x1c7   :  { %11420 = vmatmul.mubr.bf16.vlgmr.msra.gmra.mrb[4].mxu0 %v423_v55  ;;  %v661_v58 = vadd.f32 %v11427_v57, %v9266_v54  ;;  %v652_v59 = vpop.f32.mrb[5].mxu1 }
 0x1c8   :  { %11430 = vmatpush3.bf16.msra.mxu0 %v12413_v44  ;;  %v653_v60 = vadd.f32 %v9266_v54, %v652_v59  ;;  %v11428_v61 = vpop.f32.mrb[6].mxu1 }
 0x1c9   :  { %11431 = vmatprep.subr.bf16.mxu0 %v12414_v56  ;;  %v669_v63 = vmax.f32 %v661_v58, 0.0  ;;  %v664_v1 = vadd.f32 %v11428_v61, %v9266_v54  ;;  %v655_v2 = vpop.f32.mrb[7].mxu1  ;;  %v13182_v53 = vpop.permute.xlu1 %964 }
 0x1ca   :  { %v667_v3 = vmax.f32 %v653_v60, 0.0  ;;  %v656_v4 = vadd.f32 %v9266_v54, %v655_v2  ;;  %v951_v54 = vlaneseq }
 0x1cb   :  { %v670_v5 = vmax.f32 %v664_v1, 0.0 }
 0x1cc   :  { %11432 = vmatpush3.bf16.msra.mxu0 %v12414_v56  ;;  %v668_v6 = vmax.f32 %v656_v4, 0.0  ;;  %v13187_v56 = vand.u32 127, %v951_v54 }
 0x1cd   :  { %11433 = vmatprep.subr.bf16.mxu0 %v12415_v62  ;;  %v672_v8 = vpack.c.bf16 %v670_v5, %v669_v63  ;;  %v13184_v55 = vpop.permute.xlu1 %967 }
 0x1ce   :  { %v671_v9 = vpack.c.bf16 %v668_v6, %v667_v3  ;;  %vm970_vm9 = vcmp.eq.s32.totalorder %v13187_v56, %v962_v52  ;;  %vm971_vm11 = vcmp.eq.s32.totalorder %v13187_v56, %v13182_v53  ;;  %vm972_vm12 = vcmp.eq.s32.totalorder %v13187_v56, %v13184_v55  ;;  %v12435_v52 = vld [vmem:[%s13224_s9 + $0x58] sm:$0xff]   ;;  %v12437_v55 = vld [vmem:[%s13224_s9 + $0x60] sm:$0xff]  }
 0x1cf   :  { %v12436_v53 = vld [vmem:[%s13224_s9 + $0x18] sm:$0xff]  }
 0x1d0   :  { %11434 = vmatpush3.bf16.msra.mxu0 %v12415_v62  ;;  %11445 = vmatprep.mubr.bf16.mxu0 %v671_v9 }
 0x1d1   :  { %11435 = vmatprep.subr.bf16.mxu0 %v12416_v7  ;;  %v985_v57 = vpop.permute.xlu1 %984 }
 0x1d2   :  { %vm995_vm6 = vcmp.eq.s32.totalorder %v13187_v56, %v985_v57  ;;  %v12439_v57 = vld [vmem:[%s13224_s9 + $0x68] sm:$0xff]  }
 0x1d3   :  { %v999_v58 = vsel %vm995_vm6, 1.0, %v13012_v0 }
 0x1d4   :  { %11436 = vmatpush3.bf16.msra.mxu0 %v12416_v7  ;;  %v974_v7 = vsel %vm970_vm9, 1.0, %v13012_v0 }
 0x1d5   :  { %11437 = vmatprep.subr.bf16.mxu0 %v12417_v10  ;;  %v988_v59 = vpop.permute.xlu1 %987 }
 0x1d6   :  { %vm996_vm7 = vcmp.eq.s32.totalorder %v13187_v56, %v988_v59  ;;  %v12441_v59 = vld [vmem:[%s13224_s9 + $0x70] sm:$0xff]  }
 0x1d7   :  { %v1000_v60 = vsel %vm996_vm7, 1.0, %v13012_v0 }
 0x1d8   :  { %11438 = vmatpush3.bf16.msra.mxu0 %v12417_v10  ;;  %v13193_v61 = vpack.c.bf16 %v1000_v60, %v999_v58  ;;  %v12440_v58 = vld [vmem:[%s13224_s9 + $0x28] sm:$0xff]  }
 0x1d9   :  { %11439 = vmatprep.subr.bf16.mxu0 %v12418_v11  ;;  %v991_v21 = vpop.permute.xlu1 %990 }
 0x1da   :  { %vm997_vm13 = vcmp.eq.s32.totalorder %v13187_v56, %v991_v21  ;;  %v12448_v21 = vld [vmem:[%s13224_s9 + $0x98] sm:$0xff]  }
 0x1dc   :  { %11440 = vmatpush3.bf16.msra.mxu0 %v12418_v11  ;;  %v982_v11 = vld [vmem:[%s13169_s23 + $0x18] sm:$0xff]  ;;  %s13794_s23 = sld [smem:[%s14602_s0 + %s13056_s18]]  }
 0x1dd   :  { %11441 = vmatprep.subr.bf16.mxu0 %v12419_v12 }
 0x1e0   :  { %11442 = vmatpush3.bf16.msra.mxu0 %v12419_v12  ;;  %v9278_v12 = vld [vmem:[%s9210_s5] ss:$0 sm:$0xff]  ;;  %s13045_s5 = smov 5  }
 0x1e1   :  { %11443 = vmatprep.subr.bf16.mxu0 %v12420_v13  ;;  %s9196_s10 = sld [smem:[%s14602_s0 + %s13045_s5]]  }
 0x1e2   :  { %s13806_s5 = sld [smem:[%s14602_s0 + %s13057_s26]]  }
 0x1e4   :  { %11444 = vmatpush3.bf16.msra.mxu0 %v12420_v13 }
 0x1e7   :  { %11446 = vmatmul.mubr.bf16.vlgmr.msra.gmra.mrb[8].mxu0 %v672_v8 }
 0x29a   :  { %v512_v30 = vpop.f32.mrb[4].mxu0 }
 0x29b   :  { %v513_v31 = vadd.f32 %v9255_v29, %v512_v30  ;;  %v11421_v32 = vpop.f32.mrb[5].mxu0  ;;  %v976_v30 = vsel %vm972_vm12, 1.0, %v13012_v0 }
 0x29c   :  { %v515_v33 = vpop.f32.mrb[6].mxu0 }
 0x29d   :  { %521 = vadd.xlane.f32.xlu0 %v513_v31  ;;  %v11422_v34 = vpop.f32.mrb[7].mxu0  ;;  %v516_v35 = vadd.f32 %v9255_v29, %v515_v33  ;;  %v975_v29 = vsel %vm971_vm11, 1.0, %v13012_v0 }
 0x29e   :  { %v9264_v34 = vld [vmem:[%s9203_s13] ss:$0 sm:$0xff]  ;;  %s13040_s13 = smov 39  }
 0x29f   :  { %s13372_s16 = sld [smem:[%s14602_s0 + %s13040_s13]]  }
 0x2a0   :  { %s9221_s13 = sld [smem:[%s14602_s0 + %s13060_s2]]   ;;  %s13062_s2 = smov 32  }
 0x2a1   :  { %523 = vadd.xlane.f32.xlu0 %v516_v35 }
 0x2b7   :  { %958 = vperm.xlu0 %12393, %v953_v36  }
 0x2ba   :  { %v11447_v38 = vpop.f32.mrb[8].mxu0 }
 0x2bb   :  { %v770_v39 = vadd.f32 %v11447_v38, %v9269_v37  ;;  %v761_v40 = vpop.f32.mrb[9].mxu0 }
 0x2bc   :  { %v762_v41 = vadd.f32 %v9269_v37, %v761_v40  ;;  %v11448_v42 = vpop.f32.mrb[10].mxu0 }
 0x2bd   :  { %v773_v43 = vadd.f32 %v11448_v42, %v9269_v37  ;;  %v764_v44 = vpop.f32.mrb[11].mxu0  ;;  %v778_v46 = vmax.f32 %v770_v39, 0.0 }
 0x2be   :  { %v765_v45 = vadd.f32 %v9269_v37, %v764_v44  ;;  %v776_v48 = vmax.f32 %v762_v41, 0.0  ;;  %v9265_v37 = vld [vmem:[%s9204_s17] ss:$0 sm:$0xff]  ;;  %s13041_s17 = smov 2  }
 0x2bf   :  { %v779_v47 = vmax.f32 %v773_v43, 0.0  ;;  %v12429_v43 = vld [vmem:[%s13224_s9 + $0x40] sm:$0xff]   ;;  %s9193_s20 = sld [smem:[%s14602_s0 + %s13041_s17]]   ;;  %s13047_s17 = smov 46  }
 0x2c0   :  { %v777_v49 = vmax.f32 %v765_v45, 0.0  ;;  %v12430_v45 = vld [vmem:[%s13224_s9] sm:$0xff]  }
 0x2c1   :  { %v781_v50 = vpack.c.bf16 %v779_v47, %v778_v46  ;;  %v12431_v46 = vld [vmem:[%s13224_s9 + $0x48] sm:$0xff]   ;;  %v13257_v47 = vpack.c.bf16 %v976_v30, %v975_v29 }
 0x2c2   :  { %v780_v51 = vpack.c.bf16 %v777_v49, %v776_v48  ;;  %v12432_v49 = vld [vmem:[%s13224_s9 + $0x8] sm:$0xff]  }
 0x2c4   :  { %11465 = vmatprep.mubr.bf16.mxu1 %v780_v51  ;;  %v12434_v51 = vld [vmem:[%s13224_s9 + $0x10] sm:$0xff]  }
 0x2c5   :  { %11466 = vmatmul.mubr.bf16.vlgmr.msra.gmra.mrb[8].mxu1 %v781_v50  ;;  %v12433_v50 = vld [vmem:[%s13224_s9 + $0x50] sm:$0xff]  }
 0x2c6   :  { %11477 = vmatprep.mubr.msk.bf16.mxu1 %vm1019_vm8, %v13193_v61 }
 0x32a   :  { %v522_v62 = vpop.xlane.xlu0 %521 }
 0x32b   :  { %v526_v63 = vmul.f32 0.0078125, %v522_v62 }
 0x32d   :  { %v528_v1 = vsub.f32 %v513_v31, %v526_v63  ;;  %v1001_v31 = vsel %vm997_vm13, 1.0, %v13012_v0 }
 0x32e   :  { %v524_v2 = vpop.xlane.xlu0 %523 }
 0x32f   :  { %v527_v3 = vmul.f32 0.0078125, %v524_v2  ;;  %v530_v4 = vmul.f32 %v528_v1, %v528_v1 }
 0x331   :  { %v529_v5 = vsub.f32 %v516_v35, %v527_v3  ;;  %532 = vadd.xlane.f32.xlu1 %v530_v4 }
 0x333   :  { %v531_v6 = vmul.f32 %v529_v5, %v529_v5 }
 0x335   :  { %534 = vadd.xlane.f32.xlu1 %v531_v6 }
 0x336   :  { %v959_v8 = vpop.permute.xlu0 %958 }
 0x337   :  { %vm969_vm10 = vcmp.eq.s32.totalorder %v13187_v56, %v959_v8 }
 0x338   :  { %v973_v9 = vsel %vm969_vm10, 1.0, %v13012_v0 }
 0x339   :  { %v13201_v10 = vpack.c.bf16 %v974_v7, %v973_v9 }
 0x33b   :  { %11471 = vmatprep.mubr.msk.bf16.mxu0 %vm1019_vm8, %v13201_v10 }
 0x346   :  { %993 = vperm.xlu1 %12394, %v982_v11  }
 0x398   :  { %v11467_v13 = vpop.f32.mrb[8].mxu1 }
 0x399   :  { %v870_v14 = vpop.f32.mrb[9].mxu1  ;;  %v13217_v20 = vadd.f32 %v11467_v13, %v9278_v12 }
 0x39a   :  { %v13209_v15 = vadd.f32 %v9278_v12, %v870_v14  ;;  %v11468_v16 = vpop.f32.mrb[10].mxu1  ;;  %v12443_v14 = vld [vmem:[%s13224_s9 + $0x78] sm:$0xff]  }
 0x39b   :  { %v873_v17 = vpop.f32.mrb[11].mxu1  ;;  %v13214_v19 = vadd.f32 %v11468_v16, %v9278_v12 }
 0x39c   :  { %v13211_v18 = vadd.f32 %v9278_v12, %v873_v17  ;;  %887 = vadd.xlane.f32.xlu1 %v13209_v15  ;;  %v12442_v12 = vld [vmem:[%s13224_s9 + $0x30] sm:$0xff]   ;;  %v12444_v17 = vld [vmem:[%s13224_s9 + $0x38] sm:$0xff]  }
 0x39e   :  { %889 = vadd.xlane.f32.xlu0 %v13211_v18 }
 0x3a0   :  { %893 = vadd.xlane.f32.xlu1 %v13214_v19 }
 0x3a2   :  { %891 = vadd.xlane.f32.xlu0 %v13217_v20 }
 0x3be   :  { %v533_v22 = vpop.xlane.xlu1 %532 }
 0x3bf   :  { %v536_v23 = vmul.f32 0.0078125, %v533_v22  ;;  %v12449_v22 = vld [vmem:[%s13224_s9 + $0xa0] sm:$0xff]  }
 0x3c1   :  { %v538_v24 = vadd.f32 1e-05, %v536_v23  ;;  %v12450_v23 = vld [vmem:[%s13224_s9 + $0xa8] sm:$0xff]  }
 0x3c2   :  { %v535_v25 = vpop.xlane.xlu1 %534 }
 0x3c3   :  { %12893 = vrsqrt.f32 %v538_v24  ;;  %v537_v26 = vmul.f32 0.0078125, %v535_v25  ;;  %v12451_v24 = vld [vmem:[%s13224_s9 + $0xb0] sm:$0xff]   ;;  %v12452_v25 = vld [vmem:[%s13224_s9 + $0xb8] sm:$0xff]  }
 0x3c5   :  { %v539_v27 = vadd.f32 1e-05, %v537_v26 }
 0x3c6   :  { %v994_v28 = vpop.permute.xlu1 %993 }
 0x3c7   :  { %12895 = vrsqrt.f32 %v539_v27  ;;  %vm998_vm14 = vcmp.eq.s32.totalorder %v13187_v56, %v994_v28  ;;  %v12438_v56 = vld [vmem:[%s13224_s9 + $0x20] sm:$0xff]  }
 0x3c8   :  { %v1002_v32 = vsel %vm998_vm14, 1.0, %v13012_v0 }
 0x3c9   :  { %v13259_v48 = vpack.c.bf16 %v1002_v32, %v1001_v31 }
 0x3cd   :  { %v12894_v33 = vpop.eup %12893 }
 0x3ce   :  { %v542_v35 = vmul.f32 %v12894_v33, %v528_v1 }
 0x3d0   :  { %v550_v38 = vmul.f32 %v9264_v34, %v542_v35 }
 0x3d1   :  { %v12896_v36 = vpop.eup %12895 }
 0x3d2   :  { %v543_v39 = vmul.f32 %v12896_v36, %v529_v5  ;;  %v13242_v41 = vadd.f32 %v9265_v37, %v550_v38 }
 0x3d4   :  { %v551_v40 = vmul.f32 %v9264_v34, %v543_v39 }
 0x3d6   :  { %v13244_v42 = vadd.f32 %v9265_v37, %v551_v40 }
 0x3d8   :  { %v13249_v44 = vpack.c.bf16 %v13244_v42, %v13242_v41 }
 0x3da   :  { %11469 = vmatprep.subr.bf16.mxu0 %v13249_v44  ;;  %11475 = vmatprep.subr.bf16.mxu1 %v13249_v44 }
 0x3db   :  { %11470 = vmatpush3.bf16.msra.mxu0 %v13249_v44  ;;  %11476 = vmatpush3.bf16.msra.mxu1 %v13249_v44 }
 0x3dc   :  { %10673 = vmatprep.subr.bf16.mxu0 %v12429_v43 }
 0x3de   :  { %11472 = vmatmul.mubr.msk.bf16.vlgmr.msra.gmra.mrb[12].mxu0 %vm1019_vm8, %v13257_v47  ;;  %11478 = vmatmul.mubr.msk.bf16.vlgmr.msra.gmra.mrb[12].mxu1 %vm1019_vm8, %v13259_v48 }
 0x3df   :  { %10674 = vmatpush3.bf16.msra.mxu0 %v12430_v45 }
 0x3e0   :  { %10675 = vmatprep.subr.bf16.mxu0 %v12431_v46 }
 0x3e3   :  { %10676 = vmatpush3.bf16.msra.mxu0 %v12432_v49 }
 0x3e4   :  { %10677 = vmatprep.subr.bf16.mxu0 %v12433_v50 }
 0x3e7   :  { %10678 = vmatpush3.bf16.msra.mxu0 %v12434_v51 }
 0x3e8   :  { %10679 = vmatprep.subr.bf16.mxu0 %v12435_v52 }
 0x3eb   :  { %10680 = vmatpush3.bf16.msra.mxu0 %v12436_v53 }
 0x3ec   :  { %10681 = vmatprep.subr.bf16.mxu0 %v12437_v55 }
 0x3ef   :  { %10682 = vmatpush3.bf16.msra.mxu0 %v12438_v56 }
 0x3f0   :  { %10683 = vmatprep.subr.bf16.mxu0 %v12439_v57  ;;  %v9287_v57 = vld [vmem:[%s9211_s21] ss:$0 sm:$0xff]  ;;  %s13042_s21 = smov 42  }
 0x3f1   :  { %s13397_s24 = sld [smem:[%s14602_s0 + %s13042_s21]]   ;;  %s13048_s21 = smov 43  }
 0x3f3   :  { %10684 = vmatpush3.bf16.msra.mxu0 %v12440_v58 }
 0x3f4   :  { %10685 = vmatprep.subr.bf16.mxu0 %v12441_v59 }
 0x3f7   :  { %10686 = vmatpush3.bf16.msra.mxu0 %v12442_v12 }
 0x3f8   :  { %10687 = vmatprep.subr.bf16.mxu0 %v12443_v14 }
 0x3fb   :  { %10688 = vmatpush3.bf16.msra.mxu0 %v12444_v17  ;;  %v12455_v17 = vld [vmem:[%s13331_s29 + $0x10] sm:$0xff]  }
 0x429   :  { %v888_v60 = vpop.xlane.xlu1 %887 }
 0x42a   :  { %v895_v62 = vmul.f32 0.0078125, %v888_v60 }
 0x42b   :  { %v890_v63 = vpop.xlane.xlu0 %889 }
 0x42c   :  { %v13276_v1 = vsub.f32 %v13209_v15, %v895_v62  ;;  %v896_v2 = vmul.f32 0.0078125, %v890_v63  ;;  %v9288_v63 = vld [vmem:[%s9212_s25] ss:$0 sm:$0xff]  ;;  %s13043_s25 = smov 40  }
 0x42d   :  { %v894_v3 = vpop.xlane.xlu1 %893  ;;  %s13418_s28 = sld [smem:[%s14602_s0 + %s13043_s25]]  }
 0x42e   :  { %v13279_v4 = vsub.f32 %v13211_v18, %v896_v2  ;;  %v898_v5 = vmul.f32 0.0078125, %v894_v3  ;;  %v903_v6 = vmul.f32 %v13276_v1, %v13276_v1  ;;  %v12445_v18 = vld [vmem:[%s13224_s9 + $0x80] sm:$0xff]   ;;  %s13513_s25 = sld [smem:[%s14602_s0 + %s13048_s21]]  }
 0x42f   :  { %v892_v7 = vpop.xlane.xlu0 %891  ;;  %11481 = vmatprep.subr.bf16.mxu1 %v12445_v18 }
 0x430   :  { %v13284_v8 = vsub.f32 %v13214_v19, %v898_v5  ;;  %v897_v9 = vmul.f32 0.0078125, %v892_v7  ;;  %907 = vadd.xlane.f32.xlu0 %v903_v6  ;;  %v904_v11 = vmul.f32 %v13279_v4, %v13279_v4  ;;  %11482 = vmatpush3.bf16.msra.mxu1 %v12445_v18  ;;  %v12446_v19 = vld [vmem:[%s13224_s9 + $0x88] sm:$0xff]   ;;  %v12456_v18 = vld [vmem:[%s13331_s29 + $0x18] sm:$0xff]  }
 0x431   :  { %11483 = vmatprep.subr.bf16.mxu1 %v12446_v19 }
 0x432   :  { %v13290_v13 = vsub.f32 %v13217_v20, %v897_v9  ;;  %909 = vadd.xlane.f32.xlu1 %v904_v11  ;;  %v906_v16 = vmul.f32 %v13284_v8, %v13284_v8  ;;  %v12447_v20 = vld [vmem:[%s13224_s9 + $0x90] sm:$0xff]  }
 0x434   :  { %v905_v15 = vmul.f32 %v13290_v13, %v13290_v13  ;;  %11484 = vmatpush3.bf16.msra.mxu1 %v12446_v19  ;;  %v12457_v19 = vld [vmem:[%s13331_s29 + $0x20] sm:$0xff]  }
 0x435   :  { %11485 = vmatprep.subr.bf16.mxu1 %v12447_v20 }
 0x436   :  { %911 = vadd.xlane.f32.xlu0 %v905_v15  ;;  %913 = vadd.xlane.f32.xlu1 %v906_v16 }
 0x438   :  { %11486 = vmatpush3.bf16.msra.mxu1 %v12447_v20  ;;  %v12458_v20 = vld [vmem:[%s13331_s29 + $0x28] sm:$0xff]  }
 0x439   :  { %11487 = vmatprep.subr.bf16.mxu1 %v12448_v21 }
 0x43c   :  { %11488 = vmatpush3.bf16.msra.mxu1 %v12448_v21  ;;  %v12459_v21 = vld [vmem:[%s13331_s29 + $0x30] sm:$0xff]  }
 0x43d   :  { %11489 = vmatprep.subr.bf16.mxu1 %v12449_v22 }
 0x440   :  { %11490 = vmatpush3.bf16.msra.mxu1 %v12449_v22  ;;  %v12460_v22 = vld [vmem:[%s13331_s29 + $0x38] sm:$0xff]  }
 0x441   :  { %11491 = vmatprep.subr.bf16.mxu1 %v12450_v23 }
 0x444   :  { %11492 = vmatpush3.bf16.msra.mxu1 %v12450_v23  ;;  %v12461_v23 = vld [vmem:[%s13345_s3] sm:$0xff]  }
 0x445   :  { %11493 = vmatprep.subr.bf16.mxu1 %v12451_v24 }
 0x448   :  { %11494 = vmatpush3.bf16.msra.mxu1 %v12451_v24  ;;  %v12462_v24 = vld [vmem:[%s13345_s3 + $0x8] sm:$0xff]  }
 0x449   :  { %11495 = vmatprep.subr.bf16.mxu1 %v12452_v25 }
 0x44c   :  { %11496 = vmatpush3.bf16.msra.mxu1 %v12452_v25  ;;  %v12463_v25 = vld [vmem:[%s13345_s3 + $0x10] sm:$0xff]  }
 0x44d   :  { %11521 = vmatprep.subr.bf16.mxu1 %v12461_v23 }
 0x4b1   :  { %v11473_v26 = vpop.f32.mrb[12].mxu0  ;;  %v11479_v27 = vpop.f32.mrb[12].mxu1 }
 0x4b2   :  { %v1060_v28 = vpop.f32.mrb[13].mxu0  ;;  %v1115_v29 = vpop.f32.mrb[13].mxu1 }
 0x4b3   :  { %v11474_v30 = vpop.f32.mrb[14].mxu0  ;;  %v11480_v31 = vpop.f32.mrb[14].mxu1 }
 0x4b4   :  { %v1217_v32 = vpack.c.bf16 %v11474_v30, %v11473_v26  ;;  %v1216_v33 = vpack.c.bf16 %v11480_v31, %v11479_v27  ;;  %v1063_v34 = vpop.f32.mrb[15].mxu0  ;;  %v1118_v35 = vpop.f32.mrb[15].mxu1  ;;  %v12464_v26 = vld [vmem:[%s13345_s3 + $0x18] sm:$0xff]   ;;  %v12465_v27 = vld [vmem:[%s13345_s3 + $0x20] sm:$0xff]  }
 0x4b5   :  { %v1214_v36 = vpack.c.bf16 %v1063_v34, %v1060_v28  ;;  %v1213_v37 = vpack.c.bf16 %v1118_v35, %v1115_v29  ;;  %v12466_v28 = vld [vmem:[%s13345_s3 + $0x28] sm:$0xff]  }
 0x4b7   :  { %1401 = vmatprep.mubr.bf16.mxu0 %v1214_v36 }
 0x4b8   :  { %1402 = vmatmul.mubr.bf16.vlgmr.msra.gmra.mrb[16].mxu0 %v1213_v37 }
 0x4b9   :  { %1409 = vmatprep.mubr.bf16.mxu0 %v1217_v32 }
 0x4bd   :  { %v908_v38 = vpop.xlane.xlu0 %907 }
 0x4be   :  { %v915_v39 = vmul.f32 0.0078125, %v908_v38 }
 0x4bf   :  { %v910_v40 = vpop.xlane.xlu1 %909 }
 0x4c0   :  { %v919_v43 = vadd.f32 1e-05, %v915_v39  ;;  %v916_v45 = vmul.f32 0.0078125, %v910_v40  ;;  %1410 = vmatmul.mubr.bf16.gmra.mrb[20].mxu0 %v1216_v33 }
 0x4c2   :  { %12897 = vrsqrt.f32 %v919_v43  ;;  %v920_v46 = vadd.f32 1e-05, %v916_v45  ;;  %v9294_v43 = vld [vmem:[%s13356_s7] ss:$0 sm:$0xff] }
 0x4c3   :  { %v912_v49 = vpop.xlane.xlu0 %911  ;;  %v914_v50 = vpop.xlane.xlu1 %913 }
 0x4c4   :  { %12899 = vrsqrt.f32 %v920_v46  ;;  %v917_v51 = vmul.f32 0.0078125, %v912_v49  ;;  %v918_v52 = vmul.f32 0.0078125, %v914_v50 }
 0x4c6   :  { %v921_v53 = vadd.f32 1e-05, %v917_v51  ;;  %v922_v55 = vadd.f32 1e-05, %v918_v52 }
 0x4c8   :  { %12901 = vrsqrt.f32 %v921_v53 }
 0x4c9   :  { %12903 = vrsqrt.f32 %v922_v55 }
 0x4cc   :  { %v12898_v56 = vpop.eup %12897 }
 0x4cd   :  { %v927_v58 = vmul.f32 %v12898_v56, %v13276_v1 }
 0x4ce   :  { %v12900_v59 = vpop.eup %12899 }
 0x4cf   :  { %v928_v60 = vmul.f32 %v12900_v59, %v13279_v4  ;;  %v937_v62 = vmul.f32 %v9287_v57, %v927_v58 }
 0x4d1   :  { %v938_v2 = vmul.f32 %v9287_v57, %v928_v60  ;;  %v13315_v7 = vadd.f32 %v9288_v63, %v937_v62 }
 0x4d2   :  { %v12902_v3 = vpop.eup %12901 }
 0x4d3   :  { %v12904_v5 = vpop.eup %12903  ;;  %v929_v6 = vmul.f32 %v12902_v3, %v13290_v13  ;;  %v13317_v9 = vadd.f32 %v9288_v63, %v938_v2  ;;  %v12454_v13 = vld [vmem:[%s13331_s29 + $0x8] sm:$0xff]  }
 0x4d4   :  { %v930_v11 = vmul.f32 %v12904_v5, %v13284_v8  ;;  %v12453_v8 = vld [vmem:[%s13331_s29] sm:$0xff]  }
 0x4d5   :  { %v1215_v12 = vpack.c.bf16 %v13317_v9, %v13315_v7  ;;  %v939_v1 = vmul.f32 %v9287_v57, %v929_v6  ;;  %11501 = vmatprep.subr.bf16.mxu0 %v12453_v8  ;;  %v12467_v6 = vld [vmem:[%s13345_s3 + $0x30] sm:$0xff]  }
 0x4d6   :  { %v940_v14 = vmul.f32 %v9287_v57, %v930_v11  ;;  %11502 = vmatpush3.bf16.msra.mxu0 %v12453_v8  ;;  %v12468_v11 = vld [vmem:[%s13345_s3 + $0x38] sm:$0xff]  }
 0x4d7   :  { %11497 = vmatprep.mubr.bf16.mxu1 %v1215_v12  ;;  %v13322_v4 = vadd.f32 %v9288_v63, %v939_v1  ;;  %11503 = vmatprep.subr.bf16.mxu0 %v12454_v13  ;;  %v9319_v12 = vld [vmem:[%s13366_s12] ss:$0 sm:$0xff] }
 0x4d8   :  { %v13324_v15 = vadd.f32 %v9288_v63, %v940_v14 }
 0x4da   :  { %v1218_v16 = vpack.c.bf16 %v13324_v15, %v13322_v4  ;;  %11504 = vmatpush3.bf16.msra.mxu0 %v12454_v13 }
 0x4db   :  { %11505 = vmatprep.subr.bf16.mxu0 %v12455_v17 }
 0x4dc   :  { %11498 = vmatmul.mubr.bf16.vlgmr.msra.gmra.mrb[16].mxu1 %v1218_v16 }
 0x4dd   :  { %11522 = vmatpush3.bf16.msra.mxu1 %v12461_v23 }
 0x4de   :  { %11506 = vmatpush3.bf16.msra.mxu0 %v12455_v17  ;;  %11523 = vmatprep.subr.bf16.mxu1 %v12462_v24 }
 0x4df   :  { %11507 = vmatprep.subr.bf16.mxu0 %v12456_v18 }
 0x4e1   :  { %11524 = vmatpush3.bf16.msra.mxu1 %v12462_v24 }
 0x4e2   :  { %11508 = vmatpush3.bf16.msra.mxu0 %v12456_v18  ;;  %11525 = vmatprep.subr.bf16.mxu1 %v12463_v25 }
 0x4e3   :  { %11509 = vmatprep.subr.bf16.mxu0 %v12457_v19 }
 0x4e5   :  { %11526 = vmatpush3.bf16.msra.mxu1 %v12463_v25 }
 0x4e6   :  { %11510 = vmatpush3.bf16.msra.mxu0 %v12457_v19  ;;  %11527 = vmatprep.subr.bf16.mxu1 %v12464_v26 }
 0x4e7   :  { %11511 = vmatprep.subr.bf16.mxu0 %v12458_v20 }
 0x4e9   :  { %11528 = vmatpush3.bf16.msra.mxu1 %v12464_v26  ;;  %v9328_v26 = vld [vmem:[%s13372_s16] ss:$0 sm:$0xff] }
 0x4ea   :  { %11512 = vmatpush3.bf16.msra.mxu0 %v12458_v20  ;;  %11529 = vmatprep.subr.bf16.mxu1 %v12465_v27 }
 0x4eb   :  { %11513 = vmatprep.subr.bf16.mxu0 %v12459_v21 }
 0x4ed   :  { %11530 = vmatpush3.bf16.msra.mxu1 %v12465_v27 }
 0x4ee   :  { %11514 = vmatpush3.bf16.msra.mxu0 %v12459_v21  ;;  %11531 = vmatprep.subr.bf16.mxu1 %v12466_v28 }
 0x4ef   :  { %11515 = vmatprep.subr.bf16.mxu0 %v12460_v22 }
 0x4f1   :  { %11532 = vmatpush3.bf16.msra.mxu1 %v12466_v28 }
 0x4f2   :  { %11516 = vmatpush3.bf16.msra.mxu0 %v12460_v22  ;;  %11533 = vmatprep.subr.bf16.mxu1 %v12467_v6 }
 0x4f3   :  { %11541 = vmatprep.subr.bf16.mxu0 %v13012_v0 }
 0x4f5   :  { %11534 = vmatpush3.bf16.msra.mxu1 %v12467_v6  ;;  %v12474_v6 = vld [vmem:[%s13397_s24 + $0x10] sm:$0xff]  }
 0x4f6   :  { %11535 = vmatprep.subr.bf16.mxu1 %v12468_v11 }
 0x4f9   :  { %11536 = vmatpush3.bf16.msra.mxu1 %v12468_v11  ;;  %v12475_v11 = vld [vmem:[%s13397_s24 + $0x58] sm:$0xff]  }
 0x58b   :  { %v10689_v29 = vpop.f32.mrb[16].mxu0 }
 0x58c   :  { %v10690_v30 = vpop.f32.mrb[17].mxu0 }
 0x58d   :  { %v10691_v31 = vadd.f32 %v10690_v30, %v10689_v29  ;;  %v10692_v32 = vpop.f32.mrb[18].mxu0 }
 0x58e   :  { %v10693_v33 = vpop.f32.mrb[19].mxu0 }
 0x58f   :  { %v10694_v34 = vadd.f32 %v10693_v33, %v10692_v32  ;;  %v1404_v49 = vadd.f32 %v10691_v31, %v9294_v43 }
 0x591   :  { %v1407_v56 = vadd.f32 %v10694_v34, %v9294_v43 }
 0x593   :  { %v10695_v35 = vpop.f32.mrb[20].mxu0 }
 0x594   :  { %v10696_v36 = vpop.f32.mrb[21].mxu0 }
 0x595   :  { %v10697_v37 = vadd.f32 %v10696_v36, %v10695_v35  ;;  %v10698_v38 = vpop.f32.mrb[22].mxu0  ;;  %v214_v35 = vld [vmem:[%s9193_s20 + $0x8] sm:$0xff] }
 0x596   :  { %v10699_v39 = vpop.f32.mrb[23].mxu0 }
 0x597   :  { %v10700_v40 = vadd.f32 %v10699_v39, %v10698_v38  ;;  %v1412_v45 = vadd.f32 %v10697_v37, %v9294_v43 }
 0x599   :  { %v1415_v52 = vadd.f32 %v10700_v40, %v9294_v43 }
 0x5af   :  { %v11499_v46 = vpop.f32.mrb[16].mxu1 }
 0x5b0   :  { %v1461_v50 = vadd.f32 %v11499_v46, %v1412_v45  ;;  %v1452_v51 = vpop.f32.mrb[17].mxu1 }
 0x5b1   :  { %v1453_v53 = vadd.f32 %v1452_v51, %v1404_v49  ;;  %v11500_v55 = vpop.f32.mrb[18].mxu1 }
 0x5b2   :  { %v1464_v57 = vadd.f32 %v11500_v55, %v1415_v52  ;;  %v1455_v58 = vpop.f32.mrb[19].mxu1  ;;  %v1469_v60 = vmax.f32 %v1461_v50, 0.0 }
 0x5b3   :  { %v1456_v59 = vadd.f32 %v1455_v58, %v1407_v56  ;;  %v1467_v63 = vmax.f32 %v1453_v53, 0.0  ;;  %v215_v58 = vld [vmem:[%s9193_s20 + $0x10] sm:$0xff] }
 0x5b4   :  { %v1470_v62 = vmax.f32 %v1464_v57, 0.0 }
 0x5b5   :  { %v1468_v2 = vmax.f32 %v1456_v59, 0.0  ;;  %v213_v59 = vld [vmem:[%s9193_s20] sm:$0xff] }
 0x5b6   :  { %v1472_v3 = vpack.c.bf16 %v1470_v62, %v1469_v60  ;;  %v216_v60 = vld [vmem:[%s9193_s20 + $0x18] sm:$0xff]  ;;  %v12469_v62 = vld [vmem:[%s13397_s24 + $0x40] sm:$0xff]   ;;  %s13496_s20 = sld [smem:[%s14602_s0 + %s13047_s17]]   ;;  %s13052_s17 = smov 49  }
 0x5b7   :  { %v1471_v5 = vpack.c.bf16 %v1468_v2, %v1467_v63  ;;  %v12470_v63 = vld [vmem:[%s13397_s24] sm:$0xff]   ;;  %10734 = vmatprep.subr.bf16.mxu1 %v12469_v62  ;;  %v12471_v2 = vld [vmem:[%s13397_s24 + $0x48] sm:$0xff]   ;;  %s13577_s21 = sld [smem:[%s14602_s0 + %s13052_s17]]  }
 0x5b9   :  { %11517 = vmatprep.mubr.bf16.mxu0 %v1471_v5  ;;  %v12473_v5 = vld [vmem:[%s13397_s24 + $0x50] sm:$0xff]  }
 0x5ba   :  { %11518 = vmatmul.mubr.bf16.vlgmr.msra.gmra.mrb[24].mxu0 %v1472_v3  ;;  %v12472_v3 = vld [vmem:[%s13397_s24 + $0x8] sm:$0xff]  }
 0x5bb   :  { %11545 = vmatprep.mubr.msk.bf16.mxu0 %vm13014_vm0, %v13012_v0 }
 0x68d   :  { %v11519_v1 = vpop.f32.mrb[24].mxu0 }
 0x68e   :  { %v1570_v14 = vadd.f32 %v11519_v1, %v9319_v12  ;;  %v1561_v16 = vpop.f32.mrb[25].mxu0  ;;  %v12477_v1 = vld [vmem:[%s13397_s24 + $0x60] sm:$0xff]  }
 0x68f   :  { %v1562_v8 = vadd.f32 %v9319_v12, %v1561_v16  ;;  %v11520_v13 = vpop.f32.mrb[26].mxu0  ;;  %v12479_v16 = vld [vmem:[%s13397_s24 + $0x68] sm:$0xff]  }
 0x690   :  { %v1573_v17 = vadd.f32 %v11520_v13, %v9319_v12  ;;  %v1564_v18 = vpop.f32.mrb[27].mxu0  ;;  %v1578_v20 = vmax.f32 %v1570_v14, 0.0  ;;  %v12478_v14 = vld [vmem:[%s13397_s24 + $0x20] sm:$0xff]   ;;  %v12481_v13 = vld [vmem:[%s13397_s24 + $0x70] sm:$0xff]  }
 0x691   :  { %v1565_v19 = vadd.f32 %v9319_v12, %v1564_v18  ;;  %v1576_v22 = vmax.f32 %v1562_v8, 0.0  ;;  %v12476_v12 = vld [vmem:[%s13397_s24 + $0x18] sm:$0xff]   ;;  %v12480_v8 = vld [vmem:[%s13397_s24 + $0x28] sm:$0xff]  }
 0x692   :  { %v1579_v21 = vmax.f32 %v1573_v17, 0.0  ;;  %v12482_v17 = vld [vmem:[%s13397_s24 + $0x30] sm:$0xff]  }
 0x693   :  { %v1577_v23 = vmax.f32 %v1565_v19, 0.0 }
 0x694   :  { %v1581_v24 = vpack.c.bf16 %v1579_v21, %v1578_v20 }
 0x695   :  { %v1580_v25 = vpack.c.bf16 %v1577_v23, %v1576_v22 }
 0x697   :  { %11537 = vmatprep.mubr.bf16.mxu1 %v1580_v25 }
 0x698   :  { %11538 = vmatmul.mubr.bf16.vlgmr.msra.gmra.mrb[20].mxu1 %v1581_v24 }
 0x699   :  { %10735 = vmatpush3.bf16.msra.mxu1 %v12470_v63 }
 0x69a   :  { %10736 = vmatprep.subr.bf16.mxu1 %v12471_v2 }
 0x69d   :  { %10737 = vmatpush3.bf16.msra.mxu1 %v12472_v3 }
 0x69e   :  { %10738 = vmatprep.subr.bf16.mxu1 %v12473_v5 }
 0x6a1   :  { %10739 = vmatpush3.bf16.msra.mxu1 %v12474_v6 }
 0x6a2   :  { %10740 = vmatprep.subr.bf16.mxu1 %v12475_v11 }
 0x6a5   :  { %10741 = vmatpush3.bf16.msra.mxu1 %v12476_v12 }
 0x6a6   :  { %10742 = vmatprep.subr.bf16.mxu1 %v12477_v1  ;;  %v12483_v1 = vld [vmem:[%s13397_s24 + $0x78] sm:$0xff]  }
 0x6a9   :  { %10743 = vmatpush3.bf16.msra.mxu1 %v12478_v14  ;;  %v12484_v14 = vld [vmem:[%s13397_s24 + $0x38] sm:$0xff]  }
 0x6aa   :  { %10744 = vmatprep.subr.bf16.mxu1 %v12479_v16  ;;  %v12485_v16 = vld [vmem:[%s13473_s15] sm:$0xff]  }
 0x6ad   :  { %10745 = vmatpush3.bf16.msra.mxu1 %v12480_v8  ;;  %v12486_v8 = vld [vmem:[%s13473_s15 + $0x8] sm:$0xff]  }
 0x6ae   :  { %10746 = vmatprep.subr.bf16.mxu1 %v12481_v13  ;;  %v12487_v13 = vld [vmem:[%s13473_s15 + $0x10] sm:$0xff]  }
 0x6b1   :  { %10747 = vmatpush3.bf16.msra.mxu1 %v12482_v17  ;;  %v12488_v17 = vld [vmem:[%s13473_s15 + $0x18] sm:$0xff]  }
 0x6b2   :  { %10748 = vmatprep.subr.bf16.mxu1 %v12483_v1 }
 0x6b5   :  { %10749 = vmatpush3.bf16.msra.mxu1 %v12484_v14 }
 0x6b6   :  { %11569 = vmatprep.subr.bf16.mxu1 %v13012_v0 }
 0x76b   :  { %v11539_v27 = vpop.f32.mrb[20].mxu1 }
 0x76c   :  { %v1670_v28 = vpop.f32.mrb[21].mxu1  ;;  %v1679_v33 = vadd.f32 %v11539_v27, %v9328_v26 }
 0x76d   :  { %v1671_v29 = vadd.f32 %v9328_v26, %v1670_v28  ;;  %v11540_v30 = vpop.f32.mrb[22].mxu1 }
 0x76e   :  { %v1673_v31 = vpop.f32.mrb[23].mxu1  ;;  %v1682_v34 = vadd.f32 %v11540_v30, %v9328_v26 }
 0x76f   :  { %v1674_v32 = vadd.f32 %v9328_v26, %v1673_v31  ;;  %1687 = vadd.xlane.f32.xlu0 %v1671_v29 }
 0x771   :  { %1689 = vadd.xlane.f32.xlu1 %v1674_v32 }
 0x773   :  { %1691 = vadd.xlane.f32.xlu0 %v1679_v33 }
 0x775   :  { %1693 = vadd.xlane.f32.xlu1 %v1682_v34 }
 0x786   :  { %1758 = vperm.xlu1 %12394, %v214_v35  }
 0x7fc   :  { %v1688_v36 = vpop.xlane.xlu0 %1687 }
 0x7fd   :  { %v1695_v39 = vmul.f32 0.0078125, %v1688_v36 }
 0x7fe   :  { %v1690_v37 = vpop.xlane.xlu1 %1689 }
 0x7ff   :  { %v1696_v45 = vmul.f32 0.0078125, %v1690_v37  ;;  %v13380_v50 = vsub.f32 %v1671_v29, %v1695_v39  ;;  %v1006_v39 = vshrl.u32 %v951_v54, 7 }
 0x800   :  { %v1692_v38 = vpop.xlane.xlu0 %1691 }
 0x801   :  { %v1697_v40 = vmul.f32 0.0078125, %v1692_v38  ;;  %v13386_v53 = vsub.f32 %v1674_v32, %v1696_v45  ;;  %v1703_v56 = vmul.f32 %v13380_v50, %v13380_v50  ;;  %v9337_v38 = vld [vmem:[%s13418_s28] ss:$0 sm:$0xff] }
 0x802   :  { %v1694_v43 = vpop.xlane.xlu1 %1693 }
 0x803   :  { %v13378_v46 = vsub.f32 %v1679_v33, %v1697_v40  ;;  %v1698_v49 = vmul.f32 0.0078125, %v1694_v43  ;;  %v1704_v57 = vmul.f32 %v13386_v53, %v13386_v53 }
 0x805   :  { %v13382_v51 = vsub.f32 %v1682_v34, %v1698_v49  ;;  %v1705_v52 = vmul.f32 %v13378_v46, %v13378_v46 }
 0x806   :  { %v13413_v18 = vpop.permute.xlu1 %1758 }
 0x807   :  { %1711 = vadd.xlane.f32.xlu0 %v1705_v52  ;;  %v1706_v55 = vmul.f32 %v13382_v51, %v13382_v51 }
 0x809   :  { %1713 = vadd.xlane.f32.xlu1 %v1706_v55 }
 0x80b   :  { %1707 = vadd.xlane.f32.xlu0 %v1703_v56 }
 0x80d   :  { %1709 = vadd.xlane.f32.xlu1 %v1704_v57  ;;  %v1007_v57 = vadd.s32 8, %v1006_v39 }
 0x81e   :  { %1763 = vperm.xlu1 %12394, %v215_v58  }
 0x821   :  { %1753 = vperm.xlu0 %12393, %v213_v59  }
 0x825   :  { %1768 = vperm.xlu0 %12393, %v216_v60  }
 0x894   :  { %v1712_v19 = vpop.xlane.xlu0 %1711 }
 0x895   :  { %v1717_v20 = vmul.f32 0.0078125, %v1712_v19  ;;  %v12489_v19 = vld [vmem:[%s13473_s15 + $0x20] sm:$0xff]  }
 0x896   :  { %v1714_v21 = vpop.xlane.xlu1 %1713 }
 0x897   :  { %v1721_v22 = vadd.f32 1e-05, %v1717_v20  ;;  %v1718_v23 = vmul.f32 0.0078125, %v1714_v21 }
 0x898   :  { %v1708_v24 = vpop.xlane.xlu0 %1707 }
 0x899   :  { %v1722_v25 = vadd.f32 1e-05, %v1718_v23  ;;  %v1715_v26 = vmul.f32 0.0078125, %v1708_v24  ;;  %12905 = vrsqrt.f32 %v1721_v22 }
 0x89a   :  { %v1710_v27 = vpop.xlane.xlu1 %1709 }
 0x89b   :  { %12907 = vrsqrt.f32 %v1722_v25  ;;  %v1719_v28 = vadd.f32 1e-05, %v1715_v26  ;;  %v1716_v29 = vmul.f32 0.0078125, %v1710_v27  ;;  %v12490_v25 = vld [vmem:[%s13473_s15 + $0x28] sm:$0xff]   ;;  %v12491_v26 = vld [vmem:[%s13473_s15 + $0x30] sm:$0xff]   ;;  %v12492_v27 = vld [vmem:[%s13473_s15 + $0x38] sm:$0xff]  }
 0x89d   :  { %12909 = vrsqrt.f32 %v1719_v28  ;;  %v1720_v30 = vadd.f32 1e-05, %v1716_v29  ;;  %v12494_v28 = vld [vmem:[%s13496_s20 + $0x8] sm:$0xff]   ;;  %v12495_v29 = vld [vmem:[%s13496_s20 + $0x10] sm:$0xff]  }
 0x89e   :  { %v13453_v2 = vpop.permute.xlu1 %1763 }
 0x89f   :  { %12911 = vrsqrt.f32 %v1720_v30  ;;  %v12496_v30 = vld [vmem:[%s13496_s20 + $0x18] sm:$0xff]  }
 0x8a0   :  { %v13434_v49 = vpop.permute.xlu0 %1753 }
 0x8a3   :  { %v12906_v31 = vpop.eup %12905 }
 0x8a4   :  { %v1729_v35 = vmul.f32 %v12906_v31, %v13378_v46  ;;  %v13449_v60 = vpop.permute.xlu0 %1768  ;;  %v12497_v31 = vld [vmem:[%s13496_s20 + $0x20] sm:$0xff]  }
 0x8a5   :  { %v12908_v32 = vpop.eup %12907 }
 0x8a6   :  { %v1730_v33 = vmul.f32 %v12908_v32, %v13382_v51  ;;  %v9338_v51 = vld [vmem:[%s13423_s4] ss:$0 sm:$0xff]  ;;  %v1739_v56 = vmul.f32 %v9337_v38, %v1729_v35  ;;  %v12498_v32 = vld [vmem:[%s13496_s20 + $0x28] sm:$0xff]  }
 0x8a7   :  { %v12910_v34 = vpop.eup %12909 }
 0x8a8   :  { %v1727_v36 = vmul.f32 %v12910_v34, %v13380_v50  ;;  %v1740_v45 = vmul.f32 %v9337_v38, %v1730_v33  ;;  %v9289_v50 = vld [vmem:[%s9196_s10] ss:$0 sm:$0xff]  ;;  %v13447_v59 = vadd.f32 %v9338_v51, %v1739_v56  ;;  %v12499_v56 = vld [vmem:[%s13496_s20 + $0x30] sm:$0xff]   ;;  %s13051_s10 = smov 48  }
 0x8a9   :  { %v12912_v37 = vpop.eup %12911  ;;  %vm1013_vm15 = vcmp.eq.s32.totalorder %v1006_v39, %v9289_v50  ;;  %vm1014_vm1 = vcmp.eq.s32.totalorder %v1007_v57, %v9289_v50  ;;  %v9340_v34 = vld [vmem:[%s13513_s25] ss:$0 sm:$0xff]  ;;  %v12500_v57 = vld [vmem:[%s13496_s20 + $0x38] sm:$0xff]   ;;  %s13572_s14 = sld [smem:[%s14602_s0 + %s13051_s10]]   ;;  %s13055_s10 = smov 26  }
 0x8aa   :  { %v1728_v40 = vmul.f32 %v12912_v37, %v13386_v53  ;;  %v1737_v43 = vmul.f32 %v9337_v38, %v1727_v36  ;;  %v13441_v46 = vadd.f32 %v9338_v51, %v1740_v45  ;;  %v1773_v3 = vmul.f32 %v13453_v2, %v13447_v59  ;;  %v12501_v50 = vld [vmem:[%s13224_s9 + $0x140] sm:$0xff]   ;;  %s13777_s17 = sld [smem:[%s14602_s0 + %s13055_s10]]   ;;  %s13058_s10 = smov 28  }
 0x8ab   :  { %v1015_v5 = vsel %vm1013_vm15, 1.0, %v13012_v0  ;;  %v1016_v6 = vsel %vm1014_vm1, 1.0, %v13012_v0  ;;  %s9219_s18 = sld [smem:[%s14602_s0 + %s13058_s10]]  }
 0x8ac   :  { %v1738_v52 = vmul.f32 %v9337_v38, %v1728_v40  ;;  %v13437_v55 = vadd.f32 %v9338_v51, %v1737_v43  ;;  %v1774_v63 = vmul.f32 %v13449_v60, %v13441_v46  ;;  %v13460_v12 = vpack.c.bf16 %v1016_v6, %v1015_v5 }
 0x8ae   :  { %v13439_v58 = vadd.f32 %v9338_v51, %v1738_v52  ;;  %v1771_v54 = vmul.f32 %v13434_v49, %v13437_v55  ;;  %v1776_v11 = vpack.c.bf16 %v1774_v63, %v1773_v3 }
 0x8b0   :  { %v1772_v53 = vmul.f32 %v13413_v18, %v13439_v58 }
 0x8b2   :  { %v1775_v62 = vpack.c.bf16 %v1772_v53, %v1771_v54  ;;  %v9357_v54 = vld [vmem:[%s13525_s1] ss:$0 sm:$0xff] }
 0x8b4   :  { %11542 = vmatpush3.bf16.msra.mxu0 %v1775_v62 }
 0x8b5   :  { %11543 = vmatprep.subr.bf16.mxu0 %v13012_v0 }
 0x8b8   :  { %11544 = vmatpush3.bf16.msra.mxu0 %v1776_v11  ;;  %v13530_v11 = vadd.f32 %v13439_v58, %v13317_v9  ;;  %v12503_v9 = vld [vmem:[%s13224_s9 + $0x150] sm:$0xff]   ;;  %v12504_v58 = vld [vmem:[%s13224_s9 + $0x158] sm:$0xff]  }
 0x8b9   :  { %11549 = vmatprep.subr.bf16.mxu0 %v13012_v0 }
 0x8bb   :  { %11546 = vmatmul.mubr.msk.bf16.vlgmr.msra.gmra.mrb[28].mxu0 %vm1777_vm2, %v13460_v12 }
 0x8bc   :  { %11565 = vmatprep.mubr.msk.bf16.mxu0 %vm13014_vm0, %v13012_v0  ;;  %11550 = vmatpush3.bf16.msra.mxu0 %v12485_v16  ;;  %v13534_v16 = vadd.f32 %v13437_v55, %v13315_v7  ;;  %v12505_v7 = vld [vmem:[%s13224_s9 + $0x160] sm:$0xff]   ;;  %v12506_v55 = vld [vmem:[%s13224_s9 + $0x168] sm:$0xff]  }
 0x8bd   :  { %11551 = vmatprep.subr.bf16.mxu0 %v13012_v0 }
 0x8c0   :  { %11552 = vmatpush3.bf16.msra.mxu0 %v12486_v8 }
 0x8c1   :  { %11553 = vmatprep.subr.bf16.mxu0 %v13012_v0 }
 0x8c4   :  { %11554 = vmatpush3.bf16.msra.mxu0 %v12487_v13  ;;  %v12502_v13 = vld [vmem:[%s13224_s9 + $0x148] sm:$0xff]  }
 0x8c5   :  { %11555 = vmatprep.subr.bf16.mxu0 %v13012_v0 }
 0x8c8   :  { %11556 = vmatpush3.bf16.msra.mxu0 %v12488_v17  ;;  %v2465_v17 = vpack.c.bf16 %v13530_v11, %v13534_v16 }
 0x8c9   :  { %11557 = vmatprep.subr.bf16.mxu0 %v13012_v0 }
 0x8cc   :  { %11558 = vmatpush3.bf16.msra.mxu0 %v12489_v19  ;;  %v12507_v19 = vld [vmem:[%s13224_s9 + $0x170] sm:$0xff]  }
 0x8cd   :  { %11559 = vmatprep.subr.bf16.mxu0 %v13012_v0 }
 0x8d0   :  { %11560 = vmatpush3.bf16.msra.mxu0 %v12490_v25 }
 0x8d1   :  { %11561 = vmatprep.subr.bf16.mxu0 %v13012_v0 }
 0x8d4   :  { %11562 = vmatpush3.bf16.msra.mxu0 %v12491_v26 }
 0x8d5   :  { %11563 = vmatprep.subr.bf16.mxu0 %v13012_v0 }
 0x8d8   :  { %11564 = vmatpush3.bf16.msra.mxu0 %v12492_v27 }
 0x98e   :  { %v1815_v20 = vpop.f32.mrb[28].mxu0 }
 0x98f   :  { %v11547_v21 = vpop.f32.mrb[29].mxu0 }
 0x990   :  { %v1818_v22 = vpop.f32.mrb[30].mxu0  ;;  %v13547_v21 = vadd.f32 %v13441_v46, %v13324_v15 }
 0x991   :  { %v1889_v23 = vpack.c.bf16 %v1818_v22, %v1815_v20  ;;  %v11548_v24 = vpop.f32.mrb[31].mxu0  ;;  %v12508_v20 = vld [vmem:[%s13224_s9 + $0x178] sm:$0xff]   ;;  %v13551_v22 = vadd.f32 %v13447_v59, %v13322_v4 }
 0x992   :  { %v9366_v24 = vld [vmem:[%s13558_s8] ss:$0 sm:$0xff] }
 0x993   :  { %2024 = vmatprep.mubr.bf16.mxu1 %v1889_v23  ;;  %v2468_v23 = vpack.c.bf16 %v13547_v21, %v13551_v22 }
 0x994   :  { %2025 = vmatmul.mubr.bf16.vlgmr.msra.gmra.mrb[24].mxu1 %v13249_v44  ;;  %v12493_v44 = vld [vmem:[%s13496_s20] sm:$0xff]  }
 0x995   :  { %11585 = vmatprep.mubr.msk.bf16.mxu1 %vm13014_vm0, %v13012_v0  ;;  %11570 = vmatpush3.bf16.msra.mxu1 %v12493_v44 }
 0x996   :  { %11571 = vmatprep.subr.bf16.mxu1 %v13012_v0 }
 0x999   :  { %11572 = vmatpush3.bf16.msra.mxu1 %v12494_v28 }
 0x99a   :  { %11573 = vmatprep.subr.bf16.mxu1 %v13012_v0 }
 0x99d   :  { %11574 = vmatpush3.bf16.msra.mxu1 %v12495_v29 }
 0x99e   :  { %11575 = vmatprep.subr.bf16.mxu1 %v13012_v0 }
 0x9a1   :  { %11576 = vmatpush3.bf16.msra.mxu1 %v12496_v30 }
 0x9a2   :  { %11577 = vmatprep.subr.bf16.mxu1 %v13012_v0 }
 0x9a5   :  { %11578 = vmatpush3.bf16.msra.mxu1 %v12497_v31 }
 0x9a6   :  { %11579 = vmatprep.subr.bf16.mxu1 %v13012_v0 }
 0x9a9   :  { %11580 = vmatpush3.bf16.msra.mxu1 %v12498_v32 }
 0x9aa   :  { %11581 = vmatprep.subr.bf16.mxu1 %v13012_v0 }
 0x9ad   :  { %11582 = vmatpush3.bf16.msra.mxu1 %v12499_v56  ;;  %v9375_v56 = vld [vmem:[%s13572_s14] ss:$0 sm:$0xff] }
 0x9ae   :  { %11583 = vmatprep.subr.bf16.mxu1 %v13012_v0 }
 0x9b1   :  { %11584 = vmatpush3.bf16.msra.mxu1 %v12500_v57 }
 0x9b2   :  { %11601 = vmatprep.subr.bf16.mxu1 %v12501_v50 }
 0xa67   :  { %v10750_v33 = vpop.f32.mrb[24].mxu1 }
 0xa68   :  { %v10751_v35 = vpop.f32.mrb[25].mxu1 }
 0xa69   :  { %v10752_v36 = vadd.f32 %v10751_v35, %v10750_v33  ;;  %v10753_v37 = vpop.f32.mrb[26].mxu1 }
 0xa6a   :  { %v10754_v38 = vpop.f32.mrb[27].mxu1 }
 0xa6b   :  { %v2027_v39 = vadd.f32 %v10752_v36, %v9340_v34  ;;  %v10755_v40 = vadd.f32 %v10754_v38, %v10753_v37 }
 0xa6d   :  { %v2030_v43 = vadd.f32 %v10755_v40, %v9340_v34  ;;  %v2033_v45 = vmax.f32 %v2027_v39, 0.0 }
 0xa6f   :  { %v2034_v51 = vmax.f32 %v2030_v43, 0.0 }
 0xa71   :  { %v2035_v52 = vpack.c.bf16 %v2034_v51, %v2033_v45 }
 0xa73   :  { %11566 = vmatmul.mubr.bf16.vlgmr.msra.gmra.mrb[32].mxu0 %v2035_v52 }
 0xa74   :  { %11591 = vmatprep.mubr.msk.bf16.mxu0 %vm1019_vm8, %v13201_v10 }
 0xb46   :  { %v2124_v53 = vpop.f32.mrb[32].mxu0 }
 0xb47   :  { %v2125_v62 = vadd.f32 %v9357_v54, %v2124_v53  ;;  %v11567_v63 = vpop.f32.mrb[33].mxu0 }
 0xb48   :  { %v2127_v3 = vpop.f32.mrb[34].mxu0 }
 0xb49   :  { %v2128_v5 = vadd.f32 %v9357_v54, %v2127_v3  ;;  %v11568_v6 = vpop.f32.mrb[35].mxu0  ;;  %v2131_v1 = vmax.f32 %v2125_v62, 0.0  ;;  %v9376_v54 = vld [vmem:[%s13577_s21] ss:$0 sm:$0xff] }
 0xb4b   :  { %v2132_v14 = vmax.f32 %v2128_v5, 0.0 }
 0xb4d   :  { %v2133_v8 = vpack.c.bf16 %v2132_v14, %v2131_v1 }
 0xb4f   :  { %11586 = vmatmul.mubr.bf16.vlgmr.msra.gmra.mrb[28].mxu1 %v2133_v8  ;;  %v12509_v8 = vld [vmem:[%s13224_s9 + $0x100] sm:$0xff]  }
 0xb50   :  { %11602 = vmatpush3.bf16.msra.mxu1 %v12501_v50  ;;  %11617 = vmatprep.mubr.bf16.mxu1 %v2465_v17  ;;  %v12513_v17 = vld [vmem:[%s13224_s9 + $0x110] sm:$0xff]  }
 0xb51   :  { %11603 = vmatprep.subr.bf16.mxu1 %v12502_v13 }
 0xb54   :  { %11604 = vmatpush3.bf16.msra.mxu1 %v12502_v13  ;;  %v12512_v13 = vld [vmem:[%s13224_s9 + $0xc8] sm:$0xff]  }
 0xb55   :  { %11605 = vmatprep.subr.bf16.mxu1 %v12503_v9 }
 0xb58   :  { %11606 = vmatpush3.bf16.msra.mxu1 %v12503_v9  ;;  %v12514_v9 = vld [vmem:[%s13224_s9 + $0xd0] sm:$0xff]  }
 0xb59   :  { %11607 = vmatprep.subr.bf16.mxu1 %v12504_v58 }
 0xb5c   :  { %11608 = vmatpush3.bf16.msra.mxu1 %v12504_v58  ;;  %v12515_v58 = vld [vmem:[%s13224_s9 + $0x118] sm:$0xff]  }
 0xb5d   :  { %11609 = vmatprep.subr.bf16.mxu1 %v12505_v7 }
 0xb60   :  { %11610 = vmatpush3.bf16.msra.mxu1 %v12505_v7  ;;  %v12516_v7 = vld [vmem:[%s13224_s9 + $0xd8] sm:$0xff]  }
 0xb61   :  { %11611 = vmatprep.subr.bf16.mxu1 %v12506_v55 }
 0xb64   :  { %11612 = vmatpush3.bf16.msra.mxu1 %v12506_v55  ;;  %v12517_v55 = vld [vmem:[%s13224_s9 + $0x120] sm:$0xff]  }
 0xb65   :  { %11613 = vmatprep.subr.bf16.mxu1 %v12507_v19 }
 0xb68   :  { %11614 = vmatpush3.bf16.msra.mxu1 %v12507_v19  ;;  %v12518_v19 = vld [vmem:[%s13224_s9 + $0xe0] sm:$0xff]  }
 0xb69   :  { %11615 = vmatprep.subr.bf16.mxu1 %v12508_v20 }
 0xb6c   :  { %11616 = vmatpush3.bf16.msra.mxu1 %v12508_v20  ;;  %v12519_v20 = vld [vmem:[%s13224_s9 + $0x128] sm:$0xff]  }
 0xb6f   :  { %11618 = vmatmul.mubr.bf16.vlgmr.msra.gmra.mrb[32].mxu1 %v2468_v23  ;;  %v12520_v23 = vld [vmem:[%s13224_s9 + $0xe8] sm:$0xff]  }
 0xc22   :  { %v2222_v25 = vpop.f32.mrb[28].mxu1 }
 0xc23   :  { %v2223_v15 = vadd.f32 %v9366_v24, %v2222_v25  ;;  %v11587_v46 = vpop.f32.mrb[29].mxu1  ;;  %v12522_v25 = vld [vmem:[%s13224_s9 + $0xf0] sm:$0xff]  }
 0xc24   :  { %v2225_v26 = vpop.f32.mrb[30].mxu1  ;;  %v12524_v46 = vld [vmem:[%s13224_s9 + $0xf8] sm:$0xff]  }
 0xc25   :  { %v2226_v27 = vadd.f32 %v9366_v24, %v2225_v26  ;;  %2231 = vadd.xlane.f32.xlu1 %v2223_v15  ;;  %v11588_v4 = vpop.f32.mrb[31].mxu1  ;;  %v12521_v24 = vld [vmem:[%s13224_s9 + $0x130] sm:$0xff]   ;;  %v12525_v26 = vld [vmem:[%s13331_s29 + $0x40] sm:$0xff]  }
 0xc27   :  { %2233 = vadd.xlane.f32.xlu0 %v2226_v27 }
 0xc42   :  { %v13561_v59 = vpop.f32.mrb[32].mxu1 }
 0xc43   :  { %v13563_v44 = vpop.f32.mrb[33].mxu1 }
 0xc44   :  { %v13565_v28 = vpop.f32.mrb[34].mxu1 }
 0xc45   :  { %v13567_v29 = vpop.f32.mrb[35].mxu1 }
 0xcb2   :  { %v2232_v30 = vpop.xlane.xlu1 %2231 }
 0xcb3   :  { %v2235_v31 = vmul.f32 0.0078125, %v2232_v30 }
 0xcb4   :  { %v2234_v32 = vpop.xlane.xlu0 %2233 }
 0xcb5   :  { %v2237_v33 = vsub.f32 %v2223_v15, %v2235_v31  ;;  %v2236_v34 = vmul.f32 0.0078125, %v2234_v32  ;;  %v12523_v15 = vld [vmem:[%s13224_s9 + $0x138] sm:$0xff]  }
 0xcb7   :  { %v2238_v35 = vsub.f32 %v2226_v27, %v2236_v34  ;;  %v2239_v36 = vmul.f32 %v2237_v33, %v2237_v33 }
 0xcb9   :  { %2241 = vadd.xlane.f32.xlu0 %v2239_v36  ;;  %v2240_v37 = vmul.f32 %v2238_v35, %v2238_v35 }
 0xcbb   :  { %2243 = vadd.xlane.f32.xlu1 %v2240_v37 }
 0xd46   :  { %v2242_v38 = vpop.xlane.xlu0 %2241 }
 0xd47   :  { %v2245_v39 = vmul.f32 0.0078125, %v2242_v38 }
 0xd48   :  { %v2244_v40 = vpop.xlane.xlu1 %2243 }
 0xd49   :  { %v2247_v43 = vadd.f32 1e-05, %v2245_v39  ;;  %v2246_v45 = vmul.f32 0.0078125, %v2244_v40  ;;  %v12526_v40 = vld [vmem:[%s13331_s29 + $0x48] sm:$0xff]  }
 0xd4b   :  { %12913 = vrsqrt.f32 %v2247_v43  ;;  %v2248_v51 = vadd.f32 1e-05, %v2246_v45  ;;  %v12527_v43 = vld [vmem:[%s13331_s29 + $0x50] sm:$0xff]   ;;  %v12528_v45 = vld [vmem:[%s13331_s29 + $0x58] sm:$0xff]  }
 0xd4d   :  { %12915 = vrsqrt.f32 %v2248_v51  ;;  %v12529_v51 = vld [vmem:[%s13331_s29 + $0x60] sm:$0xff]  }
 0xd55   :  { %v12914_v52 = vpop.eup %12913 }
 0xd56   :  { %v2251_v57 = vmul.f32 %v12914_v52, %v2237_v33  ;;  %v12530_v52 = vld [vmem:[%s13331_s29 + $0x68] sm:$0xff]  }
 0xd57   :  { %v12916_v50 = vpop.eup %12915 }
 0xd58   :  { %v2259_v53 = vmul.f32 %v9375_v56, %v2251_v57  ;;  %v2252_v62 = vmul.f32 %v12916_v50, %v2238_v35  ;;  %v12532_v57 = vld [vmem:[%s13331_s29 + $0x78] sm:$0xff]   ;;  %v12533_v50 = vld [vmem:[%s13345_s3 + $0x40] sm:$0xff]  }
 0xd59   :  { %11641 = vmatprep.subr.bf16.mxu1 %v12533_v50 }
 0xd5a   :  { %v2260_v63 = vmul.f32 %v9375_v56, %v2252_v62  ;;  %v2267_v3 = vadd.f32 %v9376_v54, %v2259_v53  ;;  %v12531_v56 = vld [vmem:[%s13331_s29 + $0x70] sm:$0xff]   ;;  %11642 = vmatpush3.bf16.msra.mxu1 %v12533_v50  ;;  %v12536_v62 = vld [vmem:[%s13345_s3 + $0x58] sm:$0xff]  }
 0xd5b   :  { %v12535_v53 = vld [vmem:[%s13345_s3 + $0x50] sm:$0xff]  }
 0xd5c   :  { %v2268_v5 = vadd.f32 %v9376_v54, %v2260_v63  ;;  %v13582_v6 = vadd.f32 %v2267_v3, %v13242_v41  ;;  %v12510_v41 = vld [vmem:[%s13224_s9 + $0xc0] sm:$0xff]   ;;  %v12534_v54 = vld [vmem:[%s13345_s3 + $0x48] sm:$0xff]  }
 0xd5d   :  { %11643 = vmatprep.subr.bf16.mxu1 %v12534_v54  ;;  %v12537_v63 = vld [vmem:[%s13345_s3 + $0x60] sm:$0xff]   ;;  %v12538_v3 = vld [vmem:[%s13345_s3 + $0x68] sm:$0xff]  }
 0xd5e   :  { %v13585_v1 = vadd.f32 %v2268_v5, %v13244_v42  ;;  %v12511_v42 = vld [vmem:[%s13224_s9 + $0x108] sm:$0xff]   ;;  %11644 = vmatpush3.bf16.msra.mxu1 %v12534_v54 }
 0xd5f   :  { %11645 = vmatprep.subr.bf16.mxu1 %v12535_v53 }
 0xd60   :  { %v13589_v14 = vpack.c.bf16 %v13585_v1, %v13582_v6 }
 0xd62   :  { %11589 = vmatprep.subr.bf16.mxu0 %v13589_v14  ;;  %11646 = vmatpush3.bf16.msra.mxu1 %v12535_v53 }
 0xd63   :  { %11590 = vmatpush3.bf16.msra.mxu0 %v13589_v14  ;;  %11647 = vmatprep.subr.bf16.mxu1 %v12536_v62 }
 0xd64   :  { %11595 = vmatprep.subr.bf16.mxu0 %v13589_v14 }
 0xd66   :  { %11592 = vmatmul.mubr.msk.bf16.vlgmr.msra.gmra.mrb[36].mxu0 %vm1019_vm8, %v13257_v47  ;;  %11648 = vmatpush3.bf16.msra.mxu1 %v12536_v62  ;;  %v9498_v62 = vld [vmem:[%s13372_s16 + $0x1] ss:$0 sm:$0xff] }
 0xd67   :  { %11596 = vmatpush3.bf16.msra.mxu0 %v13589_v14  ;;  %11597 = vmatprep.mubr.msk.bf16.mxu0 %vm1019_vm8, %v13193_v61 }
 0xd68   :  { %10780 = vmatprep.subr.bf16.mxu0 %v12509_v8  ;;  %11649 = vmatprep.subr.bf16.mxu1 %v12537_v63  ;;  %v9464_v8 = vld [vmem:[%s13356_s7 + $0x1] ss:$0 sm:$0xff] }
 0xd6a   :  { %11650 = vmatpush3.bf16.msra.mxu1 %v12537_v63 }
 0xd6b   :  { %11651 = vmatprep.subr.bf16.mxu1 %v12538_v3 }
 0xd6e   :  { %11598 = vmatmul.mubr.msk.bf16.vlgmr.msra.gmra.mrb[40].mxu0 %vm1019_vm8, %v13259_v48  ;;  %11652 = vmatpush3.bf16.msra.mxu1 %v12538_v3 }
 0xd6f   :  { %10781 = vmatpush3.bf16.msra.mxu0 %v12510_v41 }
 0xd70   :  { %10782 = vmatprep.subr.bf16.mxu0 %v12511_v42 }
 0xd73   :  { %10783 = vmatpush3.bf16.msra.mxu0 %v12512_v13 }
 0xd74   :  { %10784 = vmatprep.subr.bf16.mxu0 %v12513_v17 }
 0xd77   :  { %10785 = vmatpush3.bf16.msra.mxu0 %v12514_v9 }
 0xd78   :  { %10786 = vmatprep.subr.bf16.mxu0 %v12515_v58 }
 0xd7b   :  { %10787 = vmatpush3.bf16.msra.mxu0 %v12516_v7 }
 0xd7c   :  { %10788 = vmatprep.subr.bf16.mxu0 %v12517_v55 }
 0xd7f   :  { %10789 = vmatpush3.bf16.msra.mxu0 %v12518_v19 }
 0xd80   :  { %10790 = vmatprep.subr.bf16.mxu0 %v12519_v20 }
 0xd83   :  { %10791 = vmatpush3.bf16.msra.mxu0 %v12520_v23 }
 0xd84   :  { %10792 = vmatprep.subr.bf16.mxu0 %v12521_v24 }
 0xd87   :  { %10793 = vmatpush3.bf16.msra.mxu0 %v12522_v25 }
 0xd88   :  { %10794 = vmatprep.subr.bf16.mxu0 %v12523_v15 }
 0xd8b   :  { %10795 = vmatpush3.bf16.msra.mxu0 %v12524_v46 }
 0xd8c   :  { %11621 = vmatprep.subr.bf16.mxu0 %v12525_v26 }
 0xe39   :  { %v11593_v27 = vpop.f32.mrb[36].mxu0 }
 0xe3a   :  { %v2310_v4 = vpop.f32.mrb[37].mxu0 }
 0xe3b   :  { %v11594_v30 = vpop.f32.mrb[38].mxu0 }
 0xe3c   :  { %v2467_v31 = vpack.c.bf16 %v11594_v30, %v11593_v27  ;;  %v2313_v32 = vpop.f32.mrb[39].mxu0 }
 0xe3d   :  { %v2464_v33 = vpack.c.bf16 %v2313_v32, %v2310_v4 }
 0xe3f   :  { %2651 = vmatprep.mubr.bf16.mxu0 %v2464_v33 }
 0xe41   :  { %v11599_v34 = vpop.f32.mrb[40].mxu0 }
 0xe42   :  { %v2359_v35 = vpop.f32.mrb[41].mxu0 }
 0xe43   :  { %v11600_v36 = vpop.f32.mrb[42].mxu0 }
 0xe44   :  { %v2466_v37 = vpack.c.bf16 %v11600_v36, %v11599_v34  ;;  %v2362_v38 = vpop.f32.mrb[43].mxu0  ;;  %v12540_v36 = vld [vmem:[%s13345_s3 + $0x78] sm:$0xff]  }
 0xe45   :  { %v2463_v39 = vpack.c.bf16 %v2362_v38, %v2359_v35  ;;  %v12539_v35 = vld [vmem:[%s13345_s3 + $0x70] sm:$0xff]  }
 0xe46   :  { %11653 = vmatprep.subr.bf16.mxu1 %v12539_v35 }
 0xe47   :  { %2652 = vmatmul.mubr.bf16.vlgmr.msra.gmra.mrb[44].mxu0 %v2463_v39  ;;  %11654 = vmatpush3.bf16.msra.mxu1 %v12539_v35 }
 0xe48   :  { %2659 = vmatprep.mubr.bf16.mxu0 %v2467_v31  ;;  %11622 = vmatpush3.bf16.msra.mxu0 %v12525_v26 }
 0xe49   :  { %11623 = vmatprep.subr.bf16.mxu0 %v12526_v40  ;;  %11655 = vmatprep.subr.bf16.mxu1 %v12540_v36 }
 0xe4b   :  { %11656 = vmatpush3.bf16.msra.mxu1 %v12540_v36 }
 0xe4c   :  { %11624 = vmatpush3.bf16.msra.mxu0 %v12526_v40  ;;  %11669 = vmatprep.subr.bf16.mxu1 %v13012_v0 }
 0xe4d   :  { %11625 = vmatprep.subr.bf16.mxu0 %v12527_v43 }
 0xe4f   :  { %2660 = vmatmul.mubr.bf16.gmra.mrb[48].mxu0 %v2466_v37 }
 0xe50   :  { %11626 = vmatpush3.bf16.msra.mxu0 %v12527_v43 }
 0xe51   :  { %11627 = vmatprep.subr.bf16.mxu0 %v12528_v45 }
 0xe54   :  { %11628 = vmatpush3.bf16.msra.mxu0 %v12528_v45 }
 0xe55   :  { %11629 = vmatprep.subr.bf16.mxu0 %v12529_v51 }
 0xe58   :  { %11630 = vmatpush3.bf16.msra.mxu0 %v12529_v51 }
 0xe59   :  { %11631 = vmatprep.subr.bf16.mxu0 %v12530_v52 }
 0xe5c   :  { %11632 = vmatpush3.bf16.msra.mxu0 %v12530_v52 }
 0xe5d   :  { %11633 = vmatprep.subr.bf16.mxu0 %v12531_v56 }
 0xe60   :  { %11634 = vmatpush3.bf16.msra.mxu0 %v12531_v56 }
 0xe61   :  { %11635 = vmatprep.subr.bf16.mxu0 %v12532_v57 }
 0xe64   :  { %11636 = vmatpush3.bf16.msra.mxu0 %v12532_v57 }
 0xe65   :  { %11661 = vmatprep.subr.bf16.mxu0 %v13012_v0 }
 0xf1a   :  { %v10796_v5 = vpop.f32.mrb[44].mxu0 }
 0xf1b   :  { %v10797_v41 = vpop.f32.mrb[45].mxu0 }
 0xf1c   :  { %v10798_v42 = vadd.f32 %v10797_v41, %v10796_v5  ;;  %v10799_v13 = vpop.f32.mrb[46].mxu0 }
 0xf1d   :  { %v10800_v17 = vpop.f32.mrb[47].mxu0 }
 0xf1e   :  { %v2654_v9 = vadd.f32 %v10798_v42, %v9464_v8  ;;  %v10801_v58 = vadd.f32 %v10800_v17, %v10799_v13 }
 0xf20   :  { %v2703_v7 = vadd.f32 %v13563_v44, %v2654_v9  ;;  %v2657_v55 = vadd.f32 %v10801_v58, %v9464_v8 }
 0xf22   :  { %v2706_v19 = vadd.f32 %v13567_v29, %v2657_v55  ;;  %v10802_v20 = vpop.f32.mrb[48].mxu0  ;;  %v2717_v24 = vmax.f32 %v2703_v7, 0.0 }
 0xf23   :  { %v10803_v23 = vpop.f32.mrb[49].mxu0 }
 0xf24   :  { %v2718_v25 = vmax.f32 %v2706_v19, 0.0  ;;  %v10804_v15 = vadd.f32 %v10803_v23, %v10802_v20  ;;  %v10805_v46 = vpop.f32.mrb[50].mxu0 }
 0xf25   :  { %v10806_v26 = vpop.f32.mrb[51].mxu0 }
 0xf26   :  { %v2662_v27 = vadd.f32 %v10804_v15, %v9464_v8  ;;  %v10807_v4 = vadd.f32 %v10806_v26, %v10805_v46  ;;  %v2721_v30 = vpack.c.bf16 %v2718_v25, %v2717_v24 }
 0xf28   :  { %v2711_v31 = vadd.f32 %v13561_v59, %v2662_v27  ;;  %v2665_v32 = vadd.f32 %v10807_v4, %v9464_v8  ;;  %11637 = vmatprep.mubr.bf16.mxu0 %v2721_v30  ;;  %v9489_v59 = vld [vmem:[%s13366_s12 + $0x1] ss:$0 sm:$0xff] }
 0xf2a   :  { %v2714_v44 = vadd.f32 %v13565_v28, %v2665_v32  ;;  %v2719_v29 = vmax.f32 %v2711_v31, 0.0 }
 0xf2c   :  { %v2720_v33 = vmax.f32 %v2714_v44, 0.0 }
 0xf2e   :  { %v2722_v34 = vpack.c.bf16 %v2720_v33, %v2719_v29 }
 0xf30   :  { %11638 = vmatmul.mubr.bf16.vlgmr.msra.gmra.mrb[52].mxu0 %v2722_v34 }
 0xf31   :  { %11665 = vmatprep.mubr.msk.bf16.mxu0 %vm13014_vm0, %v13012_v0 }
0x1003   :  { %v11639_v37 = vpop.f32.mrb[52].mxu0 }
0x1004   :  { %v2820_v38 = vadd.f32 %v11639_v37, %v9489_v59  ;;  %v2811_v28 = vpop.f32.mrb[53].mxu0 }
0x1005   :  { %v2812_v39 = vadd.f32 %v9489_v59, %v2811_v28  ;;  %v11640_v40 = vpop.f32.mrb[54].mxu0 }
0x1006   :  { %v2823_v43 = vadd.f32 %v11640_v40, %v9489_v59  ;;  %v2814_v45 = vpop.f32.mrb[55].mxu0  ;;  %v2828_v52 = vmax.f32 %v2820_v38, 0.0 }
0x1007   :  { %v2815_v51 = vadd.f32 %v9489_v59, %v2814_v45  ;;  %v2826_v57 = vmax.f32 %v2812_v39, 0.0 }
0x1008   :  { %v2829_v56 = vmax.f32 %v2823_v43, 0.0  ;;  %v9509_v43 = vld [vmem:[%s13418_s28 + $0x1] ss:$0 sm:$0xff] }
0x1009   :  { %v2827_v50 = vmax.f32 %v2815_v51, 0.0 }
0x100a   :  { %v2831_v54 = vpack.c.bf16 %v2829_v56, %v2828_v52  ;;  %v9510_v52 = vld [vmem:[%s13423_s4 + $0x1] ss:$0 sm:$0xff] }
0x100b   :  { %v2830_v53 = vpack.c.bf16 %v2827_v50, %v2826_v57 }
0x100d   :  { %11657 = vmatprep.mubr.bf16.mxu1 %v2830_v53 }
0x100e   :  { %11658 = vmatmul.mubr.bf16.vlgmr.msra.gmra.mrb[36].mxu1 %v2831_v54 }
0x100f   :  { %11685 = vmatprep.mubr.msk.bf16.mxu1 %vm13014_vm0, %v13012_v0 }
0x10e1   :  { %v11659_v63 = vpop.f32.mrb[36].mxu1 }
0x10e2   :  { %v2920_v3 = vpop.f32.mrb[37].mxu1  ;;  %v2929_v13 = vadd.f32 %v11659_v63, %v9498_v62 }
0x10e3   :  { %v2921_v5 = vadd.f32 %v9498_v62, %v2920_v3  ;;  %v11660_v8 = vpop.f32.mrb[38].mxu1 }
0x10e4   :  { %v2923_v41 = vpop.f32.mrb[39].mxu1  ;;  %v2932_v17 = vadd.f32 %v11660_v8, %v9498_v62 }
0x10e5   :  { %v2924_v42 = vadd.f32 %v9498_v62, %v2923_v41  ;;  %2939 = vadd.xlane.f32.xlu0 %v2921_v5 }
0x10e7   :  { %2941 = vadd.xlane.f32.xlu1 %v2924_v42 }
0x10e9   :  { %2943 = vadd.xlane.f32.xlu0 %v2929_v13 }
0x10eb   :  { %2945 = vadd.xlane.f32.xlu1 %v2932_v17 }
0x1172   :  { %v2940_v9 = vpop.xlane.xlu0 %2939 }
0x1173   :  { %v2947_v58 = vmul.f32 0.0078125, %v2940_v9 }
0x1174   :  { %v2942_v7 = vpop.xlane.xlu1 %2941 }
0x1175   :  { %v2951_v55 = vsub.f32 %v2921_v5, %v2947_v58  ;;  %v2948_v19 = vmul.f32 0.0078125, %v2942_v7 }
0x1176   :  { %v2944_v20 = vpop.xlane.xlu0 %2943 }
0x1177   :  { %v2952_v23 = vsub.f32 %v2924_v42, %v2948_v19  ;;  %v2949_v24 = vmul.f32 0.0078125, %v2944_v20  ;;  %v2955_v25 = vmul.f32 %v2951_v55, %v2951_v55  ;;  %v12541_v19 = vld [vmem:[%s13397_s24 + $0xc0] sm:$0xff]  }
0x1178   :  { %v2946_v15 = vpop.xlane.xlu1 %2945 }
0x1179   :  { %v2953_v46 = vsub.f32 %v2929_v13, %v2949_v24  ;;  %v2950_v26 = vmul.f32 0.0078125, %v2946_v15  ;;  %2959 = vadd.xlane.f32.xlu0 %v2955_v25  ;;  %v2956_v27 = vmul.f32 %v2952_v23, %v2952_v23  ;;  %v12543_v24 = vld [vmem:[%s13397_s24 + $0xc8] sm:$0xff]   ;;  %v12545_v15 = vld [vmem:[%s13397_s24 + $0xd0] sm:$0xff]  }
0x117a   :  { %v12544_v25 = vld [vmem:[%s13397_s24 + $0x88] sm:$0xff]  }
0x117b   :  { %v2954_v4 = vsub.f32 %v2932_v17, %v2950_v26  ;;  %2961 = vadd.xlane.f32.xlu1 %v2956_v27  ;;  %v2957_v30 = vmul.f32 %v2953_v46, %v2953_v46  ;;  %v12547_v26 = vld [vmem:[%s13397_s24 + $0xd8] sm:$0xff]  }
0x117c   :  { %v12548_v27 = vld [vmem:[%s13397_s24 + $0x98] sm:$0xff]  }
0x117d   :  { %2963 = vadd.xlane.f32.xlu0 %v2957_v30  ;;  %v2958_v31 = vmul.f32 %v2954_v4, %v2954_v4  ;;  %v12550_v30 = vld [vmem:[%s13397_s24 + $0xa0] sm:$0xff]  }
0x117f   :  { %2965 = vadd.xlane.f32.xlu1 %v2958_v31  ;;  %v12551_v31 = vld [vmem:[%s13397_s24 + $0xe8] sm:$0xff]  }
0x1206   :  { %v2960_v32 = vpop.xlane.xlu0 %2959 }
0x1207   :  { %v2967_v44 = vmul.f32 0.0078125, %v2960_v32  ;;  %v12552_v32 = vld [vmem:[%s13397_s24 + $0xa8] sm:$0xff]  }
0x1208   :  { %v2962_v29 = vpop.xlane.xlu1 %2961 }
0x1209   :  { %v2971_v33 = vadd.f32 1e-05, %v2967_v44  ;;  %v2968_v34 = vmul.f32 0.0078125, %v2962_v29  ;;  %v12553_v44 = vld [vmem:[%s13397_s24 + $0xf0] sm:$0xff]  }
0x120a   :  { %v2964_v35 = vpop.xlane.xlu0 %2963  ;;  %v12554_v29 = vld [vmem:[%s13397_s24 + $0xb0] sm:$0xff]  }
0x120b   :  { %12917 = vrsqrt.f32 %v2971_v33  ;;  %v2972_v36 = vadd.f32 1e-05, %v2968_v34  ;;  %v2969_v59 = vmul.f32 0.0078125, %v2964_v35  ;;  %v12555_v33 = vld [vmem:[%s13397_s24 + $0xf8] sm:$0xff]   ;;  %v12557_v35 = vld [vmem:[%s13473_s15 + $0x40] sm:$0xff]  }
0x120c   :  { %v2966_v37 = vpop.xlane.xlu1 %2965  ;;  %v12556_v34 = vld [vmem:[%s13397_s24 + $0xb8] sm:$0xff]   ;;  %11670 = vmatpush3.bf16.msra.mxu1 %v12557_v35 }
0x120d   :  { %12919 = vrsqrt.f32 %v2972_v36  ;;  %v2973_v38 = vadd.f32 1e-05, %v2969_v59  ;;  %v2970_v28 = vmul.f32 0.0078125, %v2966_v37  ;;  %v12558_v36 = vld [vmem:[%s13473_s15 + $0x48] sm:$0xff]   ;;  %11671 = vmatprep.subr.bf16.mxu1 %v13012_v0  ;;  %v12559_v59 = vld [vmem:[%s13473_s15 + $0x50] sm:$0xff]   ;;  %v12560_v37 = vld [vmem:[%s13473_s15 + $0x58] sm:$0xff]  }
0x120f   :  { %12921 = vrsqrt.f32 %v2973_v38  ;;  %v2974_v39 = vadd.f32 1e-05, %v2970_v28  ;;  %v12561_v38 = vld [vmem:[%s13473_s15 + $0x60] sm:$0xff]  }
0x1210   :  { %11672 = vmatpush3.bf16.msra.mxu1 %v12558_v36 }
0x1211   :  { %12923 = vrsqrt.f32 %v2974_v39  ;;  %11673 = vmatprep.subr.bf16.mxu1 %v13012_v0 }
0x1214   :  { %11674 = vmatpush3.bf16.msra.mxu1 %v12559_v59 }
0x1215   :  { %v12918_v40 = vpop.eup %12917  ;;  %11675 = vmatprep.subr.bf16.mxu1 %v13012_v0 }
0x1216   :  { %v2979_v45 = vmul.f32 %v12918_v40, %v2951_v55 }
0x1217   :  { %v12920_v51 = vpop.eup %12919 }
0x1218   :  { %v2980_v56 = vmul.f32 %v12920_v51, %v2952_v23  ;;  %v2989_v57 = vmul.f32 %v9509_v43, %v2979_v45  ;;  %v12542_v23 = vld [vmem:[%s13397_s24 + $0x80] sm:$0xff]   ;;  %11676 = vmatpush3.bf16.msra.mxu1 %v12560_v37  ;;  %v12562_v51 = vld [vmem:[%s13473_s15 + $0x68] sm:$0xff]  }
0x1219   :  { %v12922_v50 = vpop.eup %12921  ;;  %11677 = vmatprep.subr.bf16.mxu1 %v13012_v0 }
0x121a   :  { %v2981_v54 = vmul.f32 %v12922_v50, %v2953_v46  ;;  %v2990_v53 = vmul.f32 %v9509_v43, %v2980_v56  ;;  %v13648_v62 = vadd.f32 %v9510_v52, %v2989_v57  ;;  %v12546_v46 = vld [vmem:[%s13397_s24 + $0x90] sm:$0xff]   ;;  %v12564_v56 = vld [vmem:[%s13473_s15 + $0x78] sm:$0xff]   ;;  %v12566_v57 = vld [vmem:[%s13496_s20 + $0x48] sm:$0xff]  }
0x121b   :  { %v12924_v63 = vpop.eup %12923  ;;  %v12567_v50 = vld [vmem:[%s13496_s20 + $0x50] sm:$0xff]  }
0x121c   :  { %v2982_v3 = vmul.f32 %v12924_v63, %v2954_v4  ;;  %v13650_v5 = vadd.f32 %v9510_v52, %v2990_v53  ;;  %v2991_v8 = vmul.f32 %v9509_v43, %v2981_v54  ;;  %v3003_v41 = vmul.f32 %v13648_v62, %v13434_v49  ;;  %v12549_v4 = vld [vmem:[%s13397_s24 + $0xe0] sm:$0xff]   ;;  %11678 = vmatpush3.bf16.msra.mxu1 %v12561_v38  ;;  %v12568_v54 = vld [vmem:[%s13496_s20 + $0x58] sm:$0xff]   ;;  %v12570_v63 = vld [vmem:[%s13496_s20 + $0x68] sm:$0xff]  }
0x121d   :  { %11679 = vmatprep.subr.bf16.mxu1 %v13012_v0  ;;  %v12569_v53 = vld [vmem:[%s13496_s20 + $0x60] sm:$0xff]  }
0x121e   :  { %v3004_v42 = vmul.f32 %v13650_v5, %v13413_v18  ;;  %v2992_v13 = vmul.f32 %v9509_v43, %v2982_v3  ;;  %v13656_v17 = vadd.f32 %v9510_v52, %v2991_v8  ;;  %v9579_v8 = vld [vmem:[%s13513_s25 + $0x1] ss:$0 sm:$0xff] }
0x1220   :  { %v3007_v9 = vpack.c.bf16 %v3004_v42, %v3003_v41  ;;  %v13658_v58 = vadd.f32 %v9510_v52, %v2992_v13  ;;  %v3005_v7 = vmul.f32 %v13656_v17, %v13453_v2  ;;  %11680 = vmatpush3.bf16.msra.mxu1 %v12562_v51  ;;  %v12563_v52 = vld [vmem:[%s13473_s15 + $0x70] sm:$0xff]  }
0x1221   :  { %11681 = vmatprep.subr.bf16.mxu1 %v13012_v0 }
0x1222   :  { %11662 = vmatpush3.bf16.msra.mxu0 %v3007_v9  ;;  %v3006_v55 = vmul.f32 %v13658_v58, %v13449_v60 }
0x1223   :  { %11663 = vmatprep.subr.bf16.mxu0 %v13012_v0 }
0x1224   :  { %v3008_v20 = vpack.c.bf16 %v3006_v55, %v3005_v7  ;;  %11682 = vmatpush3.bf16.msra.mxu1 %v12563_v52 }
0x1225   :  { %11683 = vmatprep.subr.bf16.mxu1 %v13012_v0 }
0x1226   :  { %11664 = vmatpush3.bf16.msra.mxu0 %v3008_v20 }
0x1227   :  { %10841 = vmatprep.subr.bf16.mxu0 %v12541_v19 }
0x1228   :  { %11684 = vmatpush3.bf16.msra.mxu1 %v12564_v56 }
0x1229   :  { %11666 = vmatmul.mubr.msk.bf16.vlgmr.msra.gmra.mrb[56].mxu0 %vm1777_vm2, %v13460_v12  ;;  %11709 = vmatprep.subr.bf16.mxu1 %v13012_v0 }
0x122a   :  { %10842 = vmatpush3.bf16.msra.mxu0 %v12542_v23 }
0x122b   :  { %10843 = vmatprep.subr.bf16.mxu0 %v12543_v24 }
0x122e   :  { %10844 = vmatpush3.bf16.msra.mxu0 %v12544_v25  ;;  %v12571_v25 = vld [vmem:[%s13496_s20 + $0x70] sm:$0xff]  }
0x122f   :  { %10845 = vmatprep.subr.bf16.mxu0 %v12545_v15  ;;  %v12572_v15 = vld [vmem:[%s13496_s20 + $0x78] sm:$0xff]  }
0x1232   :  { %10846 = vmatpush3.bf16.msra.mxu0 %v12546_v46  ;;  %v9596_v46 = vld [vmem:[%s13525_s1 + $0x1] ss:$0 sm:$0xff] }
0x1233   :  { %10847 = vmatprep.subr.bf16.mxu0 %v12547_v26 }
0x1236   :  { %10848 = vmatpush3.bf16.msra.mxu0 %v12548_v27 }
0x1237   :  { %10849 = vmatprep.subr.bf16.mxu0 %v12549_v4 }
0x123a   :  { %10850 = vmatpush3.bf16.msra.mxu0 %v12550_v30 }
0x123b   :  { %10851 = vmatprep.subr.bf16.mxu0 %v12551_v31 }
0x123e   :  { %10852 = vmatpush3.bf16.msra.mxu0 %v12552_v32 }
0x123f   :  { %10853 = vmatprep.subr.bf16.mxu0 %v12553_v44 }
0x1242   :  { %10854 = vmatpush3.bf16.msra.mxu0 %v12554_v29 }
0x1243   :  { %10855 = vmatprep.subr.bf16.mxu0 %v12555_v33 }
0x1246   :  { %10856 = vmatpush3.bf16.msra.mxu0 %v12556_v34  ;;  %v9605_v34 = vld [vmem:[%s13558_s8 + $0x1] ss:$0 sm:$0xff] }
0x1247   :  { %11689 = vmatprep.subr.bf16.mxu0 %v13012_v0 }
0x12fc   :  { %v3043_v28 = vpop.f32.mrb[56].mxu0 }
0x12fd   :  { %v11667_v39 = vpop.f32.mrb[57].mxu0 }
0x12fe   :  { %v3046_v40 = vpop.f32.mrb[58].mxu0  ;;  %v12573_v39 = vld [vmem:[%s13729_s27] sm:$0xff]  }
0x12ff   :  { %v3123_v43 = vpack.c.bf16 %v3046_v40, %v3043_v28  ;;  %v11668_v45 = vpop.f32.mrb[59].mxu0 }
0x1301   :  { %3258 = vmatprep.mubr.bf16.mxu0 %v3123_v43 }
0x1302   :  { %3259 = vmatmul.mubr.bf16.vlgmr.msra.gmra.mrb[60].mxu0 %v13589_v14  ;;  %v12565_v14 = vld [vmem:[%s13496_s20 + $0x40] sm:$0xff]  }
0x1303   :  { %11705 = vmatprep.mubr.msk.bf16.mxu0 %vm13014_vm0, %v13012_v0  ;;  %11690 = vmatpush3.bf16.msra.mxu0 %v12565_v14 }
0x1304   :  { %11691 = vmatprep.subr.bf16.mxu0 %v13012_v0 }
0x1307   :  { %11692 = vmatpush3.bf16.msra.mxu0 %v12566_v57 }
0x1308   :  { %11693 = vmatprep.subr.bf16.mxu0 %v13012_v0 }
0x130b   :  { %11694 = vmatpush3.bf16.msra.mxu0 %v12567_v50  ;;  %v12574_v50 = vld [vmem:[%s13729_s27 + $0x8] sm:$0xff]  }
0x130c   :  { %11695 = vmatprep.subr.bf16.mxu0 %v13012_v0 }
0x130f   :  { %11696 = vmatpush3.bf16.msra.mxu0 %v12568_v54  ;;  %v12575_v54 = vld [vmem:[%s13729_s27 + $0x10] sm:$0xff]  }
0x1310   :  { %11697 = vmatprep.subr.bf16.mxu0 %v13012_v0 }
0x1313   :  { %11698 = vmatpush3.bf16.msra.mxu0 %v12569_v53  ;;  %v12576_v53 = vld [vmem:[%s13729_s27 + $0x18] sm:$0xff]  }
0x1314   :  { %11699 = vmatprep.subr.bf16.mxu0 %v13012_v0 }
0x1317   :  { %11700 = vmatpush3.bf16.msra.mxu0 %v12570_v63  ;;  %v12577_v63 = vld [vmem:[%s13729_s27 + $0x20] sm:$0xff]  }
0x1318   :  { %11701 = vmatprep.subr.bf16.mxu0 %v13012_v0 }
0x131b   :  { %11702 = vmatpush3.bf16.msra.mxu0 %v12571_v25 }
0x131c   :  { %11703 = vmatprep.subr.bf16.mxu0 %v13012_v0 }
0x131f   :  { %11704 = vmatpush3.bf16.msra.mxu0 %v12572_v15 }
0x1320   :  { %11729 = vmatprep.subr.bf16.mxu0 %v13012_v0 }
0x13d5   :  { %v10857_v3 = vpop.f32.mrb[60].mxu0 }
0x13d6   :  { %v10858_v41 = vpop.f32.mrb[61].mxu0 }
0x13d7   :  { %v10859_v42 = vadd.f32 %v10858_v41, %v10857_v3  ;;  %v10860_v13 = vpop.f32.mrb[62].mxu0  ;;  %v12578_v3 = vld [vmem:[%s13729_s27 + $0x28] sm:$0xff]   ;;  %v12580_v41 = vld [vmem:[%s13729_s27 + $0x38] sm:$0xff]  }
0x13d8   :  { %v10861_v9 = vpop.f32.mrb[63].mxu0 }
0x13d9   :  { %v3261_v7 = vadd.f32 %v10859_v42, %v9579_v8  ;;  %v10862_v55 = vadd.f32 %v10861_v9, %v10860_v13  ;;  %v12581_v42 = vld [vmem:[%s13750_s6] sm:$0xff]   ;;  %v12582_v13 = vld [vmem:[%s13750_s6 + $0x8] sm:$0xff]   ;;  %v12583_v9 = vld [vmem:[%s13750_s6 + $0x10] sm:$0xff]  }
0x13db   :  { %v3264_v19 = vadd.f32 %v10862_v55, %v9579_v8  ;;  %v3267_v20 = vmax.f32 %v3261_v7, 0.0  ;;  %v12579_v8 = vld [vmem:[%s13729_s27 + $0x30] sm:$0xff]   ;;  %v12584_v7 = vld [vmem:[%s13750_s6 + $0x18] sm:$0xff]   ;;  %v12585_v55 = vld [vmem:[%s13750_s6 + $0x20] sm:$0xff]  }
0x13dd   :  { %v3268_v23 = vmax.f32 %v3264_v19, 0.0  ;;  %v12586_v19 = vld [vmem:[%s13750_s6 + $0x28] sm:$0xff]  }
0x13df   :  { %v3269_v24 = vpack.c.bf16 %v3268_v23, %v3267_v20 }
0x13e1   :  { %11686 = vmatmul.mubr.bf16.vlgmr.msra.gmra.mrb[40].mxu1 %v3269_v24 }
0x13e2   :  { %11725 = vmatprep.mubr.msk.bf16.mxu1 %vm13014_vm0, %v13012_v0  ;;  %11710 = vmatpush3.bf16.msra.mxu1 %v12573_v39  ;;  %v12592_v39 = vld [vmem:[%s13777_s17 + $0x18] sm:$0xff]  }
0x13e3   :  { %11711 = vmatprep.subr.bf16.mxu1 %v13012_v0 }
0x13e6   :  { %11712 = vmatpush3.bf16.msra.mxu1 %v12574_v50 }
0x13e7   :  { %11713 = vmatprep.subr.bf16.mxu1 %v13012_v0 }
0x13ea   :  { %11714 = vmatpush3.bf16.msra.mxu1 %v12575_v54 }
0x13eb   :  { %11715 = vmatprep.subr.bf16.mxu1 %v13012_v0 }
0x13ee   :  { %11716 = vmatpush3.bf16.msra.mxu1 %v12576_v53 }
0x13ef   :  { %11717 = vmatprep.subr.bf16.mxu1 %v13012_v0 }
0x13f2   :  { %11718 = vmatpush3.bf16.msra.mxu1 %v12577_v63 }
0x13f3   :  { %11719 = vmatprep.subr.bf16.mxu1 %v13012_v0 }
0x13f6   :  { %11720 = vmatpush3.bf16.msra.mxu1 %v12578_v3  ;;  %v12595_v3 = vld [vmem:[%s13777_s17 + $0x30] sm:$0xff]  }
0x13f7   :  { %11721 = vmatprep.subr.bf16.mxu1 %v13012_v0 }
0x13fa   :  { %11722 = vmatpush3.bf16.msra.mxu1 %v12579_v8  ;;  %v12596_v8 = vld [vmem:[%s13777_s17 + $0x38] sm:$0xff]  }
0x13fb   :  { %11723 = vmatprep.subr.bf16.mxu1 %v13012_v0 }
0x13fe   :  { %11724 = vmatpush3.bf16.msra.mxu1 %v12580_v41  ;;  %v9627_v41 = vld [vmem:[%s13806_s5] ss:$0 sm:$0xff] }
0x13ff   :  { %11749 = vmatprep.subr.bf16.mxu1 %v13012_v0 }
0x14b4   :  { %v3358_v26 = vpop.f32.mrb[40].mxu1 }
0x14b5   :  { %v3359_v27 = vadd.f32 %v9596_v46, %v3358_v26  ;;  %v11687_v4 = vpop.f32.mrb[41].mxu1 }
0x14b6   :  { %v3361_v30 = vpop.f32.mrb[42].mxu1 }
0x14b7   :  { %v3362_v31 = vadd.f32 %v9596_v46, %v3361_v30  ;;  %v11688_v32 = vpop.f32.mrb[43].mxu1  ;;  %v3365_v44 = vmax.f32 %v3359_v27, 0.0  ;;  %v9616_v27 = vld [vmem:[%s13572_s14 + $0x1] ss:$0 sm:$0xff] }
0x14b9   :  { %v3366_v29 = vmax.f32 %v3362_v31, 0.0  ;;  %v9617_v31 = vld [vmem:[%s13577_s21 + $0x1] ss:$0 sm:$0xff] }
0x14bb   :  { %v3367_v33 = vpack.c.bf16 %v3366_v29, %v3365_v44 }
0x14bd   :  { %11706 = vmatmul.mubr.bf16.vlgmr.msra.gmra.mrb[64].mxu0 %v3367_v33 }
0x14be   :  { %11745 = vmatprep.mubr.msk.bf16.mxu0 %vm13014_vm0, %v13012_v0  ;;  %11730 = vmatpush3.bf16.msra.mxu0 %v12581_v42 }
0x14bf   :  { %11731 = vmatprep.subr.bf16.mxu0 %v13012_v0 }
0x14c2   :  { %11732 = vmatpush3.bf16.msra.mxu0 %v12582_v13 }
0x14c3   :  { %11733 = vmatprep.subr.bf16.mxu0 %v13012_v0 }
0x14c6   :  { %11734 = vmatpush3.bf16.msra.mxu0 %v12583_v9 }
0x14c7   :  { %11735 = vmatprep.subr.bf16.mxu0 %v13012_v0 }
0x14ca   :  { %11736 = vmatpush3.bf16.msra.mxu0 %v12584_v7 }
0x14cb   :  { %11737 = vmatprep.subr.bf16.mxu0 %v13012_v0 }
0x14ce   :  { %11738 = vmatpush3.bf16.msra.mxu0 %v12585_v55 }
0x14cf   :  { %11739 = vmatprep.subr.bf16.mxu0 %v13012_v0 }
0x14d2   :  { %11740 = vmatpush3.bf16.msra.mxu0 %v12586_v19 }
0x14d3   :  { %11741 = vmatprep.subr.bf16.mxu0 %v13012_v0 }
0x1590   :  { %v3456_v35 = vpop.f32.mrb[64].mxu0 }
0x1591   :  { %v3457_v36 = vadd.f32 %v9605_v34, %v3456_v35  ;;  %v11707_v59 = vpop.f32.mrb[65].mxu0 }
0x1592   :  { %v3459_v37 = vpop.f32.mrb[66].mxu0 }
0x1593   :  { %v3460_v38 = vadd.f32 %v9605_v34, %v3459_v37  ;;  %3467 = vadd.xlane.f32.xlu0 %v3457_v36  ;;  %v11708_v28 = vpop.f32.mrb[67].mxu0  ;;  %v12587_v37 = vld [vmem:[%s13750_s6 + $0x30] sm:$0xff]  }
0x1594   :  { %11742 = vmatpush3.bf16.msra.mxu0 %v12587_v37  ;;  %v12591_v28 = vld [vmem:[%s13777_s17 + $0x10] sm:$0xff]  }
0x1595   :  { %3469 = vadd.xlane.f32.xlu1 %v3460_v38  ;;  %11743 = vmatprep.subr.bf16.mxu0 %v13012_v0 }
0x1620   :  { %v3468_v40 = vpop.xlane.xlu0 %3467 }
0x1621   :  { %v3471_v43 = vmul.f32 0.0078125, %v3468_v40  ;;  %v12593_v40 = vld [vmem:[%s13777_s17 + $0x20] sm:$0xff]  }
0x1622   :  { %v3470_v45 = vpop.xlane.xlu1 %3469 }
0x1623   :  { %v3473_v51 = vsub.f32 %v3457_v36, %v3471_v43  ;;  %v3472_v52 = vmul.f32 0.0078125, %v3470_v45  ;;  %v12594_v43 = vld [vmem:[%s13777_s17 + $0x28] sm:$0xff]   ;;  %v9618_v45 = vld [vmem:[%s13794_s23] ss:$0 sm:$0xff] }
0x1625   :  { %v3474_v56 = vsub.f32 %v3460_v38, %v3472_v52  ;;  %v3475_v14 = vmul.f32 %v3473_v51, %v3473_v51  ;;  %v12588_v38 = vld [vmem:[%s13750_s6 + $0x38] sm:$0xff]  }
0x1626   :  { %11744 = vmatpush3.bf16.msra.mxu0 %v12588_v38 }
0x1627   :  { %3477 = vadd.xlane.f32.xlu0 %v3475_v14  ;;  %v3476_v57 = vmul.f32 %v3474_v56, %v3474_v56  ;;  %11769 = vmatprep.subr.bf16.mxu0 %v13012_v0 }
0x1629   :  { %3479 = vadd.xlane.f32.xlu1 %v3476_v57 }
0x16b4   :  { %v3478_v20 = vpop.xlane.xlu0 %3477 }
0x16b5   :  { %v3481_v23 = vmul.f32 0.0078125, %v3478_v20 }
0x16b6   :  { %v3480_v24 = vpop.xlane.xlu1 %3479 }
0x16b7   :  { %v3483_v25 = vadd.f32 1e-05, %v3481_v23  ;;  %v3482_v15 = vmul.f32 0.0078125, %v3480_v24 }
0x16b9   :  { %12925 = vrsqrt.f32 %v3483_v25  ;;  %v3484_v46 = vadd.f32 1e-05, %v3482_v15  ;;  %v3854_v25 = vld [vmem:[%s9219_s18] sm:$0x1]  ;;  %s13061_s18 = smov 29  }
0x16ba   :  { %v3886_v15 = vsel %vm611_vm3, %v3854_v25, 0  ;;  %s9220_s26 = sld [smem:[%s14602_s0 + %s13061_s18]]   ;;  %vm3978_vm3 = vcmask 523264   ;;  %s13063_s18 = smov 31  }
0x16bb   :  { %12927 = vrsqrt.f32 %v3484_v46  ;;  %v9636_v46 = vld [vmem:[%s13819_s30] ss:$0 sm:$0xff] }
0x16c3   :  { %v12926_v26 = vpop.eup %12925 }
0x16c4   :  { %v3487_v4 = vmul.f32 %v12926_v26, %v3473_v51 }
0x16c5   :  { %v12928_v30 = vpop.eup %12927 }
0x16c6   :  { %v3488_v32 = vmul.f32 %v12928_v30, %v3474_v56  ;;  %v3495_v44 = vmul.f32 %v9616_v27, %v3487_v4 }
0x16c8   :  { %v3496_v29 = vmul.f32 %v9616_v27, %v3488_v32  ;;  %v3503_v33 = vadd.f32 %v9617_v31, %v3495_v44 }
0x16ca   :  { %v3504_v34 = vadd.f32 %v9617_v31, %v3496_v29  ;;  %v3505_v35 = vadd.f32 %v3503_v33, %v13582_v6  ;;  %v12589_v6 = vld [vmem:[%s13777_s17] sm:$0xff]   ;;  %v12598_v33 = vld [vmem:[%s9221_s13 + $0x8] sm:$0xff]  }
0x16cb   :  { %v12597_v29 = vld [vmem:[%s9221_s13] sm:$0xff]  }
0x16cc   :  { %v3506_v36 = vadd.f32 %v3504_v34, %v13585_v1  ;;  %v12590_v1 = vld [vmem:[%s13777_s17 + $0x8] sm:$0xff]   ;;  %v12599_v34 = vld [vmem:[%s9221_s13 + $0x10] sm:$0xff]  }
0x16ce   :  { %v3562_v59 = vpack.c.bf16 %v3506_v36, %v3505_v35  ;;  %v12600_v35 = vld [vmem:[%s9221_s13 + $0x18] sm:$0xff]   ;;  %v9645_v36 = vld [vmem:[%s9220_s26] ss:$0 sm:$0xff]  ;;  %s9223_s13 = sld [smem:[%s14602_s0 + %s13062_s2]]   ;;  %s13064_s2 = smov 33  }
0x16cf   :  { %s9222_s26 = sld [smem:[%s14602_s0 + %s13063_s18]]  }
0x16d0   :  { %11726 = vmatmul.mubr.bf16.vlgmr.msra.gmra.mrb[44].mxu1 %v3562_v59 }
0x16d1   :  { %11765 = vmatprep.mubr.msk.bf16.mxu1 %vm13014_vm0, %v13012_v0  ;;  %11750 = vmatpush3.bf16.msra.mxu1 %v12589_v6 }
0x16d2   :  { %11751 = vmatprep.subr.bf16.mxu1 %v13012_v0 }
0x16d5   :  { %11752 = vmatpush3.bf16.msra.mxu1 %v12590_v1 }
0x16d6   :  { %11753 = vmatprep.subr.bf16.mxu1 %v13012_v0 }
0x16d9   :  { %11754 = vmatpush3.bf16.msra.mxu1 %v12591_v28 }
0x16da   :  { %11755 = vmatprep.subr.bf16.mxu1 %v13012_v0 }
0x16dd   :  { %11756 = vmatpush3.bf16.msra.mxu1 %v12592_v39 }
0x16de   :  { %11757 = vmatprep.subr.bf16.mxu1 %v13012_v0 }
0x16e1   :  { %11758 = vmatpush3.bf16.msra.mxu1 %v12593_v40 }
0x16e2   :  { %11759 = vmatprep.subr.bf16.mxu1 %v13012_v0 }
0x16e5   :  { %11760 = vmatpush3.bf16.msra.mxu1 %v12594_v43 }
0x16e6   :  { %11761 = vmatprep.subr.bf16.mxu1 %v13012_v0 }
0x16e9   :  { %11762 = vmatpush3.bf16.msra.mxu1 %v12595_v3 }
0x16ea   :  { %11763 = vmatprep.subr.bf16.mxu1 %v13012_v0 }
0x16ed   :  { %11764 = vmatpush3.bf16.msra.mxu1 %v12596_v8 }
0x16ee   :  { %11775 = vmatprep.subr.bf16.mxu1 %v13012_v0 }
0x17a3   :  { %v3651_v51 = vpop.f32.mrb[44].mxu1 }
0x17a4   :  { %v3652_v52 = vadd.f32 %v9618_v45, %v3651_v51  ;;  %v11727_v56 = vpop.f32.mrb[45].mxu1 }
0x17a5   :  { %v3654_v14 = vpop.f32.mrb[46].mxu1 }
0x17a6   :  { %v3655_v57 = vadd.f32 %v9618_v45, %v3654_v14  ;;  %v11728_v50 = vpop.f32.mrb[47].mxu1  ;;  %v3658_v54 = vmax.f32 %v3652_v52, 0.0 }
0x17a8   :  { %v3659_v53 = vmax.f32 %v3655_v57, 0.0 }
0x17aa   :  { %v3660_v63 = vpack.c.bf16 %v3659_v53, %v3658_v54 }
0x17ac   :  { %11746 = vmatmul.mubr.bf16.vlgmr.msra.gmra.mrb[68].mxu0 %v3660_v63 }
0x17ad   :  { %11771 = vmatprep.mubr.msk.bf16.mxu0 %vm13014_vm0, %v13012_v0  ;;  %11770 = vmatpush3.bf16.msra.mxu0 %v3886_v15 }
0x17ae   :  { %11787 = vmatprep.subr.bf16.mxu0 %v13012_v0 }
0x187f   :  { %v3749_v42 = vpop.f32.mrb[68].mxu0 }
0x1880   :  { %v3750_v13 = vadd.f32 %v9627_v41, %v3749_v42  ;;  %v11747_v9 = vpop.f32.mrb[69].mxu0 }
0x1881   :  { %v3752_v7 = vpop.f32.mrb[70].mxu0 }
0x1882   :  { %v3753_v55 = vadd.f32 %v9627_v41, %v3752_v7  ;;  %v11748_v19 = vpop.f32.mrb[71].mxu0  ;;  %v3756_v20 = vmax.f32 %v3750_v13, 0.0  ;;  %v12601_v7 = vld [vmem:[%s9223_s13] sm:$0xff]  }
0x1883   :  { %v12603_v19 = vld [vmem:[%s9223_s13 + $0x10] sm:$0xff]  }
0x1884   :  { %v3757_v23 = vmax.f32 %v3753_v55, 0.0  ;;  %v12602_v55 = vld [vmem:[%s9223_s13 + $0x8] sm:$0xff]  }
0x1886   :  { %v3758_v24 = vpack.c.bf16 %v3757_v23, %v3756_v20  ;;  %v12604_v20 = vld [vmem:[%s9223_s13 + $0x18] sm:$0xff]   ;;  %v9647_v23 = vld [vmem:[%s9222_s26] ss:$0 sm:$0xff]  ;;  %s9224_s13 = sld [smem:[%s14602_s0 + %s13064_s2]]  }
0x1888   :  { %11766 = vmatmul.mubr.bf16.vlgmr.msra.gmra.mrb[48].mxu1 %v3758_v24 }
0x1889   :  { %11783 = vmatprep.mubr.msk.bf16.mxu1 %vm13014_vm0, %v13012_v0  ;;  %11776 = vmatpush3.bf16.msra.mxu1 %v12597_v29 }
0x188a   :  { %11777 = vmatprep.subr.bf16.mxu1 %v13012_v0 }
0x188d   :  { %11778 = vmatpush3.bf16.msra.mxu1 %v12598_v33 }
0x188e   :  { %11779 = vmatprep.subr.bf16.mxu1 %v13012_v0 }
0x1891   :  { %11780 = vmatpush3.bf16.msra.mxu1 %v12599_v34 }
0x1892   :  { %11781 = vmatprep.subr.bf16.mxu1 %v13012_v0 }
0x1895   :  { %11782 = vmatpush3.bf16.msra.mxu1 %v12600_v35 }
0x195b   :  { %v3847_v26 = vpop.f32.mrb[48].mxu1 }
0x195c   :  { %v11767_v27 = vpop.f32.mrb[49].mxu1  ;;  %v3848_v30 = vadd.f32 %v9636_v46, %v3847_v26 }
0x195d   :  { %v3850_v4 = vpop.f32.mrb[50].mxu1 }
0x195e   :  { %v3851_v31 = vadd.f32 %v9636_v46, %v3850_v4  ;;  %v11768_v32 = vpop.f32.mrb[51].mxu1 }
0x1960   :  { %v3874_v44 = vpack.c.bf16 %v3851_v31, %v3848_v30 }
0x1962   :  { %11772 = vmatmul.mubr.msk.bf16.vlgmr.msra.gmra.mrb[72].mxu0 %vm3881_vm4, %v3874_v44 }
0x1963   :  { %11795 = vmatprep.mubr.msk.bf16.mxu0 %vm13014_vm0, %v13012_v0  ;;  %11788 = vmatpush3.bf16.msra.mxu0 %v12601_v7  ;;  %v12618_v7 = vld [vmem:[%s13224_s9 + $0x190] sm:$0xff]  }
0x1964   :  { %11789 = vmatprep.subr.bf16.mxu0 %v13012_v0 }
0x1967   :  { %11790 = vmatpush3.bf16.msra.mxu0 %v12602_v55  ;;  %v12619_v55 = vld [vmem:[%s13224_s9 + $0x1d8] sm:$0xff]  }
0x1968   :  { %11791 = vmatprep.subr.bf16.mxu0 %v13012_v0 }
0x196b   :  { %11792 = vmatpush3.bf16.msra.mxu0 %v12603_v19  ;;  %v12609_v19 = vld [vmem:[%s13224_s9 + $0x220] sm:$0xff]  }
0x196c   :  { %11793 = vmatprep.subr.bf16.mxu0 %v13012_v0 }
0x196f   :  { %11794 = vmatpush3.bf16.msra.mxu0 %v12604_v20  ;;  %v12620_v20 = vld [vmem:[%s13224_s9 + $0x198] sm:$0xff]  }
0x1a35   :  { %v3922_v59 = vpop.f32.mrb[72].mxu0 }
0x1a36   :  { %v3923_v37 = vadd.f32 %v9645_v36, %v3922_v59  ;;  %v11773_v38 = vpop.f32.mrb[73].mxu0 }
0x1a37   :  { %v3925_v6 = vpop.f32.mrb[74].mxu0 }
0x1a38   :  { %v3929_v1 = vmul.f32 %v3923_v37, %v3923_v37  ;;  %v3926_v28 = vadd.f32 %v9645_v36, %v3925_v6  ;;  %v11774_v39 = vpop.f32.mrb[75].mxu0 }
0x1a3a   :  { %v3931_v40 = vmul.f32 %v3929_v1, %v3923_v37  ;;  %v3930_v43 = vmul.f32 %v3926_v28, %v3926_v28 }
0x1a3c   :  { %v3933_v45 = vmul.f32 0.044715, %v3931_v40  ;;  %v3932_v51 = vmul.f32 %v3930_v43, %v3926_v28 }
0x1a3e   :  { %v3935_v52 = vadd.f32 %v3933_v45, %v3923_v37  ;;  %v3934_v56 = vmul.f32 0.044715, %v3932_v51  ;;  %v9653_v45 = vld [vmem:[%s9224_s13] ss:$0 sm:$0xff] }
0x1a40   :  { %v3937_v14 = vmul.f32 0.7978846, %v3935_v52  ;;  %v3936_v57 = vadd.f32 %v3934_v56, %v3926_v28 }
0x1a42   :  { %12929 = vtanh.f32 %v3937_v14  ;;  %v3938_v50 = vmul.f32 0.7978846, %v3936_v57 }
0x1a44   :  { %12931 = vtanh.f32 %v3938_v50 }
0x1a4c   :  { %v12930_v54 = vpop.eup %12929 }
0x1a4d   :  { %v3941_v53 = vadd.f32 1.0, %v12930_v54 }
0x1a4e   :  { %v12932_v63 = vpop.eup %12931 }
0x1a4f   :  { %v3943_v3 = vmul.f32 0.5, %v3941_v53  ;;  %v3942_v8 = vadd.f32 1.0, %v12932_v63  ;;  %v12605_v53 = vld [vmem:[%s13224_s9 + $0x200] sm:$0xff]  }
0x1a50   :  { %v12613_v63 = vld [vmem:[%s13224_s9 + $0x1c0] sm:$0xff]  }
0x1a51   :  { %v3944_v41 = vmul.f32 0.5, %v3942_v8  ;;  %v3945_v42 = vmul.f32 %v3943_v3, %v3923_v37  ;;  %v13864_v3 = vadd.f32 %v13650_v5, %v13530_v11  ;;  %v13872_v8 = vadd.f32 %v13648_v62, %v13534_v16  ;;  %v12614_v11 = vld [vmem:[%s13224_s9 + $0x180] sm:$0xff]   ;;  %v12607_v16 = vld [vmem:[%s13224_s9 + $0x210] sm:$0xff]   ;;  %v12616_v62 = vld [vmem:[%s13224_s9 + $0x188] sm:$0xff]  }
0x1a53   :  { %v3946_v13 = vmul.f32 %v3944_v41, %v3926_v28  ;;  %v12606_v41 = vld [vmem:[%s13224_s9 + $0x208] sm:$0xff]   ;;  %v4306_v5 = vpack.c.bf16 %v13864_v3, %v13872_v8 }
0x1a55   :  { %v3947_v9 = vpack.c.bf16 %v3946_v13, %v3945_v42  ;;  %v12615_v42 = vld [vmem:[%s13224_s9 + $0x1c8] sm:$0xff]   ;;  %v12617_v13 = vld [vmem:[%s13224_s9 + $0x1d0] sm:$0xff]  }
0x1a57   :  { %11784 = vmatmul.mubr.msk.bf16.vlgmr.msra.gmra.mrb[52].mxu1 %vm3978_vm3, %v3947_v9  ;;  %v12608_v9 = vld [vmem:[%s13224_s9 + $0x218] sm:$0xff]  }
0x1a58   :  { %11801 = vmatprep.mubr.msk.bf16.mxu1 %vm1019_vm8, %v13201_v10 }
0x1b2a   :  { %v4016_v24 = vpop.f32.mrb[52].mxu1 }
0x1b2b   :  { %v4017_v25 = vadd.f32 %v9647_v23, %v4016_v24  ;;  %v11785_v15 = vpop.f32.mrb[53].mxu1  ;;  %v12610_v24 = vld [vmem:[%s13224_s9 + $0x228] sm:$0xff]  }
0x1b2c   :  { %v4019_v46 = vpop.f32.mrb[54].mxu1  ;;  %v12623_v15 = vld [vmem:[%s13224_s9 + $0x1e8] sm:$0xff]  }
0x1b2d   :  { %v4023_v26 = vmul.f32 %v4017_v25, %v4017_v25  ;;  %v4020_v27 = vadd.f32 %v9647_v23, %v4019_v46  ;;  %v11786_v4 = vpop.f32.mrb[55].mxu1  ;;  %v12621_v23 = vld [vmem:[%s13224_s9 + $0x1e0] sm:$0xff]   ;;  %v12611_v46 = vld [vmem:[%s13224_s9 + $0x230] sm:$0xff]  }
0x1b2e   :  { %v12612_v4 = vld [vmem:[%s13224_s9 + $0x238] sm:$0xff]  }
0x1b2f   :  { %v4025_v30 = vmul.f32 %v4023_v26, %v4017_v25  ;;  %v4024_v31 = vmul.f32 %v4020_v27, %v4020_v27  ;;  %v12624_v26 = vld [vmem:[%s13224_s9 + $0x1a8] sm:$0xff]  }
0x1b31   :  { %v4027_v32 = vmul.f32 0.044715, %v4025_v30  ;;  %v4026_v44 = vmul.f32 %v4024_v31, %v4020_v27  ;;  %v13901_v30 = vadd.f32 %v13658_v58, %v13547_v21  ;;  %v13905_v31 = vadd.f32 %v13656_v17, %v13551_v22 }
0x1b33   :  { %v4029_v29 = vadd.f32 %v4027_v32, %v4017_v25  ;;  %v4028_v33 = vmul.f32 0.044715, %v4026_v44  ;;  %v4309_v32 = vpack.c.bf16 %v13901_v30, %v13905_v31  ;;  %v12626_v44 = vld [vmem:[%s13224_s9 + $0x1b0] sm:$0xff]  }
0x1b35   :  { %v4031_v34 = vmul.f32 0.7978846, %v4029_v29  ;;  %v4030_v35 = vadd.f32 %v4028_v33, %v4020_v27  ;;  %v12627_v29 = vld [vmem:[%s13224_s9 + $0x1f8] sm:$0xff]  }
0x1b36   :  { %v12628_v33 = vld [vmem:[%s13224_s9 + $0x1b8] sm:$0xff]  }
0x1b37   :  { %12933 = vtanh.f32 %v4031_v34  ;;  %v4032_v36 = vmul.f32 0.7978846, %v4030_v35  ;;  %v12629_v34 = vld [vmem:[%s13331_s29 + $0x80] sm:$0xff]  }
0x1b39   :  { %12935 = vtanh.f32 %v4032_v36 }
0x1b41   :  { %v12934_v59 = vpop.eup %12933 }
0x1b42   :  { %v4035_v37 = vadd.f32 1.0, %v12934_v59 }
0x1b43   :  { %v12936_v38 = vpop.eup %12935 }
0x1b44   :  { %v4037_v6 = vmul.f32 0.5, %v4035_v37  ;;  %v4036_v1 = vadd.f32 1.0, %v12936_v38 }
0x1b46   :  { %v4038_v28 = vmul.f32 0.5, %v4036_v1  ;;  %v4039_v39 = vmul.f32 %v4037_v6, %v4017_v25  ;;  %v12622_v25 = vld [vmem:[%s13224_s9 + $0x1a0] sm:$0xff]  }
0x1b48   :  { %v4040_v40 = vmul.f32 %v4038_v28, %v4020_v27  ;;  %v12625_v27 = vld [vmem:[%s13224_s9 + $0x1f0] sm:$0xff]  }
0x1b4a   :  { %v4041_v43 = vpack.c.bf16 %v4040_v40, %v4039_v39  ;;  %v12630_v39 = vld [vmem:[%s13331_s29 + $0x88] sm:$0xff]   ;;  %v12631_v40 = vld [vmem:[%s13331_s29 + $0x90] sm:$0xff]  }
0x1b4c   :  { %11796 = vmatmul.mubr.msk.bf16.vlgmr.msra.gmra.mrb[76].mxu0 %vm3978_vm3, %v4041_v43 }
0x1b4d   :  { %11807 = vmatprep.mubr.msk.bf16.mxu0 %vm1019_vm8, %v13193_v61 }
0x1c1f   :  { %v4109_v51 = vpop.f32.mrb[76].mxu0 }
0x1c20   :  { %v11797_v52 = vpop.f32.mrb[77].mxu0  ;;  %v13852_v14 = vadd.f32 %v9653_v45, %v4109_v51 }
0x1c21   :  { %v4112_v56 = vpop.f32.mrb[78].mxu0 }
0x1c22   :  { %v13854_v57 = vadd.f32 %v9653_v45, %v4112_v56  ;;  %v11798_v50 = vpop.f32.mrb[79].mxu0  ;;  %v12632_v56 = vld [vmem:[%s13331_s29 + $0x98] sm:$0xff]  }
0x1c23   :  { %v12633_v50 = vld [vmem:[%s13331_s29 + $0xa0] sm:$0xff]  }
0x1c24   :  { %v13858_v54 = vpack.c.bf16 %v13854_v57, %v13852_v14 }
0x1c26   :  { %11799 = vmatprep.subr.bf16.mxu1 %v13858_v54  ;;  %11805 = vmatprep.subr.bf16.mxu0 %v13858_v54 }
0x1c27   :  { %11800 = vmatpush3.bf16.msra.mxu1 %v13858_v54  ;;  %11806 = vmatpush3.bf16.msra.mxu0 %v13858_v54 }
0x1c28   :  { %11811 = vmatprep.subr.bf16.mxu0 %v12605_v53  ;;  %10926 = vmatprep.subr.bf16.mxu1 %v12613_v63  ;;  %v12635_v63 = vld [vmem:[%s13331_s29 + $0xb0] sm:$0xff]  }
0x1c2a   :  { %11802 = vmatmul.mubr.msk.bf16.vlgmr.msra.gmra.mrb[56].mxu1 %vm1019_vm8, %v13257_v47  ;;  %11808 = vmatmul.mubr.msk.bf16.vlgmr.msra.gmra.mrb[80].mxu0 %vm1019_vm8, %v13259_v48 }
0x1c2b   :  { %11812 = vmatpush3.bf16.msra.mxu0 %v12605_v53  ;;  %11827 = vmatprep.mubr.bf16.mxu0 %v4306_v5  ;;  %v12634_v53 = vld [vmem:[%s13331_s29 + $0xa8] sm:$0xff]  }
0x1c2c   :  { %11813 = vmatprep.subr.bf16.mxu0 %v12606_v41  ;;  %10927 = vmatpush3.bf16.msra.mxu1 %v12614_v11  ;;  %v12637_v11 = vld [vmem:[%s13345_s3 + $0x80] sm:$0xff]   ;;  %v12638_v5 = vld [vmem:[%s13345_s3 + $0x88] sm:$0xff]  }
0x1c2d   :  { %10928 = vmatprep.subr.bf16.mxu1 %v12615_v42  ;;  %v12639_v42 = vld [vmem:[%s13345_s3 + $0x90] sm:$0xff]  }
0x1c2f   :  { %11814 = vmatpush3.bf16.msra.mxu0 %v12606_v41  ;;  %v12636_v41 = vld [vmem:[%s13331_s29 + $0xb8] sm:$0xff]  }
0x1c30   :  { %11815 = vmatprep.subr.bf16.mxu0 %v12607_v16  ;;  %10929 = vmatpush3.bf16.msra.mxu1 %v12616_v62  ;;  %v12641_v62 = vld [vmem:[%s13345_s3 + $0xa0] sm:$0xff]  }
0x1c31   :  { %10930 = vmatprep.subr.bf16.mxu1 %v12617_v13  ;;  %v12642_v13 = vld [vmem:[%s13345_s3 + $0xa8] sm:$0xff]  }
0x1c33   :  { %11816 = vmatpush3.bf16.msra.mxu0 %v12607_v16  ;;  %v12640_v16 = vld [vmem:[%s13345_s3 + $0x98] sm:$0xff]  }
0x1c34   :  { %11817 = vmatprep.subr.bf16.mxu0 %v12608_v9  ;;  %10931 = vmatpush3.bf16.msra.mxu1 %v12618_v7  ;;  %v9746_v7 = vld [vmem:[%s13356_s7 + $0x2] ss:$0 sm:$0xff] }
0x1c35   :  { %10932 = vmatprep.subr.bf16.mxu1 %v12619_v55 }
0x1c37   :  { %11818 = vmatpush3.bf16.msra.mxu0 %v12608_v9 }
0x1c38   :  { %11819 = vmatprep.subr.bf16.mxu0 %v12609_v19  ;;  %10933 = vmatpush3.bf16.msra.mxu1 %v12620_v20 }
0x1c39   :  { %10934 = vmatprep.subr.bf16.mxu1 %v12621_v23 }
0x1c3b   :  { %11820 = vmatpush3.bf16.msra.mxu0 %v12609_v19 }
0x1c3c   :  { %11821 = vmatprep.subr.bf16.mxu0 %v12610_v24  ;;  %10935 = vmatpush3.bf16.msra.mxu1 %v12622_v25 }
0x1c3d   :  { %10936 = vmatprep.subr.bf16.mxu1 %v12623_v15 }
0x1c3f   :  { %11822 = vmatpush3.bf16.msra.mxu0 %v12610_v24 }
0x1c40   :  { %11823 = vmatprep.subr.bf16.mxu0 %v12611_v46  ;;  %10937 = vmatpush3.bf16.msra.mxu1 %v12624_v26 }
0x1c41   :  { %10938 = vmatprep.subr.bf16.mxu1 %v12625_v27 }
0x1c43   :  { %11824 = vmatpush3.bf16.msra.mxu0 %v12611_v46 }
0x1c44   :  { %11825 = vmatprep.subr.bf16.mxu0 %v12612_v4  ;;  %10939 = vmatpush3.bf16.msra.mxu1 %v12626_v44 }
0x1c45   :  { %10940 = vmatprep.subr.bf16.mxu1 %v12627_v29 }
0x1c47   :  { %11826 = vmatpush3.bf16.msra.mxu0 %v12612_v4 }
0x1c48   :  { %10941 = vmatpush3.bf16.msra.mxu1 %v12628_v33  ;;  %11851 = vmatprep.subr.bf16.mxu0 %v12637_v11 }
0x1c49   :  { %11831 = vmatprep.subr.bf16.mxu1 %v12629_v34 }
0x1c4a   :  { %11828 = vmatmul.mubr.bf16.vlgmr.msra.gmra.mrb[84].mxu0 %v4309_v32 }
0x1c4b   :  { %11852 = vmatpush3.bf16.msra.mxu0 %v12637_v11 }
0x1c4c   :  { %11853 = vmatprep.subr.bf16.mxu0 %v12638_v5 }
0x1c4f   :  { %11854 = vmatpush3.bf16.msra.mxu0 %v12638_v5 }
0x1c50   :  { %11855 = vmatprep.subr.bf16.mxu0 %v12639_v42 }
0x1c53   :  { %11856 = vmatpush3.bf16.msra.mxu0 %v12639_v42 }
0x1c54   :  { %11857 = vmatprep.subr.bf16.mxu0 %v12640_v16 }
0x1c57   :  { %11858 = vmatpush3.bf16.msra.mxu0 %v12640_v16  ;;  %v9780_v16 = vld [vmem:[%s13372_s16 + $0x2] ss:$0 sm:$0xff] }
0x1c58   :  { %11859 = vmatprep.subr.bf16.mxu0 %v12641_v62 }
0x1c5b   :  { %11860 = vmatpush3.bf16.msra.mxu0 %v12641_v62 }
0x1c5c   :  { %11861 = vmatprep.subr.bf16.mxu0 %v12642_v13 }
0x1c5f   :  { %11862 = vmatpush3.bf16.msra.mxu0 %v12642_v13 }
0x1cfd   :  { %v11803_v21 = vpop.f32.mrb[56].mxu1  ;;  %v11809_v58 = vpop.f32.mrb[80].mxu0 }
0x1cfe   :  { %v4151_v35 = vpop.f32.mrb[57].mxu1  ;;  %v4200_v22 = vpop.f32.mrb[81].mxu0 }
0x1cff   :  { %v11804_v17 = vpop.f32.mrb[58].mxu1  ;;  %v11810_v36 = vpop.f32.mrb[82].mxu0 }
0x1d00   :  { %v4308_v59 = vpack.c.bf16 %v11804_v17, %v11803_v21  ;;  %v4307_v37 = vpack.c.bf16 %v11810_v36, %v11809_v58  ;;  %v4154_v38 = vpop.f32.mrb[59].mxu1  ;;  %v4203_v6 = vpop.f32.mrb[83].mxu0 }
0x1d01   :  { %v4305_v1 = vpack.c.bf16 %v4154_v38, %v4151_v35  ;;  %v4304_v28 = vpack.c.bf16 %v4203_v6, %v4200_v22  ;;  %v12643_v6 = vld [vmem:[%s13345_s3 + $0xb0] sm:$0xff]  }
0x1d02   :  { %11863 = vmatprep.subr.bf16.mxu0 %v12643_v6 }
0x1d03   :  { %4492 = vmatprep.mubr.bf16.mxu1 %v4305_v1  ;;  %11864 = vmatpush3.bf16.msra.mxu0 %v12643_v6  ;;  %v12644_v1 = vld [vmem:[%s13345_s3 + $0xb8] sm:$0xff]   ;;  %v12650_v6 = vld [vmem:[%s13397_s24 + $0x110] sm:$0xff]  }
0x1d04   :  { %4493 = vmatmul.mubr.bf16.vlgmr.msra.gmra.mrb[60].mxu1 %v4304_v28  ;;  %11865 = vmatprep.subr.bf16.mxu0 %v12644_v1  ;;  %v9771_v28 = vld [vmem:[%s13366_s12 + $0x2] ss:$0 sm:$0xff] }
0x1d05   :  { %4500 = vmatprep.mubr.bf16.mxu1 %v4308_v59  ;;  %11832 = vmatpush3.bf16.msra.mxu1 %v12629_v34 }
0x1d06   :  { %11833 = vmatprep.subr.bf16.mxu1 %v12630_v39 }
0x1d07   :  { %11866 = vmatpush3.bf16.msra.mxu0 %v12644_v1  ;;  %v12651_v1 = vld [vmem:[%s13397_s24 + $0x158] sm:$0xff]  }
0x1d09   :  { %11834 = vmatpush3.bf16.msra.mxu1 %v12630_v39 }
0x1d0a   :  { %11835 = vmatprep.subr.bf16.mxu1 %v12631_v40 }
0x1d0c   :  { %4501 = vmatmul.mubr.bf16.gmra.mrb[64].mxu1 %v4307_v37 }
0x1d0d   :  { %11836 = vmatpush3.bf16.msra.mxu1 %v12631_v40 }
0x1d0e   :  { %11837 = vmatprep.subr.bf16.mxu1 %v12632_v56 }
0x1d11   :  { %11838 = vmatpush3.bf16.msra.mxu1 %v12632_v56 }
0x1d12   :  { %11839 = vmatprep.subr.bf16.mxu1 %v12633_v50 }
0x1d15   :  { %11840 = vmatpush3.bf16.msra.mxu1 %v12633_v50 }
0x1d16   :  { %11841 = vmatprep.subr.bf16.mxu1 %v12634_v53 }
0x1d19   :  { %11842 = vmatpush3.bf16.msra.mxu1 %v12634_v53 }
0x1d1a   :  { %11843 = vmatprep.subr.bf16.mxu1 %v12635_v63 }
0x1d1d   :  { %v11829_v43 = vpop.f32.mrb[84].mxu0  ;;  %11844 = vmatpush3.bf16.msra.mxu1 %v12635_v63 }
0x1d1e   :  { %v4543_v45 = vpop.f32.mrb[85].mxu0  ;;  %11845 = vmatprep.subr.bf16.mxu1 %v12636_v41 }
0x1d1f   :  { %v11830_v51 = vpop.f32.mrb[86].mxu0 }
0x1d20   :  { %v4546_v52 = vpop.f32.mrb[87].mxu0 }
0x1d21   :  { %11846 = vmatpush3.bf16.msra.mxu1 %v12636_v41 }
0x1d22   :  { %11871 = vmatprep.subr.bf16.mxu1 %v13012_v0 }
0x1dd7   :  { %v10942_v9 = vpop.f32.mrb[60].mxu1 }
0x1dd8   :  { %v10943_v55 = vpop.f32.mrb[61].mxu1 }
0x1dd9   :  { %v10944_v19 = vadd.f32 %v10943_v55, %v10942_v9  ;;  %v10945_v20 = vpop.f32.mrb[62].mxu1 }
0x1dda   :  { %v10946_v23 = vpop.f32.mrb[63].mxu1 }
0x1ddb   :  { %v4495_v24 = vadd.f32 %v10944_v19, %v9746_v7  ;;  %v10947_v25 = vadd.f32 %v10946_v23, %v10945_v20 }
0x1ddd   :  { %v4544_v15 = vadd.f32 %v4543_v45, %v4495_v24  ;;  %v4498_v46 = vadd.f32 %v10947_v25, %v9746_v7 }
0x1ddf   :  { %v4547_v26 = vadd.f32 %v4546_v52, %v4498_v46  ;;  %v10948_v27 = vpop.f32.mrb[64].mxu1  ;;  %v4558_v32 = vmax.f32 %v4544_v15, 0.0 }
0x1de0   :  { %v10949_v4 = vpop.f32.mrb[65].mxu1 }
0x1de1   :  { %v4559_v44 = vmax.f32 %v4547_v26, 0.0  ;;  %v10950_v29 = vadd.f32 %v10949_v4, %v10948_v27  ;;  %v10951_v33 = vpop.f32.mrb[66].mxu1 }
0x1de2   :  { %v10952_v34 = vpop.f32.mrb[67].mxu1 }
0x1de3   :  { %v4503_v21 = vadd.f32 %v10950_v29, %v9746_v7  ;;  %v10953_v58 = vadd.f32 %v10952_v34, %v10951_v33  ;;  %v4562_v35 = vpack.c.bf16 %v4559_v44, %v4558_v32 }
0x1de5   :  { %v4552_v22 = vadd.f32 %v11829_v43, %v4503_v21  ;;  %v4506_v17 = vadd.f32 %v10953_v58, %v9746_v7  ;;  %11847 = vmatprep.mubr.bf16.mxu1 %v4562_v35 }
0x1de7   :  { %v4555_v36 = vadd.f32 %v11830_v51, %v4506_v17  ;;  %v4560_v59 = vmax.f32 %v4552_v22, 0.0  ;;  %v12645_v17 = vld [vmem:[%s13397_s24 + $0x140] sm:$0xff]  }
0x1de8   :  { %10987 = vmatprep.subr.bf16.mxu0 %v12645_v17 }
0x1de9   :  { %v4561_v37 = vmax.f32 %v4555_v36, 0.0  ;;  %v12646_v36 = vld [vmem:[%s13397_s24 + $0x100] sm:$0xff]  }
0x1deb   :  { %v4563_v38 = vpack.c.bf16 %v4561_v37, %v4560_v59  ;;  %v12647_v59 = vld [vmem:[%s13397_s24 + $0x148] sm:$0xff]  }
0x1dec   :  { %v12648_v37 = vld [vmem:[%s13397_s24 + $0x108] sm:$0xff]  }
0x1ded   :  { %11848 = vmatmul.mubr.bf16.vlgmr.msra.gmra.mrb[68].mxu1 %v4563_v38  ;;  %v12649_v38 = vld [vmem:[%s13397_s24 + $0x150] sm:$0xff]  }
0x1dee   :  { %11875 = vmatprep.mubr.msk.bf16.mxu1 %vm13014_vm0, %v13012_v0 }
0x1ec0   :  { %v11849_v39 = vpop.f32.mrb[68].mxu1 }
0x1ec1   :  { %v4661_v40 = vadd.f32 %v11849_v39, %v9771_v28  ;;  %v4652_v43 = vpop.f32.mrb[69].mxu1  ;;  %v12653_v39 = vld [vmem:[%s13397_s24 + $0x160] sm:$0xff]  }
0x1ec2   :  { %v4653_v45 = vadd.f32 %v9771_v28, %v4652_v43  ;;  %v11850_v51 = vpop.f32.mrb[70].mxu1  ;;  %v12655_v43 = vld [vmem:[%s13397_s24 + $0x168] sm:$0xff]  }
0x1ec3   :  { %v4664_v52 = vadd.f32 %v11850_v51, %v9771_v28  ;;  %v4655_v56 = vpop.f32.mrb[71].mxu1  ;;  %v4669_v53 = vmax.f32 %v4661_v40, 0.0  ;;  %v12654_v40 = vld [vmem:[%s13397_s24 + $0x120] sm:$0xff]   ;;  %v12657_v51 = vld [vmem:[%s13397_s24 + $0x170] sm:$0xff]  }
0x1ec4   :  { %v4656_v50 = vadd.f32 %v9771_v28, %v4655_v56  ;;  %v4667_v41 = vmax.f32 %v4653_v45, 0.0  ;;  %v12652_v28 = vld [vmem:[%s13397_s24 + $0x118] sm:$0xff]   ;;  %v12656_v45 = vld [vmem:[%s13397_s24 + $0x128] sm:$0xff]  }
0x1ec5   :  { %v4670_v63 = vmax.f32 %v4664_v52, 0.0  ;;  %v12658_v52 = vld [vmem:[%s13397_s24 + $0x130] sm:$0xff]  }
0x1ec6   :  { %v4668_v11 = vmax.f32 %v4656_v50, 0.0 }
0x1ec7   :  { %v4672_v5 = vpack.c.bf16 %v4670_v63, %v4669_v53 }
0x1ec8   :  { %v4671_v42 = vpack.c.bf16 %v4668_v11, %v4667_v41 }
0x1eca   :  { %11867 = vmatprep.mubr.bf16.mxu0 %v4671_v42 }
0x1ecb   :  { %11868 = vmatmul.mubr.bf16.vlgmr.msra.gmra.mrb[88].mxu0 %v4672_v5 }
0x1ecc   :  { %10988 = vmatpush3.bf16.msra.mxu0 %v12646_v36 }
0x1ecd   :  { %10989 = vmatprep.subr.bf16.mxu0 %v12647_v59 }
0x1ed0   :  { %10990 = vmatpush3.bf16.msra.mxu0 %v12648_v37  ;;  %v12659_v37 = vld [vmem:[%s13397_s24 + $0x178] sm:$0xff]  }
0x1ed1   :  { %10991 = vmatprep.subr.bf16.mxu0 %v12649_v38  ;;  %v12660_v38 = vld [vmem:[%s13397_s24 + $0x138] sm:$0xff]  }
0x1ed4   :  { %10992 = vmatpush3.bf16.msra.mxu0 %v12650_v6  ;;  %v12661_v6 = vld [vmem:[%s13473_s15 + $0x80] sm:$0xff]  }
0x1ed5   :  { %10993 = vmatprep.subr.bf16.mxu0 %v12651_v1  ;;  %v12662_v1 = vld [vmem:[%s13473_s15 + $0x88] sm:$0xff]  }
0x1ed8   :  { %10994 = vmatpush3.bf16.msra.mxu0 %v12652_v28  ;;  %v12663_v28 = vld [vmem:[%s13473_s15 + $0x90] sm:$0xff]  }
0x1ed9   :  { %10995 = vmatprep.subr.bf16.mxu0 %v12653_v39  ;;  %v12664_v39 = vld [vmem:[%s13473_s15 + $0x98] sm:$0xff]  }
0x1edc   :  { %10996 = vmatpush3.bf16.msra.mxu0 %v12654_v40  ;;  %v12665_v40 = vld [vmem:[%s13473_s15 + $0xa0] sm:$0xff]  }
0x1edd   :  { %10997 = vmatprep.subr.bf16.mxu0 %v12655_v43 }
0x1ee0   :  { %10998 = vmatpush3.bf16.msra.mxu0 %v12656_v45 }
0x1ee1   :  { %10999 = vmatprep.subr.bf16.mxu0 %v12657_v51 }
0x1ee4   :  { %11000 = vmatpush3.bf16.msra.mxu0 %v12658_v52 }
0x1ee5   :  { %11001 = vmatprep.subr.bf16.mxu0 %v12659_v37 }
0x1ee8   :  { %11002 = vmatpush3.bf16.msra.mxu0 %v12660_v38 }
0x1ee9   :  { %11899 = vmatprep.subr.bf16.mxu0 %v13012_v0 }
0x1f9e   :  { %v11869_v62 = vpop.f32.mrb[88].mxu0 }
0x1f9f   :  { %v4761_v13 = vpop.f32.mrb[89].mxu0  ;;  %v4770_v20 = vadd.f32 %v11869_v62, %v9780_v16 }
0x1fa0   :  { %v4762_v9 = vadd.f32 %v9780_v16, %v4761_v13  ;;  %v11870_v7 = vpop.f32.mrb[90].mxu0 }
0x1fa1   :  { %v4764_v55 = vpop.f32.mrb[91].mxu0  ;;  %v4773_v23 = vadd.f32 %v11870_v7, %v9780_v16 }
0x1fa2   :  { %v4765_v19 = vadd.f32 %v9780_v16, %v4764_v55  ;;  %4780 = vadd.xlane.f32.xlu0 %v4762_v9  ;;  %v9791_v55 = vld [vmem:[%s13418_s28 + $0x2] ss:$0 sm:$0xff] }
0x1fa4   :  { %4782 = vadd.xlane.f32.xlu1 %v4765_v19 }
0x1fa6   :  { %4784 = vadd.xlane.f32.xlu0 %v4770_v20 }
0x1fa8   :  { %4786 = vadd.xlane.f32.xlu1 %v4773_v23 }
0x202f   :  { %v4781_v24 = vpop.xlane.xlu0 %4780 }
0x2030   :  { %v4788_v25 = vmul.f32 0.0078125, %v4781_v24 }
0x2031   :  { %v4783_v15 = vpop.xlane.xlu1 %4782 }
0x2032   :  { %v13934_v46 = vsub.f32 %v4762_v9, %v4788_v25  ;;  %v4789_v26 = vmul.f32 0.0078125, %v4783_v15 }
0x2033   :  { %v4785_v27 = vpop.xlane.xlu0 %4784 }
0x2034   :  { %v13936_v4 = vsub.f32 %v4765_v19, %v4789_v26  ;;  %v4790_v32 = vmul.f32 0.0078125, %v4785_v27  ;;  %v4796_v44 = vmul.f32 %v13934_v46, %v13934_v46 }
0x2035   :  { %v4787_v29 = vpop.xlane.xlu1 %4786 }
0x2036   :  { %v4794_v33 = vsub.f32 %v4770_v20, %v4790_v32  ;;  %v4791_v34 = vmul.f32 0.0078125, %v4787_v29  ;;  %4800 = vadd.xlane.f32.xlu0 %v4796_v44  ;;  %v4797_v21 = vmul.f32 %v13936_v4, %v13936_v4 }
0x2038   :  { %v4795_v58 = vsub.f32 %v4773_v23, %v4791_v34  ;;  %4802 = vadd.xlane.f32.xlu1 %v4797_v21  ;;  %v4798_v35 = vmul.f32 %v4794_v33, %v4794_v33  ;;  %v9792_v23 = vld [vmem:[%s13423_s4 + $0x2] ss:$0 sm:$0xff] }
0x203a   :  { %4804 = vadd.xlane.f32.xlu0 %v4798_v35  ;;  %v4799_v22 = vmul.f32 %v4795_v58, %v4795_v58 }
0x203c   :  { %4806 = vadd.xlane.f32.xlu1 %v4799_v22 }
0x20c3   :  { %v4801_v56 = vpop.xlane.xlu0 %4800 }
0x20c4   :  { %v4808_v50 = vmul.f32 0.0078125, %v4801_v56 }
0x20c5   :  { %v4803_v53 = vpop.xlane.xlu1 %4802 }
0x20c6   :  { %v4812_v63 = vadd.f32 1e-05, %v4808_v50  ;;  %v4809_v41 = vmul.f32 0.0078125, %v4803_v53  ;;  %v12666_v50 = vld [vmem:[%s13473_s15 + $0xa8] sm:$0xff]   ;;  %v12667_v53 = vld [vmem:[%s13473_s15 + $0xb0] sm:$0xff]  }
0x20c7   :  { %v4805_v11 = vpop.xlane.xlu0 %4804 }
0x20c8   :  { %12937 = vrsqrt.f32 %v4812_v63  ;;  %v4813_v5 = vadd.f32 1e-05, %v4809_v41  ;;  %v4810_v42 = vmul.f32 0.0078125, %v4805_v11  ;;  %v12668_v63 = vld [vmem:[%s13473_s15 + $0xb8] sm:$0xff]   ;;  %v12669_v41 = vld [vmem:[%s13496_s20 + $0x80] sm:$0xff]   ;;  %v12670_v11 = vld [vmem:[%s13496_s20 + $0x88] sm:$0xff]  }
0x20c9   :  { %v4807_v16 = vpop.xlane.xlu1 %4806 }
0x20ca   :  { %12939 = vrsqrt.f32 %v4813_v5  ;;  %v4814_v62 = vadd.f32 1e-05, %v4810_v42  ;;  %v4811_v13 = vmul.f32 0.0078125, %v4807_v16  ;;  %v12672_v5 = vld [vmem:[%s13496_s20 + $0x98] sm:$0xff]   ;;  %v12673_v42 = vld [vmem:[%s13496_s20 + $0xa0] sm:$0xff]   ;;  %v12674_v16 = vld [vmem:[%s13496_s20 + $0xa8] sm:$0xff]  }
0x20cc   :  { %12941 = vrsqrt.f32 %v4814_v62  ;;  %v4815_v9 = vadd.f32 1e-05, %v4811_v13  ;;  %v9861_v13 = vld [vmem:[%s13513_s25 + $0x2] ss:$0 sm:$0xff] }
0x20ce   :  { %12943 = vrsqrt.f32 %v4815_v9 }
0x20d2   :  { %v12938_v7 = vpop.eup %12937 }
0x20d3   :  { %v4820_v19 = vmul.f32 %v12938_v7, %v13934_v46 }
0x20d4   :  { %v12940_v20 = vpop.eup %12939 }
0x20d5   :  { %v4821_v24 = vmul.f32 %v12940_v20, %v13936_v4  ;;  %v4830_v25 = vmul.f32 %v9791_v55, %v4820_v19 }
0x20d6   :  { %v12942_v15 = vpop.eup %12941 }
0x20d7   :  { %v4822_v26 = vmul.f32 %v12942_v15, %v4794_v33  ;;  %v4831_v27 = vmul.f32 %v9791_v55, %v4821_v24  ;;  %v13960_v32 = vadd.f32 %v9792_v23, %v4830_v25 }
0x20d8   :  { %v12944_v44 = vpop.eup %12943 }
0x20d9   :  { %v4823_v29 = vmul.f32 %v12944_v44, %v4795_v58  ;;  %v13962_v34 = vadd.f32 %v9792_v23, %v4831_v27  ;;  %v4832_v21 = vmul.f32 %v9791_v55, %v4822_v26  ;;  %v4844_v35 = vmul.f32 %v13960_v32, %v13434_v49  ;;  %v12675_v27 = vld [vmem:[%s13496_s20 + $0xb0] sm:$0xff]   ;;  %v12676_v44 = vld [vmem:[%s13496_s20 + $0xb8] sm:$0xff]  }
0x20db   :  { %v4845_v46 = vmul.f32 %v13962_v34, %v13413_v18  ;;  %v4833_v4 = vmul.f32 %v9791_v55, %v4823_v29  ;;  %v13968_v22 = vadd.f32 %v9792_v23, %v4832_v21  ;;  %v12677_v29 = vld [vmem:[%s13224_s9 + $0x2c0] sm:$0xff]  }
0x20dc   :  { %v9878_v21 = vld [vmem:[%s13525_s1 + $0x2] ss:$0 sm:$0xff] }
0x20dd   :  { %v4848_v33 = vpack.c.bf16 %v4845_v46, %v4844_v35  ;;  %v13970_v17 = vadd.f32 %v9792_v23, %v4833_v4  ;;  %v4846_v58 = vmul.f32 %v13968_v22, %v13453_v2 }
0x20df   :  { %11872 = vmatpush3.bf16.msra.mxu1 %v4848_v33  ;;  %v4847_v36 = vmul.f32 %v13970_v17, %v13449_v60 }
0x20e0   :  { %11873 = vmatprep.subr.bf16.mxu1 %v13012_v0 }
0x20e1   :  { %v4849_v59 = vpack.c.bf16 %v4847_v36, %v4846_v58 }
0x20e3   :  { %11874 = vmatpush3.bf16.msra.mxu1 %v4849_v59  ;;  %v14025_v59 = vadd.f32 %v13962_v34, %v13864_v3  ;;  %v12679_v3 = vld [vmem:[%s13224_s9 + $0x2d0] sm:$0xff]   ;;  %v12680_v34 = vld [vmem:[%s13224_s9 + $0x2d8] sm:$0xff]  }
0x20e4   :  { %11879 = vmatprep.subr.bf16.mxu1 %v13012_v0 }
0x20e6   :  { %11876 = vmatmul.mubr.msk.bf16.vlgmr.msra.gmra.mrb[72].mxu1 %vm1777_vm2, %v13460_v12 }
0x20e7   :  { %11895 = vmatprep.mubr.msk.bf16.mxu1 %vm13014_vm0, %v13012_v0  ;;  %11880 = vmatpush3.bf16.msra.mxu1 %v12661_v6  ;;  %v14029_v6 = vadd.f32 %v13960_v32, %v13872_v8  ;;  %v12681_v8 = vld [vmem:[%s13224_s9 + $0x2e0] sm:$0xff]   ;;  %v12682_v32 = vld [vmem:[%s13224_s9 + $0x2e8] sm:$0xff]  }
0x20e8   :  { %11881 = vmatprep.subr.bf16.mxu1 %v13012_v0 }
0x20eb   :  { %11882 = vmatpush3.bf16.msra.mxu1 %v12662_v1 }
0x20ec   :  { %11883 = vmatprep.subr.bf16.mxu1 %v13012_v0 }
0x20ef   :  { %11884 = vmatpush3.bf16.msra.mxu1 %v12663_v28  ;;  %v12678_v28 = vld [vmem:[%s13224_s9 + $0x2c8] sm:$0xff]  }
0x20f0   :  { %11885 = vmatprep.subr.bf16.mxu1 %v13012_v0 }
0x20f3   :  { %11886 = vmatpush3.bf16.msra.mxu1 %v12664_v39  ;;  %v5542_v39 = vpack.c.bf16 %v14025_v59, %v14029_v6 }
0x20f4   :  { %11887 = vmatprep.subr.bf16.mxu1 %v13012_v0 }
0x20f7   :  { %11888 = vmatpush3.bf16.msra.mxu1 %v12665_v40  ;;  %v12683_v40 = vld [vmem:[%s13224_s9 + $0x2f0] sm:$0xff]  }
0x20f8   :  { %11889 = vmatprep.subr.bf16.mxu1 %v13012_v0 }
0x20fb   :  { %11890 = vmatpush3.bf16.msra.mxu1 %v12666_v50 }
0x20fc   :  { %11891 = vmatprep.subr.bf16.mxu1 %v13012_v0 }
0x20ff   :  { %11892 = vmatpush3.bf16.msra.mxu1 %v12667_v53 }
0x2100   :  { %11893 = vmatprep.subr.bf16.mxu1 %v13012_v0 }
0x2103   :  { %11894 = vmatpush3.bf16.msra.mxu1 %v12668_v63 }
0x21b9   :  { %v4884_v43 = vpop.f32.mrb[72].mxu1 }
0x21ba   :  { %v11877_v45 = vpop.f32.mrb[73].mxu1 }
0x21bb   :  { %v4887_v51 = vpop.f32.mrb[74].mxu1  ;;  %v14042_v45 = vadd.f32 %v13970_v17, %v13901_v30 }
0x21bc   :  { %v4964_v52 = vpack.c.bf16 %v4887_v51, %v4884_v43  ;;  %v11878_v56 = vpop.f32.mrb[75].mxu1  ;;  %v12684_v43 = vld [vmem:[%s13224_s9 + $0x2f8] sm:$0xff]   ;;  %v14046_v51 = vadd.f32 %v13968_v22, %v13905_v31 }
0x21bd   :  { %v9887_v56 = vld [vmem:[%s13558_s8 + $0x2] ss:$0 sm:$0xff] }
0x21be   :  { %5099 = vmatprep.mubr.bf16.mxu0 %v4964_v52  ;;  %v5545_v52 = vpack.c.bf16 %v14042_v45, %v14046_v51 }
0x21bf   :  { %5100 = vmatmul.mubr.bf16.vlgmr.msra.gmra.mrb[92].mxu0 %v13858_v54  ;;  %v12671_v54 = vld [vmem:[%s13496_s20 + $0x90] sm:$0xff]  }
0x21c0   :  { %11915 = vmatprep.mubr.msk.bf16.mxu0 %vm13014_vm0, %v13012_v0  ;;  %11900 = vmatpush3.bf16.msra.mxu0 %v12669_v41 }
0x21c1   :  { %11901 = vmatprep.subr.bf16.mxu0 %v13012_v0 }
0x21c4   :  { %11902 = vmatpush3.bf16.msra.mxu0 %v12670_v11 }
0x21c5   :  { %11903 = vmatprep.subr.bf16.mxu0 %v13012_v0 }
0x21c8   :  { %11904 = vmatpush3.bf16.msra.mxu0 %v12671_v54 }
0x21c9   :  { %11905 = vmatprep.subr.bf16.mxu0 %v13012_v0 }
0x21cc   :  { %11906 = vmatpush3.bf16.msra.mxu0 %v12672_v5 }
0x21cd   :  { %11907 = vmatprep.subr.bf16.mxu0 %v13012_v0 }
0x21d0   :  { %11908 = vmatpush3.bf16.msra.mxu0 %v12673_v42 }
0x21d1   :  { %11909 = vmatprep.subr.bf16.mxu0 %v13012_v0 }
0x21d4   :  { %11910 = vmatpush3.bf16.msra.mxu0 %v12674_v16 }
0x21d5   :  { %11911 = vmatprep.subr.bf16.mxu0 %v13012_v0 }
0x21d8   :  { %11912 = vmatpush3.bf16.msra.mxu0 %v12675_v27  ;;  %v9898_v27 = vld [vmem:[%s13572_s14 + $0x2] ss:$0 sm:$0xff] }
0x21d9   :  { %11913 = vmatprep.subr.bf16.mxu0 %v13012_v0 }
0x21dc   :  { %11914 = vmatpush3.bf16.msra.mxu0 %v12676_v44 }
0x21dd   :  { %11931 = vmatprep.subr.bf16.mxu0 %v12677_v29 }
0x2292   :  { %v11003_v62 = vpop.f32.mrb[92].mxu0 }
0x2293   :  { %v11004_v9 = vpop.f32.mrb[93].mxu0 }
0x2294   :  { %v11005_v7 = vadd.f32 %v11004_v9, %v11003_v62  ;;  %v11006_v55 = vpop.f32.mrb[94].mxu0 }
0x2295   :  { %v11007_v19 = vpop.f32.mrb[95].mxu0 }
0x2296   :  { %v5102_v20 = vadd.f32 %v11005_v7, %v9861_v13  ;;  %v11008_v23 = vadd.f32 %v11007_v19, %v11006_v55 }
0x2298   :  { %v5105_v24 = vadd.f32 %v11008_v23, %v9861_v13  ;;  %v5108_v25 = vmax.f32 %v5102_v20, 0.0 }
0x229a   :  { %v5109_v15 = vmax.f32 %v5105_v24, 0.0 }
0x229c   :  { %v5110_v26 = vpack.c.bf16 %v5109_v15, %v5108_v25 }
0x229e   :  { %11896 = vmatmul.mubr.bf16.vlgmr.msra.gmra.mrb[76].mxu1 %v5110_v26 }
0x229f   :  { %11921 = vmatprep.mubr.msk.bf16.mxu1 %vm1019_vm8, %v13201_v10 }
0x2371   :  { %v5199_v35 = vpop.f32.mrb[76].mxu1 }
0x2372   :  { %v5200_v46 = vadd.f32 %v9878_v21, %v5199_v35  ;;  %v11897_v4 = vpop.f32.mrb[77].mxu1 }
0x2373   :  { %v5202_v33 = vpop.f32.mrb[78].mxu1 }
0x2374   :  { %v5203_v58 = vadd.f32 %v9878_v21, %v5202_v33  ;;  %v11898_v36 = vpop.f32.mrb[79].mxu1  ;;  %v5206_v37 = vmax.f32 %v5200_v46, 0.0  ;;  %v9899_v21 = vld [vmem:[%s13577_s21 + $0x2] ss:$0 sm:$0xff] }
0x2376   :  { %v5207_v38 = vmax.f32 %v5203_v58, 0.0 }
0x2378   :  { %v5208_v1 = vpack.c.bf16 %v5207_v38, %v5206_v37 }
0x237a   :  { %11916 = vmatmul.mubr.bf16.vlgmr.msra.gmra.mrb[96].mxu0 %v5208_v1  ;;  %v12685_v1 = vld [vmem:[%s13224_s9 + $0x280] sm:$0xff]  }
0x237b   :  { %11932 = vmatpush3.bf16.msra.mxu0 %v12677_v29  ;;  %11947 = vmatprep.mubr.bf16.mxu0 %v5542_v39  ;;  %v12689_v39 = vld [vmem:[%s13224_s9 + $0x290] sm:$0xff]  }
0x237c   :  { %11933 = vmatprep.subr.bf16.mxu0 %v12678_v28 }
0x237f   :  { %11934 = vmatpush3.bf16.msra.mxu0 %v12678_v28  ;;  %v12688_v28 = vld [vmem:[%s13224_s9 + $0x248] sm:$0xff]  }
0x2380   :  { %11935 = vmatprep.subr.bf16.mxu0 %v12679_v3 }
0x2383   :  { %11936 = vmatpush3.bf16.msra.mxu0 %v12679_v3  ;;  %v12690_v3 = vld [vmem:[%s13224_s9 + $0x250] sm:$0xff]  }
0x2384   :  { %11937 = vmatprep.subr.bf16.mxu0 %v12680_v34 }
0x2387   :  { %11938 = vmatpush3.bf16.msra.mxu0 %v12680_v34  ;;  %v12691_v34 = vld [vmem:[%s13224_s9 + $0x298] sm:$0xff]  }
0x2388   :  { %11939 = vmatprep.subr.bf16.mxu0 %v12681_v8 }
0x238b   :  { %11940 = vmatpush3.bf16.msra.mxu0 %v12681_v8  ;;  %v12692_v8 = vld [vmem:[%s13224_s9 + $0x258] sm:$0xff]  }
0x238c   :  { %11941 = vmatprep.subr.bf16.mxu0 %v12682_v32 }
0x238f   :  { %11942 = vmatpush3.bf16.msra.mxu0 %v12682_v32  ;;  %v12693_v32 = vld [vmem:[%s13224_s9 + $0x2a0] sm:$0xff]  }
0x2390   :  { %11943 = vmatprep.subr.bf16.mxu0 %v12683_v40 }
0x2393   :  { %11944 = vmatpush3.bf16.msra.mxu0 %v12683_v40  ;;  %v12694_v40 = vld [vmem:[%s13224_s9 + $0x260] sm:$0xff]  }
0x2394   :  { %11945 = vmatprep.subr.bf16.mxu0 %v12684_v43 }
0x2397   :  { %11946 = vmatpush3.bf16.msra.mxu0 %v12684_v43  ;;  %v12695_v43 = vld [vmem:[%s13224_s9 + $0x2a8] sm:$0xff]  }
0x239a   :  { %11948 = vmatmul.mubr.bf16.vlgmr.msra.gmra.mrb[100].mxu0 %v5545_v52  ;;  %v12696_v52 = vld [vmem:[%s13224_s9 + $0x268] sm:$0xff]  }
0x244d   :  { %v5297_v50 = vpop.f32.mrb[96].mxu0 }
0x244e   :  { %v5298_v53 = vadd.f32 %v9887_v56, %v5297_v50  ;;  %v11917_v63 = vpop.f32.mrb[97].mxu0  ;;  %v12698_v50 = vld [vmem:[%s13224_s9 + $0x270] sm:$0xff]  }
0x244f   :  { %v5300_v41 = vpop.f32.mrb[98].mxu0  ;;  %v12700_v63 = vld [vmem:[%s13224_s9 + $0x278] sm:$0xff]  }
0x2450   :  { %v5301_v11 = vadd.f32 %v9887_v56, %v5300_v41  ;;  %5308 = vadd.xlane.f32.xlu0 %v5298_v53  ;;  %v11918_v54 = vpop.f32.mrb[99].mxu0  ;;  %v12697_v56 = vld [vmem:[%s13224_s9 + $0x2b0] sm:$0xff]   ;;  %v12701_v41 = vld [vmem:[%s13331_s29 + $0xc0] sm:$0xff]  }
0x2452   :  { %5310 = vadd.xlane.f32.xlu1 %v5301_v11 }
0x246d   :  { %v14051_v30 = vpop.f32.mrb[100].mxu0 }
0x246e   :  { %v14053_v17 = vpop.f32.mrb[101].mxu0 }
0x246f   :  { %v14055_v31 = vpop.f32.mrb[102].mxu0 }
0x2470   :  { %v14057_v22 = vpop.f32.mrb[103].mxu0 }
0x24dd   :  { %v5309_v5 = vpop.xlane.xlu0 %5308 }
0x24de   :  { %v5312_v42 = vmul.f32 0.0078125, %v5309_v5 }
0x24df   :  { %v5311_v16 = vpop.xlane.xlu1 %5310 }
0x24e0   :  { %v5314_v62 = vsub.f32 %v5298_v53, %v5312_v42  ;;  %v5313_v13 = vmul.f32 0.0078125, %v5311_v16  ;;  %v12699_v53 = vld [vmem:[%s13224_s9 + $0x2b8] sm:$0xff]  }
0x24e2   :  { %v5315_v9 = vsub.f32 %v5301_v11, %v5313_v13  ;;  %v5316_v7 = vmul.f32 %v5314_v62, %v5314_v62 }
0x24e4   :  { %5318 = vadd.xlane.f32.xlu0 %v5316_v7  ;;  %v5317_v55 = vmul.f32 %v5315_v9, %v5315_v9 }
0x24e6   :  { %5320 = vadd.xlane.f32.xlu1 %v5317_v55 }
0x2571   :  { %v5319_v19 = vpop.xlane.xlu0 %5318 }
0x2572   :  { %v5322_v20 = vmul.f32 0.0078125, %v5319_v19 }
0x2573   :  { %v5321_v23 = vpop.xlane.xlu1 %5320 }
0x2574   :  { %v5324_v24 = vadd.f32 1e-05, %v5322_v20  ;;  %v5323_v25 = vmul.f32 0.0078125, %v5321_v23  ;;  %v12702_v23 = vld [vmem:[%s13331_s29 + $0xc8] sm:$0xff]  }
0x2576   :  { %12945 = vrsqrt.f32 %v5324_v24  ;;  %v5325_v15 = vadd.f32 1e-05, %v5323_v25  ;;  %v12703_v24 = vld [vmem:[%s13331_s29 + $0xd0] sm:$0xff]   ;;  %v12704_v25 = vld [vmem:[%s13331_s29 + $0xd8] sm:$0xff]  }
0x2578   :  { %12947 = vrsqrt.f32 %v5325_v15  ;;  %v12705_v15 = vld [vmem:[%s13331_s29 + $0xe0] sm:$0xff]  }
0x2580   :  { %v12946_v26 = vpop.eup %12945 }
0x2581   :  { %v5328_v44 = vmul.f32 %v12946_v26, %v5314_v62  ;;  %v12706_v26 = vld [vmem:[%s13331_s29 + $0xe8] sm:$0xff]  }
0x2582   :  { %v12948_v29 = vpop.eup %12947 }
0x2583   :  { %v5336_v35 = vmul.f32 %v9898_v27, %v5328_v44  ;;  %v5329_v46 = vmul.f32 %v12948_v29, %v5315_v9  ;;  %v12708_v44 = vld [vmem:[%s13331_s29 + $0xf8] sm:$0xff]   ;;  %v12709_v29 = vld [vmem:[%s13345_s3 + $0xc0] sm:$0xff]  }
0x2584   :  { %11971 = vmatprep.subr.bf16.mxu0 %v12709_v29 }
0x2585   :  { %v5337_v4 = vmul.f32 %v9898_v27, %v5329_v46  ;;  %v5344_v33 = vadd.f32 %v9899_v21, %v5336_v35  ;;  %v12707_v27 = vld [vmem:[%s13331_s29 + $0xf0] sm:$0xff]   ;;  %11972 = vmatpush3.bf16.msra.mxu0 %v12709_v29  ;;  %v12712_v46 = vld [vmem:[%s13345_s3 + $0xd8] sm:$0xff]  }
0x2586   :  { %v12711_v35 = vld [vmem:[%s13345_s3 + $0xd0] sm:$0xff]  }
0x2587   :  { %v5345_v58 = vadd.f32 %v9899_v21, %v5337_v4  ;;  %v14062_v36 = vadd.f32 %v5344_v33, %v13852_v14  ;;  %v12686_v14 = vld [vmem:[%s13224_s9 + $0x240] sm:$0xff]   ;;  %v12710_v21 = vld [vmem:[%s13345_s3 + $0xc8] sm:$0xff]  }
0x2588   :  { %11973 = vmatprep.subr.bf16.mxu0 %v12710_v21  ;;  %v12713_v4 = vld [vmem:[%s13345_s3 + $0xe0] sm:$0xff]   ;;  %v12714_v33 = vld [vmem:[%s13345_s3 + $0xe8] sm:$0xff]  }
0x2589   :  { %v14065_v37 = vadd.f32 %v5345_v58, %v13854_v57  ;;  %v12687_v57 = vld [vmem:[%s13224_s9 + $0x288] sm:$0xff]   ;;  %11974 = vmatpush3.bf16.msra.mxu0 %v12710_v21 }
0x258a   :  { %11975 = vmatprep.subr.bf16.mxu0 %v12711_v35 }
0x258b   :  { %v14069_v38 = vpack.c.bf16 %v14065_v37, %v14062_v36 }
0x258d   :  { %11919 = vmatprep.subr.bf16.mxu1 %v14069_v38  ;;  %11976 = vmatpush3.bf16.msra.mxu0 %v12711_v35 }
0x258e   :  { %11920 = vmatpush3.bf16.msra.mxu1 %v14069_v38  ;;  %11977 = vmatprep.subr.bf16.mxu0 %v12712_v46 }
0x258f   :  { %11925 = vmatprep.subr.bf16.mxu1 %v14069_v38 }
0x2591   :  { %11922 = vmatmul.mubr.msk.bf16.vlgmr.msra.gmra.mrb[80].mxu1 %vm1019_vm8, %v13257_v47  ;;  %11978 = vmatpush3.bf16.msra.mxu0 %v12712_v46  ;;  %v10021_v46 = vld [vmem:[%s13372_s16 + $0x3] ss:$0 sm:$0xff] }
0x2592   :  { %11926 = vmatpush3.bf16.msra.mxu1 %v14069_v38  ;;  %11927 = vmatprep.mubr.msk.bf16.mxu1 %vm1019_vm8, %v13193_v61 }
0x2593   :  { %11033 = vmatprep.subr.bf16.mxu1 %v12685_v1  ;;  %11979 = vmatprep.subr.bf16.mxu0 %v12713_v4  ;;  %v9987_v1 = vld [vmem:[%s13356_s7 + $0x3] ss:$0 sm:$0xff] }
0x2595   :  { %11980 = vmatpush3.bf16.msra.mxu0 %v12713_v4 }
0x2596   :  { %11981 = vmatprep.subr.bf16.mxu0 %v12714_v33 }
0x2599   :  { %11928 = vmatmul.mubr.msk.bf16.vlgmr.msra.gmra.mrb[84].mxu1 %vm1019_vm8, %v13259_v48  ;;  %11982 = vmatpush3.bf16.msra.mxu0 %v12714_v33 }
0x259a   :  { %11034 = vmatpush3.bf16.msra.mxu1 %v12686_v14 }
0x259b   :  { %11035 = vmatprep.subr.bf16.mxu1 %v12687_v57 }
0x259e   :  { %11036 = vmatpush3.bf16.msra.mxu1 %v12688_v28 }
0x259f   :  { %11037 = vmatprep.subr.bf16.mxu1 %v12689_v39 }
0x25a2   :  { %11038 = vmatpush3.bf16.msra.mxu1 %v12690_v3 }
0x25a3   :  { %11039 = vmatprep.subr.bf16.mxu1 %v12691_v34 }
0x25a6   :  { %11040 = vmatpush3.bf16.msra.mxu1 %v12692_v8 }
0x25a7   :  { %11041 = vmatprep.subr.bf16.mxu1 %v12693_v32 }
0x25aa   :  { %11042 = vmatpush3.bf16.msra.mxu1 %v12694_v40 }
0x25ab   :  { %11043 = vmatprep.subr.bf16.mxu1 %v12695_v43 }
0x25ae   :  { %11044 = vmatpush3.bf16.msra.mxu1 %v12696_v52 }
0x25af   :  { %11045 = vmatprep.subr.bf16.mxu1 %v12697_v56 }
0x25b2   :  { %11046 = vmatpush3.bf16.msra.mxu1 %v12698_v50 }
0x25b3   :  { %11047 = vmatprep.subr.bf16.mxu1 %v12699_v53 }
0x25b6   :  { %11048 = vmatpush3.bf16.msra.mxu1 %v12700_v63 }
0x25b7   :  { %11951 = vmatprep.subr.bf16.mxu1 %v12701_v41 }
0x2664   :  { %v11923_v11 = vpop.f32.mrb[80].mxu1 }
0x2665   :  { %v5387_v54 = vpop.f32.mrb[81].mxu1 }
0x2666   :  { %v11924_v5 = vpop.f32.mrb[82].mxu1 }
0x2667   :  { %v5544_v42 = vpack.c.bf16 %v11924_v5, %v11923_v11  ;;  %v5390_v16 = vpop.f32.mrb[83].mxu1 }
0x2668   :  { %v5541_v62 = vpack.c.bf16 %v5390_v16, %v5387_v54 }
0x266a   :  { %5728 = vmatprep.mubr.bf16.mxu1 %v5541_v62 }
0x266c   :  { %v11929_v13 = vpop.f32.mrb[84].mxu1 }
0x266d   :  { %v5436_v9 = vpop.f32.mrb[85].mxu1 }
0x266e   :  { %v11930_v7 = vpop.f32.mrb[86].mxu1 }
0x266f   :  { %v5543_v55 = vpack.c.bf16 %v11930_v7, %v11929_v13  ;;  %v5439_v19 = vpop.f32.mrb[87].mxu1  ;;  %v12716_v7 = vld [vmem:[%s13345_s3 + $0xf8] sm:$0xff]  }
0x2670   :  { %v5540_v20 = vpack.c.bf16 %v5439_v19, %v5436_v9  ;;  %v12715_v9 = vld [vmem:[%s13345_s3 + $0xf0] sm:$0xff]  }
0x2671   :  { %11983 = vmatprep.subr.bf16.mxu0 %v12715_v9 }
0x2672   :  { %5729 = vmatmul.mubr.bf16.vlgmr.msra.gmra.mrb[88].mxu1 %v5540_v20  ;;  %11984 = vmatpush3.bf16.msra.mxu0 %v12715_v9 }
0x2673   :  { %5736 = vmatprep.mubr.bf16.mxu1 %v5544_v42  ;;  %11952 = vmatpush3.bf16.msra.mxu1 %v12701_v41 }
0x2674   :  { %11953 = vmatprep.subr.bf16.mxu1 %v12702_v23  ;;  %11985 = vmatprep.subr.bf16.mxu0 %v12716_v7 }
0x2676   :  { %11986 = vmatpush3.bf16.msra.mxu0 %v12716_v7 }
0x2677   :  { %11954 = vmatpush3.bf16.msra.mxu1 %v12702_v23  ;;  %11999 = vmatprep.subr.bf16.mxu0 %v13012_v0 }
0x2678   :  { %11955 = vmatprep.subr.bf16.mxu1 %v12703_v24 }
0x267a   :  { %5737 = vmatmul.mubr.bf16.gmra.mrb[92].mxu1 %v5543_v55 }
0x267b   :  { %11956 = vmatpush3.bf16.msra.mxu1 %v12703_v24 }
0x267c   :  { %11957 = vmatprep.subr.bf16.mxu1 %v12704_v25 }
0x267f   :  { %11958 = vmatpush3.bf16.msra.mxu1 %v12704_v25 }
0x2680   :  { %11959 = vmatprep.subr.bf16.mxu1 %v12705_v15 }
0x2683   :  { %11960 = vmatpush3.bf16.msra.mxu1 %v12705_v15 }
0x2684   :  { %11961 = vmatprep.subr.bf16.mxu1 %v12706_v26 }
0x2687   :  { %11962 = vmatpush3.bf16.msra.mxu1 %v12706_v26 }
0x2688   :  { %11963 = vmatprep.subr.bf16.mxu1 %v12707_v27 }
0x268b   :  { %11964 = vmatpush3.bf16.msra.mxu1 %v12707_v27 }
0x268c   :  { %11965 = vmatprep.subr.bf16.mxu1 %v12708_v44 }
0x268f   :  { %11966 = vmatpush3.bf16.msra.mxu1 %v12708_v44 }
0x2690   :  { %11991 = vmatprep.subr.bf16.mxu1 %v13012_v0 }
0x2745   :  { %v11049_v58 = vpop.f32.mrb[88].mxu1 }
0x2746   :  { %v11050_v14 = vpop.f32.mrb[89].mxu1 }
0x2747   :  { %v11051_v57 = vadd.f32 %v11050_v14, %v11049_v58  ;;  %v11052_v28 = vpop.f32.mrb[90].mxu1 }
0x2748   :  { %v11053_v39 = vpop.f32.mrb[91].mxu1 }
0x2749   :  { %v5731_v3 = vadd.f32 %v11051_v57, %v9987_v1  ;;  %v11054_v34 = vadd.f32 %v11053_v39, %v11052_v28 }
0x274b   :  { %v5780_v8 = vadd.f32 %v14053_v17, %v5731_v3  ;;  %v5734_v32 = vadd.f32 %v11054_v34, %v9987_v1 }
0x274d   :  { %v5783_v40 = vadd.f32 %v14057_v22, %v5734_v32  ;;  %v11055_v43 = vpop.f32.mrb[92].mxu1  ;;  %v5794_v56 = vmax.f32 %v5780_v8, 0.0 }
0x274e   :  { %v11056_v52 = vpop.f32.mrb[93].mxu1 }
0x274f   :  { %v5795_v50 = vmax.f32 %v5783_v40, 0.0  ;;  %v11057_v53 = vadd.f32 %v11056_v52, %v11055_v43  ;;  %v11058_v63 = vpop.f32.mrb[94].mxu1 }
0x2750   :  { %v11059_v41 = vpop.f32.mrb[95].mxu1 }
0x2751   :  { %v5739_v11 = vadd.f32 %v11057_v53, %v9987_v1  ;;  %v11060_v54 = vadd.f32 %v11059_v41, %v11058_v63  ;;  %v5798_v5 = vpack.c.bf16 %v5795_v50, %v5794_v56 }
0x2753   :  { %v5788_v42 = vadd.f32 %v14051_v30, %v5739_v11  ;;  %v5742_v16 = vadd.f32 %v11060_v54, %v9987_v1  ;;  %11967 = vmatprep.mubr.bf16.mxu1 %v5798_v5  ;;  %v10012_v30 = vld [vmem:[%s13366_s12 + $0x3] ss:$0 sm:$0xff] }
0x2755   :  { %v5791_v17 = vadd.f32 %v14055_v31, %v5742_v16  ;;  %v5796_v22 = vmax.f32 %v5788_v42, 0.0 }
0x2757   :  { %v5797_v62 = vmax.f32 %v5791_v17, 0.0 }
0x2759   :  { %v5799_v13 = vpack.c.bf16 %v5797_v62, %v5796_v22 }
0x275b   :  { %11968 = vmatmul.mubr.bf16.vlgmr.msra.gmra.mrb[96].mxu1 %v5799_v13 }
0x275c   :  { %11995 = vmatprep.mubr.msk.bf16.mxu1 %vm13014_vm0, %v13012_v0 }
0x282e   :  { %v11969_v55 = vpop.f32.mrb[96].mxu1 }
0x282f   :  { %v5897_v19 = vadd.f32 %v11969_v55, %v10012_v30  ;;  %v5888_v31 = vpop.f32.mrb[97].mxu1 }
0x2830   :  { %v5889_v20 = vadd.f32 %v10012_v30, %v5888_v31  ;;  %v11970_v23 = vpop.f32.mrb[98].mxu1 }
0x2831   :  { %v5900_v24 = vadd.f32 %v11970_v23, %v10012_v30  ;;  %v5891_v25 = vpop.f32.mrb[99].mxu1  ;;  %v5905_v26 = vmax.f32 %v5897_v19, 0.0 }
0x2832   :  { %v5892_v15 = vadd.f32 %v10012_v30, %v5891_v25  ;;  %v5903_v44 = vmax.f32 %v5889_v20, 0.0 }
0x2833   :  { %v5906_v27 = vmax.f32 %v5900_v24, 0.0  ;;  %v10032_v24 = vld [vmem:[%s13418_s28 + $0x3] ss:$0 sm:$0xff] }
0x2834   :  { %v5904_v29 = vmax.f32 %v5892_v15, 0.0 }
0x2835   :  { %v5908_v21 = vpack.c.bf16 %v5906_v27, %v5905_v26  ;;  %v10033_v26 = vld [vmem:[%s13423_s4 + $0x3] ss:$0 sm:$0xff] }
0x2836   :  { %v5907_v35 = vpack.c.bf16 %v5904_v29, %v5903_v44 }
0x2838   :  { %11987 = vmatprep.mubr.bf16.mxu0 %v5907_v35 }
0x2839   :  { %11988 = vmatmul.mubr.bf16.vlgmr.msra.gmra.mrb[104].mxu0 %v5908_v21 }
0x283a   :  { %12015 = vmatprep.mubr.msk.bf16.mxu0 %vm13014_vm0, %v13012_v0 }
0x290c   :  { %v11989_v4 = vpop.f32.mrb[104].mxu0 }
0x290d   :  { %v5997_v33 = vpop.f32.mrb[105].mxu0  ;;  %v6006_v28 = vadd.f32 %v11989_v4, %v10021_v46 }
0x290e   :  { %v5998_v58 = vadd.f32 %v10021_v46, %v5997_v33  ;;  %v11990_v1 = vpop.f32.mrb[106].mxu0 }
0x290f   :  { %v6000_v14 = vpop.f32.mrb[107].mxu0  ;;  %v6009_v39 = vadd.f32 %v11990_v1, %v10021_v46 }
0x2910   :  { %v6001_v57 = vadd.f32 %v10021_v46, %v6000_v14  ;;  %6016 = vadd.xlane.f32.xlu0 %v5998_v58 }
0x2912   :  { %6018 = vadd.xlane.f32.xlu1 %v6001_v57 }
0x2914   :  { %6020 = vadd.xlane.f32.xlu0 %v6006_v28 }
0x2916   :  { %6022 = vadd.xlane.f32.xlu1 %v6009_v39 }
0x299d   :  { %v6017_v3 = vpop.xlane.xlu0 %6016 }
0x299e   :  { %v6024_v34 = vmul.f32 0.0078125, %v6017_v3 }
0x299f   :  { %v6019_v8 = vpop.xlane.xlu1 %6018 }
0x29a0   :  { %v6028_v32 = vsub.f32 %v5998_v58, %v6024_v34  ;;  %v6025_v40 = vmul.f32 0.0078125, %v6019_v8 }
0x29a1   :  { %v6021_v43 = vpop.xlane.xlu0 %6020 }
0x29a2   :  { %v6029_v52 = vsub.f32 %v6001_v57, %v6025_v40  ;;  %v6026_v56 = vmul.f32 0.0078125, %v6021_v43  ;;  %v6032_v50 = vmul.f32 %v6028_v32, %v6028_v32  ;;  %v12717_v40 = vld [vmem:[%s13397_s24 + $0x1c0] sm:$0xff]  }
0x29a3   :  { %v6023_v53 = vpop.xlane.xlu1 %6022 }
0x29a4   :  { %v6030_v63 = vsub.f32 %v6006_v28, %v6026_v56  ;;  %v6027_v41 = vmul.f32 0.0078125, %v6023_v53  ;;  %6036 = vadd.xlane.f32.xlu0 %v6032_v50  ;;  %v6033_v11 = vmul.f32 %v6029_v52, %v6029_v52  ;;  %v12719_v56 = vld [vmem:[%s13397_s24 + $0x1c8] sm:$0xff]   ;;  %v12721_v53 = vld [vmem:[%s13397_s24 + $0x1d0] sm:$0xff]  }
0x29a5   :  { %v12720_v50 = vld [vmem:[%s13397_s24 + $0x188] sm:$0xff]  }
0x29a6   :  { %v6031_v54 = vsub.f32 %v6009_v39, %v6027_v41  ;;  %6038 = vadd.xlane.f32.xlu1 %v6033_v11  ;;  %v6034_v5 = vmul.f32 %v6030_v63, %v6030_v63  ;;  %v12723_v41 = vld [vmem:[%s13397_s24 + $0x1d8] sm:$0xff]  }
0x29a7   :  { %v12724_v11 = vld [vmem:[%s13397_s24 + $0x198] sm:$0xff]  }
0x29a8   :  { %6040 = vadd.xlane.f32.xlu0 %v6034_v5  ;;  %v6035_v42 = vmul.f32 %v6031_v54, %v6031_v54  ;;  %v12726_v5 = vld [vmem:[%s13397_s24 + $0x1a0] sm:$0xff]  }
0x29aa   :  { %6042 = vadd.xlane.f32.xlu1 %v6035_v42  ;;  %v12727_v42 = vld [vmem:[%s13397_s24 + $0x1e8] sm:$0xff]  }
0x2a31   :  { %v6037_v16 = vpop.xlane.xlu0 %6036 }
0x2a32   :  { %v6044_v17 = vmul.f32 0.0078125, %v6037_v16  ;;  %v12728_v16 = vld [vmem:[%s13397_s24 + $0x1a8] sm:$0xff]  }
0x2a33   :  { %v6039_v22 = vpop.xlane.xlu1 %6038 }
0x2a34   :  { %v6048_v62 = vadd.f32 1e-05, %v6044_v17  ;;  %v6045_v13 = vmul.f32 0.0078125, %v6039_v22  ;;  %v12729_v17 = vld [vmem:[%s13397_s24 + $0x1f0] sm:$0xff]  }
0x2a35   :  { %v6041_v9 = vpop.xlane.xlu0 %6040  ;;  %v12730_v22 = vld [vmem:[%s13397_s24 + $0x1b0] sm:$0xff]  }
0x2a36   :  { %12949 = vrsqrt.f32 %v6048_v62  ;;  %v6049_v7 = vadd.f32 1e-05, %v6045_v13  ;;  %v6046_v30 = vmul.f32 0.0078125, %v6041_v9  ;;  %v12731_v62 = vld [vmem:[%s13397_s24 + $0x1f8] sm:$0xff]   ;;  %v12733_v9 = vld [vmem:[%s13473_s15 + $0xc0] sm:$0xff]  }
0x2a37   :  { %v6043_v55 = vpop.xlane.xlu1 %6042  ;;  %v12732_v13 = vld [vmem:[%s13397_s24 + $0x1b8] sm:$0xff]   ;;  %12000 = vmatpush3.bf16.msra.mxu0 %v12733_v9 }
0x2a38   :  { %12951 = vrsqrt.f32 %v6049_v7  ;;  %v6050_v19 = vadd.f32 1e-05, %v6046_v30  ;;  %v6047_v31 = vmul.f32 0.0078125, %v6043_v55  ;;  %v12734_v7 = vld [vmem:[%s13473_s15 + $0xc8] sm:$0xff]   ;;  %12001 = vmatprep.subr.bf16.mxu0 %v13012_v0  ;;  %v12735_v30 = vld [vmem:[%s13473_s15 + $0xd0] sm:$0xff]   ;;  %v12736_v55 = vld [vmem:[%s13473_s15 + $0xd8] sm:$0xff]  }
0x2a3a   :  { %12953 = vrsqrt.f32 %v6050_v19  ;;  %v6051_v20 = vadd.f32 1e-05, %v6047_v31  ;;  %v12737_v19 = vld [vmem:[%s13473_s15 + $0xe0] sm:$0xff]  }
0x2a3b   :  { %12002 = vmatpush3.bf16.msra.mxu0 %v12734_v7 }
0x2a3c   :  { %12955 = vrsqrt.f32 %v6051_v20  ;;  %12003 = vmatprep.subr.bf16.mxu0 %v13012_v0 }
0x2a3f   :  { %12004 = vmatpush3.bf16.msra.mxu0 %v12735_v30  ;;  %v12750_v30 = vld [vmem:[%s13224_s9 + $0x388] sm:$0xff]  }
0x2a40   :  { %v12950_v23 = vpop.eup %12949  ;;  %12005 = vmatprep.subr.bf16.mxu0 %v13012_v0 }
0x2a41   :  { %v6056_v25 = vmul.f32 %v12950_v23, %v6028_v32 }
0x2a42   :  { %v12952_v15 = vpop.eup %12951 }
0x2a43   :  { %v6057_v27 = vmul.f32 %v12952_v15, %v6029_v52  ;;  %v6066_v44 = vmul.f32 %v10032_v24, %v6056_v25  ;;  %v12718_v52 = vld [vmem:[%s13397_s24 + $0x180] sm:$0xff]   ;;  %12006 = vmatpush3.bf16.msra.mxu0 %v12736_v55  ;;  %v12738_v15 = vld [vmem:[%s13473_s15 + $0xe8] sm:$0xff]  }
0x2a44   :  { %v12954_v29 = vpop.eup %12953  ;;  %12007 = vmatprep.subr.bf16.mxu0 %v13012_v0 }
0x2a45   :  { %v6058_v21 = vmul.f32 %v12954_v29, %v6030_v63  ;;  %v6067_v35 = vmul.f32 %v10032_v24, %v6057_v27  ;;  %v14128_v46 = vadd.f32 %v10033_v26, %v6066_v44  ;;  %v12722_v63 = vld [vmem:[%s13397_s24 + $0x190] sm:$0xff]   ;;  %v12740_v27 = vld [vmem:[%s13473_s15 + $0xf8] sm:$0xff]   ;;  %v12741_v44 = vld [vmem:[%s13496_s20 + $0xc0] sm:$0xff]  }
0x2a46   :  { %v12956_v4 = vpop.eup %12955  ;;  %v12742_v29 = vld [vmem:[%s13496_s20 + $0xc8] sm:$0xff]  }
0x2a47   :  { %v6059_v33 = vmul.f32 %v12956_v4, %v6031_v54  ;;  %v14130_v58 = vadd.f32 %v10033_v26, %v6067_v35  ;;  %v6068_v1 = vmul.f32 %v10032_v24, %v6058_v21  ;;  %v6080_v14 = vmul.f32 %v14128_v46, %v13434_v49  ;;  %v12725_v54 = vld [vmem:[%s13397_s24 + $0x1e0] sm:$0xff]   ;;  %12008 = vmatpush3.bf16.msra.mxu0 %v12737_v19  ;;  %v12744_v21 = vld [vmem:[%s13496_s20 + $0xd8] sm:$0xff]   ;;  %v12746_v4 = vld [vmem:[%s13496_s20 + $0xe8] sm:$0xff]  }
0x2a48   :  { %12009 = vmatprep.subr.bf16.mxu0 %v13012_v0  ;;  %v12745_v35 = vld [vmem:[%s13496_s20 + $0xe0] sm:$0xff]   ;;  %v14208_v9 = vadd.f32 %v14128_v46, %v14029_v6  ;;  %v12754_v46 = vld [vmem:[%s13224_s9 + $0x3a8] sm:$0xff]   ;;  %v12755_v19 = vld [vmem:[%s13224_s9 + $0x3b0] sm:$0xff]  }
0x2a49   :  { %v6081_v57 = vmul.f32 %v14130_v58, %v13413_v18  ;;  %v6069_v28 = vmul.f32 %v10032_v24, %v6059_v33  ;;  %v14136_v39 = vadd.f32 %v10033_v26, %v6068_v1  ;;  %v10102_v1 = vld [vmem:[%s13513_s25 + $0x3] ss:$0 sm:$0xff] }
0x2a4a   :  { %v12753_v6 = vld [vmem:[%s13224_s9 + $0x3a0] sm:$0xff]  }
0x2a4b   :  { %v6084_v3 = vpack.c.bf16 %v6081_v57, %v6080_v14  ;;  %v14138_v34 = vadd.f32 %v10033_v26, %v6069_v28  ;;  %v6082_v8 = vmul.f32 %v14136_v39, %v13453_v2  ;;  %12010 = vmatpush3.bf16.msra.mxu0 %v12738_v15  ;;  %v12739_v26 = vld [vmem:[%s13473_s15 + $0xf0] sm:$0xff]  }
0x2a4c   :  { %12011 = vmatprep.subr.bf16.mxu0 %v13012_v0 }
0x2a4d   :  { %11992 = vmatpush3.bf16.msra.mxu1 %v6084_v3  ;;  %v6083_v32 = vmul.f32 %v14138_v34, %v13449_v60 }
0x2a4e   :  { %11993 = vmatprep.subr.bf16.mxu1 %v13012_v0 }
0x2a4f   :  { %v6085_v43 = vpack.c.bf16 %v6083_v32, %v6082_v8  ;;  %12012 = vmatpush3.bf16.msra.mxu0 %v12739_v26 }
0x2a50   :  { %12013 = vmatprep.subr.bf16.mxu0 %v13012_v0 }
0x2a51   :  { %11994 = vmatpush3.bf16.msra.mxu1 %v6085_v43 }
0x2a52   :  { %11094 = vmatprep.subr.bf16.mxu1 %v12717_v40 }
0x2a53   :  { %12014 = vmatpush3.bf16.msra.mxu0 %v12740_v27 }
0x2a54   :  { %11996 = vmatmul.mubr.msk.bf16.vlgmr.msra.gmra.mrb[100].mxu1 %vm1777_vm2, %v13460_v12 }
0x2a55   :  { %11095 = vmatpush3.bf16.msra.mxu1 %v12718_v52 }
0x2a56   :  { %11096 = vmatprep.subr.bf16.mxu1 %v12719_v56 }
0x2a59   :  { %11097 = vmatpush3.bf16.msra.mxu1 %v12720_v50  ;;  %v12747_v50 = vld [vmem:[%s13496_s20 + $0xf0] sm:$0xff]  }
0x2a5a   :  { %11098 = vmatprep.subr.bf16.mxu1 %v12721_v53  ;;  %v12748_v53 = vld [vmem:[%s13496_s20 + $0xf8] sm:$0xff]  }
0x2a5d   :  { %11099 = vmatpush3.bf16.msra.mxu1 %v12722_v63  ;;  %v12749_v63 = vld [vmem:[%s13224_s9 + $0x380] sm:$0xff]  }
0x2a5e   :  { %11100 = vmatprep.subr.bf16.mxu1 %v12723_v41  ;;  %v10119_v41 = vld [vmem:[%s13525_s1 + $0x3] ss:$0 sm:$0xff] }
0x2a61   :  { %11101 = vmatpush3.bf16.msra.mxu1 %v12724_v11 }
0x2a62   :  { %11102 = vmatprep.subr.bf16.mxu1 %v12725_v54 }
0x2a65   :  { %11103 = vmatpush3.bf16.msra.mxu1 %v12726_v5 }
0x2a66   :  { %11104 = vmatprep.subr.bf16.mxu1 %v12727_v42 }
0x2a69   :  { %11105 = vmatpush3.bf16.msra.mxu1 %v12728_v16 }
0x2a6a   :  { %11106 = vmatprep.subr.bf16.mxu1 %v12729_v17 }
0x2a6d   :  { %11107 = vmatpush3.bf16.msra.mxu1 %v12730_v22  ;;  %v14204_v22 = vadd.f32 %v14130_v58, %v14025_v59  ;;  %v12751_v59 = vld [vmem:[%s13224_s9 + $0x390] sm:$0xff]   ;;  %v12752_v58 = vld [vmem:[%s13224_s9 + $0x398] sm:$0xff]  }
0x2a6e   :  { %11108 = vmatprep.subr.bf16.mxu1 %v12731_v62 }
0x2a6f   :  { %v6778_v55 = vpack.c.bf16 %v14204_v22, %v14208_v9 }
0x2a71   :  { %11109 = vmatpush3.bf16.msra.mxu1 %v12732_v13 }
0x2a72   :  { %12019 = vmatprep.subr.bf16.mxu1 %v13012_v0 }
0x2b27   :  { %v6120_v31 = vpop.f32.mrb[100].mxu1 }
0x2b28   :  { %v11997_v20 = vpop.f32.mrb[101].mxu1 }
0x2b29   :  { %v6123_v23 = vpop.f32.mrb[102].mxu1  ;;  %v14221_v20 = vadd.f32 %v14138_v34, %v14042_v45 }
0x2b2a   :  { %v6200_v24 = vpack.c.bf16 %v6123_v23, %v6120_v31  ;;  %v11998_v25 = vpop.f32.mrb[103].mxu1  ;;  %v12756_v31 = vld [vmem:[%s13224_s9 + $0x3b8] sm:$0xff]   ;;  %v14225_v23 = vadd.f32 %v14136_v39, %v14046_v51 }
0x2b2b   :  { %v10128_v25 = vld [vmem:[%s13558_s8 + $0x3] ss:$0 sm:$0xff] }
0x2b2c   :  { %6335 = vmatprep.mubr.bf16.mxu1 %v6200_v24  ;;  %v6781_v24 = vpack.c.bf16 %v14221_v20, %v14225_v23 }
0x2b2d   :  { %6336 = vmatmul.mubr.bf16.vlgmr.msra.gmra.mrb[104].mxu1 %v14069_v38  ;;  %v12743_v38 = vld [vmem:[%s13496_s20 + $0xd0] sm:$0xff]  }
0x2b2e   :  { %12035 = vmatprep.mubr.msk.bf16.mxu1 %vm13014_vm0, %v13012_v0  ;;  %12020 = vmatpush3.bf16.msra.mxu1 %v12741_v44 }
0x2b2f   :  { %12021 = vmatprep.subr.bf16.mxu1 %v13012_v0 }
0x2b32   :  { %12022 = vmatpush3.bf16.msra.mxu1 %v12742_v29 }
0x2b33   :  { %12023 = vmatprep.subr.bf16.mxu1 %v13012_v0 }
0x2b36   :  { %12024 = vmatpush3.bf16.msra.mxu1 %v12743_v38 }
0x2b37   :  { %12025 = vmatprep.subr.bf16.mxu1 %v13012_v0 }
0x2b3a   :  { %12026 = vmatpush3.bf16.msra.mxu1 %v12744_v21 }
0x2b3b   :  { %12027 = vmatprep.subr.bf16.mxu1 %v13012_v0 }
0x2b3e   :  { %12028 = vmatpush3.bf16.msra.mxu1 %v12745_v35 }
0x2b3f   :  { %12029 = vmatprep.subr.bf16.mxu1 %v13012_v0 }
0x2b42   :  { %12030 = vmatpush3.bf16.msra.mxu1 %v12746_v4 }
0x2b43   :  { %12031 = vmatprep.subr.bf16.mxu1 %v13012_v0 }
0x2b46   :  { %12032 = vmatpush3.bf16.msra.mxu1 %v12747_v50  ;;  %v10139_v50 = vld [vmem:[%s13572_s14 + $0x3] ss:$0 sm:$0xff] }
0x2b47   :  { %12033 = vmatprep.subr.bf16.mxu1 %v13012_v0 }
0x2b4a   :  { %12034 = vmatpush3.bf16.msra.mxu1 %v12748_v53 }
0x2b4b   :  { %12051 = vmatprep.subr.bf16.mxu1 %v12749_v63 }
0x2c00   :  { %v11110_v33 = vpop.f32.mrb[104].mxu1 }
0x2c01   :  { %v11111_v14 = vpop.f32.mrb[105].mxu1 }
0x2c02   :  { %v11112_v57 = vadd.f32 %v11111_v14, %v11110_v33  ;;  %v11113_v28 = vpop.f32.mrb[106].mxu1 }
0x2c03   :  { %v11114_v3 = vpop.f32.mrb[107].mxu1 }
0x2c04   :  { %v6338_v8 = vadd.f32 %v11112_v57, %v10102_v1  ;;  %v11115_v32 = vadd.f32 %v11114_v3, %v11113_v28 }
0x2c06   :  { %v6341_v40 = vadd.f32 %v11115_v32, %v10102_v1  ;;  %v6344_v43 = vmax.f32 %v6338_v8, 0.0 }
0x2c08   :  { %v6345_v52 = vmax.f32 %v6341_v40, 0.0 }
0x2c0a   :  { %v6346_v56 = vpack.c.bf16 %v6345_v52, %v6344_v43 }
0x2c0c   :  { %12016 = vmatmul.mubr.bf16.vlgmr.msra.gmra.mrb[108].mxu0 %v6346_v56 }
0x2c0d   :  { %12041 = vmatprep.mubr.msk.bf16.mxu0 %vm1019_vm8, %v13201_v10 }
0x2cdf   :  { %v6435_v11 = vpop.f32.mrb[108].mxu0 }
0x2ce0   :  { %v6436_v54 = vadd.f32 %v10119_v41, %v6435_v11  ;;  %v12017_v5 = vpop.f32.mrb[109].mxu0 }
0x2ce1   :  { %v6438_v42 = vpop.f32.mrb[110].mxu0 }
0x2ce2   :  { %v6439_v16 = vadd.f32 %v10119_v41, %v6438_v42  ;;  %v12018_v17 = vpop.f32.mrb[111].mxu0  ;;  %v6442_v62 = vmax.f32 %v6436_v54, 0.0  ;;  %v10140_v41 = vld [vmem:[%s13577_s21 + $0x3] ss:$0 sm:$0xff] }
0x2ce4   :  { %v6443_v13 = vmax.f32 %v6439_v16, 0.0 }
0x2ce6   :  { %v6444_v7 = vpack.c.bf16 %v6443_v13, %v6442_v62 }
0x2ce8   :  { %12036 = vmatmul.mubr.bf16.vlgmr.msra.gmra.mrb[108].mxu1 %v6444_v7  ;;  %v12757_v7 = vld [vmem:[%s13224_s9 + $0x340] sm:$0xff]  }
0x2ce9   :  { %12052 = vmatpush3.bf16.msra.mxu1 %v12749_v63  ;;  %12067 = vmatprep.mubr.bf16.mxu1 %v6778_v55  ;;  %v12761_v55 = vld [vmem:[%s13224_s9 + $0x350] sm:$0xff]  }
0x2cea   :  { %12053 = vmatprep.subr.bf16.mxu1 %v12750_v30 }
0x2ced   :  { %12054 = vmatpush3.bf16.msra.mxu1 %v12750_v30  ;;  %v12760_v30 = vld [vmem:[%s13224_s9 + $0x308] sm:$0xff]  }
0x2cee   :  { %12055 = vmatprep.subr.bf16.mxu1 %v12751_v59 }
0x2cf1   :  { %12056 = vmatpush3.bf16.msra.mxu1 %v12751_v59  ;;  %v12762_v59 = vld [vmem:[%s13224_s9 + $0x310] sm:$0xff]  }
0x2cf2   :  { %12057 = vmatprep.subr.bf16.mxu1 %v12752_v58 }
0x2cf5   :  { %12058 = vmatpush3.bf16.msra.mxu1 %v12752_v58  ;;  %v12763_v58 = vld [vmem:[%s13224_s9 + $0x358] sm:$0xff]  }
0x2cf6   :  { %12059 = vmatprep.subr.bf16.mxu1 %v12753_v6 }
0x2cf9   :  { %12060 = vmatpush3.bf16.msra.mxu1 %v12753_v6  ;;  %v12764_v6 = vld [vmem:[%s13224_s9 + $0x318] sm:$0xff]  }
0x2cfa   :  { %12061 = vmatprep.subr.bf16.mxu1 %v12754_v46 }
0x2cfd   :  { %12062 = vmatpush3.bf16.msra.mxu1 %v12754_v46  ;;  %v12765_v46 = vld [vmem:[%s13224_s9 + $0x360] sm:$0xff]  }
0x2cfe   :  { %12063 = vmatprep.subr.bf16.mxu1 %v12755_v19 }
0x2d01   :  { %12064 = vmatpush3.bf16.msra.mxu1 %v12755_v19  ;;  %v12766_v19 = vld [vmem:[%s13224_s9 + $0x320] sm:$0xff]  }
0x2d02   :  { %12065 = vmatprep.subr.bf16.mxu1 %v12756_v31 }
0x2d05   :  { %12066 = vmatpush3.bf16.msra.mxu1 %v12756_v31  ;;  %v12767_v31 = vld [vmem:[%s13224_s9 + $0x368] sm:$0xff]  }
0x2d08   :  { %12068 = vmatmul.mubr.bf16.vlgmr.msra.gmra.mrb[112].mxu1 %v6781_v24  ;;  %v12768_v24 = vld [vmem:[%s13224_s9 + $0x328] sm:$0xff]  }
0x2dbb   :  { %v6533_v15 = vpop.f32.mrb[108].mxu1 }
0x2dbc   :  { %v6534_v26 = vadd.f32 %v10128_v25, %v6533_v15  ;;  %v12037_v27 = vpop.f32.mrb[109].mxu1  ;;  %v12770_v15 = vld [vmem:[%s13224_s9 + $0x330] sm:$0xff]  }
0x2dbd   :  { %v6536_v44 = vpop.f32.mrb[110].mxu1  ;;  %v12772_v27 = vld [vmem:[%s13224_s9 + $0x338] sm:$0xff]  }
0x2dbe   :  { %v6537_v29 = vadd.f32 %v10128_v25, %v6536_v44  ;;  %6544 = vadd.xlane.f32.xlu0 %v6534_v26  ;;  %v12038_v38 = vpop.f32.mrb[111].mxu1  ;;  %v12769_v25 = vld [vmem:[%s13224_s9 + $0x370] sm:$0xff]   ;;  %v12773_v44 = vld [vmem:[%s13331_s29 + $0x100] sm:$0xff]  }
0x2dc0   :  { %6546 = vadd.xlane.f32.xlu1 %v6537_v29 }
0x2ddb   :  { %v14230_v45 = vpop.f32.mrb[112].mxu1 }
0x2ddc   :  { %v14232_v34 = vpop.f32.mrb[113].mxu1 }
0x2ddd   :  { %v14234_v51 = vpop.f32.mrb[114].mxu1 }
0x2dde   :  { %v14236_v39 = vpop.f32.mrb[115].mxu1 }
0x2e4b   :  { %v6545_v21 = vpop.xlane.xlu0 %6544 }
0x2e4c   :  { %v6548_v35 = vmul.f32 0.0078125, %v6545_v21 }
0x2e4d   :  { %v6547_v4 = vpop.xlane.xlu1 %6546 }
0x2e4e   :  { %v6550_v33 = vsub.f32 %v6534_v26, %v6548_v35  ;;  %v6549_v1 = vmul.f32 0.0078125, %v6547_v4  ;;  %v12771_v26 = vld [vmem:[%s13224_s9 + $0x378] sm:$0xff]  }
0x2e50   :  { %v6551_v14 = vsub.f32 %v6537_v29, %v6549_v1  ;;  %v6552_v57 = vmul.f32 %v6550_v33, %v6550_v33 }
0x2e52   :  { %6554 = vadd.xlane.f32.xlu0 %v6552_v57  ;;  %v6553_v28 = vmul.f32 %v6551_v14, %v6551_v14 }
0x2e54   :  { %6556 = vadd.xlane.f32.xlu1 %v6553_v28 }
0x2edf   :  { %v6555_v3 = vpop.xlane.xlu0 %6554 }
0x2ee0   :  { %v6558_v8 = vmul.f32 0.0078125, %v6555_v3 }
0x2ee1   :  { %v6557_v32 = vpop.xlane.xlu1 %6556 }
0x2ee2   :  { %v6560_v40 = vadd.f32 1e-05, %v6558_v8  ;;  %v6559_v43 = vmul.f32 0.0078125, %v6557_v32  ;;  %v12774_v32 = vld [vmem:[%s13331_s29 + $0x108] sm:$0xff]  }
0x2ee4   :  { %12957 = vrsqrt.f32 %v6560_v40  ;;  %v6561_v52 = vadd.f32 1e-05, %v6559_v43  ;;  %v12775_v40 = vld [vmem:[%s13331_s29 + $0x110] sm:$0xff]   ;;  %v12776_v43 = vld [vmem:[%s13331_s29 + $0x118] sm:$0xff]  }
0x2ee6   :  { %12959 = vrsqrt.f32 %v6561_v52  ;;  %v12777_v52 = vld [vmem:[%s13331_s29 + $0x120] sm:$0xff]  }
0x2eee   :  { %v12958_v56 = vpop.eup %12957 }
0x2eef   :  { %v6564_v53 = vmul.f32 %v12958_v56, %v6550_v33  ;;  %v12778_v56 = vld [vmem:[%s13331_s29 + $0x128] sm:$0xff]  }
0x2ef0   :  { %v12960_v63 = vpop.eup %12959 }
0x2ef1   :  { %v6572_v11 = vmul.f32 %v10139_v50, %v6564_v53  ;;  %v6565_v54 = vmul.f32 %v12960_v63, %v6551_v14  ;;  %v12780_v53 = vld [vmem:[%s13331_s29 + $0x138] sm:$0xff]   ;;  %v12781_v63 = vld [vmem:[%s13345_s3 + $0x100] sm:$0xff]  }
0x2ef2   :  { %12091 = vmatprep.subr.bf16.mxu1 %v12781_v63 }
0x2ef3   :  { %v6573_v5 = vmul.f32 %v10139_v50, %v6565_v54  ;;  %v6580_v42 = vadd.f32 %v10140_v41, %v6572_v11  ;;  %v12779_v50 = vld [vmem:[%s13331_s29 + $0x130] sm:$0xff]   ;;  %12092 = vmatpush3.bf16.msra.mxu1 %v12781_v63  ;;  %v12784_v54 = vld [vmem:[%s13345_s3 + $0x118] sm:$0xff]  }
0x2ef4   :  { %v12783_v11 = vld [vmem:[%s13345_s3 + $0x110] sm:$0xff]  }
0x2ef5   :  { %v6581_v16 = vadd.f32 %v10140_v41, %v6573_v5  ;;  %v14241_v17 = vadd.f32 %v6580_v42, %v14062_v36  ;;  %v12758_v36 = vld [vmem:[%s13224_s9 + $0x300] sm:$0xff]   ;;  %v12782_v41 = vld [vmem:[%s13345_s3 + $0x108] sm:$0xff]  }
0x2ef6   :  { %12093 = vmatprep.subr.bf16.mxu1 %v12782_v41  ;;  %v12785_v5 = vld [vmem:[%s13345_s3 + $0x120] sm:$0xff]   ;;  %v12786_v42 = vld [vmem:[%s13345_s3 + $0x128] sm:$0xff]  }
0x2ef7   :  { %v14244_v62 = vadd.f32 %v6581_v16, %v14065_v37  ;;  %v12759_v37 = vld [vmem:[%s13224_s9 + $0x348] sm:$0xff]   ;;  %12094 = vmatpush3.bf16.msra.mxu1 %v12782_v41 }
0x2ef8   :  { %12095 = vmatprep.subr.bf16.mxu1 %v12783_v11 }
0x2ef9   :  { %v14248_v13 = vpack.c.bf16 %v14244_v62, %v14241_v17 }
0x2efb   :  { %12039 = vmatprep.subr.bf16.mxu0 %v14248_v13  ;;  %12096 = vmatpush3.bf16.msra.mxu1 %v12783_v11 }
0x2efc   :  { %12040 = vmatpush3.bf16.msra.mxu0 %v14248_v13  ;;  %12097 = vmatprep.subr.bf16.mxu1 %v12784_v54 }
0x2efd   :  { %12045 = vmatprep.subr.bf16.mxu0 %v14248_v13 }
0x2eff   :  { %12042 = vmatmul.mubr.msk.bf16.vlgmr.msra.gmra.mrb[112].mxu0 %vm1019_vm8, %v13257_v47  ;;  %12098 = vmatpush3.bf16.msra.mxu1 %v12784_v54  ;;  %v10262_v54 = vld [vmem:[%s13372_s16 + $0x4] ss:$0 sm:$0xff] }
0x2f00   :  { %12046 = vmatpush3.bf16.msra.mxu0 %v14248_v13  ;;  %12047 = vmatprep.mubr.msk.bf16.mxu0 %vm1019_vm8, %v13193_v61 }
0x2f01   :  { %11140 = vmatprep.subr.bf16.mxu0 %v12757_v7  ;;  %12099 = vmatprep.subr.bf16.mxu1 %v12785_v5  ;;  %v10228_v7 = vld [vmem:[%s13356_s7 + $0x4] ss:$0 sm:$0xff] }
0x2f03   :  { %12100 = vmatpush3.bf16.msra.mxu1 %v12785_v5 }
0x2f04   :  { %12101 = vmatprep.subr.bf16.mxu1 %v12786_v42 }
0x2f07   :  { %12048 = vmatmul.mubr.msk.bf16.vlgmr.msra.gmra.mrb[116].mxu0 %vm1019_vm8, %v13259_v48  ;;  %12102 = vmatpush3.bf16.msra.mxu1 %v12786_v42 }
0x2f08   :  { %11141 = vmatpush3.bf16.msra.mxu0 %v12758_v36 }
0x2f09   :  { %11142 = vmatprep.subr.bf16.mxu0 %v12759_v37 }
0x2f0c   :  { %11143 = vmatpush3.bf16.msra.mxu0 %v12760_v30 }
0x2f0d   :  { %11144 = vmatprep.subr.bf16.mxu0 %v12761_v55 }
0x2f10   :  { %11145 = vmatpush3.bf16.msra.mxu0 %v12762_v59 }
0x2f11   :  { %11146 = vmatprep.subr.bf16.mxu0 %v12763_v58 }
0x2f14   :  { %11147 = vmatpush3.bf16.msra.mxu0 %v12764_v6 }
0x2f15   :  { %11148 = vmatprep.subr.bf16.mxu0 %v12765_v46 }
0x2f18   :  { %11149 = vmatpush3.bf16.msra.mxu0 %v12766_v19 }
0x2f19   :  { %11150 = vmatprep.subr.bf16.mxu0 %v12767_v31 }
0x2f1c   :  { %11151 = vmatpush3.bf16.msra.mxu0 %v12768_v24 }
0x2f1d   :  { %11152 = vmatprep.subr.bf16.mxu0 %v12769_v25 }
0x2f20   :  { %11153 = vmatpush3.bf16.msra.mxu0 %v12770_v15 }
0x2f21   :  { %11154 = vmatprep.subr.bf16.mxu0 %v12771_v26 }
0x2f24   :  { %11155 = vmatpush3.bf16.msra.mxu0 %v12772_v27 }
0x2f25   :  { %12071 = vmatprep.subr.bf16.mxu0 %v12773_v44 }
0x2fd2   :  { %v12043_v29 = vpop.f32.mrb[112].mxu0 }
0x2fd3   :  { %v6623_v38 = vpop.f32.mrb[113].mxu0 }
0x2fd4   :  { %v12044_v21 = vpop.f32.mrb[114].mxu0 }
0x2fd5   :  { %v6780_v35 = vpack.c.bf16 %v12044_v21, %v12043_v29  ;;  %v6626_v4 = vpop.f32.mrb[115].mxu0 }
0x2fd6   :  { %v6777_v33 = vpack.c.bf16 %v6626_v4, %v6623_v38 }
0x2fd8   :  { %6964 = vmatprep.mubr.bf16.mxu0 %v6777_v33 }
0x2fda   :  { %v12049_v1 = vpop.f32.mrb[116].mxu0 }
0x2fdb   :  { %v6672_v14 = vpop.f32.mrb[117].mxu0 }
0x2fdc   :  { %v12050_v57 = vpop.f32.mrb[118].mxu0 }
0x2fdd   :  { %v6779_v28 = vpack.c.bf16 %v12050_v57, %v12049_v1  ;;  %v6675_v3 = vpop.f32.mrb[119].mxu0  ;;  %v12788_v57 = vld [vmem:[%s13345_s3 + $0x138] sm:$0xff]  }
0x2fde   :  { %v6776_v8 = vpack.c.bf16 %v6675_v3, %v6672_v14  ;;  %v12787_v14 = vld [vmem:[%s13345_s3 + $0x130] sm:$0xff]  }
0x2fdf   :  { %12103 = vmatprep.subr.bf16.mxu1 %v12787_v14 }
0x2fe0   :  { %6965 = vmatmul.mubr.bf16.vlgmr.msra.gmra.mrb[120].mxu0 %v6776_v8  ;;  %12104 = vmatpush3.bf16.msra.mxu1 %v12787_v14 }
0x2fe1   :  { %6972 = vmatprep.mubr.bf16.mxu0 %v6780_v35  ;;  %12072 = vmatpush3.bf16.msra.mxu0 %v12773_v44 }
0x2fe2   :  { %12073 = vmatprep.subr.bf16.mxu0 %v12774_v32  ;;  %12105 = vmatprep.subr.bf16.mxu1 %v12788_v57 }
0x2fe4   :  { %12106 = vmatpush3.bf16.msra.mxu1 %v12788_v57 }
0x2fe5   :  { %12074 = vmatpush3.bf16.msra.mxu0 %v12774_v32  ;;  %12119 = vmatprep.subr.bf16.mxu1 %v13012_v0 }
0x2fe6   :  { %12075 = vmatprep.subr.bf16.mxu0 %v12775_v40 }
0x2fe8   :  { %6973 = vmatmul.mubr.bf16.gmra.mrb[124].mxu0 %v6779_v28 }
0x2fe9   :  { %12076 = vmatpush3.bf16.msra.mxu0 %v12775_v40 }
0x2fea   :  { %12077 = vmatprep.subr.bf16.mxu0 %v12776_v43 }
0x2fed   :  { %12078 = vmatpush3.bf16.msra.mxu0 %v12776_v43 }
0x2fee   :  { %12079 = vmatprep.subr.bf16.mxu0 %v12777_v52 }
0x2ff1   :  { %12080 = vmatpush3.bf16.msra.mxu0 %v12777_v52 }
0x2ff2   :  { %12081 = vmatprep.subr.bf16.mxu0 %v12778_v56 }
0x2ff5   :  { %12082 = vmatpush3.bf16.msra.mxu0 %v12778_v56 }
0x2ff6   :  { %12083 = vmatprep.subr.bf16.mxu0 %v12779_v50 }
0x2ff9   :  { %12084 = vmatpush3.bf16.msra.mxu0 %v12779_v50 }
0x2ffa   :  { %12085 = vmatprep.subr.bf16.mxu0 %v12780_v53 }
0x2ffd   :  { %12086 = vmatpush3.bf16.msra.mxu0 %v12780_v53 }
0x2ffe   :  { %12111 = vmatprep.subr.bf16.mxu0 %v13012_v0 }
0x30b3   :  { %v11156_v16 = vpop.f32.mrb[120].mxu0 }
0x30b4   :  { %v11157_v36 = vpop.f32.mrb[121].mxu0 }
0x30b5   :  { %v11158_v37 = vadd.f32 %v11157_v36, %v11156_v16  ;;  %v11159_v30 = vpop.f32.mrb[122].mxu0 }
0x30b6   :  { %v11160_v55 = vpop.f32.mrb[123].mxu0 }
0x30b7   :  { %v6967_v59 = vadd.f32 %v11158_v37, %v10228_v7  ;;  %v11161_v58 = vadd.f32 %v11160_v55, %v11159_v30 }
0x30b9   :  { %v7016_v6 = vadd.f32 %v14232_v34, %v6967_v59  ;;  %v6970_v46 = vadd.f32 %v11161_v58, %v10228_v7 }
0x30bb   :  { %v7019_v19 = vadd.f32 %v14236_v39, %v6970_v46  ;;  %v11162_v31 = vpop.f32.mrb[124].mxu0  ;;  %v7030_v25 = vmax.f32 %v7016_v6, 0.0 }
0x30bc   :  { %v11163_v24 = vpop.f32.mrb[125].mxu0 }
0x30bd   :  { %v7031_v15 = vmax.f32 %v7019_v19, 0.0  ;;  %v11164_v26 = vadd.f32 %v11163_v24, %v11162_v31  ;;  %v11165_v27 = vpop.f32.mrb[126].mxu0 }
0x30be   :  { %v11166_v44 = vpop.f32.mrb[127].mxu0 }
0x30bf   :  { %v6975_v29 = vadd.f32 %v11164_v26, %v10228_v7  ;;  %v11167_v38 = vadd.f32 %v11166_v44, %v11165_v27  ;;  %v7034_v21 = vpack.c.bf16 %v7031_v15, %v7030_v25 }
0x30c1   :  { %v7024_v35 = vadd.f32 %v14230_v45, %v6975_v29  ;;  %v6978_v4 = vadd.f32 %v11167_v38, %v10228_v7  ;;  %12087 = vmatprep.mubr.bf16.mxu0 %v7034_v21  ;;  %v10253_v45 = vld [vmem:[%s13366_s12 + $0x4] ss:$0 sm:$0xff] }
0x30c3   :  { %v7027_v34 = vadd.f32 %v14234_v51, %v6978_v4  ;;  %v7032_v39 = vmax.f32 %v7024_v35, 0.0 }
0x30c5   :  { %v7033_v33 = vmax.f32 %v7027_v34, 0.0 }
0x30c7   :  { %v7035_v1 = vpack.c.bf16 %v7033_v33, %v7032_v39 }
0x30c9   :  { %12088 = vmatmul.mubr.bf16.vlgmr.msra.gmra.mrb[128].mxu0 %v7035_v1 }
0x30ca   :  { %12115 = vmatprep.mubr.msk.bf16.mxu0 %vm13014_vm0, %v13012_v0 }
0x319c   :  { %v12089_v28 = vpop.f32.mrb[128].mxu0 }
0x319d   :  { %v7133_v3 = vadd.f32 %v12089_v28, %v10253_v45  ;;  %v7124_v51 = vpop.f32.mrb[129].mxu0 }
0x319e   :  { %v7125_v8 = vadd.f32 %v10253_v45, %v7124_v51  ;;  %v12090_v32 = vpop.f32.mrb[130].mxu0 }
0x319f   :  { %v7136_v40 = vadd.f32 %v12090_v32, %v10253_v45  ;;  %v7127_v43 = vpop.f32.mrb[131].mxu0  ;;  %v7141_v56 = vmax.f32 %v7133_v3, 0.0 }
0x31a0   :  { %v7128_v52 = vadd.f32 %v10253_v45, %v7127_v43  ;;  %v7139_v53 = vmax.f32 %v7125_v8, 0.0 }
0x31a1   :  { %v7142_v50 = vmax.f32 %v7136_v40, 0.0  ;;  %v10273_v40 = vld [vmem:[%s13418_s28 + $0x4] ss:$0 sm:$0xff] }
0x31a2   :  { %v7140_v63 = vmax.f32 %v7128_v52, 0.0 }
0x31a3   :  { %v7144_v41 = vpack.c.bf16 %v7142_v50, %v7141_v56  ;;  %v10274_v56 = vld [vmem:[%s13423_s4 + $0x4] ss:$0 sm:$0xff] }
0x31a4   :  { %v7143_v11 = vpack.c.bf16 %v7140_v63, %v7139_v53 }
0x31a6   :  { %12107 = vmatprep.mubr.bf16.mxu1 %v7143_v11 }
0x31a7   :  { %12108 = vmatmul.mubr.bf16.vlgmr.msra.gmra.mrb[116].mxu1 %v7144_v41 }
0x31a8   :  { %12135 = vmatprep.mubr.msk.bf16.mxu1 %vm13014_vm0, %v13012_v0 }
0x327a   :  { %v12109_v5 = vpop.f32.mrb[116].mxu1 }
0x327b   :  { %v7233_v42 = vpop.f32.mrb[117].mxu1  ;;  %v7242_v30 = vadd.f32 %v12109_v5, %v10262_v54 }
0x327c   :  { %v7234_v16 = vadd.f32 %v10262_v54, %v7233_v42  ;;  %v12110_v7 = vpop.f32.mrb[118].mxu1 }
0x327d   :  { %v7236_v36 = vpop.f32.mrb[119].mxu1  ;;  %v7245_v55 = vadd.f32 %v12110_v7, %v10262_v54 }
0x327e   :  { %v7237_v37 = vadd.f32 %v10262_v54, %v7236_v36  ;;  %7252 = vadd.xlane.f32.xlu0 %v7234_v16 }
0x3280   :  { %7254 = vadd.xlane.f32.xlu1 %v7237_v37 }
0x3282   :  { %7256 = vadd.xlane.f32.xlu0 %v7242_v30 }
0x3284   :  { %7258 = vadd.xlane.f32.xlu1 %v7245_v55 }
0x330b   :  { %v7253_v59 = vpop.xlane.xlu0 %7252 }
0x330c   :  { %v7260_v58 = vmul.f32 0.0078125, %v7253_v59 }
0x330d   :  { %v7255_v6 = vpop.xlane.xlu1 %7254 }
0x330e   :  { %v7264_v46 = vsub.f32 %v7234_v16, %v7260_v58  ;;  %v7261_v19 = vmul.f32 0.0078125, %v7255_v6 }
0x330f   :  { %v7257_v31 = vpop.xlane.xlu0 %7256 }
0x3310   :  { %v7265_v24 = vsub.f32 %v7237_v37, %v7261_v19  ;;  %v7262_v25 = vmul.f32 0.0078125, %v7257_v31  ;;  %v7268_v15 = vmul.f32 %v7264_v46, %v7264_v46 }
0x3311   :  { %v7259_v26 = vpop.xlane.xlu1 %7258 }
0x3312   :  { %v7266_v27 = vsub.f32 %v7242_v30, %v7262_v25  ;;  %v7263_v44 = vmul.f32 0.0078125, %v7259_v26  ;;  %7272 = vadd.xlane.f32.xlu0 %v7268_v15  ;;  %v7269_v29 = vmul.f32 %v7265_v24, %v7265_v24  ;;  %v12789_v25 = vld [vmem:[%s13397_s24 + $0x240] sm:$0xff]  }
0x3314   :  { %v7267_v38 = vsub.f32 %v7245_v55, %v7263_v44  ;;  %7274 = vadd.xlane.f32.xlu1 %v7269_v29  ;;  %v7270_v21 = vmul.f32 %v7266_v27, %v7266_v27  ;;  %v12793_v44 = vld [vmem:[%s13397_s24 + $0x250] sm:$0xff]  }
0x3315   :  { %v12794_v29 = vld [vmem:[%s13397_s24 + $0x210] sm:$0xff]  }
0x3316   :  { %7276 = vadd.xlane.f32.xlu0 %v7270_v21  ;;  %v7271_v35 = vmul.f32 %v7267_v38, %v7267_v38  ;;  %v12796_v21 = vld [vmem:[%s13397_s24 + $0x218] sm:$0xff]  }
0x3318   :  { %7278 = vadd.xlane.f32.xlu1 %v7271_v35  ;;  %v12797_v35 = vld [vmem:[%s13397_s24 + $0x260] sm:$0xff]  }
0x339f   :  { %v7273_v4 = vpop.xlane.xlu0 %7272 }
0x33a0   :  { %v7280_v34 = vmul.f32 0.0078125, %v7273_v4  ;;  %v12798_v4 = vld [vmem:[%s13397_s24 + $0x220] sm:$0xff]  }
0x33a1   :  { %v7275_v39 = vpop.xlane.xlu1 %7274 }
0x33a2   :  { %v7284_v33 = vadd.f32 1e-05, %v7280_v34  ;;  %v7281_v1 = vmul.f32 0.0078125, %v7275_v39  ;;  %v12799_v34 = vld [vmem:[%s13397_s24 + $0x268] sm:$0xff]  }
0x33a3   :  { %v7277_v14 = vpop.xlane.xlu0 %7276  ;;  %v12800_v39 = vld [vmem:[%s13397_s24 + $0x228] sm:$0xff]  }
0x33a4   :  { %12961 = vrsqrt.f32 %v7284_v33  ;;  %v7285_v57 = vadd.f32 1e-05, %v7281_v1  ;;  %v7282_v45 = vmul.f32 0.0078125, %v7277_v14  ;;  %v12801_v33 = vld [vmem:[%s13397_s24 + $0x270] sm:$0xff]   ;;  %v12803_v14 = vld [vmem:[%s13397_s24 + $0x278] sm:$0xff]  }
0x33a5   :  { %v7279_v28 = vpop.xlane.xlu1 %7278  ;;  %v12802_v1 = vld [vmem:[%s13397_s24 + $0x230] sm:$0xff]  }
0x33a6   :  { %12963 = vrsqrt.f32 %v7285_v57  ;;  %v7286_v3 = vadd.f32 1e-05, %v7282_v45  ;;  %v7283_v51 = vmul.f32 0.0078125, %v7279_v28  ;;  %v12804_v57 = vld [vmem:[%s13397_s24 + $0x238] sm:$0xff]   ;;  %v12805_v45 = vld [vmem:[%s13473_s15 + $0x100] sm:$0xff]   ;;  %v12806_v28 = vld [vmem:[%s13473_s15 + $0x108] sm:$0xff]  }
0x33a7   :  { %12120 = vmatpush3.bf16.msra.mxu1 %v12805_v45  ;;  %v12825_v45 = vld [vmem:[%s13224_s9 + $0x460] sm:$0xff]  }
0x33a8   :  { %12965 = vrsqrt.f32 %v7286_v3  ;;  %v7287_v8 = vadd.f32 1e-05, %v7283_v51  ;;  %12121 = vmatprep.subr.bf16.mxu1 %v13012_v0  ;;  %v12807_v3 = vld [vmem:[%s13473_s15 + $0x110] sm:$0xff]   ;;  %v12808_v51 = vld [vmem:[%s13473_s15 + $0x118] sm:$0xff]  }
0x33aa   :  { %12967 = vrsqrt.f32 %v7287_v8  ;;  %v12809_v8 = vld [vmem:[%s13473_s15 + $0x120] sm:$0xff]  }
0x33ab   :  { %12122 = vmatpush3.bf16.msra.mxu1 %v12806_v28  ;;  %v12826_v28 = vld [vmem:[%s13224_s9 + $0x468] sm:$0xff]  }
0x33ac   :  { %12123 = vmatprep.subr.bf16.mxu1 %v13012_v0 }
0x33ae   :  { %v12962_v32 = vpop.eup %12961 }
0x33af   :  { %v7292_v43 = vmul.f32 %v12962_v32, %v7264_v46  ;;  %12124 = vmatpush3.bf16.msra.mxu1 %v12807_v3  ;;  %v12827_v3 = vld [vmem:[%s13224_s9 + $0x470] sm:$0xff]  }
0x33b0   :  { %v12964_v52 = vpop.eup %12963  ;;  %12125 = vmatprep.subr.bf16.mxu1 %v13012_v0 }
0x33b1   :  { %v7293_v50 = vmul.f32 %v12964_v52, %v7265_v24  ;;  %v7302_v53 = vmul.f32 %v10273_v40, %v7292_v43 }
0x33b2   :  { %v12966_v63 = vpop.eup %12965 }
0x33b3   :  { %v7294_v41 = vmul.f32 %v12966_v63, %v7266_v27  ;;  %v7303_v11 = vmul.f32 %v10273_v40, %v7293_v50  ;;  %v7312_v54 = vadd.f32 %v10274_v56, %v7302_v53  ;;  %v12790_v27 = vld [vmem:[%s13397_s24 + $0x200] sm:$0xff]   ;;  %12126 = vmatpush3.bf16.msra.mxu1 %v12808_v51  ;;  %v12810_v50 = vld [vmem:[%s13473_s15 + $0x128] sm:$0xff]   ;;  %v12811_v53 = vld [vmem:[%s13473_s15 + $0x130] sm:$0xff]  }
0x33b4   :  { %v12968_v5 = vpop.eup %12967  ;;  %12127 = vmatprep.subr.bf16.mxu1 %v13012_v0  ;;  %v12812_v63 = vld [vmem:[%s13473_s15 + $0x138] sm:$0xff]  }
0x33b5   :  { %v7295_v42 = vmul.f32 %v12968_v5, %v7267_v38  ;;  %v7313_v16 = vadd.f32 %v10274_v56, %v7303_v11  ;;  %v7304_v7 = vmul.f32 %v10273_v40, %v7294_v41  ;;  %v7316_v36 = vmul.f32 %v7312_v54, %v13434_v49  ;;  %v12795_v38 = vld [vmem:[%s13397_s24 + $0x258] sm:$0xff]   ;;  %v12813_v41 = vld [vmem:[%s13496_s20 + $0x100] sm:$0xff]   ;;  %v12814_v11 = vld [vmem:[%s13496_s20 + $0x108] sm:$0xff]  }
0x33b6   :  { %v14309_v37 = vadd.f32 %v7312_v54, %v14208_v9  ;;  %v12816_v54 = vld [vmem:[%s13496_s20 + $0x118] sm:$0xff]   ;;  %v12817_v5 = vld [vmem:[%s13496_s20 + $0x120] sm:$0xff]  }
0x33b7   :  { %v7317_v30 = vmul.f32 %v7313_v16, %v13413_v18  ;;  %v7305_v55 = vmul.f32 %v10273_v40, %v7295_v42  ;;  %v7314_v59 = vadd.f32 %v10274_v56, %v7304_v7  ;;  %v14313_v58 = vadd.f32 %v7313_v16, %v14204_v22  ;;  %12128 = vmatpush3.bf16.msra.mxu1 %v12809_v8  ;;  %v12818_v42 = vld [vmem:[%s13496_s20 + $0x128] sm:$0xff]   ;;  %v10343_v7 = vld [vmem:[%s13513_s25 + $0x4] ss:$0 sm:$0xff] }
0x33b8   :  { %12129 = vmatprep.subr.bf16.mxu1 %v13012_v0 }
0x33b9   :  { %v7320_v6 = vpack.c.bf16 %v7317_v30, %v7316_v36  ;;  %v7315_v46 = vadd.f32 %v10274_v56, %v7305_v55  ;;  %v8014_v19 = vpack.c.bf16 %v14313_v58, %v14309_v37  ;;  %v7318_v31 = vmul.f32 %v7314_v59, %v13453_v2  ;;  %v12828_v37 = vld [vmem:[%s13224_s9 + $0x478] sm:$0xff]   ;;  %v10369_v58 = vld [vmem:[%s13558_s8 + $0x4] ss:$0 sm:$0xff] }
0x33ba   :  { %v14320_v24 = vadd.f32 %v7314_v59, %v14225_v23  ;;  %v12791_v23 = vld [vmem:[%s13397_s24 + $0x248] sm:$0xff]  }
0x33bb   :  { %12112 = vmatpush3.bf16.msra.mxu0 %v7320_v6  ;;  %v7319_v9 = vmul.f32 %v7315_v46, %v13449_v60  ;;  %v14323_v22 = vadd.f32 %v7315_v46, %v14221_v20  ;;  %v12792_v20 = vld [vmem:[%s13397_s24 + $0x208] sm:$0xff]   ;;  %12130 = vmatpush3.bf16.msra.mxu1 %v12810_v50 }
0x33bc   :  { %12113 = vmatprep.subr.bf16.mxu0 %v13012_v0  ;;  %12131 = vmatprep.subr.bf16.mxu1 %v13012_v0 }
0x33bd   :  { %v7321_v15 = vpack.c.bf16 %v7319_v9, %v7318_v31  ;;  %v8017_v26 = vpack.c.bf16 %v14323_v22, %v14320_v24 }
0x33bf   :  { %12114 = vmatpush3.bf16.msra.mxu0 %v7321_v15  ;;  %12132 = vmatpush3.bf16.msra.mxu1 %v12811_v53 }
0x33c0   :  { %11201 = vmatprep.subr.bf16.mxu0 %v12789_v25  ;;  %12133 = vmatprep.subr.bf16.mxu1 %v13012_v0 }
0x33c2   :  { %12116 = vmatmul.mubr.msk.bf16.vlgmr.msra.gmra.mrb[132].mxu0 %vm1777_vm2, %v13460_v12 }
0x33c3   :  { %11202 = vmatpush3.bf16.msra.mxu0 %v12790_v27  ;;  %12134 = vmatpush3.bf16.msra.mxu1 %v12812_v63  ;;  %v12819_v27 = vld [vmem:[%s13496_s20 + $0x130] sm:$0xff]  }
0x33c4   :  { %11203 = vmatprep.subr.bf16.mxu0 %v12791_v23  ;;  %v12820_v23 = vld [vmem:[%s13496_s20 + $0x138] sm:$0xff]  }
0x33c7   :  { %11204 = vmatpush3.bf16.msra.mxu0 %v12792_v20  ;;  %v12821_v20 = vld [vmem:[%s13224_s9 + $0x440] sm:$0xff]  }
0x33c8   :  { %11205 = vmatprep.subr.bf16.mxu0 %v12793_v44  ;;  %v10360_v44 = vld [vmem:[%s13525_s1 + $0x4] ss:$0 sm:$0xff] }
0x33cb   :  { %11206 = vmatpush3.bf16.msra.mxu0 %v12794_v29 }
0x33cc   :  { %11207 = vmatprep.subr.bf16.mxu0 %v12795_v38 }
0x33cf   :  { %11208 = vmatpush3.bf16.msra.mxu0 %v12796_v21 }
0x33d0   :  { %11209 = vmatprep.subr.bf16.mxu0 %v12797_v35 }
0x33d3   :  { %11210 = vmatpush3.bf16.msra.mxu0 %v12798_v4 }
0x33d4   :  { %11211 = vmatprep.subr.bf16.mxu0 %v12799_v34 }
0x33d7   :  { %11212 = vmatpush3.bf16.msra.mxu0 %v12800_v39 }
0x33d8   :  { %11213 = vmatprep.subr.bf16.mxu0 %v12801_v33 }
0x33db   :  { %11214 = vmatpush3.bf16.msra.mxu0 %v12802_v1  ;;  %v12822_v1 = vld [vmem:[%s13224_s9 + $0x448] sm:$0xff]  }
0x33dc   :  { %11215 = vmatprep.subr.bf16.mxu0 %v12803_v14  ;;  %v12823_v14 = vld [vmem:[%s13224_s9 + $0x450] sm:$0xff]  }
0x33df   :  { %11216 = vmatpush3.bf16.msra.mxu0 %v12804_v57  ;;  %v12824_v57 = vld [vmem:[%s13224_s9 + $0x458] sm:$0xff]  }
0x33e0   :  { %12139 = vmatprep.subr.bf16.mxu0 %v13012_v0 }
0x3495   :  { %v7356_v32 = vpop.f32.mrb[132].mxu0 }
0x3496   :  { %v12117_v40 = vpop.f32.mrb[133].mxu0 }
0x3497   :  { %v7359_v43 = vpop.f32.mrb[134].mxu0 }
0x3498   :  { %v7436_v52 = vpack.c.bf16 %v7359_v43, %v7356_v32  ;;  %v12118_v56 = vpop.f32.mrb[135].mxu0 }
0x349a   :  { %7571 = vmatprep.mubr.bf16.mxu0 %v7436_v52 }
0x349b   :  { %7572 = vmatmul.mubr.bf16.vlgmr.msra.gmra.mrb[136].mxu0 %v14248_v13  ;;  %v12815_v13 = vld [vmem:[%s13496_s20 + $0x110] sm:$0xff]  }
0x349c   :  { %12155 = vmatprep.mubr.msk.bf16.mxu0 %vm13014_vm0, %v13012_v0  ;;  %12140 = vmatpush3.bf16.msra.mxu0 %v12813_v41 }
0x349d   :  { %12141 = vmatprep.subr.bf16.mxu0 %v13012_v0 }
0x34a0   :  { %12142 = vmatpush3.bf16.msra.mxu0 %v12814_v11 }
0x34a1   :  { %12143 = vmatprep.subr.bf16.mxu0 %v13012_v0 }
0x34a4   :  { %12144 = vmatpush3.bf16.msra.mxu0 %v12815_v13 }
0x34a5   :  { %12145 = vmatprep.subr.bf16.mxu0 %v13012_v0 }
0x34a8   :  { %12146 = vmatpush3.bf16.msra.mxu0 %v12816_v54 }
0x34a9   :  { %12147 = vmatprep.subr.bf16.mxu0 %v13012_v0 }
0x34ac   :  { %12148 = vmatpush3.bf16.msra.mxu0 %v12817_v5 }
0x34ad   :  { %12149 = vmatprep.subr.bf16.mxu0 %v13012_v0 }
0x34b0   :  { %12150 = vmatpush3.bf16.msra.mxu0 %v12818_v42 }
0x34b1   :  { %12151 = vmatprep.subr.bf16.mxu0 %v13012_v0 }
0x34b4   :  { %12152 = vmatpush3.bf16.msra.mxu0 %v12819_v27 }
0x34b5   :  { %12153 = vmatprep.subr.bf16.mxu0 %v13012_v0 }
0x34b8   :  { %12154 = vmatpush3.bf16.msra.mxu0 %v12820_v23 }
0x34b9   :  { %12171 = vmatprep.subr.bf16.mxu0 %v12821_v20 }
0x356e   :  { %v11217_v16 = vpop.f32.mrb[136].mxu0 }
0x356f   :  { %v11218_v36 = vpop.f32.mrb[137].mxu0 }
0x3570   :  { %v11219_v30 = vadd.f32 %v11218_v36, %v11217_v16  ;;  %v11220_v55 = vpop.f32.mrb[138].mxu0 }
0x3571   :  { %v11221_v59 = vpop.f32.mrb[139].mxu0 }
0x3572   :  { %v7574_v6 = vadd.f32 %v11219_v30, %v10343_v7  ;;  %v11222_v46 = vadd.f32 %v11221_v59, %v11220_v55  ;;  %v10380_v59 = vld [vmem:[%s13572_s14 + $0x4] ss:$0 sm:$0xff] }
0x3574   :  { %v7577_v31 = vadd.f32 %v11222_v46, %v10343_v7  ;;  %v7580_v9 = vmax.f32 %v7574_v6, 0.0 }
0x3576   :  { %v7581_v25 = vmax.f32 %v7577_v31, 0.0  ;;  %v10381_v31 = vld [vmem:[%s13577_s21 + $0x4] ss:$0 sm:$0xff] }
0x3578   :  { %v7582_v15 = vpack.c.bf16 %v7581_v25, %v7580_v9 }
0x357a   :  { %12136 = vmatmul.mubr.bf16.vlgmr.msra.gmra.mrb[120].mxu1 %v7582_v15 }
0x357b   :  { %12161 = vmatprep.mubr.msk.bf16.mxu1 %vm1019_vm8, %v13201_v10 }
0x364d   :  { %v7671_v29 = vpop.f32.mrb[120].mxu1 }
0x364e   :  { %v7672_v38 = vadd.f32 %v10360_v44, %v7671_v29  ;;  %v12137_v21 = vpop.f32.mrb[121].mxu1 }
0x364f   :  { %v7674_v35 = vpop.f32.mrb[122].mxu1  ;;  %v12832_v21 = vld [vmem:[%s13224_s9 + $0x3c8] sm:$0xff]  }
0x3650   :  { %v7675_v4 = vadd.f32 %v10360_v44, %v7674_v35  ;;  %v12138_v34 = vpop.f32.mrb[123].mxu1  ;;  %v7678_v10 = vmax.f32 %v7672_v38, 0.0  ;;  %v12829_v38 = vld [vmem:[%s13224_s9 + $0x400] sm:$0xff]   ;;  %v12834_v35 = vld [vmem:[%s13224_s9 + $0x3d0] sm:$0xff]  }
0x3651   :  { %v12837_v34 = vld [vmem:[%s13224_s9 + $0x420] sm:$0xff]  }
0x3652   :  { %v7679_v39 = vmax.f32 %v7675_v4, 0.0  ;;  %v12836_v4 = vld [vmem:[%s13224_s9 + $0x3d8] sm:$0xff]  }
0x3654   :  { %v7680_v33 = vpack.c.bf16 %v7679_v39, %v7678_v10  ;;  %v12839_v10 = vld [vmem:[%s13224_s9 + $0x428] sm:$0xff]  }
0x3655   :  { %v12840_v39 = vld [vmem:[%s13224_s9 + $0x3e8] sm:$0xff]  }
0x3656   :  { %12156 = vmatmul.mubr.bf16.vlgmr.msra.gmra.mrb[140].mxu0 %v7680_v33  ;;  %v12841_v33 = vld [vmem:[%s13224_s9 + $0x430] sm:$0xff]  }
0x3657   :  { %12172 = vmatpush3.bf16.msra.mxu0 %v12821_v20  ;;  %12187 = vmatprep.mubr.bf16.mxu0 %v8014_v19 }
0x3658   :  { %12173 = vmatprep.subr.bf16.mxu0 %v12822_v1 }
0x365b   :  { %12174 = vmatpush3.bf16.msra.mxu0 %v12822_v1  ;;  %v12842_v1 = vld [vmem:[%s13224_s9 + $0x3f0] sm:$0xff]  }
0x365c   :  { %12175 = vmatprep.subr.bf16.mxu0 %v12823_v14 }
0x365f   :  { %12176 = vmatpush3.bf16.msra.mxu0 %v12823_v14  ;;  %v12843_v14 = vld [vmem:[%s13224_s9 + $0x438] sm:$0xff]  }
0x3660   :  { %12177 = vmatprep.subr.bf16.mxu0 %v12824_v57 }
0x3663   :  { %12178 = vmatpush3.bf16.msra.mxu0 %v12824_v57  ;;  %v12844_v57 = vld [vmem:[%s13224_s9 + $0x3f8] sm:$0xff]  }
0x3664   :  { %12179 = vmatprep.subr.bf16.mxu0 %v12825_v45 }
0x3667   :  { %12180 = vmatpush3.bf16.msra.mxu0 %v12825_v45  ;;  %v12845_v45 = vld [vmem:[%s13331_s29 + $0x140] sm:$0xff]  }
0x3668   :  { %12181 = vmatprep.subr.bf16.mxu0 %v12826_v28 }
0x366b   :  { %12182 = vmatpush3.bf16.msra.mxu0 %v12826_v28 }
0x366c   :  { %12183 = vmatprep.subr.bf16.mxu0 %v12827_v3 }
0x366f   :  { %12184 = vmatpush3.bf16.msra.mxu0 %v12827_v3 }
0x3670   :  { %12185 = vmatprep.subr.bf16.mxu0 %v12828_v37 }
0x3673   :  { %12186 = vmatpush3.bf16.msra.mxu0 %v12828_v37 }
0x3676   :  { %12188 = vmatmul.mubr.bf16.vlgmr.msra.gmra.mrb[144].mxu0 %v8017_v26 }
0x3729   :  { %v7769_v19 = vpop.f32.mrb[140].mxu0 }
0x372a   :  { %v7770_v51 = vadd.f32 %v10369_v58, %v7769_v19  ;;  %v12157_v8 = vpop.f32.mrb[141].mxu0 }
0x372b   :  { %v7772_v32 = vpop.f32.mrb[142].mxu0 }
0x372c   :  { %v7773_v40 = vadd.f32 %v10369_v58, %v7772_v32  ;;  %7780 = vadd.xlane.f32.xlu0 %v7770_v51  ;;  %v12158_v43 = vpop.f32.mrb[143].mxu0 }
0x372e   :  { %7782 = vadd.xlane.f32.xlu1 %v7773_v40 }
0x3749   :  { %v14399_v52 = vpop.f32.mrb[144].mxu0 }
0x374a   :  { %v14401_v56 = vpop.f32.mrb[145].mxu0 }
0x374b   :  { %v14403_v50 = vpop.f32.mrb[146].mxu0 }
0x374c   :  { %v14405_v53 = vpop.f32.mrb[147].mxu0 }
0x37b9   :  { %v7781_v63 = vpop.xlane.xlu0 %7780 }
0x37ba   :  { %v7784_v24 = vmul.f32 0.0078125, %v7781_v63 }
0x37bb   :  { %v7783_v22 = vpop.xlane.xlu1 %7782 }
0x37bc   :  { %v7786_v26 = vsub.f32 %v7770_v51, %v7784_v24  ;;  %v7785_v41 = vmul.f32 0.0078125, %v7783_v22  ;;  %v12846_v22 = vld [vmem:[%s13331_s29 + $0x148] sm:$0xff]  }
0x37be   :  { %v7787_v11 = vsub.f32 %v7773_v40, %v7785_v41  ;;  %v7788_v13 = vmul.f32 %v7786_v26, %v7786_v26  ;;  %v12848_v41 = vld [vmem:[%s13331_s29 + $0x158] sm:$0xff]  }
0x37c0   :  { %7790 = vadd.xlane.f32.xlu0 %v7788_v13  ;;  %v7789_v54 = vmul.f32 %v7787_v11, %v7787_v11  ;;  %v12850_v13 = vld [vmem:[%s13331_s29 + $0x168] sm:$0xff]  }
0x37c2   :  { %7792 = vadd.xlane.f32.xlu1 %v7789_v54  ;;  %v12851_v54 = vld [vmem:[%s13331_s29 + $0x170] sm:$0xff]  }
0x384d   :  { %v7791_v5 = vpop.xlane.xlu0 %7790 }
0x384e   :  { %v7794_v42 = vmul.f32 0.0078125, %v7791_v5  ;;  %v12852_v5 = vld [vmem:[%s13331_s29 + $0x178] sm:$0xff]  }
0x384f   :  { %v7793_v16 = vpop.xlane.xlu1 %7792 }
0x3850   :  { %v7796_v7 = vadd.f32 1e-05, %v7794_v42  ;;  %v7795_v36 = vmul.f32 0.0078125, %v7793_v16  ;;  %v12853_v42 = vld [vmem:[%s13345_s3 + $0x140] sm:$0xff]   ;;  %v12854_v16 = vld [vmem:[%s13345_s3 + $0x148] sm:$0xff]  }
0x3851   :  { %12211 = vmatprep.subr.bf16.mxu0 %v12853_v42 }
0x3852   :  { %12969 = vrsqrt.f32 %v7796_v7  ;;  %v7797_v30 = vadd.f32 1e-05, %v7795_v36  ;;  %12212 = vmatpush3.bf16.msra.mxu0 %v12853_v42  ;;  %v12855_v7 = vld [vmem:[%s13345_s3 + $0x150] sm:$0xff]   ;;  %v12856_v36 = vld [vmem:[%s13345_s3 + $0x158] sm:$0xff]  }
0x3853   :  { %12213 = vmatprep.subr.bf16.mxu0 %v12854_v16 }
0x3854   :  { %12971 = vrsqrt.f32 %v7797_v30  ;;  %v12857_v30 = vld [vmem:[%s13345_s3 + $0x160] sm:$0xff]  }
0x3856   :  { %12214 = vmatpush3.bf16.msra.mxu0 %v12854_v16 }
0x3857   :  { %12215 = vmatprep.subr.bf16.mxu0 %v12855_v7 }
0x385a   :  { %12216 = vmatpush3.bf16.msra.mxu0 %v12855_v7 }
0x385b   :  { %12217 = vmatprep.subr.bf16.mxu0 %v12856_v36 }
0x385c   :  { %v12970_v55 = vpop.eup %12969 }
0x385d   :  { %v7800_v6 = vmul.f32 %v12970_v55, %v7786_v26  ;;  %v12847_v26 = vld [vmem:[%s13331_s29 + $0x150] sm:$0xff]   ;;  %v12858_v55 = vld [vmem:[%s13345_s3 + $0x168] sm:$0xff]  }
0x385e   :  { %v12972_v46 = vpop.eup %12971  ;;  %12218 = vmatpush3.bf16.msra.mxu0 %v12856_v36 }
0x385f   :  { %v7808_v9 = vmul.f32 %v10380_v59, %v7800_v6  ;;  %v7801_v25 = vmul.f32 %v12972_v46, %v7787_v11  ;;  %v12849_v11 = vld [vmem:[%s13331_s29 + $0x160] sm:$0xff]   ;;  %12219 = vmatprep.subr.bf16.mxu0 %v12857_v30 }
0x3860   :  { %v10469_v6 = vld [vmem:[%s13356_s7 + $0x5] ss:$0 sm:$0xff] }
0x3861   :  { %v7809_v15 = vmul.f32 %v10380_v59, %v7801_v25  ;;  %v7816_v27 = vadd.f32 %v10381_v31, %v7808_v9 }
0x3862   :  { %12220 = vmatpush3.bf16.msra.mxu0 %v12857_v30 }
0x3863   :  { %v7817_v23 = vadd.f32 %v10381_v31, %v7809_v15  ;;  %v14410_v20 = vadd.f32 %v7816_v27, %v14241_v17  ;;  %v12830_v17 = vld [vmem:[%s13224_s9 + $0x3c0] sm:$0xff]   ;;  %12221 = vmatprep.subr.bf16.mxu0 %v12858_v55 }
0x3865   :  { %v14413_v44 = vadd.f32 %v7817_v23, %v14244_v62  ;;  %v12831_v62 = vld [vmem:[%s13224_s9 + $0x408] sm:$0xff]  }
0x3866   :  { %12222 = vmatpush3.bf16.msra.mxu0 %v12858_v55 }
0x3867   :  { %v14417_v29 = vpack.c.bf16 %v14413_v44, %v14410_v20 }
0x3869   :  { %12159 = vmatprep.subr.bf16.mxu1 %v14417_v29 }
0x386a   :  { %12160 = vmatpush3.bf16.msra.mxu1 %v14417_v29 }
0x386b   :  { %12165 = vmatprep.subr.bf16.mxu1 %v14417_v29 }
0x386d   :  { %12162 = vmatmul.mubr.msk.bf16.vlgmr.msra.gmra.mrb[124].mxu1 %vm1019_vm8, %v13257_v47  ;;  %v12833_v47 = vld [vmem:[%s13224_s9 + $0x410] sm:$0xff]  }
0x386e   :  { %12166 = vmatpush3.bf16.msra.mxu1 %v14417_v29  ;;  %12167 = vmatprep.mubr.msk.bf16.mxu1 %vm1019_vm8, %v13193_v61  ;;  %v12835_v61 = vld [vmem:[%s13224_s9 + $0x418] sm:$0xff]  }
0x386f   :  { %11247 = vmatprep.subr.bf16.mxu1 %v12829_v38 }
0x3875   :  { %12168 = vmatmul.mubr.msk.bf16.vlgmr.msra.gmra.mrb[128].mxu1 %vm1019_vm8, %v13259_v48  ;;  %v12838_v48 = vld [vmem:[%s13224_s9 + $0x3e0] sm:$0xff]   ;;  %s13065_s9 = smov 50  }
0x3876   :  { %11248 = vmatpush3.bf16.msra.mxu1 %v12830_v17  ;;  %s9241_s7 = sld [smem:[%s14602_s0 + %s13065_s9]]  }
0x3877   :  { %11249 = vmatprep.subr.bf16.mxu1 %v12831_v62 }
0x387a   :  { %11250 = vmatpush3.bf16.msra.mxu1 %v12832_v21 }
0x387b   :  { %11251 = vmatprep.subr.bf16.mxu1 %v12833_v47 }
0x387e   :  { %11252 = vmatpush3.bf16.msra.mxu1 %v12834_v35 }
0x387f   :  { %11253 = vmatprep.subr.bf16.mxu1 %v12835_v61 }
0x3882   :  { %11254 = vmatpush3.bf16.msra.mxu1 %v12836_v4 }
0x3883   :  { %11255 = vmatprep.subr.bf16.mxu1 %v12837_v34 }
0x3886   :  { %11256 = vmatpush3.bf16.msra.mxu1 %v12838_v48 }
0x3887   :  { %11257 = vmatprep.subr.bf16.mxu1 %v12839_v10 }
0x388a   :  { %11258 = vmatpush3.bf16.msra.mxu1 %v12840_v39 }
0x388b   :  { %11259 = vmatprep.subr.bf16.mxu1 %v12841_v33 }
0x388e   :  { %11260 = vmatpush3.bf16.msra.mxu1 %v12842_v1 }
0x388f   :  { %11261 = vmatprep.subr.bf16.mxu1 %v12843_v14 }
0x3892   :  { %11262 = vmatpush3.bf16.msra.mxu1 %v12844_v57 }
0x3893   :  { %12191 = vmatprep.subr.bf16.mxu1 %v12845_v45 }
0x3940   :  { %v12163_v28 = vpop.f32.mrb[124].mxu1 }
0x3941   :  { %v7859_v3 = vpop.f32.mrb[125].mxu1 }
0x3942   :  { %v12164_v37 = vpop.f32.mrb[126].mxu1 }
0x3943   :  { %v8016_v58 = vpack.c.bf16 %v12164_v37, %v12163_v28  ;;  %v7862_v19 = vpop.f32.mrb[127].mxu1  ;;  %v12860_v28 = vld [vmem:[%s13345_s3 + $0x178] sm:$0xff]  }
0x3944   :  { %v8013_v51 = vpack.c.bf16 %v7862_v19, %v7859_v3 }
0x3946   :  { %8200 = vmatprep.mubr.bf16.mxu1 %v8013_v51 }
0x3948   :  { %v12169_v8 = vpop.f32.mrb[128].mxu1 }
0x3949   :  { %v7908_v32 = vpop.f32.mrb[129].mxu1 }
0x394a   :  { %v12170_v40 = vpop.f32.mrb[130].mxu1 }
0x394b   :  { %v8015_v43 = vpack.c.bf16 %v12170_v40, %v12169_v8  ;;  %v7911_v63 = vpop.f32.mrb[131].mxu1 }
0x394c   :  { %v8012_v24 = vpack.c.bf16 %v7911_v63, %v7908_v32 }
0x394e   :  { %8201 = vmatmul.mubr.bf16.vlgmr.msra.gmra.mrb[132].mxu1 %v8012_v24 }
0x394f   :  { %8208 = vmatprep.mubr.bf16.mxu1 %v8016_v58  ;;  %12192 = vmatpush3.bf16.msra.mxu1 %v12845_v45  ;;  %v12859_v45 = vld [vmem:[%s13345_s3 + $0x170] sm:$0xff]  }
0x3950   :  { %12193 = vmatprep.subr.bf16.mxu1 %v12846_v22  ;;  %12223 = vmatprep.subr.bf16.mxu0 %v12859_v45 }
0x3951   :  { %12224 = vmatpush3.bf16.msra.mxu0 %v12859_v45  ;;  %v10514_v45 = vld [vmem:[%s13418_s28 + $0x5] ss:$0 sm:$0xff] }
0x3952   :  { %12225 = vmatprep.subr.bf16.mxu0 %v12860_v28 }
0x3953   :  { %12194 = vmatpush3.bf16.msra.mxu1 %v12846_v22 }
0x3954   :  { %12195 = vmatprep.subr.bf16.mxu1 %v12847_v26 }
0x3955   :  { %12226 = vmatpush3.bf16.msra.mxu0 %v12860_v28 }
0x3956   :  { %8209 = vmatmul.mubr.bf16.gmra.mrb[136].mxu1 %v8015_v43  ;;  %12239 = vmatprep.subr.bf16.mxu0 %v13012_v0 }
0x3957   :  { %12196 = vmatpush3.bf16.msra.mxu1 %v12847_v26 }
0x3958   :  { %12197 = vmatprep.subr.bf16.mxu1 %v12848_v41 }
0x395b   :  { %12198 = vmatpush3.bf16.msra.mxu1 %v12848_v41  ;;  %v10503_v41 = vld [vmem:[%s13372_s16 + $0x5] ss:$0 sm:$0xff] }
0x395c   :  { %12199 = vmatprep.subr.bf16.mxu1 %v12849_v11 }
0x395f   :  { %12200 = vmatpush3.bf16.msra.mxu1 %v12849_v11 }
0x3960   :  { %12201 = vmatprep.subr.bf16.mxu1 %v12850_v13 }
0x3963   :  { %12202 = vmatpush3.bf16.msra.mxu1 %v12850_v13 }
0x3964   :  { %12203 = vmatprep.subr.bf16.mxu1 %v12851_v54 }
0x3967   :  { %12204 = vmatpush3.bf16.msra.mxu1 %v12851_v54 }
0x3968   :  { %12205 = vmatprep.subr.bf16.mxu1 %v12852_v5 }
0x396b   :  { %12206 = vmatpush3.bf16.msra.mxu1 %v12852_v5 }
0x396c   :  { %12231 = vmatprep.subr.bf16.mxu1 %v13012_v0 }
0x3a21   :  { %v11263_v59 = vpop.f32.mrb[132].mxu1 }
0x3a22   :  { %v11264_v46 = vpop.f32.mrb[133].mxu1 }
0x3a23   :  { %v11265_v31 = vadd.f32 %v11264_v46, %v11263_v59  ;;  %v11266_v9 = vpop.f32.mrb[134].mxu1 }
0x3a24   :  { %v11267_v25 = vpop.f32.mrb[135].mxu1 }
0x3a25   :  { %v8203_v15 = vadd.f32 %v11265_v31, %v10469_v6  ;;  %v11268_v27 = vadd.f32 %v11267_v25, %v11266_v9 }
0x3a27   :  { %v8252_v23 = vadd.f32 %v14401_v56, %v8203_v15  ;;  %v8206_v38 = vadd.f32 %v11268_v27, %v10469_v6 }
0x3a29   :  { %v8255_v17 = vadd.f32 %v14405_v53, %v8206_v38  ;;  %v11269_v62 = vpop.f32.mrb[136].mxu1  ;;  %v8266_v47 = vmax.f32 %v8252_v23, 0.0 }
0x3a2a   :  { %v11270_v21 = vpop.f32.mrb[137].mxu1 }
0x3a2b   :  { %v8267_v35 = vmax.f32 %v8255_v17, 0.0  ;;  %v11271_v61 = vadd.f32 %v11270_v21, %v11269_v62  ;;  %v11272_v4 = vpop.f32.mrb[138].mxu1 }
0x3a2c   :  { %v11273_v34 = vpop.f32.mrb[139].mxu1 }
0x3a2d   :  { %v8211_v48 = vadd.f32 %v11271_v61, %v10469_v6  ;;  %v11274_v10 = vadd.f32 %v11273_v34, %v11272_v4  ;;  %v8270_v39 = vpack.c.bf16 %v8267_v35, %v8266_v47 }
0x3a2f   :  { %v8260_v33 = vadd.f32 %v14399_v52, %v8211_v48  ;;  %v8214_v1 = vadd.f32 %v11274_v10, %v10469_v6  ;;  %12207 = vmatprep.mubr.bf16.mxu1 %v8270_v39  ;;  %v10494_v52 = vld [vmem:[%s13366_s12 + $0x5] ss:$0 sm:$0xff] }
0x3a31   :  { %v8263_v56 = vadd.f32 %v14403_v50, %v8214_v1  ;;  %v8268_v53 = vmax.f32 %v8260_v33, 0.0 }
0x3a33   :  { %v8269_v14 = vmax.f32 %v8263_v56, 0.0 }
0x3a35   :  { %v8271_v57 = vpack.c.bf16 %v8269_v14, %v8268_v53 }
0x3a37   :  { %12208 = vmatmul.mubr.bf16.vlgmr.msra.gmra.mrb[140].mxu1 %v8271_v57 }
0x3a38   :  { %12235 = vmatprep.mubr.msk.bf16.mxu1 %vm13014_vm0, %v13012_v0 }
0x3b0a   :  { %v12209_v3 = vpop.f32.mrb[140].mxu1 }
0x3b0b   :  { %v8369_v37 = vadd.f32 %v12209_v3, %v10494_v52  ;;  %v8360_v50 = vpop.f32.mrb[141].mxu1  ;;  %v10515_v3 = vld [vmem:[%s13423_s4 + $0x5] ss:$0 sm:$0xff] }
0x3b0c   :  { %v8361_v58 = vadd.f32 %v10494_v52, %v8360_v50  ;;  %v12210_v19 = vpop.f32.mrb[142].mxu1 }
0x3b0d   :  { %v8372_v51 = vadd.f32 %v12210_v19, %v10494_v52  ;;  %v8363_v8 = vpop.f32.mrb[143].mxu1  ;;  %v8377_v40 = vmax.f32 %v8369_v37, 0.0 }
0x3b0e   :  { %v8364_v32 = vadd.f32 %v10494_v52, %v8363_v8  ;;  %v8375_v63 = vmax.f32 %v8361_v58, 0.0 }
0x3b0f   :  { %v8378_v43 = vmax.f32 %v8372_v51, 0.0 }
0x3b10   :  { %v8376_v24 = vmax.f32 %v8364_v32, 0.0 }
0x3b11   :  { %v8380_v22 = vpack.c.bf16 %v8378_v43, %v8377_v40 }
0x3b12   :  { %v8379_v26 = vpack.c.bf16 %v8376_v24, %v8375_v63 }
0x3b14   :  { %12227 = vmatprep.mubr.bf16.mxu0 %v8379_v26 }
0x3b15   :  { %12228 = vmatmul.mubr.bf16.vlgmr.msra.gmra.mrb[148].mxu0 %v8380_v22 }
0x3b16   :  { %12255 = vmatprep.mubr.msk.bf16.mxu0 %vm13014_vm0, %v13012_v0 }
0x3be8   :  { %v12229_v11 = vpop.f32.mrb[148].mxu0 }
0x3be9   :  { %v8469_v13 = vpop.f32.mrb[149].mxu0  ;;  %v8478_v7 = vadd.f32 %v12229_v11, %v10503_v41 }
0x3bea   :  { %v8470_v54 = vadd.f32 %v10503_v41, %v8469_v13  ;;  %v12230_v5 = vpop.f32.mrb[150].mxu0 }
0x3beb   :  { %v8472_v42 = vpop.f32.mrb[151].mxu0  ;;  %v8481_v36 = vadd.f32 %v12230_v5, %v10503_v41 }
0x3bec   :  { %v8473_v16 = vadd.f32 %v10503_v41, %v8472_v42  ;;  %8488 = vadd.xlane.f32.xlu0 %v8470_v54  ;;  %v12861_v42 = vld [vmem:[%s13397_s24 + $0x2c0] sm:$0xff]  }
0x3bee   :  { %8490 = vadd.xlane.f32.xlu1 %v8473_v16 }
0x3bf0   :  { %8492 = vadd.xlane.f32.xlu0 %v8478_v7 }
0x3bf2   :  { %8494 = vadd.xlane.f32.xlu1 %v8481_v36 }
0x3c79   :  { %v8489_v30 = vpop.xlane.xlu0 %8488 }
0x3c7a   :  { %v8496_v55 = vmul.f32 0.0078125, %v8489_v30  ;;  %v12868_v30 = vld [vmem:[%s13397_s24 + $0x298] sm:$0xff]  }
0x3c7b   :  { %v8491_v59 = vpop.xlane.xlu1 %8490 }
0x3c7c   :  { %v8500_v6 = vsub.f32 %v8470_v54, %v8496_v55  ;;  %v8497_v46 = vmul.f32 0.0078125, %v8491_v59  ;;  %v12869_v55 = vld [vmem:[%s13397_s24 + $0x2e0] sm:$0xff]   ;;  %v12871_v59 = vld [vmem:[%s13397_s24 + $0x2e8] sm:$0xff]  }
0x3c7d   :  { %v8493_v31 = vpop.xlane.xlu0 %8492 }
0x3c7e   :  { %v8501_v9 = vsub.f32 %v8473_v16, %v8497_v46  ;;  %v8498_v25 = vmul.f32 0.0078125, %v8493_v31  ;;  %v8504_v15 = vmul.f32 %v8500_v6, %v8500_v6  ;;  %v12863_v16 = vld [vmem:[%s13397_s24 + $0x2c8] sm:$0xff]   ;;  %v12873_v46 = vld [vmem:[%s13397_s24 + $0x2f0] sm:$0xff]  }
0x3c7f   :  { %v8495_v27 = vpop.xlane.xlu1 %8494  ;;  %v12874_v31 = vld [vmem:[%s13397_s24 + $0x2b0] sm:$0xff]  }
0x3c80   :  { %v8502_v23 = vsub.f32 %v8478_v7, %v8498_v25  ;;  %v8499_v38 = vmul.f32 0.0078125, %v8495_v27  ;;  %8508 = vadd.xlane.f32.xlu0 %v8504_v15  ;;  %v8505_v17 = vmul.f32 %v8501_v9, %v8501_v9  ;;  %v12866_v7 = vld [vmem:[%s13397_s24 + $0x290] sm:$0xff]   ;;  %v12876_v25 = vld [vmem:[%s13397_s24 + $0x2b8] sm:$0xff]   ;;  %v12877_v15 = vld [vmem:[%s13473_s15 + $0x140] sm:$0xff]  }
0x3c81   :  { %12240 = vmatpush3.bf16.msra.mxu0 %v12877_v15  ;;  %v12878_v27 = vld [vmem:[%s13473_s15 + $0x148] sm:$0xff]  }
0x3c82   :  { %v8503_v62 = vsub.f32 %v8481_v36, %v8499_v38  ;;  %8510 = vadd.xlane.f32.xlu1 %v8505_v17  ;;  %v8506_v21 = vmul.f32 %v8502_v23, %v8502_v23  ;;  %v12867_v36 = vld [vmem:[%s13397_s24 + $0x2d8] sm:$0xff]   ;;  %12241 = vmatprep.subr.bf16.mxu0 %v13012_v0  ;;  %v12881_v17 = vld [vmem:[%s13473_s15 + $0x160] sm:$0xff]  }
0x3c83   :  { %v12880_v38 = vld [vmem:[%s13473_s15 + $0x158] sm:$0xff]  }
0x3c84   :  { %8512 = vadd.xlane.f32.xlu0 %v8506_v21  ;;  %v8507_v47 = vmul.f32 %v8503_v62, %v8503_v62 }
0x3c85   :  { %12242 = vmatpush3.bf16.msra.mxu0 %v12878_v27 }
0x3c86   :  { %8514 = vadd.xlane.f32.xlu1 %v8507_v47  ;;  %12243 = vmatprep.subr.bf16.mxu0 %v13012_v0 }
0x3d0d   :  { %v8509_v35 = vpop.xlane.xlu0 %8508 }
0x3d0e   :  { %v8516_v61 = vmul.f32 0.0078125, %v8509_v35 }
0x3d0f   :  { %v8511_v4 = vpop.xlane.xlu1 %8510 }
0x3d10   :  { %v8520_v34 = vadd.f32 1e-05, %v8516_v61  ;;  %v8517_v48 = vmul.f32 0.0078125, %v8511_v4  ;;  %v12882_v4 = vld [vmem:[%s13473_s15 + $0x168] sm:$0xff]  }
0x3d11   :  { %v8513_v10 = vpop.xlane.xlu0 %8512 }
0x3d12   :  { %12973 = vrsqrt.f32 %v8520_v34  ;;  %v8521_v39 = vadd.f32 1e-05, %v8517_v48  ;;  %v8518_v33 = vmul.f32 0.0078125, %v8513_v10  ;;  %v12883_v34 = vld [vmem:[%s13473_s15 + $0x170] sm:$0xff]   ;;  %v12884_v48 = vld [vmem:[%s13473_s15 + $0x178] sm:$0xff]   ;;  %v12886_v10 = vld [vmem:[%s13496_s20 + $0x148] sm:$0xff]  }
0x3d13   :  { %v8515_v1 = vpop.xlane.xlu1 %8514 }
0x3d14   :  { %12975 = vrsqrt.f32 %v8521_v39  ;;  %v8522_v56 = vadd.f32 1e-05, %v8518_v33  ;;  %v8519_v53 = vmul.f32 0.0078125, %v8515_v1  ;;  %v12887_v39 = vld [vmem:[%s13496_s20 + $0x150] sm:$0xff]   ;;  %v12888_v33 = vld [vmem:[%s13496_s20 + $0x158] sm:$0xff]   ;;  %v12889_v1 = vld [vmem:[%s13496_s20 + $0x160] sm:$0xff]  }
0x3d16   :  { %12977 = vrsqrt.f32 %v8522_v56  ;;  %v8523_v14 = vadd.f32 1e-05, %v8519_v53  ;;  %v12890_v56 = vld [vmem:[%s13496_s20 + $0x168] sm:$0xff]  }
0x3d18   :  { %12979 = vrsqrt.f32 %v8523_v14  ;;  %v10584_v14 = vld [vmem:[%s13513_s25 + $0x5] ss:$0 sm:$0xff] }
0x3d1c   :  { %v12974_v57 = vpop.eup %12973 }
0x3d1d   :  { %v8528_v28 = vmul.f32 %v12974_v57, %v8500_v6  ;;  %v12872_v6 = vld [vmem:[%s13397_s24 + $0x2a8] sm:$0xff]  }
0x3d1e   :  { %v12976_v52 = vpop.eup %12975 }
0x3d1f   :  { %v8529_v37 = vmul.f32 %v12976_v52, %v8501_v9  ;;  %v8538_v50 = vmul.f32 %v10514_v45, %v8528_v28  ;;  %v12875_v9 = vld [vmem:[%s13397_s24 + $0x2f8] sm:$0xff]  }
0x3d20   :  { %v12978_v58 = vpop.eup %12977 }
0x3d21   :  { %v8530_v19 = vmul.f32 %v12978_v58, %v8502_v23  ;;  %v8539_v51 = vmul.f32 %v10514_v45, %v8529_v37  ;;  %v8548_v8 = vadd.f32 %v10515_v3, %v8538_v50  ;;  %v12879_v23 = vld [vmem:[%s13473_s15 + $0x150] sm:$0xff]  }
0x3d22   :  { %v12980_v32 = vpop.eup %12979  ;;  %12244 = vmatpush3.bf16.msra.mxu0 %v12879_v23 }
0x3d23   :  { %v8531_v40 = vmul.f32 %v12980_v32, %v8503_v62  ;;  %v8549_v43 = vadd.f32 %v10515_v3, %v8539_v51  ;;  %v8540_v63 = vmul.f32 %v10514_v45, %v8530_v19  ;;  %v8552_v24 = vmul.f32 %v8548_v8, %v13434_v49  ;;  %12245 = vmatprep.subr.bf16.mxu0 %v13012_v0  ;;  %v12985_v8 = vld [vmem:[%s13729_s27] sm:$0xff]   ;;  %v12986_v32 = vld [vmem:[%s13729_s27 + $0x8] sm:$0xff]  }
0x3d25   :  { %v8553_v22 = vmul.f32 %v8549_v43, %v13413_v18  ;;  %v8541_v26 = vmul.f32 %v10514_v45, %v8531_v40  ;;  %v8550_v41 = vadd.f32 %v10515_v3, %v8540_v63  ;;  %v12862_v18 = vld [vmem:[%s13397_s24 + $0x280] sm:$0xff]   ;;  %v12987_v40 = vld [vmem:[%s13729_s27 + $0x10] sm:$0xff]   ;;  %v12988_v43 = vld [vmem:[%s13729_s27 + $0x18] sm:$0xff]  }
0x3d26   :  { %12246 = vmatpush3.bf16.msra.mxu0 %v12880_v38  ;;  %v12989_v63 = vld [vmem:[%s13729_s27 + $0x20] sm:$0xff]  }
0x3d27   :  { %v8556_v11 = vpack.c.bf16 %v8553_v22, %v8552_v24  ;;  %v8551_v13 = vadd.f32 %v10515_v3, %v8541_v26  ;;  %v8554_v54 = vmul.f32 %v8550_v41, %v13453_v2  ;;  %v12864_v2 = vld [vmem:[%s13397_s24 + $0x288] sm:$0xff]   ;;  %12247 = vmatprep.subr.bf16.mxu0 %v13012_v0  ;;  %v12991_v22 = vld [vmem:[%s13729_s27 + $0x30] sm:$0xff]   ;;  %v12992_v26 = vld [vmem:[%s13729_s27 + $0x38] sm:$0xff]  }
0x3d28   :  { %v12990_v24 = vld [vmem:[%s13729_s27 + $0x28] sm:$0xff]   ;;  %v12891_v41 = vld [vmem:[%s13496_s20 + $0x170] sm:$0xff]  }
0x3d29   :  { %12232 = vmatpush3.bf16.msra.mxu1 %v8556_v11  ;;  %v8555_v5 = vmul.f32 %v8551_v13, %v13449_v60  ;;  %v12865_v60 = vld [vmem:[%s13397_s24 + $0x2d0] sm:$0xff]   ;;  %v12892_v11 = vld [vmem:[%s13496_s20 + $0x178] sm:$0xff]   ;;  %v10601_v13 = vld [vmem:[%s13525_s1 + $0x5] ss:$0 sm:$0xff] }
0x3d2a   :  { %12233 = vmatprep.subr.bf16.mxu1 %v13012_v0  ;;  %12248 = vmatpush3.bf16.msra.mxu0 %v12881_v17 }
0x3d2b   :  { %v8557_v49 = vpack.c.bf16 %v8555_v5, %v8554_v54  ;;  %12249 = vmatprep.subr.bf16.mxu0 %v13012_v0 }
0x3d2d   :  { %12234 = vmatpush3.bf16.msra.mxu1 %v8557_v49 }
0x3d2e   :  { %11308 = vmatprep.subr.bf16.mxu1 %v12861_v42  ;;  %12250 = vmatpush3.bf16.msra.mxu0 %v12882_v4 }
0x3d2f   :  { %12251 = vmatprep.subr.bf16.mxu0 %v13012_v0 }
0x3d30   :  { %12236 = vmatmul.mubr.msk.bf16.vlgmr.msra.gmra.mrb[144].mxu1 %vm1777_vm2, %v13460_v12  ;;  %v12870_v12 = vld [vmem:[%s13397_s24 + $0x2a0] sm:$0xff]  }
0x3d31   :  { %11309 = vmatpush3.bf16.msra.mxu1 %v12862_v18 }
0x3d32   :  { %11310 = vmatprep.subr.bf16.mxu1 %v12863_v16  ;;  %12252 = vmatpush3.bf16.msra.mxu0 %v12883_v34 }
0x3d33   :  { %12253 = vmatprep.subr.bf16.mxu0 %v13012_v0 }
0x3d35   :  { %11311 = vmatpush3.bf16.msra.mxu1 %v12864_v2 }
0x3d36   :  { %11312 = vmatprep.subr.bf16.mxu1 %v12865_v60  ;;  %12254 = vmatpush3.bf16.msra.mxu0 %v12884_v48 }
0x3d37   :  { %12279 = vmatprep.subr.bf16.mxu0 %v13012_v0 }
0x3d39   :  { %11313 = vmatpush3.bf16.msra.mxu1 %v12866_v7 }
0x3d3a   :  { %11314 = vmatprep.subr.bf16.mxu1 %v12867_v36  ;;  %v12993_v36 = vld [vmem:[%s13750_s6] sm:$0xff]  }
0x3d3d   :  { %11315 = vmatpush3.bf16.msra.mxu1 %v12868_v30  ;;  %v12994_v30 = vld [vmem:[%s13750_s6 + $0x8] sm:$0xff]  }
0x3d3e   :  { %11316 = vmatprep.subr.bf16.mxu1 %v12869_v55  ;;  %v12995_v55 = vld [vmem:[%s13750_s6 + $0x10] sm:$0xff]  }
0x3d41   :  { %11317 = vmatpush3.bf16.msra.mxu1 %v12870_v12  ;;  %v12996_v12 = vld [vmem:[%s13750_s6 + $0x18] sm:$0xff]  }
0x3d42   :  { %11318 = vmatprep.subr.bf16.mxu1 %v12871_v59  ;;  %v12997_v59 = vld [vmem:[%s13750_s6 + $0x20] sm:$0xff]  }
0x3d45   :  { %11319 = vmatpush3.bf16.msra.mxu1 %v12872_v6  ;;  %v12998_v6 = vld [vmem:[%s13750_s6 + $0x28] sm:$0xff]  }
0x3d46   :  { %11320 = vmatprep.subr.bf16.mxu1 %v12873_v46  ;;  %v12999_v46 = vld [vmem:[%s13750_s6 + $0x30] sm:$0xff]  }
0x3d49   :  { %11321 = vmatpush3.bf16.msra.mxu1 %v12874_v31  ;;  %v13000_v31 = vld [vmem:[%s13750_s6 + $0x38] sm:$0xff]  }
0x3d4a   :  { %11322 = vmatprep.subr.bf16.mxu1 %v12875_v9  ;;  %v10610_v9 = vld [vmem:[%s13558_s8 + $0x5] ss:$0 sm:$0xff] }
0x3d4d   :  { %11323 = vmatpush3.bf16.msra.mxu1 %v12876_v25 }
0x3d4e   :  { %12259 = vmatprep.subr.bf16.mxu1 %v13012_v0 }
0x3e03   :  { %v8592_v62 = vpop.f32.mrb[144].mxu1 }
0x3e04   :  { %v12237_v21 = vpop.f32.mrb[145].mxu1 }
0x3e05   :  { %v8595_v47 = vpop.f32.mrb[146].mxu1 }
0x3e06   :  { %v8672_v35 = vpack.c.bf16 %v8595_v47, %v8592_v62  ;;  %v12238_v61 = vpop.f32.mrb[147].mxu1 }
0x3e08   :  { %8807 = vmatprep.mubr.bf16.mxu1 %v8672_v35 }
0x3e09   :  { %8808 = vmatmul.mubr.bf16.vlgmr.msra.gmra.mrb[148].mxu1 %v14417_v29  ;;  %v12885_v29 = vld [vmem:[%s13496_s20 + $0x140] sm:$0xff]  }
0x3e0a   :  { %12275 = vmatprep.mubr.msk.bf16.mxu1 %vm13014_vm0, %v13012_v0  ;;  %12260 = vmatpush3.bf16.msra.mxu1 %v12885_v29 }
0x3e0b   :  { %12261 = vmatprep.subr.bf16.mxu1 %v13012_v0 }
0x3e0e   :  { %12262 = vmatpush3.bf16.msra.mxu1 %v12886_v10 }
0x3e0f   :  { %12263 = vmatprep.subr.bf16.mxu1 %v13012_v0 }
0x3e12   :  { %12264 = vmatpush3.bf16.msra.mxu1 %v12887_v39 }
0x3e13   :  { %12265 = vmatprep.subr.bf16.mxu1 %v13012_v0 }
0x3e16   :  { %12266 = vmatpush3.bf16.msra.mxu1 %v12888_v33 }
0x3e17   :  { %12267 = vmatprep.subr.bf16.mxu1 %v13012_v0 }
0x3e1a   :  { %12268 = vmatpush3.bf16.msra.mxu1 %v12889_v1 }
0x3e1b   :  { %12269 = vmatprep.subr.bf16.mxu1 %v13012_v0 }
0x3e1e   :  { %12270 = vmatpush3.bf16.msra.mxu1 %v12890_v56 }
0x3e1f   :  { %12271 = vmatprep.subr.bf16.mxu1 %v13012_v0 }
0x3e22   :  { %12272 = vmatpush3.bf16.msra.mxu1 %v12891_v41  ;;  %v13009_v41 = vld [vmem:[%s13794_s23] ss:$0 sm:$0xff] }
0x3e23   :  { %12273 = vmatprep.subr.bf16.mxu1 %v13012_v0 }
0x3e26   :  { %12274 = vmatpush3.bf16.msra.mxu1 %v12892_v11 }
0x3e27   :  { %12299 = vmatprep.subr.bf16.mxu1 %v13012_v0 }
0x3edc   :  { %v11324_v53 = vpop.f32.mrb[148].mxu1 }
0x3edd   :  { %v11325_v57 = vpop.f32.mrb[149].mxu1 }
0x3ede   :  { %v11326_v45 = vadd.f32 %v11325_v57, %v11324_v53  ;;  %v11327_v28 = vpop.f32.mrb[150].mxu1 }
0x3edf   :  { %v11328_v52 = vpop.f32.mrb[151].mxu1 }
0x3ee0   :  { %v8810_v3 = vadd.f32 %v11326_v45, %v10584_v14  ;;  %v11329_v37 = vadd.f32 %v11328_v52, %v11327_v28  ;;  %v10622_v28 = vld [vmem:[%s13577_s21 + $0x5] ss:$0 sm:$0xff] }
0x3ee2   :  { %v8813_v50 = vadd.f32 %v11329_v37, %v10584_v14  ;;  %v8816_v58 = vmax.f32 %v8810_v3, 0.0  ;;  %v10621_v14 = vld [vmem:[%s13572_s14 + $0x5] ss:$0 sm:$0xff] }
0x3ee4   :  { %v8817_v19 = vmax.f32 %v8813_v50, 0.0 }
0x3ee6   :  { %v8818_v51 = vpack.c.bf16 %v8817_v19, %v8816_v58 }
0x3ee8   :  { %12256 = vmatmul.mubr.bf16.vlgmr.msra.gmra.mrb[152].mxu0 %v8818_v51 }
0x3ee9   :  { %12280 = vmatpush3.bf16.msra.mxu0 %v12985_v8  ;;  %12295 = vmatprep.mubr.msk.bf16.mxu0 %vm13014_vm0, %v13012_v0 }
0x3eea   :  { %12281 = vmatprep.subr.bf16.mxu0 %v13012_v0 }
0x3eed   :  { %12282 = vmatpush3.bf16.msra.mxu0 %v12986_v32  ;;  %v13001_v32 = vld [vmem:[%s13777_s17] sm:$0xff]  }
0x3eee   :  { %12283 = vmatprep.subr.bf16.mxu0 %v13012_v0 }
0x3ef1   :  { %12284 = vmatpush3.bf16.msra.mxu0 %v12987_v40  ;;  %v13002_v40 = vld [vmem:[%s13777_s17 + $0x8] sm:$0xff]  }
0x3ef2   :  { %12285 = vmatprep.subr.bf16.mxu0 %v13012_v0 }
0x3ef5   :  { %12286 = vmatpush3.bf16.msra.mxu0 %v12988_v43  ;;  %v13005_v43 = vld [vmem:[%s13777_s17 + $0x20] sm:$0xff]  }
0x3ef6   :  { %12287 = vmatprep.subr.bf16.mxu0 %v13012_v0 }
0x3ef9   :  { %12288 = vmatpush3.bf16.msra.mxu0 %v12989_v63  ;;  %v13006_v63 = vld [vmem:[%s13777_s17 + $0x28] sm:$0xff]  }
0x3efa   :  { %12289 = vmatprep.subr.bf16.mxu0 %v13012_v0 }
0x3efd   :  { %12290 = vmatpush3.bf16.msra.mxu0 %v12990_v24  ;;  %v13007_v24 = vld [vmem:[%s13777_s17 + $0x30] sm:$0xff]  }
0x3efe   :  { %12291 = vmatprep.subr.bf16.mxu0 %v13012_v0 }
0x3f01   :  { %12292 = vmatpush3.bf16.msra.mxu0 %v12991_v22  ;;  %v13008_v22 = vld [vmem:[%s13777_s17 + $0x38] sm:$0xff]  }
0x3f02   :  { %12293 = vmatprep.subr.bf16.mxu0 %v13012_v0 }
0x3f05   :  { %12294 = vmatpush3.bf16.msra.mxu0 %v12992_v26 }
0x3f06   :  { %12319 = vmatprep.subr.bf16.mxu0 %v13012_v0 }
0x3fbb   :  { %v8907_v54 = vpop.f32.mrb[152].mxu0 }
0x3fbc   :  { %v8908_v5 = vadd.f32 %v10601_v13, %v8907_v54  ;;  %v12257_v42 = vpop.f32.mrb[153].mxu0 }
0x3fbd   :  { %v8910_v49 = vpop.f32.mrb[154].mxu0 }
0x3fbe   :  { %v8911_v18 = vadd.f32 %v10601_v13, %v8910_v49  ;;  %v12258_v16 = vpop.f32.mrb[155].mxu0  ;;  %v8914_v2 = vmax.f32 %v8908_v5, 0.0 }
0x3fc0   :  { %v8915_v60 = vmax.f32 %v8911_v18, 0.0 }
0x3fc2   :  { %v8916_v7 = vpack.c.bf16 %v8915_v60, %v8914_v2  ;;  %v13010_v60 = vld [vmem:[%s13806_s5] ss:$0 sm:$0xff] }
0x3fc4   :  { %12276 = vmatmul.mubr.bf16.vlgmr.msra.gmra.mrb[152].mxu1 %v8916_v7 }
0x3fc5   :  { %12300 = vmatpush3.bf16.msra.mxu1 %v12993_v36  ;;  %12315 = vmatprep.mubr.msk.bf16.mxu1 %vm13014_vm0, %v13012_v0 }
0x3fc6   :  { %12301 = vmatprep.subr.bf16.mxu1 %v13012_v0 }
0x3fc9   :  { %12302 = vmatpush3.bf16.msra.mxu1 %v12994_v30 }
0x3fca   :  { %12303 = vmatprep.subr.bf16.mxu1 %v13012_v0 }
0x3fcd   :  { %12304 = vmatpush3.bf16.msra.mxu1 %v12995_v55 }
0x3fce   :  { %12305 = vmatprep.subr.bf16.mxu1 %v13012_v0 }
0x3fd1   :  { %12306 = vmatpush3.bf16.msra.mxu1 %v12996_v12 }
0x3fd2   :  { %12307 = vmatprep.subr.bf16.mxu1 %v13012_v0 }
0x3fd5   :  { %12308 = vmatpush3.bf16.msra.mxu1 %v12997_v59 }
0x3fd6   :  { %12309 = vmatprep.subr.bf16.mxu1 %v13012_v0 }
0x3fd9   :  { %12310 = vmatpush3.bf16.msra.mxu1 %v12998_v6 }
0x3fda   :  { %12311 = vmatprep.subr.bf16.mxu1 %v13012_v0 }
0x3fdd   :  { %12312 = vmatpush3.bf16.msra.mxu1 %v12999_v46 }
0x3fde   :  { %12313 = vmatprep.subr.bf16.mxu1 %v13012_v0 }
0x3fe1   :  { %12314 = vmatpush3.bf16.msra.mxu1 %v13000_v31  ;;  %v13011_v31 = vld [vmem:[%s13819_s30] ss:$0 sm:$0xff] }
0x4097   :  { %v9005_v25 = vpop.f32.mrb[152].mxu1 }
0x4098   :  { %v9006_v15 = vadd.f32 %v10610_v9, %v9005_v25  ;;  %v12277_v27 = vpop.f32.mrb[153].mxu1 }
0x4099   :  { %v9008_v23 = vpop.f32.mrb[154].mxu1 }
0x409a   :  { %v9009_v38 = vadd.f32 %v10610_v9, %v9008_v23  ;;  %9016 = vadd.xlane.f32.xlu0 %v9006_v15  ;;  %v12278_v17 = vpop.f32.mrb[155].mxu1 }
0x409c   :  { %9018 = vadd.xlane.f32.xlu1 %v9009_v38 }
0x4127   :  { %v9017_v62 = vpop.xlane.xlu0 %9016 }
0x4128   :  { %v9020_v21 = vmul.f32 0.0078125, %v9017_v62 }
0x4129   :  { %v9019_v47 = vpop.xlane.xlu1 %9018 }
0x412a   :  { %v9022_v35 = vsub.f32 %v9006_v15, %v9020_v21  ;;  %v9021_v61 = vmul.f32 0.0078125, %v9019_v47 }
0x412c   :  { %v9023_v4 = vsub.f32 %v9009_v38, %v9021_v61  ;;  %v9024_v34 = vmul.f32 %v9022_v35, %v9022_v35 }
0x412e   :  { %9026 = vadd.xlane.f32.xlu0 %v9024_v34  ;;  %v9025_v48 = vmul.f32 %v9023_v4, %v9023_v4 }
0x4130   :  { %9028 = vadd.xlane.f32.xlu1 %v9025_v48 }
0x41bb   :  { %v9027_v29 = vpop.xlane.xlu0 %9026 }
0x41bc   :  { %v9030_v10 = vmul.f32 0.0078125, %v9027_v29 }
0x41bd   :  { %v9029_v39 = vpop.xlane.xlu1 %9028 }
0x41be   :  { %v9032_v33 = vadd.f32 1e-05, %v9030_v10  ;;  %v9031_v1 = vmul.f32 0.0078125, %v9029_v39 }
0x41c0   :  { %12981 = vrsqrt.f32 %v9032_v33  ;;  %v9033_v56 = vadd.f32 1e-05, %v9031_v1 }
0x41c2   :  { %12983 = vrsqrt.f32 %v9033_v56 }
0x41ca   :  { %v12982_v53 = vpop.eup %12981 }
0x41cb   :  { %v9036_v57 = vmul.f32 %v12982_v53, %v9022_v35 }
0x41cc   :  { %v12984_v45 = vpop.eup %12983 }
0x41cd   :  { %v9037_v52 = vmul.f32 %v12984_v45, %v9023_v4  ;;  %v9044_v3 = vmul.f32 %v10621_v14, %v9036_v57 }
0x41cf   :  { %v9045_v37 = vmul.f32 %v10621_v14, %v9037_v52  ;;  %v9052_v50 = vadd.f32 %v10622_v28, %v9044_v3 }
0x41d1   :  { %v9053_v58 = vadd.f32 %v10622_v28, %v9045_v37  ;;  %v9054_v19 = vadd.f32 %v9052_v50, %v14410_v20  ;;  %v13003_v20 = vld [vmem:[%s13777_s17 + $0x10] sm:$0xff]  }
0x41d3   :  { %v9055_v51 = vadd.f32 %v9053_v58, %v14413_v44  ;;  %v13004_v44 = vld [vmem:[%s13777_s17 + $0x18] sm:$0xff]  }
0x41d5   :  { %v9056_v8 = vpack.c.bf16 %v9055_v51, %v9054_v19 }
0x41d7   :  { %12296 = vmatmul.mubr.bf16.vlgmr.msra.gmra.mrb[156].mxu0 %v9056_v8 }
0x41d8   :  { %12320 = vmatpush3.bf16.msra.mxu0 %v13001_v32  ;;  %12335 = vmatprep.mubr.msk.bf16.mxu0 %vm13014_vm0, %v13012_v0 }
0x41d9   :  { %12321 = vmatprep.subr.bf16.mxu0 %v13012_v0 }
0x41dc   :  { %12322 = vmatpush3.bf16.msra.mxu0 %v13002_v40 }
0x41dd   :  { %12323 = vmatprep.subr.bf16.mxu0 %v13012_v0 }
0x41e0   :  { %12324 = vmatpush3.bf16.msra.mxu0 %v13003_v20 }
0x41e1   :  { %12325 = vmatprep.subr.bf16.mxu0 %v13012_v0 }
0x41e4   :  { %12326 = vmatpush3.bf16.msra.mxu0 %v13004_v44 }
0x41e5   :  { %12327 = vmatprep.subr.bf16.mxu0 %v13012_v0 }
0x41e8   :  { %12328 = vmatpush3.bf16.msra.mxu0 %v13005_v43 }
0x41e9   :  { %12329 = vmatprep.subr.bf16.mxu0 %v13012_v0 }
0x41ec   :  { %12330 = vmatpush3.bf16.msra.mxu0 %v13006_v63 }
0x41ed   :  { %12331 = vmatprep.subr.bf16.mxu0 %v13012_v0 }
0x41f0   :  { %12332 = vmatpush3.bf16.msra.mxu0 %v13007_v24 }
0x41f1   :  { %12333 = vmatprep.subr.bf16.mxu0 %v13012_v0 }
0x41f4   :  { %12334 = vmatpush3.bf16.msra.mxu0 %v13008_v22 }
0x42aa   :  { %v9091_v26 = vpop.f32.mrb[156].mxu0 }
0x42ab   :  { %v9092_v11 = vadd.f32 %v13009_v41, %v9091_v26  ;;  %v12297_v13 = vpop.f32.mrb[157].mxu0 }
0x42ac   :  { %v9094_v54 = vpop.f32.mrb[158].mxu0 }
0x42ad   :  { %v9095_v5 = vadd.f32 %v13009_v41, %v9094_v54  ;;  %v12298_v42 = vpop.f32.mrb[159].mxu0  ;;  %v9098_v49 = vmax.f32 %v9092_v11, 0.0 }
0x42af   :  { %v9099_v18 = vmax.f32 %v9095_v5, 0.0 }
0x42b1   :  { %v9100_v16 = vpack.c.bf16 %v9099_v18, %v9098_v49 }
0x42b3   :  { %12316 = vmatmul.mubr.bf16.vlgmr.msra.gmra.mrb[156].mxu1 %v9100_v16 }
0x4386   :  { %v9135_v2 = vpop.f32.mrb[156].mxu1 }
0x4387   :  { %v9136_v7 = vadd.f32 %v13010_v60, %v9135_v2  ;;  %v12317_v36 = vpop.f32.mrb[157].mxu1 }
0x4388   :  { %v9138_v30 = vpop.f32.mrb[158].mxu1 }
0x4389   :  { %v9139_v0 = vadd.f32 %v13010_v60, %v9138_v30  ;;  %v12318_v55 = vpop.f32.mrb[159].mxu1  ;;  %v9142_v12 = vmax.f32 %v9136_v7, 0.0 }
0x438b   :  { %v9143_v59 = vmax.f32 %v9139_v0, 0.0 }
0x438d   :  { %v9144_v6 = vpack.c.bf16 %v9143_v59, %v9142_v12 }
0x438f   :  { %12336 = vmatmul.mubr.bf16.vlgmr.msra.gmra.mrb[160].mxu0 %v9144_v6 }
0x4462   :  { %v9179_v46 = vpop.f32.mrb[160].mxu0 }
0x4463   :  { %v9180_v9 = vadd.f32 %v13011_v31, %v9179_v46  ;;  %v12337_v25 = vpop.f32.mrb[161].mxu0 }
0x4464   :  { %v9182_v15 = vpop.f32.mrb[162].mxu0 }
0x4465   :  { %9186 = vst.msk [vmem:[%s9241_s7] sm:$0xff] %vm3881_vm4, %v9180_v9  ;;  %v9183_v27 = vadd.f32 %v13011_v31, %v9182_v15  ;;  %v12338_v23 = vpop.f32.mrb[163].mxu0 }
0x4467   :  { %9187 = vst.msk [vmem:[%s9241_s7 + $0x8] sm:$0xff] %vm3881_vm4, %v9183_v27 }

</bundles_post_ra>
